<compile_context>
chip_gen: v7x
topology: tpu7x:2x2x1
jax: 0.10.0
libtpu: 0.0.40
codegen_flags: <defaults>
</compile_context>

<pallas_src>
import functools

import jax
import jax.numpy as jnp
from jax.experimental import pallas as pl
from jax.experimental.pallas import tpu as pltpu

CONV_OUTPUT = 1024          # 64 channels * 4 * 4 spatial  -> requires 60x60 input
STATE_VEC_DIM = 128
LANE = 128


# ---------------------------------------------------------------------------
# The fused kernel.
#
# Activation row layouts (all VMEM scratch, never touch HBM):
#   a1 (conv1 out, 14x14x64):  row = (((hp*2+wp)*7 + hh)*7 + wh)*B + b
#                              with h = 2*hh + hp, w = 2*wh + wp   ("parity" layout)
#   a2 (conv2 out, 6x6x128):   row = (oh*7 + X)*B + b, valid X = ow in [0,6)
#   a3 (conv3 out, 4x4x128):   row = (oh*7 + Y)*B + b, valid Y = ow in [0,4)
# With these layouts every conv tap reads a contiguous row block; shifted adds put
# invalid tap contributions into the spare slot (X==6 / Y>=4), which is never read.
# Channels are fused over the twin nets: [Q1 | Q2] along the lane dimension.
# ---------------------------------------------------------------------------
def _fused_twin_kernel(patches_ref, sv_ref,
                       c1w_ref, c1b_ref, c2w_ref, c2b_ref, c3w_ref, c3b_ref,
                       w1c_ref, w1s_ref, b1_ref, w2_ref, b2_ref,
                       o_ref,
                       a1_ref, a2_ref, a3_ref, acc2_ref, acc3_ref, *, batch):
    B = batch
    f32 = jnp.float32

    # ---- conv1 (k8 s4, 60->14): one GEMM over all patch rows ----------------
    a1 = jnp.dot(patches_ref[...], c1w_ref[...], preferred_element_type=f32)
    a1 = jnp.maximum(a1 + c1b_ref[...], 0.0)
    a1_ref[...] = a1.astype(a1_ref.dtype)                      # (392, 64) bf16

    # ---- conv2 (k4 s2, 14->6): 16 taps, each a contiguous row block ---------
    acc2_ref[...] = jnp.zeros_like(acc2_ref)
    R2 = 6 * 7 * B
    for khp in range(2):
        for kwp in range(2):
            for khh in range(2):
                for kwh in range(2):
                    tap = ((khp * 2 + kwp) * 2 + khh) * 2 + kwh
                    start = ((khp * 2 + kwp) * 7 + khh) * 7 * B
                    blk = a1_ref[start:start + R2, :]            # (R2, 64) bf16
                    res = jnp.dot(blk, c2w_ref[tap],
                                  preferred_element_type=f32)    # (R2, 128) f32
                    sh = kwh * B                                 # row shift for this tap
                    if sh == 0:
                        acc2_ref[...] = acc2_ref[...] + res
                    else:
                        acc2_ref[0:R2 - sh, :] = acc2_ref[0:R2 - sh, :] + res[sh:, :]
    a2_ref[...] = jnp.maximum(acc2_ref[...] + c2b_ref[...], 0.0).astype(a2_ref.dtype)

    # ---- conv3 (k3 s1, 6->4): 9 taps -----------------------------------------
    acc3_ref[...] = jnp.zeros_like(acc3_ref)
    R3 = 4 * 7 * B
    for kh in range(3):
        for kw in range(3):
            tap = kh * 3 + kw
            start = kh * 7 * B
            blk = a2_ref[start:start + R3, :]                    # (R3, 128) bf16
            res = jnp.dot(blk, c3w_ref[tap], preferred_element_type=f32)
            sh = kw * B
            if sh == 0:
                acc3_ref[...] = acc3_ref[...] + res
            else:
                acc3_ref[0:R3 - sh, :] = acc3_ref[0:R3 - sh, :] + res[sh:, :]
    a3_ref[...] = jnp.maximum(acc3_ref[...] + c3b_ref[...], 0.0).astype(a3_ref.dtype)

    # ---- twin head:  h = relu(flat@W1c + sv@W1s + b1);  q = h@W2 + b2 --------
    # The flatten is done as a K-loop of 16 accumulating GEMMs (one per spatial
    # position), so no in-kernel reshape/relayout is needed.
    sv = sv_ref[...]                                             # (B, 128) bf16
    for g in range(2):                                           # unrolled: Q1, Q2
        h = jnp.dot(sv, w1s_ref[g], preferred_element_type=f32)  # (B, 512) f32
        for oh in range(4):
            for ow in range(4):
                p = oh * 4 + ow
                row = (oh * 7 + ow) * B
                xg = a3_ref[row:row + B, g * 64:(g + 1) * 64]    # (B, 64) bf16
                h = h + jnp.dot(xg, w1c_ref[g, p], preferred_element_type=f32)
        h = jnp.maximum(h + b1_ref[g], 0.0)                      # (B, 512) f32 epilogue
        q = jnp.dot(h.astype(w2_ref.dtype), w2_ref[g],
                    preferred_element_type=f32) + b2_ref[g]      # (B, 128) f32
        o_ref[g] = q.astype(o_ref.dtype)                         # lane-dense store


def _full_spec(shape):
    n = len(shape)
    return pl.BlockSpec(shape, lambda i, _n=n: (0,) * _n)


def fused_twin_qnet(patches, sv, f, *, batch):
    """One pallas_call for the whole twin forward. Returns (2, B, 128) f32."""
    B = batch
    R1, K1 = patches.shape
    return pl.pallas_call(
        functools.partial(_fused_twin_kernel, batch=B),
        out_shape=jax.ShapeDtypeStruct((2, B, LANE), jnp.float32),
        grid_spec=pltpu.PrefetchScalarGridSpec(
            num_scalar_prefetch=0,
            grid=(1,),
            in_specs=[
                _full_spec((R1, K1)),              # conv1 im2col patches
                _full_spec((B, STATE_VEC_DIM)),    # state vectors
                _full_spec(f["c1w"].shape),
                _full_spec(f["c1b"].shape),
                _full_spec(f["c2w"].shape),
                _full_spec(f["c2b"].shape),
                _full_spec(f["c3w"].shape),
                _full_spec(f["c3b"].shape),
                _full_spec(f["w1c"].shape),
                _full_spec(f["w1s"].shape),
                _full_spec(f["b1"].shape),
                _full_spec(f["w2"].shape),
                _full_spec(f["b2"].shape),
            ],
            out_specs=_full_spec((2, B, LANE)),
            scratch_shapes=[
                pltpu.VMEM((R1, 64), jnp.bfloat16),           # a1
                pltpu.VMEM((6 * 7 * B, LANE), jnp.bfloat16),  # a2
                pltpu.VMEM((4 * 7 * B, LANE), jnp.bfloat16),  # a3
                pltpu.VMEM((6 * 7 * B, LANE), jnp.float32),   # acc2
                pltpu.VMEM((4 * 7 * B, LANE), jnp.float32),   # acc3
            ],
        ),
        compiler_params=pltpu.CompilerParams(
            dimension_semantics=("arbitrary",),
            vmem_limit_bytes=32 * 1024 * 1024,
        ),
    )(patches, sv, f["c1w"], f["c1b"], f["c2w"], f["c2b"], f["c3w"], f["c3b"],
      f["w1c"], f["w1s"], f["b1"], f["w2"], f["b2"])


# ---------------------------------------------------------------------------
# Parameter construction (PyTorch layouts / init semantics).
#   DQNBase convs: kaiming_uniform_ weights, zero biases  (initialize_weights_he)
#   Head Linears : PyTorch default init U(+-1/sqrt(fan_in)) for weight and bias.
# ---------------------------------------------------------------------------
def init_qnet_params(key, num_channels, num_actions):
    ks = jax.random.split(key, 7)

    def kaiming_uniform(k, shape, fan_in):              # a=0 -> bound sqrt(6/fan_in)
        bound = (6.0 / fan_in) ** 0.5
        return jax.random.uniform(k, shape, jnp.float32, -bound, bound)

    def linear_default(kw_, kb_, out_f, in_f):          # torch nn.Linear default
        bound = 1.0 / (in_f ** 0.5)
        w = jax.random.uniform(kw_, (out_f, in_f), jnp.float32, -bound, bound)
        b = jax.random.uniform(kb_, (out_f,), jnp.float32, -bound, bound)
        return w, b

    p = {
        "c1w": kaiming_uniform(ks[0], (32, num_channels, 8, 8), num_channels * 64),
        "c1b": jnp.zeros((32,), jnp.float32),
        "c2w": kaiming_uniform(ks[1], (64, 32, 4, 4), 32 * 16),
        "c2b": jnp.zeros((64,), jnp.float32),
        "c3w": kaiming_uniform(ks[2], (64, 64, 3, 3), 64 * 9),
        "c3b": jnp.zeros((64,), jnp.float32),
    }
    p["f1w"], p["f1b"] = linear_default(ks[3], ks[4], 512, CONV_OUTPUT + STATE_VEC_DIM)
    p["f2w"], p["f2b"] = linear_default(ks[5], ks[6], num_actions, 512)
    return p


def prepare_fused(p1, p2, num_actions):
    """Twin-fused, tap-split, bf16 weights for the single fused kernel (done once)."""
    assert num_actions <= LANE
    bf = jnp.bfloat16
    f = {}

    # conv1: (OC, IC, 8, 8) -> (8*8*IC, OC), feature order (kh, kw, c); concat heads.
    def c1_gemm(w):
        return jnp.transpose(w, (2, 3, 1, 0)).reshape(-1, w.shape[0])
    f["c1w"] = jnp.concatenate([c1_gemm(p1["c1w"]), c1_gemm(p2["c1w"])], axis=1).astype(bf)
    f["c1b"] = jnp.concatenate([p1["c1b"], p2["c1b"]])[None, :]              # (1, 64) f32

    # conv2: per parity-tap (khp,kwp,khh,kwh) -> (64, 128) block-diag over heads.
    taps = []
    for khp in range(2):
        for kwp in range(2):
            for khh in range(2):
                for kwh in range(2):
                    kh, kw = 2 * khh + khp, 2 * kwh + kwp
                    t = jnp.zeros((64, 128), jnp.float32)
                    t = t.at[0:32, 0:64].set(p1["c2w"][:, :, kh, kw].T)      # (IC, OC)
                    t = t.at[32:64, 64:128].set(p2["c2w"][:, :, kh, kw].T)
                    taps.append(t)
    f["c2w"] = jnp.stack(taps).astype(bf)                                    # (16, 64, 128)
    f["c2b"] = jnp.concatenate([p1["c2b"], p2["c2b"]])[None, :]              # (1, 128)

    # conv3: per tap (kh,kw) -> (128, 128) block-diag over heads.
    taps = []
    for kh in range(3):
        for kw in range(3):
            t = jnp.zeros((128, 128), jnp.float32)
            t = t.at[0:64, 0:64].set(p1["c3w"][:, :, kh, kw].T)
            t = t.at[64:128, 64:128].set(p2["c3w"][:, :, kh, kw].T)
            taps.append(t)
    f["c3w"] = jnp.stack(taps).astype(bf)                                    # (9, 128, 128)
    f["c3b"] = jnp.concatenate([p1["c3b"], p2["c3b"]])[None, :]              # (1, 128)

    # head: split f1w's conv part per spatial position p=(h,w) (torch flatten is
    # (c,h,w) ordered); pad the action dim to 128 with zeros (exact, sliced later).
    def head_parts(p):
        wc = p["f1w"][:, :CONV_OUTPUT].T.reshape(64, 4, 4, 512)              # (c, h, w, n)
        wc = jnp.transpose(wc, (1, 2, 0, 3)).reshape(16, 64, 512)            # (p, c, n)
        ws = p["f1w"][:, CONV_OUTPUT:].T                                     # (128, 512)
        w2 = jnp.pad(p["f2w"].T, ((0, 0), (0, LANE - num_actions)))          # (512, 128)
        b2 = jnp.pad(p["f2b"], (0, LANE - num_actions))
        return wc, ws, p["f1b"], w2, b2

    a, b = head_parts(p1), head_parts(p2)
    f["w1c"] = jnp.stack([a[0], b[0]]).astype(bf)                            # (2, 16, 64, 512)
    f["w1s"] = jnp.stack([a[1], b[1]]).astype(bf)                            # (2, 128, 512)
    f["b1"] = jnp.stack([a[2], b[2]])[:, None, :]                            # (2, 1, 512) f32
    f["w2"] = jnp.stack([a[3], b[3]]).astype(bf)                             # (2, 512, 128)
    f["b2"] = jnp.stack([a[4], b[4]])[:, None, :]                            # (2, 1, 128) f32
    return f


# ---------------------------------------------------------------------------
# Twin forward pass: one fused pallas_call; only conv1 im2col (static strided
# slices, ~200 KB) and the final action-slice remain in XLA.
# ---------------------------------------------------------------------------
def twin_forward(fused, states, state_vectors, *, num_actions):
    """states: (B, C, 60, 60) NCHW (PyTorch layout); state_vectors: (B, 128)."""
    B, C, H, W = states.shape
    assert H == 60 and W == 60, "CONV_OUTPUT=1024 implies a 60x60 input"
    bf = jnp.bfloat16
    x = jnp.transpose(states, (0, 2, 3, 1)).astype(bf)          # one NCHW -> NHWC

    # conv1 im2col with STATIC strided slices (no gather); rows ordered
    # (hp, wp, hh, wh, b) so every conv2 tap is a contiguous row block in-kernel.
    taps = [x[:, kh:kh + 53:4, kw:kw + 53:4, :]                 # (B, 14, 14, C) each
            for kh in range(8) for kw in range(8)]
    p = jnp.stack(taps, axis=3).reshape(B, 14, 14, 64 * C)      # feature = (kh, kw, c)
    p = (p.reshape(B, 7, 2, 7, 2, 64 * C)
          .transpose(2, 4, 1, 3, 0, 5)                          # (hp, wp, hh, wh, b, f)
          .reshape(2 * 2 * 7 * 7 * B, 64 * C))

    q = fused_twin_qnet(p, state_vectors.astype(bf), fused, batch=B)   # (2, B, 128)
    return q[0, :, :num_actions], q[1, :, :num_actions]


# ---------------------------------------------------------------------------
# References.
#   ref_qnet_f32 : exact PyTorch forward semantics in f32 (loose check).
#   ref_qnet_bf16: same semantics with bf16 matmul operands / f32 accumulate,
#                  mirroring the kernel numerics (tight check).
# ---------------------------------------------------------------------------
def ref_qnet_f32(p, states, sv):
    def conv(x, w, b, s):
        y = jax.lax.conv_general_dilated(x, w, (s, s), "VALID",
                                         dimension_numbers=("NCHW", "OIHW", "NCHW"))
        return jax.nn.relu(y + b[None, :, None, None])

    x = conv(states, p["c1w"], p["c1b"], 4)
    x = conv(x, p["c2w"], p["c2b"], 2)
    x = conv(x, p["c3w"], p["c3b"], 1)
    x = x.reshape(x.shape[0], -1)
    x = jnp.concatenate([x, sv], axis=-1)
    h = jax.nn.relu(x @ p["f1w"].T + p["f1b"])
    return h @ p["f2w"].T + p["f2b"]


def ref_qnet_bf16(p, states, sv):
    bf = jnp.bfloat16

    def conv(x, w, b, s):
        y = jax.lax.conv_general_dilated(x.astype(bf), w.astype(bf), (s, s), "VALID",
                                         dimension_numbers=("NCHW", "OIHW", "NCHW"),
                                         preferred_element_type=jnp.float32)
        return jax.nn.relu(y + b[None, :, None, None])

    x = conv(states, p["c1w"], p["c1b"], 4)
    x = conv(x, p["c2w"], p["c2b"], 2)
    x = conv(x, p["c3w"], p["c3b"], 1)
    x = x.reshape(x.shape[0], -1)
    x = jnp.concatenate([x, sv], axis=-1)
    h = jax.nn.relu(jnp.dot(x.astype(bf), p["f1w"].T.astype(bf),
                            preferred_element_type=jnp.float32) + p["f1b"])
    return jnp.dot(h.astype(bf), p["f2w"].T.astype(bf),
                   preferred_element_type=jnp.float32) + p["f2b"]


if __name__ == "__main__":
    batch = 2
    num_channels = 4
    num_actions = 6
    H = W = 60  # required so the flattened conv output equals CONV_OUTPUT (1024)

    root = jax.random.PRNGKey(0)
    k_x, k_v, k_q1, k_q2 = jax.random.split(root, 4)

    states = jax.random.normal(k_x, (batch, num_channels, H, W), jnp.float32)
    state_vectors = jax.random.normal(k_v, (batch, STATE_VEC_DIM), jnp.float32)

    params_q1 = init_qnet_params(k_q1, num_channels, num_actions)
    params_q2 = init_qnet_params(k_q2, num_channels, num_actions)
    fused = prepare_fused(params_q1, params_q2, num_actions)     # once, outside jit

    fwd = jax.jit(functools.partial(twin_forward, num_actions=num_actions))
    q1, q2 = fwd(fused, states, state_vectors)
    q1 = jax.block_until_ready(q1)
    q2 = jax.block_until_ready(q2)
    assert q1.shape == (batch, num_actions) and q2.shape == (batch, num_actions)

    # Tight check vs. a reference with identical numerics (bf16 operands, f32 accum).
    r1 = ref_qnet_bf16(params_q1, states, state_vectors)
    r2 = ref_qnet_bf16(params_q2, states, state_vectors)
    assert jnp.allclose(q1, r1, rtol=1e-2, atol=1e-2), "Q1 mismatch (bf16 reference)"
    assert jnp.allclose(q2, r2, rtol=1e-2, atol=1e-2), "Q2 mismatch (bf16 reference)"

    # Loose sanity check vs. the full-f32 PyTorch-semantics reference
    # (differences come only from bf16 rounding of the MXU operands).
    s1 = ref_qnet_f32(params_q1, states, state_vectors)
    s2 = ref_qnet_f32(params_q2, states, state_vectors)
    assert jnp.allclose(q1, s1, rtol=1e-1, atol=1e-1), "Q1 mismatch (f32 reference)"
    assert jnp.allclose(q2, s2, rtol=1e-1, atol=1e-1), "Q2 mismatch (f32 reference)"

    print("KERNEL_OK")
</pallas_src>

<mosaic_0001>
module attributes {stable_mosaic.version = 11 : i64} {
  func.func @_fused_twin_kernel(%arg0: i32, %arg1: memref<392x256xbf16, #tpu.memory_space<vmem>>, %arg2: memref<2x128xbf16, #tpu.memory_space<vmem>>, %arg3: memref<256x64xbf16, #tpu.memory_space<vmem>>, %arg4: memref<1x64xf32, #tpu.memory_space<vmem>>, %arg5: memref<16x64x128xbf16, #tpu.memory_space<vmem>>, %arg6: memref<1x128xf32, #tpu.memory_space<vmem>>, %arg7: memref<9x128x128xbf16, #tpu.memory_space<vmem>>, %arg8: memref<1x128xf32, #tpu.memory_space<vmem>>, %arg9: memref<2x16x64x512xbf16, #tpu.memory_space<vmem>>, %arg10: memref<2x128x512xbf16, #tpu.memory_space<vmem>>, %arg11: memref<2x1x512xf32, #tpu.memory_space<vmem>>, %arg12: memref<2x512x128xbf16, #tpu.memory_space<vmem>>, %arg13: memref<2x1x128xf32, #tpu.memory_space<vmem>>, %arg14: memref<2x2x128xf32, #tpu.memory_space<vmem>>, %arg15: memref<392x64xbf16, #tpu.memory_space<vmem>>, %arg16: memref<84x128xbf16, #tpu.memory_space<vmem>>, %arg17: memref<56x128xbf16, #tpu.memory_space<vmem>>, %arg18: memref<84x128xf32, #tpu.memory_space<vmem>>, %arg19: memref<56x128xf32, #tpu.memory_space<vmem>>) attributes {dimension_semantics = [#tpu.dimension_semantics<arbitrary>], iteration_bounds = array<i64: 1>, scalar_prefetch = 0 : i64, scratch_operands = 5 : i64, tpu.core_type = #tpu.core_type<tc>, window_params = [{pipeline_mode = #tpu.pipeline_mode<synchronous>, transform_indices = @transform_0, window_bounds = array<i64: 392, 256>}, {pipeline_mode = #tpu.pipeline_mode<synchronous>, transform_indices = @transform_1, window_bounds = array<i64: 2, 128>}, {pipeline_mode = #tpu.pipeline_mode<synchronous>, transform_indices = @transform_2, window_bounds = array<i64: 256, 64>}, {pipeline_mode = #tpu.pipeline_mode<synchronous>, transform_indices = @transform_3, window_bounds = array<i64: 1, 64>}, {pipeline_mode = #tpu.pipeline_mode<synchronous>, transform_indices = @transform_4, window_bounds = array<i64: 16, 64, 128>}, {pipeline_mode = #tpu.pipeline_mode<synchronous>, transform_indices = @transform_5, window_bounds = array<i64: 1, 128>}, {pipeline_mode = #tpu.pipeline_mode<synchronous>, transform_indices = @transform_6, window_bounds = array<i64: 9, 128, 128>}, {pipeline_mode = #tpu.pipeline_mode<synchronous>, transform_indices = @transform_7, window_bounds = array<i64: 1, 128>}, {pipeline_mode = #tpu.pipeline_mode<synchronous>, transform_indices = @transform_8, window_bounds = array<i64: 2, 16, 64, 512>}, {pipeline_mode = #tpu.pipeline_mode<synchronous>, transform_indices = @transform_9, window_bounds = array<i64: 2, 128, 512>}, {pipeline_mode = #tpu.pipeline_mode<synchronous>, transform_indices = @transform_10, window_bounds = array<i64: 2, 1, 512>}, {pipeline_mode = #tpu.pipeline_mode<synchronous>, transform_indices = @transform_11, window_bounds = array<i64: 2, 512, 128>}, {pipeline_mode = #tpu.pipeline_mode<synchronous>, transform_indices = @transform_12, window_bounds = array<i64: 2, 1, 128>}, {pipeline_mode = #tpu.pipeline_mode<synchronous>, transform_indices = @transform_13, window_bounds = array<i64: 2, 2, 128>}]} {
    %c0 = arith.constant 0 : index
    %c0_0 = arith.constant 0 : index
    %0 = vector.load %arg1[%c0, %c0_0] : memref<392x256xbf16, #tpu.memory_space<vmem>>, vector<392x256xbf16>
    %c0_1 = arith.constant 0 : index
    %c0_2 = arith.constant 0 : index
    %1 = vector.load %arg3[%c0_1, %c0_2] : memref<256x64xbf16, #tpu.memory_space<vmem>>, vector<256x64xbf16>
    %cst = arith.constant dense<0.000000e+00> : vector<392x64xf32>
    %2 = tpu.matmul %0, %1, %cst {dimension_numbers = #tpu.dot_dimension_numbers<[1], [0], [0], [1], [0, 0, 1, 1], [], []>} : vector<392x256xbf16>, vector<256x64xbf16>, vector<392x64xf32> -> vector<392x64xf32>
    %c0_3 = arith.constant 0 : index
    %c0_4 = arith.constant 0 : index
    %3 = vector.load %arg4[%c0_3, %c0_4] : memref<1x64xf32, #tpu.memory_space<vmem>>, vector<1x64xf32>
    %4 = vector.broadcast %3 : vector<1x64xf32> to vector<392x64xf32>
    %5 = arith.addf %2, %4 : vector<392x64xf32>
    %cst_5 = arith.constant 0.000000e+00 : f32
    %6 = vector.broadcast %cst_5 : f32 to vector<392x64xf32>
    %7 = arith.maximumf %5, %6 : vector<392x64xf32>
    %8 = arith.truncf %7 : vector<392x64xf32> to vector<392x64xbf16>
    %c0_6 = arith.constant 0 : index
    %c0_7 = arith.constant 0 : index
    %9 = vector.load %arg15[%c0_6, %c0_7] : memref<392x64xbf16, #tpu.memory_space<vmem>>, vector<392x64xbf16>
    tpu.vector_store %arg15[%c0_6, %c0_7], %8 {strides = array<i32>} : memref<392x64xbf16, #tpu.memory_space<vmem>>, vector<392x64xbf16>,
    %cst_8 = arith.constant 0.000000e+00 : f32
    %10 = vector.broadcast %cst_8 : f32 to vector<84x128xf32>
    %c0_9 = arith.constant 0 : index
    %c0_10 = arith.constant 0 : index
    %11 = vector.load %arg18[%c0_9, %c0_10] : memref<84x128xf32, #tpu.memory_space<vmem>>, vector<84x128xf32>
    tpu.vector_store %arg18[%c0_9, %c0_10], %10 {strides = array<i32>} : memref<84x128xf32, #tpu.memory_space<vmem>>, vector<84x128xf32>,
    %c0_11 = arith.constant 0 : index
    %c0_12 = arith.constant 0 : index
    %12 = vector.load %arg15[%c0_11, %c0_12] : memref<392x64xbf16, #tpu.memory_space<vmem>>, vector<84x64xbf16>
    %c0_13 = arith.constant 0 : index
    %c0_14 = arith.constant 0 : index
    %c0_15 = arith.constant 0 : index
    %13 = vector.load %arg5[%c0_13, %c0_14, %c0_15] : memref<16x64x128xbf16, #tpu.memory_space<vmem>>, vector<1x64x128xbf16>
    %14 = vector.shape_cast %13 : vector<1x64x128xbf16> to vector<64x128xbf16>
    %cst_16 = arith.constant dense<0.000000e+00> : vector<84x128xf32>
    %15 = tpu.matmul %12, %14, %cst_16 {dimension_numbers = #tpu.dot_dimension_numbers<[1], [0], [0], [1], [0, 0, 1, 1], [], []>} : vector<84x64xbf16>, vector<64x128xbf16>, vector<84x128xf32> -> vector<84x128xf32>
    %c0_17 = arith.constant 0 : index
    %c0_18 = arith.constant 0 : index
    %16 = vector.load %arg18[%c0_17, %c0_18] : memref<84x128xf32, #tpu.memory_space<vmem>>, vector<84x128xf32>
    %17 = arith.addf %16, %15 : vector<84x128xf32>
    %c0_19 = arith.constant 0 : index
    %c0_20 = arith.constant 0 : index
    %18 = vector.load %arg18[%c0_19, %c0_20] : memref<84x128xf32, #tpu.memory_space<vmem>>, vector<84x128xf32>
    tpu.vector_store %arg18[%c0_19, %c0_20], %17 {strides = array<i32>} : memref<84x128xf32, #tpu.memory_space<vmem>>, vector<84x128xf32>,
    %c0_21 = arith.constant 0 : index
    %c0_22 = arith.constant 0 : index
    %19 = vector.load %arg15[%c0_21, %c0_22] : memref<392x64xbf16, #tpu.memory_space<vmem>>, vector<84x64xbf16>
    %c1 = arith.constant 1 : index
    %c0_23 = arith.constant 0 : index
    %c0_24 = arith.constant 0 : index
    %20 = vector.load %arg5[%c1, %c0_23, %c0_24] : memref<16x64x128xbf16, #tpu.memory_space<vmem>>, vector<1x64x128xbf16>
    %21 = vector.shape_cast %20 : vector<1x64x128xbf16> to vector<64x128xbf16>
    %cst_25 = arith.constant dense<0.000000e+00> : vector<84x128xf32>
    %22 = tpu.matmul %19, %21, %cst_25 {dimension_numbers = #tpu.dot_dimension_numbers<[1], [0], [0], [1], [0, 0, 1, 1], [], []>} : vector<84x64xbf16>, vector<64x128xbf16>, vector<84x128xf32> -> vector<84x128xf32>
    %c0_26 = arith.constant 0 : index
    %c0_27 = arith.constant 0 : index
    %23 = vector.load %arg18[%c0_26, %c0_27] : memref<84x128xf32, #tpu.memory_space<vmem>>, vector<82x128xf32>
    %24 = vector.extract_strided_slice %22 {offsets = [2, 0], sizes = [82, 128], strides = [1, 1]} : vector<84x128xf32> to vector<82x128xf32>
    %25 = arith.addf %23, %24 : vector<82x128xf32>
    %c0_28 = arith.constant 0 : index
    %c0_29 = arith.constant 0 : index
    %26 = vector.load %arg18[%c0_28, %c0_29] : memref<84x128xf32, #tpu.memory_space<vmem>>, vector<82x128xf32>
    tpu.vector_store %arg18[%c0_28, %c0_29], %25 {strides = array<i32>} : memref<84x128xf32, #tpu.memory_space<vmem>>, vector<82x128xf32>,
    %c14 = arith.constant 14 : index
    %c0_30 = arith.constant 0 : index
    %27 = vector.load %arg15[%c14, %c0_30] : memref<392x64xbf16, #tpu.memory_space<vmem>>, vector<84x64xbf16>
    %c2 = arith.constant 2 : index
    %c0_31 = arith.constant 0 : index
    %c0_32 = arith.constant 0 : index
    %28 = vector.load %arg5[%c2, %c0_31, %c0_32] : memref<16x64x128xbf16, #tpu.memory_space<vmem>>, vector<1x64x128xbf16>
    %29 = vector.shape_cast %28 : vector<1x64x128xbf16> to vector<64x128xbf16>
    %cst_33 = arith.constant dense<0.000000e+00> : vector<84x128xf32>
    %30 = tpu.matmul %27, %29, %cst_33 {dimension_numbers = #tpu.dot_dimension_numbers<[1], [0], [0], [1], [0, 0, 1, 1], [], []>} : vector<84x64xbf16>, vector<64x128xbf16>, vector<84x128xf32> -> vector<84x128xf32>
    %c0_34 = arith.constant 0 : index
    %c0_35 = arith.constant 0 : index
    %31 = vector.load %arg18[%c0_34, %c0_35] : memref<84x128xf32, #tpu.memory_space<vmem>>, vector<84x128xf32>
    %32 = arith.addf %31, %30 : vector<84x128xf32>
    %c0_36 = arith.constant 0 : index
    %c0_37 = arith.constant 0 : index
    %33 = vector.load %arg18[%c0_36, %c0_37] : memref<84x128xf32, #tpu.memory_space<vmem>>, vector<84x128xf32>
    tpu.vector_store %arg18[%c0_36, %c0_37], %32 {strides = array<i32>} : memref<84x128xf32, #tpu.memory_space<vmem>>, vector<84x128xf32>,
    %c14_38 = arith.constant 14 : index
    %c0_39 = arith.constant 0 : index
    %34 = vector.load %arg15[%c14_38, %c0_39] : memref<392x64xbf16, #tpu.memory_space<vmem>>, vector<84x64xbf16>
    %c3 = arith.constant 3 : index
    %c0_40 = arith.constant 0 : index
    %c0_41 = arith.constant 0 : index
    %35 = vector.load %arg5[%c3, %c0_40, %c0_41] : memref<16x64x128xbf16, #tpu.memory_space<vmem>>, vector<1x64x128xbf16>
    %36 = vector.shape_cast %35 : vector<1x64x128xbf16> to vector<64x128xbf16>
    %cst_42 = arith.constant dense<0.000000e+00> : vector<84x128xf32>
    %37 = tpu.matmul %34, %36, %cst_42 {dimension_numbers = #tpu.dot_dimension_numbers<[1], [0], [0], [1], [0, 0, 1, 1], [], []>} : vector<84x64xbf16>, vector<64x128xbf16>, vector<84x128xf32> -> vector<84x128xf32>
    %c0_43 = arith.constant 0 : index
    %c0_44 = arith.constant 0 : index
    %38 = vector.load %arg18[%c0_43, %c0_44] : memref<84x128xf32, #tpu.memory_space<vmem>>, vector<82x128xf32>
    %39 = vector.extract_strided_slice %37 {offsets = [2, 0], sizes = [82, 128], strides = [1, 1]} : vector<84x128xf32> to vector<82x128xf32>
    %40 = arith.addf %38, %39 : vector<82x128xf32>
    %c0_45 = arith.constant 0 : index
    %c0_46 = arith.constant 0 : index
    %41 = vector.load %arg18[%c0_45, %c0_46] : memref<84x128xf32, #tpu.memory_space<vmem>>, vector<82x128xf32>
    tpu.vector_store %arg18[%c0_45, %c0_46], %40 {strides = array<i32>} : memref<84x128xf32, #tpu.memory_space<vmem>>, vector<82x128xf32>,
    %c98 = arith.constant 98 : index
    %c0_47 = arith.constant 0 : index
    %42 = vector.load %arg15[%c98, %c0_47] : memref<392x64xbf16, #tpu.memory_space<vmem>>, vector<84x64xbf16>
    %c4 = arith.constant 4 : index
    %c0_48 = arith.constant 0 : index
    %c0_49 = arith.constant 0 : index
    %43 = vector.load %arg5[%c4, %c0_48, %c0_49] : memref<16x64x128xbf16, #tpu.memory_space<vmem>>, vector<1x64x128xbf16>
    %44 = vector.shape_cast %43 : vector<1x64x128xbf16> to vector<64x128xbf16>
    %cst_50 = arith.constant dense<0.000000e+00> : vector<84x128xf32>
    %45 = tpu.matmul %42, %44, %cst_50 {dimension_numbers = #tpu.dot_dimension_numbers<[1], [0], [0], [1], [0, 0, 1, 1], [], []>} : vector<84x64xbf16>, vector<64x128xbf16>, vector<84x128xf32> -> vector<84x128xf32>
    %c0_51 = arith.constant 0 : index
    %c0_52 = arith.constant 0 : index
    %46 = vector.load %arg18[%c0_51, %c0_52] : memref<84x128xf32, #tpu.memory_space<vmem>>, vector<84x128xf32>
    %47 = arith.addf %46, %45 : vector<84x128xf32>
    %c0_53 = arith.constant 0 : index
    %c0_54 = arith.constant 0 : index
    %48 = vector.load %arg18[%c0_53, %c0_54] : memref<84x128xf32, #tpu.memory_space<vmem>>, vector<84x128xf32>
    tpu.vector_store %arg18[%c0_53, %c0_54], %47 {strides = array<i32>} : memref<84x128xf32, #tpu.memory_space<vmem>>, vector<84x128xf32>,
    %c98_55 = arith.constant 98 : index
    %c0_56 = arith.constant 0 : index
    %49 = vector.load %arg15[%c98_55, %c0_56] : memref<392x64xbf16, #tpu.memory_space<vmem>>, vector<84x64xbf16>
    %c5 = arith.constant 5 : index
    %c0_57 = arith.constant 0 : index
    %c0_58 = arith.constant 0 : index
    %50 = vector.load %arg5[%c5, %c0_57, %c0_58] : memref<16x64x128xbf16, #tpu.memory_space<vmem>>, vector<1x64x128xbf16>
    %51 = vector.shape_cast %50 : vector<1x64x128xbf16> to vector<64x128xbf16>
    %cst_59 = arith.constant dense<0.000000e+00> : vector<84x128xf32>
    %52 = tpu.matmul %49, %51, %cst_59 {dimension_numbers = #tpu.dot_dimension_numbers<[1], [0], [0], [1], [0, 0, 1, 1], [], []>} : vector<84x64xbf16>, vector<64x128xbf16>, vector<84x128xf32> -> vector<84x128xf32>
    %c0_60 = arith.constant 0 : index
    %c0_61 = arith.constant 0 : index
    %53 = vector.load %arg18[%c0_60, %c0_61] : memref<84x128xf32, #tpu.memory_space<vmem>>, vector<82x128xf32>
    %54 = vector.extract_strided_slice %52 {offsets = [2, 0], sizes = [82, 128], strides = [1, 1]} : vector<84x128xf32> to vector<82x128xf32>
    %55 = arith.addf %53, %54 : vector<82x128xf32>
    %c0_62 = arith.constant 0 : index
    %c0_63 = arith.constant 0 : index
    %56 = vector.load %arg18[%c0_62, %c0_63] : memref<84x128xf32, #tpu.memory_space<vmem>>, vector<82x128xf32>
    tpu.vector_store %arg18[%c0_62, %c0_63], %55 {strides = array<i32>} : memref<84x128xf32, #tpu.memory_space<vmem>>, vector<82x128xf32>,
    %c112 = arith.constant 112 : index
    %c0_64 = arith.constant 0 : index
    %57 = vector.load %arg15[%c112, %c0_64] : memref<392x64xbf16, #tpu.memory_space<vmem>>, vector<84x64xbf16>
    %c6 = arith.constant 6 : index
    %c0_65 = arith.constant 0 : index
    %c0_66 = arith.constant 0 : index
    %58 = vector.load %arg5[%c6, %c0_65, %c0_66] : memref<16x64x128xbf16, #tpu.memory_space<vmem>>, vector<1x64x128xbf16>
    %59 = vector.shape_cast %58 : vector<1x64x128xbf16> to vector<64x128xbf16>
    %cst_67 = arith.constant dense<0.000000e+00> : vector<84x128xf32>
    %60 = tpu.matmul %57, %59, %cst_67 {dimension_numbers = #tpu.dot_dimension_numbers<[1], [0], [0], [1], [0, 0, 1, 1], [], []>} : vector<84x64xbf16>, vector<64x128xbf16>, vector<84x128xf32> -> vector<84x128xf32>
    %c0_68 = arith.constant 0 : index
    %c0_69 = arith.constant 0 : index
    %61 = vector.load %arg18[%c0_68, %c0_69] : memref<84x128xf32, #tpu.memory_space<vmem>>, vector<84x128xf32>
    %62 = arith.addf %61, %60 : vector<84x128xf32>
    %c0_70 = arith.constant 0 : index
    %c0_71 = arith.constant 0 : index
    %63 = vector.load %arg18[%c0_70, %c0_71] : memref<84x128xf32, #tpu.memory_space<vmem>>, vector<84x128xf32>
    tpu.vector_store %arg18[%c0_70, %c0_71], %62 {strides = array<i32>} : memref<84x128xf32, #tpu.memory_space<vmem>>, vector<84x128xf32>,
    %c112_72 = arith.constant 112 : index
    %c0_73 = arith.constant 0 : index
    %64 = vector.load %arg15[%c112_72, %c0_73] : memref<392x64xbf16, #tpu.memory_space<vmem>>, vector<84x64xbf16>
    %c7 = arith.constant 7 : index
    %c0_74 = arith.constant 0 : index
    %c0_75 = arith.constant 0 : index
    %65 = vector.load %arg5[%c7, %c0_74, %c0_75] : memref<16x64x128xbf16, #tpu.memory_space<vmem>>, vector<1x64x128xbf16>
    %66 = vector.shape_cast %65 : vector<1x64x128xbf16> to vector<64x128xbf16>
    %cst_76 = arith.constant dense<0.000000e+00> : vector<84x128xf32>
    %67 = tpu.matmul %64, %66, %cst_76 {dimension_numbers = #tpu.dot_dimension_numbers<[1], [0], [0], [1], [0, 0, 1, 1], [], []>} : vector<84x64xbf16>, vector<64x128xbf16>, vector<84x128xf32> -> vector<84x128xf32>
    %c0_77 = arith.constant 0 : index
    %c0_78 = arith.constant 0 : index
    %68 = vector.load %arg18[%c0_77, %c0_78] : memref<84x128xf32, #tpu.memory_space<vmem>>, vector<82x128xf32>
    %69 = vector.extract_strided_slice %67 {offsets = [2, 0], sizes = [82, 128], strides = [1, 1]} : vector<84x128xf32> to vector<82x128xf32>
    %70 = arith.addf %68, %69 : vector<82x128xf32>
    %c0_79 = arith.constant 0 : index
    %c0_80 = arith.constant 0 : index
    %71 = vector.load %arg18[%c0_79, %c0_80] : memref<84x128xf32, #tpu.memory_space<vmem>>, vector<82x128xf32>
    tpu.vector_store %arg18[%c0_79, %c0_80], %70 {strides = array<i32>} : memref<84x128xf32, #tpu.memory_space<vmem>>, vector<82x128xf32>,
    %c196 = arith.constant 196 : index
    %c0_81 = arith.constant 0 : index
    %72 = vector.load %arg15[%c196, %c0_81] : memref<392x64xbf16, #tpu.memory_space<vmem>>, vector<84x64xbf16>
    %c8 = arith.constant 8 : index
    %c0_82 = arith.constant 0 : index
    %c0_83 = arith.constant 0 : index
    %73 = vector.load %arg5[%c8, %c0_82, %c0_83] : memref<16x64x128xbf16, #tpu.memory_space<vmem>>, vector<1x64x128xbf16>
    %74 = vector.shape_cast %73 : vector<1x64x128xbf16> to vector<64x128xbf16>
    %cst_84 = arith.constant dense<0.000000e+00> : vector<84x128xf32>
    %75 = tpu.matmul %72, %74, %cst_84 {dimension_numbers = #tpu.dot_dimension_numbers<[1], [0], [0], [1], [0, 0, 1, 1], [], []>} : vector<84x64xbf16>, vector<64x128xbf16>, vector<84x128xf32> -> vector<84x128xf32>
    %c0_85 = arith.constant 0 : index
    %c0_86 = arith.constant 0 : index
    %76 = vector.load %arg18[%c0_85, %c0_86] : memref<84x128xf32, #tpu.memory_space<vmem>>, vector<84x128xf32>
    %77 = arith.addf %76, %75 : vector<84x128xf32>
    %c0_87 = arith.constant 0 : index
    %c0_88 = arith.constant 0 : index
    %78 = vector.load %arg18[%c0_87, %c0_88] : memref<84x128xf32, #tpu.memory_space<vmem>>, vector<84x128xf32>
    tpu.vector_store %arg18[%c0_87, %c0_88], %77 {strides = array<i32>} : memref<84x128xf32, #tpu.memory_space<vmem>>, vector<84x128xf32>,
    %c196_89 = arith.constant 196 : index
    %c0_90 = arith.constant 0 : index
    %79 = vector.load %arg15[%c196_89, %c0_90] : memref<392x64xbf16, #tpu.memory_space<vmem>>, vector<84x64xbf16>
    %c9 = arith.constant 9 : index
    %c0_91 = arith.constant 0 : index
    %c0_92 = arith.constant 0 : index
    %80 = vector.load %arg5[%c9, %c0_91, %c0_92] : memref<16x64x128xbf16, #tpu.memory_space<vmem>>, vector<1x64x128xbf16>
    %81 = vector.shape_cast %80 : vector<1x64x128xbf16> to vector<64x128xbf16>
    %cst_93 = arith.constant dense<0.000000e+00> : vector<84x128xf32>
    %82 = tpu.matmul %79, %81, %cst_93 {dimension_numbers = #tpu.dot_dimension_numbers<[1], [0], [0], [1], [0, 0, 1, 1], [], []>} : vector<84x64xbf16>, vector<64x128xbf16>, vector<84x128xf32> -> vector<84x128xf32>
    %c0_94 = arith.constant 0 : index
    %c0_95 = arith.constant 0 : index
    %83 = vector.load %arg18[%c0_94, %c0_95] : memref<84x128xf32, #tpu.memory_space<vmem>>, vector<82x128xf32>
    %84 = vector.extract_strided_slice %82 {offsets = [2, 0], sizes = [82, 128], strides = [1, 1]} : vector<84x128xf32> to vector<82x128xf32>
    %85 = arith.addf %83, %84 : vector<82x128xf32>
    %c0_96 = arith.constant 0 : index
    %c0_97 = arith.constant 0 : index
    %86 = vector.load %arg18[%c0_96, %c0_97] : memref<84x128xf32, #tpu.memory_space<vmem>>, vector<82x128xf32>
    tpu.vector_store %arg18[%c0_96, %c0_97], %85 {strides = array<i32>} : memref<84x128xf32, #tpu.memory_space<vmem>>, vector<82x128xf32>,
    %c210 = arith.constant 210 : index
    %c0_98 = arith.constant 0 : index
    %87 = vector.load %arg15[%c210, %c0_98] : memref<392x64xbf16, #tpu.memory_space<vmem>>, vector<84x64xbf16>
    %c10 = arith.constant 10 : index
    %c0_99 = arith.constant 0 : index
    %c0_100 = arith.constant 0 : index
    %88 = vector.load %arg5[%c10, %c0_99, %c0_100] : memref<16x64x128xbf16, #tpu.memory_space<vmem>>, vector<1x64x128xbf16>
    %89 = vector.shape_cast %88 : vector<1x64x128xbf16> to vector<64x128xbf16>
    %cst_101 = arith.constant dense<0.000000e+00> : vector<84x128xf32>
    %90 = tpu.matmul %87, %89, %cst_101 {dimension_numbers = #tpu.dot_dimension_numbers<[1], [0], [0], [1], [0, 0, 1, 1], [], []>} : vector<84x64xbf16>, vector<64x128xbf16>, vector<84x128xf32> -> vector<84x128xf32>
    %c0_102 = arith.constant 0 : index
    %c0_103 = arith.constant 0 : index
    %91 = vector.load %arg18[%c0_102, %c0_103] : memref<84x128xf32, #tpu.memory_space<vmem>>, vector<84x128xf32>
    %92 = arith.addf %91, %90 : vector<84x128xf32>
    %c0_104 = arith.constant 0 : index
    %c0_105 = arith.constant 0 : index
    %93 = vector.load %arg18[%c0_104, %c0_105] : memref<84x128xf32, #tpu.memory_space<vmem>>, vector<84x128xf32>
    tpu.vector_store %arg18[%c0_104, %c0_105], %92 {strides = array<i32>} : memref<84x128xf32, #tpu.memory_space<vmem>>, vector<84x128xf32>,
    %c210_106 = arith.constant 210 : index
    %c0_107 = arith.constant 0 : index
    %94 = vector.load %arg15[%c210_106, %c0_107] : memref<392x64xbf16, #tpu.memory_space<vmem>>, vector<84x64xbf16>
    %c11 = arith.constant 11 : index
    %c0_108 = arith.constant 0 : index
    %c0_109 = arith.constant 0 : index
    %95 = vector.load %arg5[%c11, %c0_108, %c0_109] : memref<16x64x128xbf16, #tpu.memory_space<vmem>>, vector<1x64x128xbf16>
    %96 = vector.shape_cast %95 : vector<1x64x128xbf16> to vector<64x128xbf16>
    %cst_110 = arith.constant dense<0.000000e+00> : vector<84x128xf32>
    %97 = tpu.matmul %94, %96, %cst_110 {dimension_numbers = #tpu.dot_dimension_numbers<[1], [0], [0], [1], [0, 0, 1, 1], [], []>} : vector<84x64xbf16>, vector<64x128xbf16>, vector<84x128xf32> -> vector<84x128xf32>
    %c0_111 = arith.constant 0 : index
    %c0_112 = arith.constant 0 : index
    %98 = vector.load %arg18[%c0_111, %c0_112] : memref<84x128xf32, #tpu.memory_space<vmem>>, vector<82x128xf32>
    %99 = vector.extract_strided_slice %97 {offsets = [2, 0], sizes = [82, 128], strides = [1, 1]} : vector<84x128xf32> to vector<82x128xf32>
    %100 = arith.addf %98, %99 : vector<82x128xf32>
    %c0_113 = arith.constant 0 : index
    %c0_114 = arith.constant 0 : index
    %101 = vector.load %arg18[%c0_113, %c0_114] : memref<84x128xf32, #tpu.memory_space<vmem>>, vector<82x128xf32>
    tpu.vector_store %arg18[%c0_113, %c0_114], %100 {strides = array<i32>} : memref<84x128xf32, #tpu.memory_space<vmem>>, vector<82x128xf32>,
    %c294 = arith.constant 294 : index
    %c0_115 = arith.constant 0 : index
    %102 = vector.load %arg15[%c294, %c0_115] : memref<392x64xbf16, #tpu.memory_space<vmem>>, vector<84x64xbf16>
    %c12 = arith.constant 12 : index
    %c0_116 = arith.constant 0 : index
    %c0_117 = arith.constant 0 : index
    %103 = vector.load %arg5[%c12, %c0_116, %c0_117] : memref<16x64x128xbf16, #tpu.memory_space<vmem>>, vector<1x64x128xbf16>
    %104 = vector.shape_cast %103 : vector<1x64x128xbf16> to vector<64x128xbf16>
    %cst_118 = arith.constant dense<0.000000e+00> : vector<84x128xf32>
    %105 = tpu.matmul %102, %104, %cst_118 {dimension_numbers = #tpu.dot_dimension_numbers<[1], [0], [0], [1], [0, 0, 1, 1], [], []>} : vector<84x64xbf16>, vector<64x128xbf16>, vector<84x128xf32> -> vector<84x128xf32>
    %c0_119 = arith.constant 0 : index
    %c0_120 = arith.constant 0 : index
    %106 = vector.load %arg18[%c0_119, %c0_120] : memref<84x128xf32, #tpu.memory_space<vmem>>, vector<84x128xf32>
    %107 = arith.addf %106, %105 : vector<84x128xf32>
    %c0_121 = arith.constant 0 : index
    %c0_122 = arith.constant 0 : index
    %108 = vector.load %arg18[%c0_121, %c0_122] : memref<84x128xf32, #tpu.memory_space<vmem>>, vector<84x128xf32>
    tpu.vector_store %arg18[%c0_121, %c0_122], %107 {strides = array<i32>} : memref<84x128xf32, #tpu.memory_space<vmem>>, vector<84x128xf32>,
    %c294_123 = arith.constant 294 : index
    %c0_124 = arith.constant 0 : index
    %109 = vector.load %arg15[%c294_123, %c0_124] : memref<392x64xbf16, #tpu.memory_space<vmem>>, vector<84x64xbf16>
    %c13 = arith.constant 13 : index
    %c0_125 = arith.constant 0 : index
    %c0_126 = arith.constant 0 : index
    %110 = vector.load %arg5[%c13, %c0_125, %c0_126] : memref<16x64x128xbf16, #tpu.memory_space<vmem>>, vector<1x64x128xbf16>
    %111 = vector.shape_cast %110 : vector<1x64x128xbf16> to vector<64x128xbf16>
    %cst_127 = arith.constant dense<0.000000e+00> : vector<84x128xf32>
    %112 = tpu.matmul %109, %111, %cst_127 {dimension_numbers = #tpu.dot_dimension_numbers<[1], [0], [0], [1], [0, 0, 1, 1], [], []>} : vector<84x64xbf16>, vector<64x128xbf16>, vector<84x128xf32> -> vector<84x128xf32>
    %c0_128 = arith.constant 0 : index
    %c0_129 = arith.constant 0 : index
    %113 = vector.load %arg18[%c0_128, %c0_129] : memref<84x128xf32, #tpu.memory_space<vmem>>, vector<82x128xf32>
    %114 = vector.extract_strided_slice %112 {offsets = [2, 0], sizes = [82, 128], strides = [1, 1]} : vector<84x128xf32> to vector<82x128xf32>
    %115 = arith.addf %113, %114 : vector<82x128xf32>
    %c0_130 = arith.constant 0 : index
    %c0_131 = arith.constant 0 : index
    %116 = vector.load %arg18[%c0_130, %c0_131] : memref<84x128xf32, #tpu.memory_space<vmem>>, vector<82x128xf32>
    tpu.vector_store %arg18[%c0_130, %c0_131], %115 {strides = array<i32>} : memref<84x128xf32, #tpu.memory_space<vmem>>, vector<82x128xf32>,
    %c308 = arith.constant 308 : index
    %c0_132 = arith.constant 0 : index
    %117 = vector.load %arg15[%c308, %c0_132] : memref<392x64xbf16, #tpu.memory_space<vmem>>, vector<84x64xbf16>
    %c14_133 = arith.constant 14 : index
    %c0_134 = arith.constant 0 : index
    %c0_135 = arith.constant 0 : index
    %118 = vector.load %arg5[%c14_133, %c0_134, %c0_135] : memref<16x64x128xbf16, #tpu.memory_space<vmem>>, vector<1x64x128xbf16>
    %119 = vector.shape_cast %118 : vector<1x64x128xbf16> to vector<64x128xbf16>
    %cst_136 = arith.constant dense<0.000000e+00> : vector<84x128xf32>
    %120 = tpu.matmul %117, %119, %cst_136 {dimension_numbers = #tpu.dot_dimension_numbers<[1], [0], [0], [1], [0, 0, 1, 1], [], []>} : vector<84x64xbf16>, vector<64x128xbf16>, vector<84x128xf32> -> vector<84x128xf32>
    %c0_137 = arith.constant 0 : index
    %c0_138 = arith.constant 0 : index
    %121 = vector.load %arg18[%c0_137, %c0_138] : memref<84x128xf32, #tpu.memory_space<vmem>>, vector<84x128xf32>
    %122 = arith.addf %121, %120 : vector<84x128xf32>
    %c0_139 = arith.constant 0 : index
    %c0_140 = arith.constant 0 : index
    %123 = vector.load %arg18[%c0_139, %c0_140] : memref<84x128xf32, #tpu.memory_space<vmem>>, vector<84x128xf32>
    tpu.vector_store %arg18[%c0_139, %c0_140], %122 {strides = array<i32>} : memref<84x128xf32, #tpu.memory_space<vmem>>, vector<84x128xf32>,
    %c308_141 = arith.constant 308 : index
    %c0_142 = arith.constant 0 : index
    %124 = vector.load %arg15[%c308_141, %c0_142] : memref<392x64xbf16, #tpu.memory_space<vmem>>, vector<84x64xbf16>
    %c15 = arith.constant 15 : index
    %c0_143 = arith.constant 0 : index
    %c0_144 = arith.constant 0 : index
    %125 = vector.load %arg5[%c15, %c0_143, %c0_144] : memref<16x64x128xbf16, #tpu.memory_space<vmem>>, vector<1x64x128xbf16>
    %126 = vector.shape_cast %125 : vector<1x64x128xbf16> to vector<64x128xbf16>
    %cst_145 = arith.constant dense<0.000000e+00> : vector<84x128xf32>
    %127 = tpu.matmul %124, %126, %cst_145 {dimension_numbers = #tpu.dot_dimension_numbers<[1], [0], [0], [1], [0, 0, 1, 1], [], []>} : vector<84x64xbf16>, vector<64x128xbf16>, vector<84x128xf32> -> vector<84x128xf32>
    %c0_146 = arith.constant 0 : index
    %c0_147 = arith.constant 0 : index
    %128 = vector.load %arg18[%c0_146, %c0_147] : memref<84x128xf32, #tpu.memory_space<vmem>>, vector<82x128xf32>
    %129 = vector.extract_strided_slice %127 {offsets = [2, 0], sizes = [82, 128], strides = [1, 1]} : vector<84x128xf32> to vector<82x128xf32>
    %130 = arith.addf %128, %129 : vector<82x128xf32>
    %c0_148 = arith.constant 0 : index
    %c0_149 = arith.constant 0 : index
    %131 = vector.load %arg18[%c0_148, %c0_149] : memref<84x128xf32, #tpu.memory_space<vmem>>, vector<82x128xf32>
    tpu.vector_store %arg18[%c0_148, %c0_149], %130 {strides = array<i32>} : memref<84x128xf32, #tpu.memory_space<vmem>>, vector<82x128xf32>,
    %c0_150 = arith.constant 0 : index
    %c0_151 = arith.constant 0 : index
    %132 = vector.load %arg18[%c0_150, %c0_151] : memref<84x128xf32, #tpu.memory_space<vmem>>, vector<84x128xf32>
    %c0_152 = arith.constant 0 : index
    %c0_153 = arith.constant 0 : index
    %133 = vector.load %arg6[%c0_152, %c0_153] : memref<1x128xf32, #tpu.memory_space<vmem>>, vector<1x128xf32>
    %134 = vector.broadcast %133 : vector<1x128xf32> to vector<84x128xf32>
    %135 = arith.addf %132, %134 : vector<84x128xf32>
    %cst_154 = arith.constant 0.000000e+00 : f32
    %136 = vector.broadcast %cst_154 : f32 to vector<84x128xf32>
    %137 = arith.maximumf %135, %136 : vector<84x128xf32>
    %138 = arith.truncf %137 : vector<84x128xf32> to vector<84x128xbf16>
    %c0_155 = arith.constant 0 : index
    %c0_156 = arith.constant 0 : index
    %139 = vector.load %arg16[%c0_155, %c0_156] : memref<84x128xbf16, #tpu.memory_space<vmem>>, vector<84x128xbf16>
    tpu.vector_store %arg16[%c0_155, %c0_156], %138 {strides = array<i32>} : memref<84x128xbf16, #tpu.memory_space<vmem>>, vector<84x128xbf16>,
    %cst_157 = arith.constant 0.000000e+00 : f32
    %140 = vector.broadcast %cst_157 : f32 to vector<56x128xf32>
    %c0_158 = arith.constant 0 : index
    %c0_159 = arith.constant 0 : index
    %141 = vector.load %arg19[%c0_158, %c0_159] : memref<56x128xf32, #tpu.memory_space<vmem>>, vector<56x128xf32>
    tpu.vector_store %arg19[%c0_158, %c0_159], %140 {strides = array<i32>} : memref<56x128xf32, #tpu.memory_space<vmem>>, vector<56x128xf32>,
    %c0_160 = arith.constant 0 : index
    %c0_161 = arith.constant 0 : index
    %142 = vector.load %arg16[%c0_160, %c0_161] : memref<84x128xbf16, #tpu.memory_space<vmem>>, vector<56x128xbf16>
    %c0_162 = arith.constant 0 : index
    %c0_163 = arith.constant 0 : index
    %c0_164 = arith.constant 0 : index
    %143 = vector.load %arg7[%c0_162, %c0_163, %c0_164] : memref<9x128x128xbf16, #tpu.memory_space<vmem>>, vector<1x128x128xbf16>
    %144 = vector.shape_cast %143 : vector<1x128x128xbf16> to vector<128x128xbf16>
    %cst_165 = arith.constant dense<0.000000e+00> : vector<56x128xf32>
    %145 = tpu.matmul %142, %144, %cst_165 {dimension_numbers = #tpu.dot_dimension_numbers<[1], [0], [0], [1], [0, 0, 1, 1], [], []>} : vector<56x128xbf16>, vector<128x128xbf16>, vector<56x128xf32> -> vector<56x128xf32>
    %c0_166 = arith.constant 0 : index
    %c0_167 = arith.constant 0 : index
    %146 = vector.load %arg19[%c0_166, %c0_167] : memref<56x128xf32, #tpu.memory_space<vmem>>, vector<56x128xf32>
    %147 = arith.addf %146, %145 : vector<56x128xf32>
    %c0_168 = arith.constant 0 : index
    %c0_169 = arith.constant 0 : index
    %148 = vector.load %arg19[%c0_168, %c0_169] : memref<56x128xf32, #tpu.memory_space<vmem>>, vector<56x128xf32>
    tpu.vector_store %arg19[%c0_168, %c0_169], %147 {strides = array<i32>} : memref<56x128xf32, #tpu.memory_space<vmem>>, vector<56x128xf32>,
    %c0_170 = arith.constant 0 : index
    %c0_171 = arith.constant 0 : index
    %149 = vector.load %arg16[%c0_170, %c0_171] : memref<84x128xbf16, #tpu.memory_space<vmem>>, vector<56x128xbf16>
    %c1_172 = arith.constant 1 : index
    %c0_173 = arith.constant 0 : index
    %c0_174 = arith.constant 0 : index
    %150 = vector.load %arg7[%c1_172, %c0_173, %c0_174] : memref<9x128x128xbf16, #tpu.memory_space<vmem>>, vector<1x128x128xbf16>
    %151 = vector.shape_cast %150 : vector<1x128x128xbf16> to vector<128x128xbf16>
    %cst_175 = arith.constant dense<0.000000e+00> : vector<56x128xf32>
    %152 = tpu.matmul %149, %151, %cst_175 {dimension_numbers = #tpu.dot_dimension_numbers<[1], [0], [0], [1], [0, 0, 1, 1], [], []>} : vector<56x128xbf16>, vector<128x128xbf16>, vector<56x128xf32> -> vector<56x128xf32>
    %c0_176 = arith.constant 0 : index
    %c0_177 = arith.constant 0 : index
    %153 = vector.load %arg19[%c0_176, %c0_177] : memref<56x128xf32, #tpu.memory_space<vmem>>, vector<54x128xf32>
    %154 = vector.extract_strided_slice %152 {offsets = [2, 0], sizes = [54, 128], strides = [1, 1]} : vector<56x128xf32> to vector<54x128xf32>
    %155 = arith.addf %153, %154 : vector<54x128xf32>
    %c0_178 = arith.constant 0 : index
    %c0_179 = arith.constant 0 : index
    %156 = vector.load %arg19[%c0_178, %c0_179] : memref<56x128xf32, #tpu.memory_space<vmem>>, vector<54x128xf32>
    tpu.vector_store %arg19[%c0_178, %c0_179], %155 {strides = array<i32>} : memref<56x128xf32, #tpu.memory_space<vmem>>, vector<54x128xf32>,
    %c0_180 = arith.constant 0 : index
    %c0_181 = arith.constant 0 : index
    %157 = vector.load %arg16[%c0_180, %c0_181] : memref<84x128xbf16, #tpu.memory_space<vmem>>, vector<56x128xbf16>
    %c2_182 = arith.constant 2 : index
    %c0_183 = arith.constant 0 : index
    %c0_184 = arith.constant 0 : index
    %158 = vector.load %arg7[%c2_182, %c0_183, %c0_184] : memref<9x128x128xbf16, #tpu.memory_space<vmem>>, vector<1x128x128xbf16>
    %159 = vector.shape_cast %158 : vector<1x128x128xbf16> to vector<128x128xbf16>
    %cst_185 = arith.constant dense<0.000000e+00> : vector<56x128xf32>
    %160 = tpu.matmul %157, %159, %cst_185 {dimension_numbers = #tpu.dot_dimension_numbers<[1], [0], [0], [1], [0, 0, 1, 1], [], []>} : vector<56x128xbf16>, vector<128x128xbf16>, vector<56x128xf32> -> vector<56x128xf32>
    %c0_186 = arith.constant 0 : index
    %c0_187 = arith.constant 0 : index
    %161 = vector.load %arg19[%c0_186, %c0_187] : memref<56x128xf32, #tpu.memory_space<vmem>>, vector<52x128xf32>
    %162 = vector.extract_strided_slice %160 {offsets = [4, 0], sizes = [52, 128], strides = [1, 1]} : vector<56x128xf32> to vector<52x128xf32>
    %163 = arith.addf %161, %162 : vector<52x128xf32>
    %c0_188 = arith.constant 0 : index
    %c0_189 = arith.constant 0 : index
    %164 = vector.load %arg19[%c0_188, %c0_189] : memref<56x128xf32, #tpu.memory_space<vmem>>, vector<52x128xf32>
    tpu.vector_store %arg19[%c0_188, %c0_189], %163 {strides = array<i32>} : memref<56x128xf32, #tpu.memory_space<vmem>>, vector<52x128xf32>,
    %c14_190 = arith.constant 14 : index
    %c0_191 = arith.constant 0 : index
    %165 = vector.load %arg16[%c14_190, %c0_191] : memref<84x128xbf16, #tpu.memory_space<vmem>>, vector<56x128xbf16>
    %c3_192 = arith.constant 3 : index
    %c0_193 = arith.constant 0 : index
    %c0_194 = arith.constant 0 : index
    %166 = vector.load %arg7[%c3_192, %c0_193, %c0_194] : memref<9x128x128xbf16, #tpu.memory_space<vmem>>, vector<1x128x128xbf16>
    %167 = vector.shape_cast %166 : vector<1x128x128xbf16> to vector<128x128xbf16>
    %cst_195 = arith.constant dense<0.000000e+00> : vector<56x128xf32>
    %168 = tpu.matmul %165, %167, %cst_195 {dimension_numbers = #tpu.dot_dimension_numbers<[1], [0], [0], [1], [0, 0, 1, 1], [], []>} : vector<56x128xbf16>, vector<128x128xbf16>, vector<56x128xf32> -> vector<56x128xf32>
    %c0_196 = arith.constant 0 : index
    %c0_197 = arith.constant 0 : index
    %169 = vector.load %arg19[%c0_196, %c0_197] : memref<56x128xf32, #tpu.memory_space<vmem>>, vector<56x128xf32>
    %170 = arith.addf %169, %168 : vector<56x128xf32>
    %c0_198 = arith.constant 0 : index
    %c0_199 = arith.constant 0 : index
    %171 = vector.load %arg19[%c0_198, %c0_199] : memref<56x128xf32, #tpu.memory_space<vmem>>, vector<56x128xf32>
    tpu.vector_store %arg19[%c0_198, %c0_199], %170 {strides = array<i32>} : memref<56x128xf32, #tpu.memory_space<vmem>>, vector<56x128xf32>,
    %c14_200 = arith.constant 14 : index
    %c0_201 = arith.constant 0 : index
    %172 = vector.load %arg16[%c14_200, %c0_201] : memref<84x128xbf16, #tpu.memory_space<vmem>>, vector<56x128xbf16>
    %c4_202 = arith.constant 4 : index
    %c0_203 = arith.constant 0 : index
    %c0_204 = arith.constant 0 : index
    %173 = vector.load %arg7[%c4_202, %c0_203, %c0_204] : memref<9x128x128xbf16, #tpu.memory_space<vmem>>, vector<1x128x128xbf16>
    %174 = vector.shape_cast %173 : vector<1x128x128xbf16> to vector<128x128xbf16>
    %cst_205 = arith.constant dense<0.000000e+00> : vector<56x128xf32>
    %175 = tpu.matmul %172, %174, %cst_205 {dimension_numbers = #tpu.dot_dimension_numbers<[1], [0], [0], [1], [0, 0, 1, 1], [], []>} : vector<56x128xbf16>, vector<128x128xbf16>, vector<56x128xf32> -> vector<56x128xf32>
    %c0_206 = arith.constant 0 : index
    %c0_207 = arith.constant 0 : index
    %176 = vector.load %arg19[%c0_206, %c0_207] : memref<56x128xf32, #tpu.memory_space<vmem>>, vector<54x128xf32>
    %177 = vector.extract_strided_slice %175 {offsets = [2, 0], sizes = [54, 128], strides = [1, 1]} : vector<56x128xf32> to vector<54x128xf32>
    %178 = arith.addf %176, %177 : vector<54x128xf32>
    %c0_208 = arith.constant 0 : index
    %c0_209 = arith.constant 0 : index
    %179 = vector.load %arg19[%c0_208, %c0_209] : memref<56x128xf32, #tpu.memory_space<vmem>>, vector<54x128xf32>
    tpu.vector_store %arg19[%c0_208, %c0_209], %178 {strides = array<i32>} : memref<56x128xf32, #tpu.memory_space<vmem>>, vector<54x128xf32>,
    %c14_210 = arith.constant 14 : index
    %c0_211 = arith.constant 0 : index
    %180 = vector.load %arg16[%c14_210, %c0_211] : memref<84x128xbf16, #tpu.memory_space<vmem>>, vector<56x128xbf16>
    %c5_212 = arith.constant 5 : index
    %c0_213 = arith.constant 0 : index
    %c0_214 = arith.constant 0 : index
    %181 = vector.load %arg7[%c5_212, %c0_213, %c0_214] : memref<9x128x128xbf16, #tpu.memory_space<vmem>>, vector<1x128x128xbf16>
    %182 = vector.shape_cast %181 : vector<1x128x128xbf16> to vector<128x128xbf16>
    %cst_215 = arith.constant dense<0.000000e+00> : vector<56x128xf32>
    %183 = tpu.matmul %180, %182, %cst_215 {dimension_numbers = #tpu.dot_dimension_numbers<[1], [0], [0], [1], [0, 0, 1, 1], [], []>} : vector<56x128xbf16>, vector<128x128xbf16>, vector<56x128xf32> -> vector<56x128xf32>
    %c0_216 = arith.constant 0 : index
    %c0_217 = arith.constant 0 : index
    %184 = vector.load %arg19[%c0_216, %c0_217] : memref<56x128xf32, #tpu.memory_space<vmem>>, vector<52x128xf32>
    %185 = vector.extract_strided_slice %183 {offsets = [4, 0], sizes = [52, 128], strides = [1, 1]} : vector<56x128xf32> to vector<52x128xf32>
    %186 = arith.addf %184, %185 : vector<52x128xf32>
    %c0_218 = arith.constant 0 : index
    %c0_219 = arith.constant 0 : index
    %187 = vector.load %arg19[%c0_218, %c0_219] : memref<56x128xf32, #tpu.memory_space<vmem>>, vector<52x128xf32>
    tpu.vector_store %arg19[%c0_218, %c0_219], %186 {strides = array<i32>} : memref<56x128xf32, #tpu.memory_space<vmem>>, vector<52x128xf32>,
    %c28 = arith.constant 28 : index
    %c0_220 = arith.constant 0 : index
    %188 = vector.load %arg16[%c28, %c0_220] : memref<84x128xbf16, #tpu.memory_space<vmem>>, vector<56x128xbf16>
    %c6_221 = arith.constant 6 : index
    %c0_222 = arith.constant 0 : index
    %c0_223 = arith.constant 0 : index
    %189 = vector.load %arg7[%c6_221, %c0_222, %c0_223] : memref<9x128x128xbf16, #tpu.memory_space<vmem>>, vector<1x128x128xbf16>
    %190 = vector.shape_cast %189 : vector<1x128x128xbf16> to vector<128x128xbf16>
    %cst_224 = arith.constant dense<0.000000e+00> : vector<56x128xf32>
    %191 = tpu.matmul %188, %190, %cst_224 {dimension_numbers = #tpu.dot_dimension_numbers<[1], [0], [0], [1], [0, 0, 1, 1], [], []>} : vector<56x128xbf16>, vector<128x128xbf16>, vector<56x128xf32> -> vector<56x128xf32>
    %c0_225 = arith.constant 0 : index
    %c0_226 = arith.constant 0 : index
    %192 = vector.load %arg19[%c0_225, %c0_226] : memref<56x128xf32, #tpu.memory_space<vmem>>, vector<56x128xf32>
    %193 = arith.addf %192, %191 : vector<56x128xf32>
    %c0_227 = arith.constant 0 : index
    %c0_228 = arith.constant 0 : index
    %194 = vector.load %arg19[%c0_227, %c0_228] : memref<56x128xf32, #tpu.memory_space<vmem>>, vector<56x128xf32>
    tpu.vector_store %arg19[%c0_227, %c0_228], %193 {strides = array<i32>} : memref<56x128xf32, #tpu.memory_space<vmem>>, vector<56x128xf32>,
    %c28_229 = arith.constant 28 : index
    %c0_230 = arith.constant 0 : index
    %195 = vector.load %arg16[%c28_229, %c0_230] : memref<84x128xbf16, #tpu.memory_space<vmem>>, vector<56x128xbf16>
    %c7_231 = arith.constant 7 : index
    %c0_232 = arith.constant 0 : index
    %c0_233 = arith.constant 0 : index
    %196 = vector.load %arg7[%c7_231, %c0_232, %c0_233] : memref<9x128x128xbf16, #tpu.memory_space<vmem>>, vector<1x128x128xbf16>
    %197 = vector.shape_cast %196 : vector<1x128x128xbf16> to vector<128x128xbf16>
    %cst_234 = arith.constant dense<0.000000e+00> : vector<56x128xf32>
    %198 = tpu.matmul %195, %197, %cst_234 {dimension_numbers = #tpu.dot_dimension_numbers<[1], [0], [0], [1], [0, 0, 1, 1], [], []>} : vector<56x128xbf16>, vector<128x128xbf16>, vector<56x128xf32> -> vector<56x128xf32>
    %c0_235 = arith.constant 0 : index
    %c0_236 = arith.constant 0 : index
    %199 = vector.load %arg19[%c0_235, %c0_236] : memref<56x128xf32, #tpu.memory_space<vmem>>, vector<54x128xf32>
    %200 = vector.extract_strided_slice %198 {offsets = [2, 0], sizes = [54, 128], strides = [1, 1]} : vector<56x128xf32> to vector<54x128xf32>
    %201 = arith.addf %199, %200 : vector<54x128xf32>
    %c0_237 = arith.constant 0 : index
    %c0_238 = arith.constant 0 : index
    %202 = vector.load %arg19[%c0_237, %c0_238] : memref<56x128xf32, #tpu.memory_space<vmem>>, vector<54x128xf32>
    tpu.vector_store %arg19[%c0_237, %c0_238], %201 {strides = array<i32>} : memref<56x128xf32, #tpu.memory_space<vmem>>, vector<54x128xf32>,
    %c28_239 = arith.constant 28 : index
    %c0_240 = arith.constant 0 : index
    %203 = vector.load %arg16[%c28_239, %c0_240] : memref<84x128xbf16, #tpu.memory_space<vmem>>, vector<56x128xbf16>
    %c8_241 = arith.constant 8 : index
    %c0_242 = arith.constant 0 : index
    %c0_243 = arith.constant 0 : index
    %204 = vector.load %arg7[%c8_241, %c0_242, %c0_243] : memref<9x128x128xbf16, #tpu.memory_space<vmem>>, vector<1x128x128xbf16>
    %205 = vector.shape_cast %204 : vector<1x128x128xbf16> to vector<128x128xbf16>
    %cst_244 = arith.constant dense<0.000000e+00> : vector<56x128xf32>
    %206 = tpu.matmul %203, %205, %cst_244 {dimension_numbers = #tpu.dot_dimension_numbers<[1], [0], [0], [1], [0, 0, 1, 1], [], []>} : vector<56x128xbf16>, vector<128x128xbf16>, vector<56x128xf32> -> vector<56x128xf32>
    %c0_245 = arith.constant 0 : index
    %c0_246 = arith.constant 0 : index
    %207 = vector.load %arg19[%c0_245, %c0_246] : memref<56x128xf32, #tpu.memory_space<vmem>>, vector<52x128xf32>
    %208 = vector.extract_strided_slice %206 {offsets = [4, 0], sizes = [52, 128], strides = [1, 1]} : vector<56x128xf32> to vector<52x128xf32>
    %209 = arith.addf %207, %208 : vector<52x128xf32>
    %c0_247 = arith.constant 0 : index
    %c0_248 = arith.constant 0 : index
    %210 = vector.load %arg19[%c0_247, %c0_248] : memref<56x128xf32, #tpu.memory_space<vmem>>, vector<52x128xf32>
    tpu.vector_store %arg19[%c0_247, %c0_248], %209 {strides = array<i32>} : memref<56x128xf32, #tpu.memory_space<vmem>>, vector<52x128xf32>,
    %c0_249 = arith.constant 0 : index
    %c0_250 = arith.constant 0 : index
    %211 = vector.load %arg19[%c0_249, %c0_250] : memref<56x128xf32, #tpu.memory_space<vmem>>, vector<56x128xf32>
    %c0_251 = arith.constant 0 : index
    %c0_252 = arith.constant 0 : index
    %212 = vector.load %arg8[%c0_251, %c0_252] : memref<1x128xf32, #tpu.memory_space<vmem>>, vector<1x128xf32>
    %213 = vector.broadcast %212 : vector<1x128xf32> to vector<56x128xf32>
    %214 = arith.addf %211, %213 : vector<56x128xf32>
    %cst_253 = arith.constant 0.000000e+00 : f32
    %215 = vector.broadcast %cst_253 : f32 to vector<56x128xf32>
    %216 = arith.maximumf %214, %215 : vector<56x128xf32>
    %217 = arith.truncf %216 : vector<56x128xf32> to vector<56x128xbf16>
    %c0_254 = arith.constant 0 : index
    %c0_255 = arith.constant 0 : index
    %218 = vector.load %arg17[%c0_254, %c0_255] : memref<56x128xbf16, #tpu.memory_space<vmem>>, vector<56x128xbf16>
    tpu.vector_store %arg17[%c0_254, %c0_255], %217 {strides = array<i32>} : memref<56x128xbf16, #tpu.memory_space<vmem>>, vector<56x128xbf16>,
    %c0_256 = arith.constant 0 : index
    %c0_257 = arith.constant 0 : index
    %219 = vector.load %arg2[%c0_256, %c0_257] : memref<2x128xbf16, #tpu.memory_space<vmem>>, vector<2x128xbf16>
    %c0_258 = arith.constant 0 : index
    %c0_259 = arith.constant 0 : index
    %c0_260 = arith.constant 0 : index
    %220 = vector.load %arg10[%c0_258, %c0_259, %c0_260] : memref<2x128x512xbf16, #tpu.memory_space<vmem>>, vector<1x128x512xbf16>
    %221 = vector.shape_cast %220 : vector<1x128x512xbf16> to vector<128x512xbf16>
    %cst_261 = arith.constant dense<0.000000e+00> : vector<2x512xf32>
    %222 = tpu.matmul %219, %221, %cst_261 {dimension_numbers = #tpu.dot_dimension_numbers<[1], [0], [0], [1], [0, 0, 1, 1], [], []>} : vector<2x128xbf16>, vector<128x512xbf16>, vector<2x512xf32> -> vector<2x512xf32>
    %c0_262 = arith.constant 0 : index
    %c0_263 = arith.constant 0 : index
    %223 = vector.load %arg17[%c0_262, %c0_263] : memref<56x128xbf16, #tpu.memory_space<vmem>>, vector<2x64xbf16>
    %c0_264 = arith.constant 0 : index
    %c0_265 = arith.constant 0 : index
    %c0_266 = arith.constant 0 : index
    %c0_267 = arith.constant 0 : index
    %224 = vector.load %arg9[%c0_264, %c0_265, %c0_266, %c0_267] : memref<2x16x64x512xbf16, #tpu.memory_space<vmem>>, vector<1x1x64x512xbf16>
    %225 = vector.shape_cast %224 : vector<1x1x64x512xbf16> to vector<64x512xbf16>
    %cst_268 = arith.constant dense<0.000000e+00> : vector<2x512xf32>
    %226 = tpu.matmul %223, %225, %cst_268 {dimension_numbers = #tpu.dot_dimension_numbers<[1], [0], [0], [1], [0, 0, 1, 1], [], []>} : vector<2x64xbf16>, vector<64x512xbf16>, vector<2x512xf32> -> vector<2x512xf32>
    %227 = arith.addf %222, %226 : vector<2x512xf32>
    %c2_269 = arith.constant 2 : index
    %c0_270 = arith.constant 0 : index
    %228 = vector.load %arg17[%c2_269, %c0_270] : memref<56x128xbf16, #tpu.memory_space<vmem>>, vector<2x64xbf16>
    %c0_271 = arith.constant 0 : index
    %c1_272 = arith.constant 1 : index
    %c0_273 = arith.constant 0 : index
    %c0_274 = arith.constant 0 : index
    %229 = vector.load %arg9[%c0_271, %c1_272, %c0_273, %c0_274] : memref<2x16x64x512xbf16, #tpu.memory_space<vmem>>, vector<1x1x64x512xbf16>
    %230 = vector.shape_cast %229 : vector<1x1x64x512xbf16> to vector<64x512xbf16>
    %cst_275 = arith.constant dense<0.000000e+00> : vector<2x512xf32>
    %231 = tpu.matmul %228, %230, %cst_275 {dimension_numbers = #tpu.dot_dimension_numbers<[1], [0], [0], [1], [0, 0, 1, 1], [], []>} : vector<2x64xbf16>, vector<64x512xbf16>, vector<2x512xf32> -> vector<2x512xf32>
    %232 = arith.addf %227, %231 : vector<2x512xf32>
    %c4_276 = arith.constant 4 : index
    %c0_277 = arith.constant 0 : index
    %233 = vector.load %arg17[%c4_276, %c0_277] : memref<56x128xbf16, #tpu.memory_space<vmem>>, vector<2x64xbf16>
    %c0_278 = arith.constant 0 : index
    %c2_279 = arith.constant 2 : index
    %c0_280 = arith.constant 0 : index
    %c0_281 = arith.constant 0 : index
    %234 = vector.load %arg9[%c0_278, %c2_279, %c0_280, %c0_281] : memref<2x16x64x512xbf16, #tpu.memory_space<vmem>>, vector<1x1x64x512xbf16>
    %235 = vector.shape_cast %234 : vector<1x1x64x512xbf16> to vector<64x512xbf16>
    %cst_282 = arith.constant dense<0.000000e+00> : vector<2x512xf32>
    %236 = tpu.matmul %233, %235, %cst_282 {dimension_numbers = #tpu.dot_dimension_numbers<[1], [0], [0], [1], [0, 0, 1, 1], [], []>} : vector<2x64xbf16>, vector<64x512xbf16>, vector<2x512xf32> -> vector<2x512xf32>
    %237 = arith.addf %232, %236 : vector<2x512xf32>
    %c6_283 = arith.constant 6 : index
    %c0_284 = arith.constant 0 : index
    %238 = vector.load %arg17[%c6_283, %c0_284] : memref<56x128xbf16, #tpu.memory_space<vmem>>, vector<2x64xbf16>
    %c0_285 = arith.constant 0 : index
    %c3_286 = arith.constant 3 : index
    %c0_287 = arith.constant 0 : index
    %c0_288 = arith.constant 0 : index
    %239 = vector.load %arg9[%c0_285, %c3_286, %c0_287, %c0_288] : memref<2x16x64x512xbf16, #tpu.memory_space<vmem>>, vector<1x1x64x512xbf16>
    %240 = vector.shape_cast %239 : vector<1x1x64x512xbf16> to vector<64x512xbf16>
    %cst_289 = arith.constant dense<0.000000e+00> : vector<2x512xf32>
    %241 = tpu.matmul %238, %240, %cst_289 {dimension_numbers = #tpu.dot_dimension_numbers<[1], [0], [0], [1], [0, 0, 1, 1], [], []>} : vector<2x64xbf16>, vector<64x512xbf16>, vector<2x512xf32> -> vector<2x512xf32>
    %242 = arith.addf %237, %241 : vector<2x512xf32>
    %c14_290 = arith.constant 14 : index
    %c0_291 = arith.constant 0 : index
    %243 = vector.load %arg17[%c14_290, %c0_291] : memref<56x128xbf16, #tpu.memory_space<vmem>>, vector<2x64xbf16>
    %c0_292 = arith.constant 0 : index
    %c4_293 = arith.constant 4 : index
    %c0_294 = arith.constant 0 : index
    %c0_295 = arith.constant 0 : index
    %244 = vector.load %arg9[%c0_292, %c4_293, %c0_294, %c0_295] : memref<2x16x64x512xbf16, #tpu.memory_space<vmem>>, vector<1x1x64x512xbf16>
    %245 = vector.shape_cast %244 : vector<1x1x64x512xbf16> to vector<64x512xbf16>
    %cst_296 = arith.constant dense<0.000000e+00> : vector<2x512xf32>
    %246 = tpu.matmul %243, %245, %cst_296 {dimension_numbers = #tpu.dot_dimension_numbers<[1], [0], [0], [1], [0, 0, 1, 1], [], []>} : vector<2x64xbf16>, vector<64x512xbf16>, vector<2x512xf32> -> vector<2x512xf32>
    %247 = arith.addf %242, %246 : vector<2x512xf32>
    %c16 = arith.constant 16 : index
    %c0_297 = arith.constant 0 : index
    %248 = vector.load %arg17[%c16, %c0_297] : memref<56x128xbf16, #tpu.memory_space<vmem>>, vector<2x64xbf16>
    %c0_298 = arith.constant 0 : index
    %c5_299 = arith.constant 5 : index
    %c0_300 = arith.constant 0 : index
    %c0_301 = arith.constant 0 : index
    %249 = vector.load %arg9[%c0_298, %c5_299, %c0_300, %c0_301] : memref<2x16x64x512xbf16, #tpu.memory_space<vmem>>, vector<1x1x64x512xbf16>
    %250 = vector.shape_cast %249 : vector<1x1x64x512xbf16> to vector<64x512xbf16>
    %cst_302 = arith.constant dense<0.000000e+00> : vector<2x512xf32>
    %251 = tpu.matmul %248, %250, %cst_302 {dimension_numbers = #tpu.dot_dimension_numbers<[1], [0], [0], [1], [0, 0, 1, 1], [], []>} : vector<2x64xbf16>, vector<64x512xbf16>, vector<2x512xf32> -> vector<2x512xf32>
    %252 = arith.addf %247, %251 : vector<2x512xf32>
    %c18 = arith.constant 18 : index
    %c0_303 = arith.constant 0 : index
    %253 = vector.load %arg17[%c18, %c0_303] : memref<56x128xbf16, #tpu.memory_space<vmem>>, vector<2x64xbf16>
    %c0_304 = arith.constant 0 : index
    %c6_305 = arith.constant 6 : index
    %c0_306 = arith.constant 0 : index
    %c0_307 = arith.constant 0 : index
    %254 = vector.load %arg9[%c0_304, %c6_305, %c0_306, %c0_307] : memref<2x16x64x512xbf16, #tpu.memory_space<vmem>>, vector<1x1x64x512xbf16>
    %255 = vector.shape_cast %254 : vector<1x1x64x512xbf16> to vector<64x512xbf16>
    %cst_308 = arith.constant dense<0.000000e+00> : vector<2x512xf32>
    %256 = tpu.matmul %253, %255, %cst_308 {dimension_numbers = #tpu.dot_dimension_numbers<[1], [0], [0], [1], [0, 0, 1, 1], [], []>} : vector<2x64xbf16>, vector<64x512xbf16>, vector<2x512xf32> -> vector<2x512xf32>
    %257 = arith.addf %252, %256 : vector<2x512xf32>
    %c20 = arith.constant 20 : index
    %c0_309 = arith.constant 0 : index
    %258 = vector.load %arg17[%c20, %c0_309] : memref<56x128xbf16, #tpu.memory_space<vmem>>, vector<2x64xbf16>
    %c0_310 = arith.constant 0 : index
    %c7_311 = arith.constant 7 : index
    %c0_312 = arith.constant 0 : index
    %c0_313 = arith.constant 0 : index
    %259 = vector.load %arg9[%c0_310, %c7_311, %c0_312, %c0_313] : memref<2x16x64x512xbf16, #tpu.memory_space<vmem>>, vector<1x1x64x512xbf16>
    %260 = vector.shape_cast %259 : vector<1x1x64x512xbf16> to vector<64x512xbf16>
    %cst_314 = arith.constant dense<0.000000e+00> : vector<2x512xf32>
    %261 = tpu.matmul %258, %260, %cst_314 {dimension_numbers = #tpu.dot_dimension_numbers<[1], [0], [0], [1], [0, 0, 1, 1], [], []>} : vector<2x64xbf16>, vector<64x512xbf16>, vector<2x512xf32> -> vector<2x512xf32>
    %262 = arith.addf %257, %261 : vector<2x512xf32>
    %c28_315 = arith.constant 28 : index
    %c0_316 = arith.constant 0 : index
    %263 = vector.load %arg17[%c28_315, %c0_316] : memref<56x128xbf16, #tpu.memory_space<vmem>>, vector<2x64xbf16>
    %c0_317 = arith.constant 0 : index
    %c8_318 = arith.constant 8 : index
    %c0_319 = arith.constant 0 : index
    %c0_320 = arith.constant 0 : index
    %264 = vector.load %arg9[%c0_317, %c8_318, %c0_319, %c0_320] : memref<2x16x64x512xbf16, #tpu.memory_space<vmem>>, vector<1x1x64x512xbf16>
    %265 = vector.shape_cast %264 : vector<1x1x64x512xbf16> to vector<64x512xbf16>
    %cst_321 = arith.constant dense<0.000000e+00> : vector<2x512xf32>
    %266 = tpu.matmul %263, %265, %cst_321 {dimension_numbers = #tpu.dot_dimension_numbers<[1], [0], [0], [1], [0, 0, 1, 1], [], []>} : vector<2x64xbf16>, vector<64x512xbf16>, vector<2x512xf32> -> vector<2x512xf32>
    %267 = arith.addf %262, %266 : vector<2x512xf32>
    %c30 = arith.constant 30 : index
    %c0_322 = arith.constant 0 : index
    %268 = vector.load %arg17[%c30, %c0_322] : memref<56x128xbf16, #tpu.memory_space<vmem>>, vector<2x64xbf16>
    %c0_323 = arith.constant 0 : index
    %c9_324 = arith.constant 9 : index
    %c0_325 = arith.constant 0 : index
    %c0_326 = arith.constant 0 : index
    %269 = vector.load %arg9[%c0_323, %c9_324, %c0_325, %c0_326] : memref<2x16x64x512xbf16, #tpu.memory_space<vmem>>, vector<1x1x64x512xbf16>
    %270 = vector.shape_cast %269 : vector<1x1x64x512xbf16> to vector<64x512xbf16>
    %cst_327 = arith.constant dense<0.000000e+00> : vector<2x512xf32>
    %271 = tpu.matmul %268, %270, %cst_327 {dimension_numbers = #tpu.dot_dimension_numbers<[1], [0], [0], [1], [0, 0, 1, 1], [], []>} : vector<2x64xbf16>, vector<64x512xbf16>, vector<2x512xf32> -> vector<2x512xf32>
    %272 = arith.addf %267, %271 : vector<2x512xf32>
    %c32 = arith.constant 32 : index
    %c0_328 = arith.constant 0 : index
    %273 = vector.load %arg17[%c32, %c0_328] : memref<56x128xbf16, #tpu.memory_space<vmem>>, vector<2x64xbf16>
    %c0_329 = arith.constant 0 : index
    %c10_330 = arith.constant 10 : index
    %c0_331 = arith.constant 0 : index
    %c0_332 = arith.constant 0 : index
    %274 = vector.load %arg9[%c0_329, %c10_330, %c0_331, %c0_332] : memref<2x16x64x512xbf16, #tpu.memory_space<vmem>>, vector<1x1x64x512xbf16>
    %275 = vector.shape_cast %274 : vector<1x1x64x512xbf16> to vector<64x512xbf16>
    %cst_333 = arith.constant dense<0.000000e+00> : vector<2x512xf32>
    %276 = tpu.matmul %273, %275, %cst_333 {dimension_numbers = #tpu.dot_dimension_numbers<[1], [0], [0], [1], [0, 0, 1, 1], [], []>} : vector<2x64xbf16>, vector<64x512xbf16>, vector<2x512xf32> -> vector<2x512xf32>
    %277 = arith.addf %272, %276 : vector<2x512xf32>
    %c34 = arith.constant 34 : index
    %c0_334 = arith.constant 0 : index
    %278 = vector.load %arg17[%c34, %c0_334] : memref<56x128xbf16, #tpu.memory_space<vmem>>, vector<2x64xbf16>
    %c0_335 = arith.constant 0 : index
    %c11_336 = arith.constant 11 : index
    %c0_337 = arith.constant 0 : index
    %c0_338 = arith.constant 0 : index
    %279 = vector.load %arg9[%c0_335, %c11_336, %c0_337, %c0_338] : memref<2x16x64x512xbf16, #tpu.memory_space<vmem>>, vector<1x1x64x512xbf16>
    %280 = vector.shape_cast %279 : vector<1x1x64x512xbf16> to vector<64x512xbf16>
    %cst_339 = arith.constant dense<0.000000e+00> : vector<2x512xf32>
    %281 = tpu.matmul %278, %280, %cst_339 {dimension_numbers = #tpu.dot_dimension_numbers<[1], [0], [0], [1], [0, 0, 1, 1], [], []>} : vector<2x64xbf16>, vector<64x512xbf16>, vector<2x512xf32> -> vector<2x512xf32>
    %282 = arith.addf %277, %281 : vector<2x512xf32>
    %c42 = arith.constant 42 : index
    %c0_340 = arith.constant 0 : index
    %283 = vector.load %arg17[%c42, %c0_340] : memref<56x128xbf16, #tpu.memory_space<vmem>>, vector<2x64xbf16>
    %c0_341 = arith.constant 0 : index
    %c12_342 = arith.constant 12 : index
    %c0_343 = arith.constant 0 : index
    %c0_344 = arith.constant 0 : index
    %284 = vector.load %arg9[%c0_341, %c12_342, %c0_343, %c0_344] : memref<2x16x64x512xbf16, #tpu.memory_space<vmem>>, vector<1x1x64x512xbf16>
    %285 = vector.shape_cast %284 : vector<1x1x64x512xbf16> to vector<64x512xbf16>
    %cst_345 = arith.constant dense<0.000000e+00> : vector<2x512xf32>
    %286 = tpu.matmul %283, %285, %cst_345 {dimension_numbers = #tpu.dot_dimension_numbers<[1], [0], [0], [1], [0, 0, 1, 1], [], []>} : vector<2x64xbf16>, vector<64x512xbf16>, vector<2x512xf32> -> vector<2x512xf32>
    %287 = arith.addf %282, %286 : vector<2x512xf32>
    %c44 = arith.constant 44 : index
    %c0_346 = arith.constant 0 : index
    %288 = vector.load %arg17[%c44, %c0_346] : memref<56x128xbf16, #tpu.memory_space<vmem>>, vector<2x64xbf16>
    %c0_347 = arith.constant 0 : index
    %c13_348 = arith.constant 13 : index
    %c0_349 = arith.constant 0 : index
    %c0_350 = arith.constant 0 : index
    %289 = vector.load %arg9[%c0_347, %c13_348, %c0_349, %c0_350] : memref<2x16x64x512xbf16, #tpu.memory_space<vmem>>, vector<1x1x64x512xbf16>
    %290 = vector.shape_cast %289 : vector<1x1x64x512xbf16> to vector<64x512xbf16>
    %cst_351 = arith.constant dense<0.000000e+00> : vector<2x512xf32>
    %291 = tpu.matmul %288, %290, %cst_351 {dimension_numbers = #tpu.dot_dimension_numbers<[1], [0], [0], [1], [0, 0, 1, 1], [], []>} : vector<2x64xbf16>, vector<64x512xbf16>, vector<2x512xf32> -> vector<2x512xf32>
    %292 = arith.addf %287, %291 : vector<2x512xf32>
    %c46 = arith.constant 46 : index
    %c0_352 = arith.constant 0 : index
    %293 = vector.load %arg17[%c46, %c0_352] : memref<56x128xbf16, #tpu.memory_space<vmem>>, vector<2x64xbf16>
    %c0_353 = arith.constant 0 : index
    %c14_354 = arith.constant 14 : index
    %c0_355 = arith.constant 0 : index
    %c0_356 = arith.constant 0 : index
    %294 = vector.load %arg9[%c0_353, %c14_354, %c0_355, %c0_356] : memref<2x16x64x512xbf16, #tpu.memory_space<vmem>>, vector<1x1x64x512xbf16>
    %295 = vector.shape_cast %294 : vector<1x1x64x512xbf16> to vector<64x512xbf16>
    %cst_357 = arith.constant dense<0.000000e+00> : vector<2x512xf32>
    %296 = tpu.matmul %293, %295, %cst_357 {dimension_numbers = #tpu.dot_dimension_numbers<[1], [0], [0], [1], [0, 0, 1, 1], [], []>} : vector<2x64xbf16>, vector<64x512xbf16>, vector<2x512xf32> -> vector<2x512xf32>
    %297 = arith.addf %292, %296 : vector<2x512xf32>
    %c48 = arith.constant 48 : index
    %c0_358 = arith.constant 0 : index
    %298 = vector.load %arg17[%c48, %c0_358] : memref<56x128xbf16, #tpu.memory_space<vmem>>, vector<2x64xbf16>
    %c0_359 = arith.constant 0 : index
    %c15_360 = arith.constant 15 : index
    %c0_361 = arith.constant 0 : index
    %c0_362 = arith.constant 0 : index
    %299 = vector.load %arg9[%c0_359, %c15_360, %c0_361, %c0_362] : memref<2x16x64x512xbf16, #tpu.memory_space<vmem>>, vector<1x1x64x512xbf16>
    %300 = vector.shape_cast %299 : vector<1x1x64x512xbf16> to vector<64x512xbf16>
    %cst_363 = arith.constant dense<0.000000e+00> : vector<2x512xf32>
    %301 = tpu.matmul %298, %300, %cst_363 {dimension_numbers = #tpu.dot_dimension_numbers<[1], [0], [0], [1], [0, 0, 1, 1], [], []>} : vector<2x64xbf16>, vector<64x512xbf16>, vector<2x512xf32> -> vector<2x512xf32>
    %302 = arith.addf %297, %301 : vector<2x512xf32>
    %c0_364 = arith.constant 0 : index
    %c0_365 = arith.constant 0 : index
    %c0_366 = arith.constant 0 : index
    %303 = vector.load %arg11[%c0_364, %c0_365, %c0_366] : memref<2x1x512xf32, #tpu.memory_space<vmem>>, vector<1x1x512xf32>
    %304 = vector.shape_cast %303 : vector<1x1x512xf32> to vector<1x512xf32>
    %305 = vector.broadcast %304 : vector<1x512xf32> to vector<2x512xf32>
    %306 = arith.addf %302, %305 : vector<2x512xf32>
    %cst_367 = arith.constant 0.000000e+00 : f32
    %307 = vector.broadcast %cst_367 : f32 to vector<2x512xf32>
    %308 = arith.maximumf %306, %307 : vector<2x512xf32>
    %309 = arith.truncf %308 : vector<2x512xf32> to vector<2x512xbf16>
    %c0_368 = arith.constant 0 : index
    %c0_369 = arith.constant 0 : index
    %c0_370 = arith.constant 0 : index
    %310 = vector.load %arg12[%c0_368, %c0_369, %c0_370] : memref<2x512x128xbf16, #tpu.memory_space<vmem>>, vector<1x512x128xbf16>
    %311 = vector.shape_cast %310 : vector<1x512x128xbf16> to vector<512x128xbf16>
    %cst_371 = arith.constant dense<0.000000e+00> : vector<2x128xf32>
    %312 = tpu.matmul %309, %311, %cst_371 {dimension_numbers = #tpu.dot_dimension_numbers<[1], [0], [0], [1], [0, 0, 1, 1], [], []>} : vector<2x512xbf16>, vector<512x128xbf16>, vector<2x128xf32> -> vector<2x128xf32>
    %c0_372 = arith.constant 0 : index
    %c0_373 = arith.constant 0 : index
    %c0_374 = arith.constant 0 : index
    %313 = vector.load %arg13[%c0_372, %c0_373, %c0_374] : memref<2x1x128xf32, #tpu.memory_space<vmem>>, vector<1x1x128xf32>
    %314 = vector.shape_cast %313 : vector<1x1x128xf32> to vector<1x128xf32>
    %315 = vector.broadcast %314 : vector<1x128xf32> to vector<2x128xf32>
    %316 = arith.addf %312, %315 : vector<2x128xf32>
    %c0_375 = arith.constant 0 : index
    %c0_376 = arith.constant 0 : index
    %c0_377 = arith.constant 0 : index
    %317 = vector.load %arg14[%c0_375, %c0_376, %c0_377] : memref<2x2x128xf32, #tpu.memory_space<vmem>>, vector<1x2x128xf32>
    %318 = vector.shape_cast %317 : vector<1x2x128xf32> to vector<2x128xf32>
    %319 = vector.shape_cast %316 : vector<2x128xf32> to vector<1x2x128xf32>
    tpu.vector_store %arg14[%c0_375, %c0_376, %c0_377], %319 {strides = array<i32>} : memref<2x2x128xf32, #tpu.memory_space<vmem>>, vector<1x2x128xf32>,
    %c1_378 = arith.constant 1 : index
    %c0_379 = arith.constant 0 : index
    %c0_380 = arith.constant 0 : index
    %320 = vector.load %arg10[%c1_378, %c0_379, %c0_380] : memref<2x128x512xbf16, #tpu.memory_space<vmem>>, vector<1x128x512xbf16>
    %321 = vector.shape_cast %320 : vector<1x128x512xbf16> to vector<128x512xbf16>
    %cst_381 = arith.constant dense<0.000000e+00> : vector<2x512xf32>
    %322 = tpu.matmul %219, %321, %cst_381 {dimension_numbers = #tpu.dot_dimension_numbers<[1], [0], [0], [1], [0, 0, 1, 1], [], []>} : vector<2x128xbf16>, vector<128x512xbf16>, vector<2x512xf32> -> vector<2x512xf32>
    %c0_382 = arith.constant 0 : index
    %c64 = arith.constant 64 : index
    %323 = vector.load %arg17[%c0_382, %c64] : memref<56x128xbf16, #tpu.memory_space<vmem>>, vector<2x64xbf16>
    %c1_383 = arith.constant 1 : index
    %c0_384 = arith.constant 0 : index
    %c0_385 = arith.constant 0 : index
    %c0_386 = arith.constant 0 : index
    %324 = vector.load %arg9[%c1_383, %c0_384, %c0_385, %c0_386] : memref<2x16x64x512xbf16, #tpu.memory_space<vmem>>, vector<1x1x64x512xbf16>
    %325 = vector.shape_cast %324 : vector<1x1x64x512xbf16> to vector<64x512xbf16>
    %cst_387 = arith.constant dense<0.000000e+00> : vector<2x512xf32>
    %326 = tpu.matmul %323, %325, %cst_387 {dimension_numbers = #tpu.dot_dimension_numbers<[1], [0], [0], [1], [0, 0, 1, 1], [], []>} : vector<2x64xbf16>, vector<64x512xbf16>, vector<2x512xf32> -> vector<2x512xf32>
    %327 = arith.addf %322, %326 : vector<2x512xf32>
    %c2_388 = arith.constant 2 : index
    %c64_389 = arith.constant 64 : index
    %328 = vector.load %arg17[%c2_388, %c64_389] : memref<56x128xbf16, #tpu.memory_space<vmem>>, vector<2x64xbf16>
    %c1_390 = arith.constant 1 : index
    %c1_391 = arith.constant 1 : index
    %c0_392 = arith.constant 0 : index
    %c0_393 = arith.constant 0 : index
    %329 = vector.load %arg9[%c1_390, %c1_391, %c0_392, %c0_393] : memref<2x16x64x512xbf16, #tpu.memory_space<vmem>>, vector<1x1x64x512xbf16>
    %330 = vector.shape_cast %329 : vector<1x1x64x512xbf16> to vector<64x512xbf16>
    %cst_394 = arith.constant dense<0.000000e+00> : vector<2x512xf32>
    %331 = tpu.matmul %328, %330, %cst_394 {dimension_numbers = #tpu.dot_dimension_numbers<[1], [0], [0], [1], [0, 0, 1, 1], [], []>} : vector<2x64xbf16>, vector<64x512xbf16>, vector<2x512xf32> -> vector<2x512xf32>
    %332 = arith.addf %327, %331 : vector<2x512xf32>
    %c4_395 = arith.constant 4 : index
    %c64_396 = arith.constant 64 : index
    %333 = vector.load %arg17[%c4_395, %c64_396] : memref<56x128xbf16, #tpu.memory_space<vmem>>, vector<2x64xbf16>
    %c1_397 = arith.constant 1 : index
    %c2_398 = arith.constant 2 : index
    %c0_399 = arith.constant 0 : index
    %c0_400 = arith.constant 0 : index
    %334 = vector.load %arg9[%c1_397, %c2_398, %c0_399, %c0_400] : memref<2x16x64x512xbf16, #tpu.memory_space<vmem>>, vector<1x1x64x512xbf16>
    %335 = vector.shape_cast %334 : vector<1x1x64x512xbf16> to vector<64x512xbf16>
    %cst_401 = arith.constant dense<0.000000e+00> : vector<2x512xf32>
    %336 = tpu.matmul %333, %335, %cst_401 {dimension_numbers = #tpu.dot_dimension_numbers<[1], [0], [0], [1], [0, 0, 1, 1], [], []>} : vector<2x64xbf16>, vector<64x512xbf16>, vector<2x512xf32> -> vector<2x512xf32>
    %337 = arith.addf %332, %336 : vector<2x512xf32>
    %c6_402 = arith.constant 6 : index
    %c64_403 = arith.constant 64 : index
    %338 = vector.load %arg17[%c6_402, %c64_403] : memref<56x128xbf16, #tpu.memory_space<vmem>>, vector<2x64xbf16>
    %c1_404 = arith.constant 1 : index
    %c3_405 = arith.constant 3 : index
    %c0_406 = arith.constant 0 : index
    %c0_407 = arith.constant 0 : index
    %339 = vector.load %arg9[%c1_404, %c3_405, %c0_406, %c0_407] : memref<2x16x64x512xbf16, #tpu.memory_space<vmem>>, vector<1x1x64x512xbf16>
    %340 = vector.shape_cast %339 : vector<1x1x64x512xbf16> to vector<64x512xbf16>
    %cst_408 = arith.constant dense<0.000000e+00> : vector<2x512xf32>
    %341 = tpu.matmul %338, %340, %cst_408 {dimension_numbers = #tpu.dot_dimension_numbers<[1], [0], [0], [1], [0, 0, 1, 1], [], []>} : vector<2x64xbf16>, vector<64x512xbf16>, vector<2x512xf32> -> vector<2x512xf32>
    %342 = arith.addf %337, %341 : vector<2x512xf32>
    %c14_409 = arith.constant 14 : index
    %c64_410 = arith.constant 64 : index
    %343 = vector.load %arg17[%c14_409, %c64_410] : memref<56x128xbf16, #tpu.memory_space<vmem>>, vector<2x64xbf16>
    %c1_411 = arith.constant 1 : index
    %c4_412 = arith.constant 4 : index
    %c0_413 = arith.constant 0 : index
    %c0_414 = arith.constant 0 : index
    %344 = vector.load %arg9[%c1_411, %c4_412, %c0_413, %c0_414] : memref<2x16x64x512xbf16, #tpu.memory_space<vmem>>, vector<1x1x64x512xbf16>
    %345 = vector.shape_cast %344 : vector<1x1x64x512xbf16> to vector<64x512xbf16>
    %cst_415 = arith.constant dense<0.000000e+00> : vector<2x512xf32>
    %346 = tpu.matmul %343, %345, %cst_415 {dimension_numbers = #tpu.dot_dimension_numbers<[1], [0], [0], [1], [0, 0, 1, 1], [], []>} : vector<2x64xbf16>, vector<64x512xbf16>, vector<2x512xf32> -> vector<2x512xf32>
    %347 = arith.addf %342, %346 : vector<2x512xf32>
    %c16_416 = arith.constant 16 : index
    %c64_417 = arith.constant 64 : index
    %348 = vector.load %arg17[%c16_416, %c64_417] : memref<56x128xbf16, #tpu.memory_space<vmem>>, vector<2x64xbf16>
    %c1_418 = arith.constant 1 : index
    %c5_419 = arith.constant 5 : index
    %c0_420 = arith.constant 0 : index
    %c0_421 = arith.constant 0 : index
    %349 = vector.load %arg9[%c1_418, %c5_419, %c0_420, %c0_421] : memref<2x16x64x512xbf16, #tpu.memory_space<vmem>>, vector<1x1x64x512xbf16>
    %350 = vector.shape_cast %349 : vector<1x1x64x512xbf16> to vector<64x512xbf16>
    %cst_422 = arith.constant dense<0.000000e+00> : vector<2x512xf32>
    %351 = tpu.matmul %348, %350, %cst_422 {dimension_numbers = #tpu.dot_dimension_numbers<[1], [0], [0], [1], [0, 0, 1, 1], [], []>} : vector<2x64xbf16>, vector<64x512xbf16>, vector<2x512xf32> -> vector<2x512xf32>
    %352 = arith.addf %347, %351 : vector<2x512xf32>
    %c18_423 = arith.constant 18 : index
    %c64_424 = arith.constant 64 : index
    %353 = vector.load %arg17[%c18_423, %c64_424] : memref<56x128xbf16, #tpu.memory_space<vmem>>, vector<2x64xbf16>
    %c1_425 = arith.constant 1 : index
    %c6_426 = arith.constant 6 : index
    %c0_427 = arith.constant 0 : index
    %c0_428 = arith.constant 0 : index
    %354 = vector.load %arg9[%c1_425, %c6_426, %c0_427, %c0_428] : memref<2x16x64x512xbf16, #tpu.memory_space<vmem>>, vector<1x1x64x512xbf16>
    %355 = vector.shape_cast %354 : vector<1x1x64x512xbf16> to vector<64x512xbf16>
    %cst_429 = arith.constant dense<0.000000e+00> : vector<2x512xf32>
    %356 = tpu.matmul %353, %355, %cst_429 {dimension_numbers = #tpu.dot_dimension_numbers<[1], [0], [0], [1], [0, 0, 1, 1], [], []>} : vector<2x64xbf16>, vector<64x512xbf16>, vector<2x512xf32> -> vector<2x512xf32>
    %357 = arith.addf %352, %356 : vector<2x512xf32>
    %c20_430 = arith.constant 20 : index
    %c64_431 = arith.constant 64 : index
    %358 = vector.load %arg17[%c20_430, %c64_431] : memref<56x128xbf16, #tpu.memory_space<vmem>>, vector<2x64xbf16>
    %c1_432 = arith.constant 1 : index
    %c7_433 = arith.constant 7 : index
    %c0_434 = arith.constant 0 : index
    %c0_435 = arith.constant 0 : index
    %359 = vector.load %arg9[%c1_432, %c7_433, %c0_434, %c0_435] : memref<2x16x64x512xbf16, #tpu.memory_space<vmem>>, vector<1x1x64x512xbf16>
    %360 = vector.shape_cast %359 : vector<1x1x64x512xbf16> to vector<64x512xbf16>
    %cst_436 = arith.constant dense<0.000000e+00> : vector<2x512xf32>
    %361 = tpu.matmul %358, %360, %cst_436 {dimension_numbers = #tpu.dot_dimension_numbers<[1], [0], [0], [1], [0, 0, 1, 1], [], []>} : vector<2x64xbf16>, vector<64x512xbf16>, vector<2x512xf32> -> vector<2x512xf32>
    %362 = arith.addf %357, %361 : vector<2x512xf32>
    %c28_437 = arith.constant 28 : index
    %c64_438 = arith.constant 64 : index
    %363 = vector.load %arg17[%c28_437, %c64_438] : memref<56x128xbf16, #tpu.memory_space<vmem>>, vector<2x64xbf16>
    %c1_439 = arith.constant 1 : index
    %c8_440 = arith.constant 8 : index
    %c0_441 = arith.constant 0 : index
    %c0_442 = arith.constant 0 : index
    %364 = vector.load %arg9[%c1_439, %c8_440, %c0_441, %c0_442] : memref<2x16x64x512xbf16, #tpu.memory_space<vmem>>, vector<1x1x64x512xbf16>
    %365 = vector.shape_cast %364 : vector<1x1x64x512xbf16> to vector<64x512xbf16>
    %cst_443 = arith.constant dense<0.000000e+00> : vector<2x512xf32>
    %366 = tpu.matmul %363, %365, %cst_443 {dimension_numbers = #tpu.dot_dimension_numbers<[1], [0], [0], [1], [0, 0, 1, 1], [], []>} : vector<2x64xbf16>, vector<64x512xbf16>, vector<2x512xf32> -> vector<2x512xf32>
    %367 = arith.addf %362, %366 : vector<2x512xf32>
    %c30_444 = arith.constant 30 : index
    %c64_445 = arith.constant 64 : index
    %368 = vector.load %arg17[%c30_444, %c64_445] : memref<56x128xbf16, #tpu.memory_space<vmem>>, vector<2x64xbf16>
    %c1_446 = arith.constant 1 : index
    %c9_447 = arith.constant 9 : index
    %c0_448 = arith.constant 0 : index
    %c0_449 = arith.constant 0 : index
    %369 = vector.load %arg9[%c1_446, %c9_447, %c0_448, %c0_449] : memref<2x16x64x512xbf16, #tpu.memory_space<vmem>>, vector<1x1x64x512xbf16>
    %370 = vector.shape_cast %369 : vector<1x1x64x512xbf16> to vector<64x512xbf16>
    %cst_450 = arith.constant dense<0.000000e+00> : vector<2x512xf32>
    %371 = tpu.matmul %368, %370, %cst_450 {dimension_numbers = #tpu.dot_dimension_numbers<[1], [0], [0], [1], [0, 0, 1, 1], [], []>} : vector<2x64xbf16>, vector<64x512xbf16>, vector<2x512xf32> -> vector<2x512xf32>
    %372 = arith.addf %367, %371 : vector<2x512xf32>
    %c32_451 = arith.constant 32 : index
    %c64_452 = arith.constant 64 : index
    %373 = vector.load %arg17[%c32_451, %c64_452] : memref<56x128xbf16, #tpu.memory_space<vmem>>, vector<2x64xbf16>
    %c1_453 = arith.constant 1 : index
    %c10_454 = arith.constant 10 : index
    %c0_455 = arith.constant 0 : index
    %c0_456 = arith.constant 0 : index
    %374 = vector.load %arg9[%c1_453, %c10_454, %c0_455, %c0_456] : memref<2x16x64x512xbf16, #tpu.memory_space<vmem>>, vector<1x1x64x512xbf16>
    %375 = vector.shape_cast %374 : vector<1x1x64x512xbf16> to vector<64x512xbf16>
    %cst_457 = arith.constant dense<0.000000e+00> : vector<2x512xf32>
    %376 = tpu.matmul %373, %375, %cst_457 {dimension_numbers = #tpu.dot_dimension_numbers<[1], [0], [0], [1], [0, 0, 1, 1], [], []>} : vector<2x64xbf16>, vector<64x512xbf16>, vector<2x512xf32> -> vector<2x512xf32>
    %377 = arith.addf %372, %376 : vector<2x512xf32>
    %c34_458 = arith.constant 34 : index
    %c64_459 = arith.constant 64 : index
    %378 = vector.load %arg17[%c34_458, %c64_459] : memref<56x128xbf16, #tpu.memory_space<vmem>>, vector<2x64xbf16>
    %c1_460 = arith.constant 1 : index
    %c11_461 = arith.constant 11 : index
    %c0_462 = arith.constant 0 : index
    %c0_463 = arith.constant 0 : index
    %379 = vector.load %arg9[%c1_460, %c11_461, %c0_462, %c0_463] : memref<2x16x64x512xbf16, #tpu.memory_space<vmem>>, vector<1x1x64x512xbf16>
    %380 = vector.shape_cast %379 : vector<1x1x64x512xbf16> to vector<64x512xbf16>
    %cst_464 = arith.constant dense<0.000000e+00> : vector<2x512xf32>
    %381 = tpu.matmul %378, %380, %cst_464 {dimension_numbers = #tpu.dot_dimension_numbers<[1], [0], [0], [1], [0, 0, 1, 1], [], []>} : vector<2x64xbf16>, vector<64x512xbf16>, vector<2x512xf32> -> vector<2x512xf32>
    %382 = arith.addf %377, %381 : vector<2x512xf32>
    %c42_465 = arith.constant 42 : index
    %c64_466 = arith.constant 64 : index
    %383 = vector.load %arg17[%c42_465, %c64_466] : memref<56x128xbf16, #tpu.memory_space<vmem>>, vector<2x64xbf16>
    %c1_467 = arith.constant 1 : index
    %c12_468 = arith.constant 12 : index
    %c0_469 = arith.constant 0 : index
    %c0_470 = arith.constant 0 : index
    %384 = vector.load %arg9[%c1_467, %c12_468, %c0_469, %c0_470] : memref<2x16x64x512xbf16, #tpu.memory_space<vmem>>, vector<1x1x64x512xbf16>
    %385 = vector.shape_cast %384 : vector<1x1x64x512xbf16> to vector<64x512xbf16>
    %cst_471 = arith.constant dense<0.000000e+00> : vector<2x512xf32>
    %386 = tpu.matmul %383, %385, %cst_471 {dimension_numbers = #tpu.dot_dimension_numbers<[1], [0], [0], [1], [0, 0, 1, 1], [], []>} : vector<2x64xbf16>, vector<64x512xbf16>, vector<2x512xf32> -> vector<2x512xf32>
    %387 = arith.addf %382, %386 : vector<2x512xf32>
    %c44_472 = arith.constant 44 : index
    %c64_473 = arith.constant 64 : index
    %388 = vector.load %arg17[%c44_472, %c64_473] : memref<56x128xbf16, #tpu.memory_space<vmem>>, vector<2x64xbf16>
    %c1_474 = arith.constant 1 : index
    %c13_475 = arith.constant 13 : index
    %c0_476 = arith.constant 0 : index
    %c0_477 = arith.constant 0 : index
    %389 = vector.load %arg9[%c1_474, %c13_475, %c0_476, %c0_477] : memref<2x16x64x512xbf16, #tpu.memory_space<vmem>>, vector<1x1x64x512xbf16>
    %390 = vector.shape_cast %389 : vector<1x1x64x512xbf16> to vector<64x512xbf16>
    %cst_478 = arith.constant dense<0.000000e+00> : vector<2x512xf32>
    %391 = tpu.matmul %388, %390, %cst_478 {dimension_numbers = #tpu.dot_dimension_numbers<[1], [0], [0], [1], [0, 0, 1, 1], [], []>} : vector<2x64xbf16>, vector<64x512xbf16>, vector<2x512xf32> -> vector<2x512xf32>
    %392 = arith.addf %387, %391 : vector<2x512xf32>
    %c46_479 = arith.constant 46 : index
    %c64_480 = arith.constant 64 : index
    %393 = vector.load %arg17[%c46_479, %c64_480] : memref<56x128xbf16, #tpu.memory_space<vmem>>, vector<2x64xbf16>
    %c1_481 = arith.constant 1 : index
    %c14_482 = arith.constant 14 : index
    %c0_483 = arith.constant 0 : index
    %c0_484 = arith.constant 0 : index
    %394 = vector.load %arg9[%c1_481, %c14_482, %c0_483, %c0_484] : memref<2x16x64x512xbf16, #tpu.memory_space<vmem>>, vector<1x1x64x512xbf16>
    %395 = vector.shape_cast %394 : vector<1x1x64x512xbf16> to vector<64x512xbf16>
    %cst_485 = arith.constant dense<0.000000e+00> : vector<2x512xf32>
    %396 = tpu.matmul %393, %395, %cst_485 {dimension_numbers = #tpu.dot_dimension_numbers<[1], [0], [0], [1], [0, 0, 1, 1], [], []>} : vector<2x64xbf16>, vector<64x512xbf16>, vector<2x512xf32> -> vector<2x512xf32>
    %397 = arith.addf %392, %396 : vector<2x512xf32>
    %c48_486 = arith.constant 48 : index
    %c64_487 = arith.constant 64 : index
    %398 = vector.load %arg17[%c48_486, %c64_487] : memref<56x128xbf16, #tpu.memory_space<vmem>>, vector<2x64xbf16>
    %c1_488 = arith.constant 1 : index
    %c15_489 = arith.constant 15 : index
    %c0_490 = arith.constant 0 : index
    %c0_491 = arith.constant 0 : index
    %399 = vector.load %arg9[%c1_488, %c15_489, %c0_490, %c0_491] : memref<2x16x64x512xbf16, #tpu.memory_space<vmem>>, vector<1x1x64x512xbf16>
    %400 = vector.shape_cast %399 : vector<1x1x64x512xbf16> to vector<64x512xbf16>
    %cst_492 = arith.constant dense<0.000000e+00> : vector<2x512xf32>
    %401 = tpu.matmul %398, %400, %cst_492 {dimension_numbers = #tpu.dot_dimension_numbers<[1], [0], [0], [1], [0, 0, 1, 1], [], []>} : vector<2x64xbf16>, vector<64x512xbf16>, vector<2x512xf32> -> vector<2x512xf32>
    %402 = arith.addf %397, %401 : vector<2x512xf32>
    %c1_493 = arith.constant 1 : index
    %c0_494 = arith.constant 0 : index
    %c0_495 = arith.constant 0 : index
    %403 = vector.load %arg11[%c1_493, %c0_494, %c0_495] : memref<2x1x512xf32, #tpu.memory_space<vmem>>, vector<1x1x512xf32>
    %404 = vector.shape_cast %403 : vector<1x1x512xf32> to vector<1x512xf32>
    %405 = vector.broadcast %404 : vector<1x512xf32> to vector<2x512xf32>
    %406 = arith.addf %402, %405 : vector<2x512xf32>
    %cst_496 = arith.constant 0.000000e+00 : f32
    %407 = vector.broadcast %cst_496 : f32 to vector<2x512xf32>
    %408 = arith.maximumf %406, %407 : vector<2x512xf32>
    %409 = arith.truncf %408 : vector<2x512xf32> to vector<2x512xbf16>
    %c1_497 = arith.constant 1 : index
    %c0_498 = arith.constant 0 : index
    %c0_499 = arith.constant 0 : index
    %410 = vector.load %arg12[%c1_497, %c0_498, %c0_499] : memref<2x512x128xbf16, #tpu.memory_space<vmem>>, vector<1x512x128xbf16>
    %411 = vector.shape_cast %410 : vector<1x512x128xbf16> to vector<512x128xbf16>
    %cst_500 = arith.constant dense<0.000000e+00> : vector<2x128xf32>
    %412 = tpu.matmul %409, %411, %cst_500 {dimension_numbers = #tpu.dot_dimension_numbers<[1], [0], [0], [1], [0, 0, 1, 1], [], []>} : vector<2x512xbf16>, vector<512x128xbf16>, vector<2x128xf32> -> vector<2x128xf32>
    %c1_501 = arith.constant 1 : index
    %c0_502 = arith.constant 0 : index
    %c0_503 = arith.constant 0 : index
    %413 = vector.load %arg13[%c1_501, %c0_502, %c0_503] : memref<2x1x128xf32, #tpu.memory_space<vmem>>, vector<1x1x128xf32>
    %414 = vector.shape_cast %413 : vector<1x1x128xf32> to vector<1x128xf32>
    %415 = vector.broadcast %414 : vector<1x128xf32> to vector<2x128xf32>
    %416 = arith.addf %412, %415 : vector<2x128xf32>
    %c1_504 = arith.constant 1 : index
    %c0_505 = arith.constant 0 : index
    %c0_506 = arith.constant 0 : index
    %417 = vector.load %arg14[%c1_504, %c0_505, %c0_506] : memref<2x2x128xf32, #tpu.memory_space<vmem>>, vector<1x2x128xf32>
    %418 = vector.shape_cast %417 : vector<1x2x128xf32> to vector<2x128xf32>
    %419 = vector.shape_cast %416 : vector<2x128xf32> to vector<1x2x128xf32>
    tpu.vector_store %arg14[%c1_504, %c0_505, %c0_506], %419 {strides = array<i32>} : memref<2x2x128xf32, #tpu.memory_space<vmem>>, vector<1x2x128xf32>,
    return
  }
  func.func @transform_0(%arg0: i32) -> (i32, i32) {
    %c0_i32 = arith.constant 0 : i32
    %c0_i32_0 = arith.constant 0 : i32
    %c0_i32_1 = arith.constant 0 : i32
    return %c0_i32, %c0_i32_0 : i32, i32
  }
  func.func @transform_1(%arg0: i32) -> (i32, i32) {
    %c0_i32 = arith.constant 0 : i32
    %c0_i32_0 = arith.constant 0 : i32
    %c0_i32_1 = arith.constant 0 : i32
    return %c0_i32, %c0_i32_0 : i32, i32
  }
  func.func @transform_2(%arg0: i32) -> (i32, i32) {
    %c0_i32 = arith.constant 0 : i32
    %c0_i32_0 = arith.constant 0 : i32
    %c0_i32_1 = arith.constant 0 : i32
    return %c0_i32, %c0_i32_0 : i32, i32
  }
  func.func @transform_3(%arg0: i32) -> (i32, i32) {
    %c0_i32 = arith.constant 0 : i32
    %c0_i32_0 = arith.constant 0 : i32
    %c0_i32_1 = arith.constant 0 : i32
    return %c0_i32, %c0_i32_0 : i32, i32
  }
  func.func @transform_4(%arg0: i32) -> (i32, i32, i32) {
    %c0_i32 = arith.constant 0 : i32
    %c0_i32_0 = arith.constant 0 : i32
    %c0_i32_1 = arith.constant 0 : i32
    %c0_i32_2 = arith.constant 0 : i32
    return %c0_i32, %c0_i32_0, %c0_i32_1 : i32, i32, i32
  }
  func.func @transform_5(%arg0: i32) -> (i32, i32) {
    %c0_i32 = arith.constant 0 : i32
    %c0_i32_0 = arith.constant 0 : i32
    %c0_i32_1 = arith.constant 0 : i32
    return %c0_i32, %c0_i32_0 : i32, i32
  }
  func.func @transform_6(%arg0: i32) -> (i32, i32, i32) {
    %c0_i32 = arith.constant 0 : i32
    %c0_i32_0 = arith.constant 0 : i32
    %c0_i32_1 = arith.constant 0 : i32
    %c0_i32_2 = arith.constant 0 : i32
    return %c0_i32, %c0_i32_0, %c0_i32_1 : i32, i32, i32
  }
  func.func @transform_7(%arg0: i32) -> (i32, i32) {
    %c0_i32 = arith.constant 0 : i32
    %c0_i32_0 = arith.constant 0 : i32
    %c0_i32_1 = arith.constant 0 : i32
    return %c0_i32, %c0_i32_0 : i32, i32
  }
  func.func @transform_8(%arg0: i32) -> (i32, i32, i32, i32) {
    %c0_i32 = arith.constant 0 : i32
    %c0_i32_0 = arith.constant 0 : i32
    %c0_i32_1 = arith.constant 0 : i32
    %c0_i32_2 = arith.constant 0 : i32
    %c0_i32_3 = arith.constant 0 : i32
    return %c0_i32, %c0_i32_0, %c0_i32_1, %c0_i32_2 : i32, i32, i32, i32
  }
  func.func @transform_9(%arg0: i32) -> (i32, i32, i32) {
    %c0_i32 = arith.constant 0 : i32
    %c0_i32_0 = arith.constant 0 : i32
    %c0_i32_1 = arith.constant 0 : i32
    %c0_i32_2 = arith.constant 0 : i32
    return %c0_i32, %c0_i32_0, %c0_i32_1 : i32, i32, i32
  }
  func.func @transform_10(%arg0: i32) -> (i32, i32, i32) {
    %c0_i32 = arith.constant 0 : i32
    %c0_i32_0 = arith.constant 0 : i32
    %c0_i32_1 = arith.constant 0 : i32
    %c0_i32_2 = arith.constant 0 : i32
    return %c0_i32, %c0_i32_0, %c0_i32_1 : i32, i32, i32
  }
  func.func @transform_11(%arg0: i32) -> (i32, i32, i32) {
    %c0_i32 = arith.constant 0 : i32
    %c0_i32_0 = arith.constant 0 : i32
    %c0_i32_1 = arith.constant 0 : i32
    %c0_i32_2 = arith.constant 0 : i32
    return %c0_i32, %c0_i32_0, %c0_i32_1 : i32, i32, i32
  }
  func.func @transform_12(%arg0: i32) -> (i32, i32, i32) {
    %c0_i32 = arith.constant 0 : i32
    %c0_i32_0 = arith.constant 0 : i32
    %c0_i32_1 = arith.constant 0 : i32
    %c0_i32_2 = arith.constant 0 : i32
    return %c0_i32, %c0_i32_0, %c0_i32_1 : i32, i32, i32
  }
  func.func @transform_13(%arg0: i32) -> (i32, i32, i32) {
    %c0_i32 = arith.constant 0 : i32
    %c0_i32_0 = arith.constant 0 : i32
    %c0_i32_1 = arith.constant 0 : i32
    %c0_i32_2 = arith.constant 0 : i32
    return %c0_i32, %c0_i32_0, %c0_i32_1 : i32, i32, i32
  }
}

</mosaic_0001>

<bundles_post_ra>
// kernel: twin_forward.1
= control target key start
LH: loop header
LB: loop body
LE: loop exit
PB: predicated region body
PF: predicated region fallthrough
CT: control target
= control target key end

     0   :  { %v22642_v0 = vmov 0   ;;  %vm954_vm0 = vcmask 519168   ;;  %vm1086_vm1 = vcmask 523264   ;;  %vm1516_vm2 = vcmask 1044480   ;;  %s18904_s14 = smov 64   ;;  %s22628_s2 = inlined_call_operand.vmem [shape: bf16[256,64], index: 2, kind: input, shape index: {}]   ;;  %s22629_s0 = inlined_call_operand.vmem [shape: bf16[392,256], index: 0, kind: input, shape index: {}]   ;;  %s22630_s4 = inlined_call_operand.vmem [shape: bf16[16,64,128], index: 4, kind: input, shape index: {}]   ;;  %s22631_s3 = inlined_call_operand.vmem [shape: f32[1,64], index: 3, kind: input, shape index: {}]   ;;  %s22632_s6 = inlined_call_operand.vmem [shape: bf16[9,128,128], index: 6, kind: input, shape index: {}]   ;;  %s22633_s5 = inlined_call_operand.vmem [shape: f32[1,128], index: 5, kind: input, shape index: {}]   ;;  %s22634_s9 = inlined_call_operand.vmem [shape: bf16[2,128,512], index: 9, kind: input, shape index: {}]   ;;  %s22635_s8 = inlined_call_operand.vmem [shape: bf16[2,16,64,512], index: 8, kind: input, shape index: {}]   ;;  %s22636_s1 = inlined_call_operand.vmem [shape: bf16[2,128], index: 1, kind: input, shape index: {}]   ;;  %s22637_s7 = inlined_call_operand.vmem [shape: f32[1,128], index: 7, kind: input, shape index: {}]   ;;  %s22638_s11 = inlined_call_operand.vmem [shape: bf16[2,512,128], index: 11, kind: input, shape index: {}]   ;;  %s22639_s10 = inlined_call_operand.vmem [shape: f32[2,1,512], index: 10, kind: input, shape index: {}]   ;;  %s22640_s12 = inlined_call_operand.vmem [shape: f32[2,1,128], index: 12, kind: input, shape index: {}]   ;;  %s22641_s13 = inlined_call_operand.vmem [shape: f32[2,2,128], index: 13, kind: output, shape index: {}]  }
   0x1   :  { %476 = vmatprep.subr.bf16.mxu0 %v22642_v0  ;;  %v17585_v1 = vld [vmem:[%s22628_s2] sm:$0xff]   ;;  %v17586_v2 = vld [vmem:[%s22628_s2 + $0x8] sm:$0xff]   ;;  %v17587_v3 = vld [vmem:[%s22628_s2 + $0x10] sm:$0xff]   ;;  %vm1991_vm3 = vcmask 1046528   ;;  %vm1410_vm4 = vcmask 1045504   ;;  %vm5414_vm5 = vcmask 1043456  }
   0x2   :  { %477 = vmatpush1.bf16.msra.mxu0 %v17585_v1  ;;  %v17588_v4 = vld [vmem:[%s22628_s2 + $0x18] sm:$0xff]   ;;  %v17589_v5 = vld [vmem:[%s22628_s2 + $0x20] sm:$0xff]   ;;  %v17590_v7 = vld [vmem:[%s22628_s2 + $0x28] sm:$0xff]  }
   0x3   :  { %478 = vmatprep.subr.bf16.mxu0 %v22642_v0  ;;  %v17603_v6 = vld [vmem:[%s22629_s0 + $0x4] ss:$8 sps:$4 sm:$0xff]   ;;  %v17591_v8 = vld [vmem:[%s22628_s2 + $0x30] sm:$0xff]   ;;  %v17592_v9 = vld [vmem:[%s22628_s2 + $0x38] sm:$0xff]  }
   0x4   :  { %508 = vmatprep.mubr.bf16.mxu0 %v17603_v6  ;;  %v17593_v10 = vld [vmem:[%s22628_s2 + $0x40] sm:$0xff]   ;;  %v17594_v11 = vld [vmem:[%s22628_s2 + $0x48] sm:$0xff]   ;;  %v17595_v12 = vld [vmem:[%s22628_s2 + $0x50] sm:$0xff]  }
   0x5   :  { %v17596_v13 = vld [vmem:[%s22628_s2 + $0x58] sm:$0xff]   ;;  %v17597_v14 = vld [vmem:[%s22628_s2 + $0x60] sm:$0xff]   ;;  %v17598_v15 = vld [vmem:[%s22628_s2 + $0x68] sm:$0xff]  }
   0x6   :  { %479 = vmatpush1.bf16.msra.mxu0 %v17586_v2  ;;  %v17599_v16 = vld [vmem:[%s22628_s2 + $0x70] sm:$0xff]   ;;  %v17600_v17 = vld [vmem:[%s22628_s2 + $0x78] sm:$0xff]   ;;  %v17601_v18 = vld [vmem:[%s22629_s0] ss:$8 sps:$4 sm:$0xff]  }
   0x7   :  { %480 = vmatprep.subr.bf16.mxu0 %v22642_v0  ;;  %v17604_v19 = vld [vmem:[%s22629_s0 + $0x14] ss:$8 sps:$4 sm:$0xff]   ;;  %v17606_v20 = vld [vmem:[%s22629_s0 + $0x10] ss:$8 sps:$4 sm:$0xff]   ;;  %v17607_v21 = vld [vmem:[%s22629_s0 + $0x24] ss:$8 sps:$4 sm:$0xff]  }
   0x8   :  { %v17609_v22 = vld [vmem:[%s22629_s0 + $0x20] ss:$8 sps:$4 sm:$0xff]   ;;  %v17610_v23 = vld [vmem:[%s22629_s0 + $0x34] ss:$8 sps:$4 sm:$0xff]   ;;  %v17612_v24 = vld [vmem:[%s22629_s0 + $0x30] ss:$8 sps:$4 sm:$0xff]  }
   0x9   :  { %v17613_v25 = vld [vmem:[%s22629_s0 + $0x44] ss:$8 sps:$4 sm:$0xff]   ;;  %v17615_v26 = vld [vmem:[%s22629_s0 + $0x40] ss:$8 sps:$4 sm:$0xff]   ;;  %v17616_v27 = vld [vmem:[%s22629_s0 + $0x54] ss:$8 sps:$4 sm:$0xff]  }
   0xa   :  { %481 = vmatpush1.bf16.msra.mxu0 %v17587_v3  ;;  %v17618_v28 = vld [vmem:[%s22629_s0 + $0x50] ss:$8 sps:$4 sm:$0xff]   ;;  %v17619_v29 = vld [vmem:[%s22629_s0 + $0x64] ss:$8 sps:$4 sm:$0xff]   ;;  %v17621_v30 = vld [vmem:[%s22629_s0 + $0x60] ss:$8 sps:$4 sm:$0xff]  }
   0xb   :  { %482 = vmatprep.subr.bf16.mxu0 %v22642_v0  ;;  %v17622_v31 = vld [vmem:[%s22629_s0 + $0x74] ss:$8 sps:$4 sm:$0xff]   ;;  %v17624_v32 = vld [vmem:[%s22629_s0 + $0x70] ss:$8 sps:$4 sm:$0xff]   ;;  %v17625_v33 = vld [vmem:[%s22629_s0 + $0x84] ss:$8 sps:$4 sm:$0xff]  }
   0xc   :  { %v17627_v34 = vld [vmem:[%s22629_s0 + $0x80] ss:$8 sps:$4 sm:$0xff]   ;;  %v17628_v35 = vld [vmem:[%s22629_s0 + $0x94] ss:$8 sps:$4 sm:$0xff]   ;;  %v17630_v36 = vld [vmem:[%s22629_s0 + $0x90] ss:$8 sps:$4 sm:$0xff]  }
   0xd   :  { %v17631_v37 = vld [vmem:[%s22629_s0 + $0xa4] ss:$8 sps:$4 sm:$0xff]   ;;  %v17633_v38 = vld [vmem:[%s22629_s0 + $0xa0] ss:$8 sps:$4 sm:$0xff]   ;;  %v17634_v39 = vld [vmem:[%s22629_s0 + $0xb4] ss:$8 sps:$4 sm:$0xff]  }
   0xe   :  { %483 = vmatpush1.bf16.msra.mxu0 %v17588_v4  ;;  %v17636_v40 = vld [vmem:[%s22629_s0 + $0xb0] ss:$8 sps:$4 sm:$0xff]   ;;  %v17637_v41 = vld [vmem:[%s22629_s0 + $0xc4] ss:$8 sps:$4 sm:$0xff]   ;;  %v17639_v42 = vld [vmem:[%s22629_s0 + $0xc0] ss:$8 sps:$4 sm:$0xff]  }
   0xf   :  { %484 = vmatprep.subr.bf16.mxu0 %v22642_v0  ;;  %v17661_v43 = vld [vmem:[%s22630_s4] sm:$0xff]   ;;  %v17640_v44 = vld [vmem:[%s22629_s0 + $0xd4] ss:$8 sps:$4 sm:$0xff]   ;;  %v17662_v45 = vld [vmem:[%s22630_s4 + $0x8] sm:$0xff]  }
  0x10   :  { %16730 = vmatprep.subr.bf16.mxu1 %v17661_v43  ;;  %v17666_v46 = vld [vmem:[%s22630_s4 + $0x10] sm:$0xff]   ;;  %v17643_v48 = vld [vmem:[%s22629_s0 + $0xe4] ss:$8 sps:$4 sm:$0xff]   ;;  %v17668_v49 = vld [vmem:[%s22630_s4 + $0x18] sm:$0xff]  }
  0x11   :  { %16731 = vmatpush3.bf16.msra.mxu1 %v17661_v43  ;;  %v17642_v47 = vld [vmem:[%s22629_s0 + $0xd0] ss:$8 sps:$4 sm:$0xff]   ;;  %v17645_v50 = vld [vmem:[%s22629_s0 + $0xe0] ss:$8 sps:$4 sm:$0xff]   ;;  %v17646_v51 = vld [vmem:[%s22629_s0 + $0xf4] ss:$8 sps:$4 sm:$0xff]  }
  0x12   :  { %485 = vmatpush1.bf16.msra.mxu0 %v17589_v5  ;;  %16732 = vmatprep.subr.bf16.mxu1 %v17662_v45  ;;  %v17648_v52 = vld [vmem:[%s22629_s0 + $0xf0] ss:$8 sps:$4 sm:$0xff]   ;;  %v17649_v53 = vld [vmem:[%s22629_s0 + $0x104] ss:$8 sps:$4 sm:$0xff]   ;;  %v17651_v54 = vld [vmem:[%s22629_s0 + $0x100] ss:$8 sps:$4 sm:$0xff]  }
  0x13   :  { %486 = vmatprep.subr.bf16.mxu0 %v22642_v0  ;;  %v17652_v55 = vld [vmem:[%s22629_s0 + $0x114] ss:$8 sps:$4 sm:$0xff]   ;;  %v19159_v56 = vld [vmem:[%s22630_s4 + $0x20] sm:$0xff]   ;;  %v17654_v57 = vld [vmem:[%s22629_s0 + $0x110] ss:$8 sps:$4 sm:$0xff]  }
  0x14   :  { %v17655_v58 = vld [vmem:[%s22629_s0 + $0x124] ss:$8 sps:$4 sm:$0xff]   ;;  %v17657_v59 = vld [vmem:[%s22629_s0 + $0x120] ss:$8 sps:$4 sm:$0xff]   ;;  %v17658_v60 = vld [vmem:[%s22629_s0 + $0x134] ss:$8 sps:$4 sm:$0xff]  }
  0x15   :  { %16733 = vmatpush3.bf16.msra.mxu1 %v17662_v45  ;;  %v17660_v61 = vld [vmem:[%s22629_s0 + $0x130] ss:$8 sps:$4 sm:$0xff]   ;;  %v17663_v62 = vld [vmem:[%s22629_s0 + $0x144] ss:$8 sps:$4 sm:$0xff]   ;;  %v17665_v63 = vld [vmem:[%s22629_s0 + $0x140] ss:$8 sps:$4 sm:$0xff]  }
  0x16   :  { %487 = vmatpush1.bf16.msra.mxu0 %v17590_v7  ;;  %16734 = vmatprep.subr.bf16.mxu1 %v17666_v46  ;;  %v17669_v1 = vld [vmem:[%s22629_s0 + $0x154] ss:$8 sps:$4 sm:$0xff]   ;;  %v17671_v2 = vld [vmem:[%s22629_s0 + $0x150] ss:$8 sps:$4 sm:$0xff]   ;;  %v17701_v3 = vld [vmem:[%s22630_s4 + $0x160] sm:$0xff]  }
  0x17   :  { %488 = vmatprep.subr.bf16.mxu0 %v22642_v0  ;;  %v17673_v4 = vld [vmem:[%s22629_s0 + $0x164] ss:$8 sps:$4 sm:$0xff]   ;;  %v17675_v5 = vld [vmem:[%s22629_s0 + $0x160] ss:$8 sps:$4 sm:$0xff]   ;;  %v17678_v6 = vld [vmem:[%s22629_s0 + $0x174] ss:$8 sps:$4 sm:$0xff]  }
  0x18   :  { %v93_v7 = vld [vmem:[%s22629_s0 + $0x180] sm:$0xff] }
  0x19   :  { %16735 = vmatpush3.bf16.msra.mxu1 %v17666_v46 }
  0x1a   :  { %489 = vmatpush1.bf16.msra.mxu0 %v17591_v8  ;;  %16736 = vmatprep.subr.bf16.mxu1 %v17668_v49  ;;  %v17680_v8 = vld [vmem:[%s22629_s0 + $0x170] ss:$8 sps:$4 sm:$0xff]  }
  0x1b   :  { %490 = vmatprep.subr.bf16.mxu0 %v22642_v0 }
  0x1d   :  { %16737 = vmatpush3.bf16.msra.mxu1 %v17668_v49 }
  0x1e   :  { %491 = vmatpush1.bf16.msra.mxu0 %v17592_v9  ;;  %16750 = vmatprep.subr.bf16.mxu1 %v19159_v56  ;;  %v14234_v9 = vcombine.high %v93_v7, %v93_v7 }
  0x1f   :  { %492 = vmatprep.subr.bf16.mxu0 %v22642_v0 }
  0x22   :  { %493 = vmatpush1.bf16.msra.mxu0 %v17593_v10  ;;  %v14233_v10 = vcombine.low %v93_v7, %v93_v7 }
  0x23   :  { %494 = vmatprep.subr.bf16.mxu0 %v22642_v0 }
  0x26   :  { %495 = vmatpush1.bf16.msra.mxu0 %v17594_v11  ;;  %v19210_v11 = vld [vmem:[%s22631_s3] ss:$0 sm:$0xff] }
  0x27   :  { %496 = vmatprep.subr.bf16.mxu0 %v22642_v0 }
  0x2a   :  { %497 = vmatpush1.bf16.msra.mxu0 %v17595_v12 }
  0x2b   :  { %498 = vmatprep.subr.bf16.mxu0 %v22642_v0 }
  0x2e   :  { %499 = vmatpush1.bf16.msra.mxu0 %v17596_v13 }
  0x2f   :  { %500 = vmatprep.subr.bf16.mxu0 %v22642_v0 }
  0x32   :  { %501 = vmatpush1.bf16.msra.mxu0 %v17597_v14 }
  0x33   :  { %502 = vmatprep.subr.bf16.mxu0 %v22642_v0 }
  0x36   :  { %503 = vmatpush1.bf16.msra.mxu0 %v17598_v15  ;;  %v17722_v15 = vld [vmem:[%s22630_s4 + $0x168] sm:$0xff]  }
  0x37   :  { %504 = vmatprep.subr.bf16.mxu0 %v22642_v0 }
  0x3a   :  { %505 = vmatpush1.bf16.msra.mxu0 %v17599_v16 }
  0x3b   :  { %506 = vmatprep.subr.bf16.mxu0 %v22642_v0 }
  0x3e   :  { %507 = vmatpush1.bf16.msra.mxu0 %v17600_v17 }
  0x3f   :  { %16950 = vmatprep.subr.bf16.mxu0 %v17701_v3 }
  0x41   :  { %509 = vmatmul.mubr.bf16.vlgmr.msra.gmra.mrb[0].mxu0 %v17601_v18 }
  0x42   :  { %516 = vmatprep.mubr.bf16.mxu0 %v17604_v19  ;;  %16951 = vmatpush3.bf16.msra.mxu0 %v17701_v3  ;;  %v17688_v3 = vld [vmem:[%s22630_s4 + $0x40] sm:$0xff]  }
  0x43   :  { %16952 = vmatprep.subr.bf16.mxu0 %v17722_v15 }
  0x46   :  { %16953 = vmatpush3.bf16.msra.mxu0 %v17722_v15 }
  0x49   :  { %517 = vmatmul.mubr.bf16.gmra.mrb[4].mxu0 %v17606_v20 }
  0x4a   :  { %524 = vmatprep.mubr.bf16.mxu0 %v17607_v21 }
  0x51   :  { %525 = vmatmul.mubr.bf16.gmra.mrb[8].mxu0 %v17609_v22 }
  0x52   :  { %532 = vmatprep.mubr.bf16.mxu0 %v17610_v23 }
  0x59   :  { %533 = vmatmul.mubr.bf16.gmra.mrb[12].mxu0 %v17612_v24 }
  0x5a   :  { %540 = vmatprep.mubr.bf16.mxu0 %v17613_v25 }
  0x61   :  { %541 = vmatmul.mubr.bf16.gmra.mrb[16].mxu0 %v17615_v26 }
  0x62   :  { %548 = vmatprep.mubr.bf16.mxu0 %v17616_v27 }
  0x69   :  { %549 = vmatmul.mubr.bf16.gmra.mrb[20].mxu0 %v17618_v28 }
  0x6a   :  { %556 = vmatprep.mubr.bf16.mxu0 %v17619_v29 }
  0x71   :  { %557 = vmatmul.mubr.bf16.gmra.mrb[24].mxu0 %v17621_v30 }
  0x72   :  { %564 = vmatprep.mubr.bf16.mxu0 %v17622_v31 }
  0x79   :  { %565 = vmatmul.mubr.bf16.gmra.mrb[28].mxu0 %v17624_v32 }
  0x7a   :  { %572 = vmatprep.mubr.bf16.mxu0 %v17625_v33 }
  0x81   :  { %573 = vmatmul.mubr.bf16.gmra.mrb[32].mxu0 %v17627_v34 }
  0x82   :  { %580 = vmatprep.mubr.bf16.mxu0 %v17628_v35 }
  0x89   :  { %581 = vmatmul.mubr.bf16.gmra.mrb[36].mxu0 %v17630_v36 }
  0x8a   :  { %588 = vmatprep.mubr.bf16.mxu0 %v17631_v37 }
  0x91   :  { %589 = vmatmul.mubr.bf16.gmra.mrb[40].mxu0 %v17633_v38 }
  0x92   :  { %596 = vmatprep.mubr.bf16.mxu0 %v17634_v39 }
  0x99   :  { %597 = vmatmul.mubr.bf16.gmra.mrb[44].mxu0 %v17636_v40 }
  0x9a   :  { %604 = vmatprep.mubr.bf16.mxu0 %v17637_v41 }
  0xa1   :  { %605 = vmatmul.mubr.bf16.gmra.mrb[48].mxu0 %v17639_v42 }
  0xa2   :  { %612 = vmatprep.mubr.bf16.mxu0 %v17640_v44  ;;  %v17682_v44 = vld [vmem:[%s22630_s4 + $0x28] sm:$0xff]  }
  0xa9   :  { %613 = vmatmul.mubr.bf16.gmra.mrb[52].mxu0 %v17642_v47 }
  0xaa   :  { %620 = vmatprep.mubr.bf16.mxu0 %v17643_v48 }
  0xb1   :  { %621 = vmatmul.mubr.bf16.gmra.mrb[56].mxu0 %v17645_v50 }
  0xb2   :  { %628 = vmatprep.mubr.bf16.mxu0 %v17646_v51 }
  0xb9   :  { %629 = vmatmul.mubr.bf16.gmra.mrb[60].mxu0 %v17648_v52 }
  0xba   :  { %636 = vmatprep.mubr.bf16.mxu0 %v17649_v53  ;;  %v17684_v53 = vld [vmem:[%s22630_s4 + $0x30] sm:$0xff]  }
  0xc1   :  { %637 = vmatmul.mubr.bf16.gmra.mrb[64].mxu0 %v17651_v54 }
  0xc2   :  { %644 = vmatprep.mubr.bf16.mxu0 %v17652_v55 }
  0xc9   :  { %645 = vmatmul.mubr.bf16.gmra.mrb[68].mxu0 %v17654_v57 }
  0xca   :  { %652 = vmatprep.mubr.bf16.mxu0 %v17655_v58  ;;  %v17686_v58 = vld [vmem:[%s22630_s4 + $0x38] sm:$0xff]  }
  0xd1   :  { %653 = vmatmul.mubr.bf16.gmra.mrb[72].mxu0 %v17657_v59 }
  0xd2   :  { %660 = vmatprep.mubr.bf16.mxu0 %v17658_v60 }
  0xd9   :  { %661 = vmatmul.mubr.bf16.gmra.mrb[76].mxu0 %v17660_v61 }
  0xda   :  { %668 = vmatprep.mubr.bf16.mxu0 %v17663_v62 }
  0xe1   :  { %669 = vmatmul.mubr.bf16.gmra.mrb[80].mxu0 %v17665_v63 }
  0xe2   :  { %676 = vmatprep.mubr.bf16.mxu0 %v17669_v1 }
  0xe9   :  { %677 = vmatmul.mubr.bf16.gmra.mrb[84].mxu0 %v17671_v2 }
  0xea   :  { %684 = vmatprep.mubr.bf16.mxu0 %v17673_v4 }
  0xf1   :  { %685 = vmatmul.mubr.bf16.gmra.mrb[88].mxu0 %v17675_v5 }
  0xf2   :  { %692 = vmatprep.mubr.bf16.mxu0 %v17678_v6 }
  0xf9   :  { %693 = vmatmul.mubr.bf16.gmra.mrb[92].mxu0 %v17680_v8 }
  0xfa   :  { %700 = vmatprep.mubr.bf16.mxu0 %v14234_v9 }
 0x101   :  { %701 = vmatmul.mubr.bf16.gmra.mrb[96].mxu0 %v14233_v10 }
 0x114   :  { %v510_v12 = vpop.f32.mrb[0].mxu0 }
 0x115   :  { %v511_v13 = vadd.f32 %v19210_v11, %v510_v12  ;;  %v512_v14 = vpop.f32.mrb[1].mxu0 }
 0x116   :  { %v513_v16 = vpop.f32.mrb[2].mxu0 }
 0x117   :  { %v708_v17 = vmax.f32 %v511_v13, 0.0  ;;  %v514_v18 = vadd.f32 %v19210_v11, %v513_v16  ;;  %v515_v19 = vpop.f32.mrb[3].mxu0 }
 0x119   :  { %v16261_v20 = vpack.c.bf16 %v708_v17, %v708_v17  ;;  %v709_v21 = vmax.f32 %v514_v18, 0.0 }
 0x11b   :  { %955 = vst.msk [vmem:[#allocation2] sm:$0xf] %vm954_vm0, %v16261_v20  ;;  %v16262_v22 = vpack.c.bf16 %v709_v21, %v709_v21 }
 0x11c   :  { %v518_v23 = vpop.f32.mrb[4].mxu0 }
 0x11d   :  { %956 = vst.msk [vmem:[#allocation2 + $0x4] sm:$0xf] %vm954_vm0, %v16262_v22  ;;  %v519_v24 = vadd.f32 %v19210_v11, %v518_v23  ;;  %v520_v25 = vpop.f32.mrb[5].mxu0 }
 0x11e   :  { %v521_v26 = vpop.f32.mrb[6].mxu0 }
 0x11f   :  { %v710_v27 = vmax.f32 %v519_v24, 0.0  ;;  %v522_v28 = vadd.f32 %v19210_v11, %v521_v26  ;;  %v523_v29 = vpop.f32.mrb[7].mxu0  ;;  %v17742_v24 = vld [vmem:[%s22630_s4 + $0x170] sm:$0xff]  }
 0x120   :  { %16954 = vmatprep.subr.bf16.mxu0 %v17742_v24 }
 0x121   :  { %v16263_v30 = vpack.c.bf16 %v710_v27, %v710_v27  ;;  %v711_v31 = vmax.f32 %v522_v28, 0.0  ;;  %16955 = vmatpush3.bf16.msra.mxu0 %v17742_v24 }
 0x123   :  { %957 = vst.msk [vmem:[#allocation2 + $0x8] sm:$0xf] %vm954_vm0, %v16263_v30  ;;  %v16264_v32 = vpack.c.bf16 %v711_v31, %v711_v31 }
 0x124   :  { %v526_v33 = vpop.f32.mrb[8].mxu0  ;;  %v17667_v34 = vld [vmem:[#allocation2] sm:$0xff]  }
 0x125   :  { %958 = vst.msk [vmem:[#allocation2 + $0xc] sm:$0xf] %vm954_vm0, %v16264_v32  ;;  %v527_v35 = vadd.f32 %v19210_v11, %v526_v33  ;;  %v528_v36 = vpop.f32.mrb[9].mxu0  ;;  %16738 = vmatprep.mubr.msk.bf16.mxu1 %vm1086_vm1, %v17667_v34  ;;  %v17687_v31 = vld [vmem:[#allocation2] sm:$0xff]  }
 0x126   :  { %v529_v37 = vpop.f32.mrb[10].mxu0 }
 0x127   :  { %v712_v38 = vmax.f32 %v527_v35, 0.0  ;;  %v530_v39 = vadd.f32 %v19210_v11, %v529_v37  ;;  %v531_v40 = vpop.f32.mrb[11].mxu0 }
 0x128   :  { %v17691_v40 = vld [vmem:[%s22630_s4 + $0x48] sm:$0xff]  }
 0x129   :  { %v16265_v41 = vpack.c.bf16 %v712_v38, %v712_v38  ;;  %v713_v42 = vmax.f32 %v530_v39, 0.0 }
 0x12b   :  { %959 = vst.msk [vmem:[#allocation2 + $0x10] sm:$0xf] %vm954_vm0, %v16265_v41  ;;  %v16266_v43 = vpack.c.bf16 %v713_v42, %v713_v42 }
 0x12c   :  { %v534_v45 = vpop.f32.mrb[12].mxu0  ;;  %v17672_v46 = vld [vmem:[#allocation2 + $0x8] sm:$0xff]  }
 0x12d   :  { %960 = vst.msk [vmem:[#allocation2 + $0x14] sm:$0xf] %vm954_vm0, %v16266_v43  ;;  %v535_v47 = vadd.f32 %v19210_v11, %v534_v45  ;;  %v536_v48 = vpop.f32.mrb[13].mxu0  ;;  %16739 = vmatmul.mubr.msk.bf16.vlgmr.msra.gmra.mrb[0].mxu1 %vm1086_vm1, %v17672_v46  ;;  %v17689_v43 = vld [vmem:[#allocation2 + $0x8] sm:$0xff]  }
 0x12e   :  { %v537_v49 = vpop.f32.mrb[14].mxu0  ;;  %16751 = vmatpush3.bf16.msra.mxu1 %v19159_v56 }
 0x12f   :  { %v714_v50 = vmax.f32 %v535_v47, 0.0  ;;  %v538_v51 = vadd.f32 %v19210_v11, %v537_v49  ;;  %v539_v52 = vpop.f32.mrb[15].mxu0  ;;  %16752 = vmatprep.subr.bf16.mxu1 %v17682_v44  ;;  %v17695_v49 = vld [vmem:[%s22630_s4 + $0x50] sm:$0xff]  }
 0x131   :  { %v16267_v54 = vpack.c.bf16 %v714_v50, %v714_v50  ;;  %v715_v55 = vmax.f32 %v538_v51, 0.0 }
 0x132   :  { %16753 = vmatpush3.bf16.msra.mxu1 %v17682_v44 }
 0x133   :  { %961 = vst.msk [vmem:[#allocation2 + $0x18] sm:$0xf] %vm954_vm0, %v16267_v54  ;;  %v16268_v57 = vpack.c.bf16 %v715_v55, %v715_v55  ;;  %16754 = vmatprep.subr.bf16.mxu1 %v17684_v53  ;;  %v17698_v55 = vld [vmem:[%s22630_s4 + $0x58] sm:$0xff]  }
 0x134   :  { %v542_v59 = vpop.f32.mrb[16].mxu0  ;;  %v17676_v60 = vld [vmem:[#allocation2 + $0x10] sm:$0xff]  }
 0x135   :  { %962 = vst.msk [vmem:[#allocation2 + $0x1c] sm:$0xf] %vm954_vm0, %v16268_v57  ;;  %v543_v56 = vadd.f32 %v19210_v11, %v542_v59  ;;  %v544_v61 = vpop.f32.mrb[17].mxu0  ;;  %16742 = vmatprep.mubr.msk.bf16.mxu1 %vm1086_vm1, %v17676_v60  ;;  %v17690_v44 = vld [vmem:[#allocation2 + $0x10] sm:$0xff]  }
 0x136   :  { %v545_v62 = vpop.f32.mrb[18].mxu0  ;;  %16755 = vmatpush3.bf16.msra.mxu1 %v17684_v53 }
 0x137   :  { %v716_v63 = vmax.f32 %v543_v56, 0.0  ;;  %v546_v1 = vadd.f32 %v19210_v11, %v545_v62  ;;  %v547_v2 = vpop.f32.mrb[19].mxu0  ;;  %16756 = vmatprep.subr.bf16.mxu1 %v17686_v58  ;;  %v17700_v56 = vld [vmem:[#allocation2 + $0xc] sm:$0xff]   ;;  %v17699_v62 = vld [vmem:[#allocation2 + $0x4] sm:$0xf8]  }
 0x138   :  { %v17702_v2 = vld [vmem:[%s22630_s4 + $0x60] sm:$0xff]  }
 0x139   :  { %v16269_v4 = vpack.c.bf16 %v716_v63, %v716_v63  ;;  %v717_v5 = vmax.f32 %v546_v1, 0.0 }
 0x13a   :  { %16757 = vmatpush3.bf16.msra.mxu1 %v17686_v58 }
 0x13b   :  { %963 = vst.msk [vmem:[#allocation2 + $0x20] sm:$0xf] %vm954_vm0, %v16269_v4  ;;  %v16270_v6 = vpack.c.bf16 %v717_v5, %v717_v5  ;;  %16770 = vmatprep.subr.bf16.mxu1 %v17688_v3 }
 0x13c   :  { %v550_v7 = vpop.f32.mrb[20].mxu0  ;;  %v17681_v8 = vld [vmem:[#allocation2 + $0x18] sm:$0xff]  }
 0x13d   :  { %964 = vst.msk [vmem:[#allocation2 + $0x24] sm:$0xf] %vm954_vm0, %v16270_v6  ;;  %v551_v9 = vadd.f32 %v19210_v11, %v550_v7  ;;  %v552_v10 = vpop.f32.mrb[21].mxu0  ;;  %16743 = vmatmul.mubr.msk.bf16.gmra.mrb[4].mxu1 %vm1086_vm1, %v17681_v8  ;;  %v17692_v54 = vld [vmem:[#allocation2 + $0x18] sm:$0xff]   ;;  %v1518_v7 = vrot.slane %v17700_v56, 3 }
 0x13e   :  { %v553_v12 = vpop.f32.mrb[22].mxu0 }
 0x13f   :  { %v718_v13 = vmax.f32 %v551_v9, 0.0  ;;  %v554_v14 = vadd.f32 %v19210_v11, %v553_v12  ;;  %v555_v15 = vpop.f32.mrb[23].mxu0  ;;  %v1517_v9 = vrot.slane %v17699_v62, 3 }
 0x141   :  { %v16271_v16 = vpack.c.bf16 %v718_v13, %v718_v13  ;;  %v719_v17 = vmax.f32 %v554_v14, 0.0  ;;  %v17703_v13 = vld [vmem:[#allocation2 + $0x14] sm:$0xff]   ;;  %v1519_v15 = vsel %vm1516_vm2, %v1517_v9, %v1518_v7 }
 0x143   :  { %965 = vst.msk [vmem:[#allocation2 + $0x28] sm:$0xf] %vm954_vm0, %v16271_v16  ;;  %v16272_v18 = vpack.c.bf16 %v719_v17, %v719_v17  ;;  %v17704_v16 = vld [vmem:[#allocation2 + $0x1c] sm:$0xff]  }
 0x144   :  { %v558_v19 = vpop.f32.mrb[24].mxu0  ;;  %v17683_v20 = vld [vmem:[#allocation2 + $0x20] sm:$0xff]  }
 0x145   :  { %966 = vst.msk [vmem:[#allocation2 + $0x2c] sm:$0xf] %vm954_vm0, %v16272_v18  ;;  %v559_v21 = vadd.f32 %v19210_v11, %v558_v19  ;;  %v560_v22 = vpop.f32.mrb[25].mxu0  ;;  %16746 = vmatprep.mubr.msk.bf16.mxu1 %vm1086_vm1, %v17683_v20  ;;  %v17693_v59 = vld [vmem:[#allocation2 + $0x20] sm:$0xff]  }
 0x146   :  { %v561_v23 = vpop.f32.mrb[26].mxu0  ;;  %v1520_v22 = vrot.slane %v17703_v13, 3 }
 0x147   :  { %v720_v25 = vmax.f32 %v559_v21, 0.0  ;;  %v562_v26 = vadd.f32 %v19210_v11, %v561_v23  ;;  %v563_v27 = vpop.f32.mrb[27].mxu0  ;;  %v17756_v21 = vld [vmem:[%s22630_s4 + $0x178] sm:$0xff]  }
 0x148   :  { %16956 = vmatprep.subr.bf16.mxu0 %v17756_v21  ;;  %v17705_v27 = vld [vmem:[%s22630_s4 + $0x68] sm:$0xff]  }
 0x149   :  { %v16273_v28 = vpack.c.bf16 %v720_v25, %v720_v25  ;;  %v721_v29 = vmax.f32 %v562_v26, 0.0  ;;  %v1522_v26 = vrot.slane %v17704_v16, 3  ;;  %16957 = vmatpush3.bf16.msra.mxu0 %v17756_v21 }
 0x14a   :  { %v17685_v30 = vld [vmem:[#allocation2 + $0x28] ss:$0 sps:$4 sm:$0x33]  }
 0x14b   :  { %967 = vst.msk [vmem:[#allocation2 + $0x30] sm:$0xf] %vm954_vm0, %v16273_v28  ;;  %v16274_v32 = vpack.c.bf16 %v721_v29, %v721_v29  ;;  %16747 = vmatmul.mubr.msk.bf16.gmra.mrb[8].mxu1 %vm1086_vm1, %v17685_v30  ;;  %v17697_v8 = vld [vmem:[#allocation2 + $0x28] ss:$0 sps:$4 sm:$0x33]   ;;  %v1521_v30 = vsel %vm1516_vm2, %v1518_v7, %v1520_v22 }
 0x14c   :  { %v566_v33 = vpop.f32.mrb[28].mxu0  ;;  %16758 = vmatprep.mubr.msk.bf16.mxu1 %vm1086_vm1, %v17687_v31  ;;  %v17706_v31 = vld [vmem:[#allocation2 + $0x24] sm:$0xff]  }
 0x14d   :  { %968 = vst.msk [vmem:[#allocation2 + $0x34] sm:$0xf] %vm954_vm0, %v16274_v32  ;;  %v567_v34 = vadd.f32 %v19210_v11, %v566_v33  ;;  %v568_v35 = vpop.f32.mrb[29].mxu0 }
 0x14e   :  { %v569_v36 = vpop.f32.mrb[30].mxu0 }
 0x14f   :  { %v722_v37 = vmax.f32 %v567_v34, 0.0  ;;  %v570_v38 = vadd.f32 %v19210_v11, %v569_v36  ;;  %v571_v39 = vpop.f32.mrb[31].mxu0  ;;  %v1523_v34 = vsel %vm1516_vm2, %v1520_v22, %v1522_v26 }
 0x151   :  { %v16275_v41 = vpack.c.bf16 %v722_v37, %v722_v37  ;;  %v723_v42 = vmax.f32 %v570_v38, 0.0  ;;  %v17708_v38 = vld [vmem:[%s22630_s4 + $0x70] sm:$0xff]  }
 0x152   :  { %v17707_v32 = vld [vmem:[#allocation2 + $0x2c] sm:$0x1f]  }
 0x153   :  { %969 = vst.msk [vmem:[#allocation2 + $0x38] sm:$0xf] %vm954_vm0, %v16275_v41  ;;  %v16276_v45 = vpack.c.bf16 %v723_v42, %v723_v42  ;;  %16759 = vmatmul.mubr.msk.bf16.vlgmr.msra.gmra.mrb[12].mxu1 %vm1086_vm1, %v17689_v43  ;;  %v17717_v21 = vld [vmem:[#allocation2 + $0x2c] sm:$0x1f]  }
 0x154   :  { %v574_v46 = vpop.f32.mrb[32].mxu0  ;;  %16771 = vmatpush3.bf16.msra.mxu1 %v17688_v3  ;;  %16762 = vmatprep.mubr.msk.bf16.mxu1 %vm1086_vm1, %v17690_v44  ;;  %v1526_v44 = vrot.slane %v17707_v32, 3 }
 0x155   :  { %970 = vst.msk [vmem:[#allocation2 + $0x3c] sm:$0xf] %vm954_vm0, %v16276_v45  ;;  %v575_v47 = vadd.f32 %v19210_v11, %v574_v46  ;;  %v576_v48 = vpop.f32.mrb[33].mxu0  ;;  %16772 = vmatprep.subr.bf16.mxu1 %v17691_v40  ;;  %v17709_v45 = vld [vmem:[%s22630_s4 + $0x78] sm:$0xff]  }
 0x156   :  { %v577_v50 = vpop.f32.mrb[34].mxu0 }
 0x157   :  { %v724_v51 = vmax.f32 %v575_v47, 0.0  ;;  %v578_v52 = vadd.f32 %v19210_v11, %v577_v50  ;;  %v579_v53 = vpop.f32.mrb[35].mxu0 }
 0x158   :  { %16773 = vmatpush3.bf16.msra.mxu1 %v17691_v40  ;;  %v1524_v40 = vrot.slane %v17706_v31, 3 }
 0x159   :  { %v16277_v57 = vpack.c.bf16 %v724_v51, %v724_v51  ;;  %v725_v58 = vmax.f32 %v578_v52, 0.0  ;;  %16774 = vmatprep.subr.bf16.mxu1 %v17695_v49  ;;  %v17711_v51 = vld [vmem:[#allocation2 + $0xc] sm:$0xff]  }
 0x15a   :  { %v1525_v48 = vsel %vm1516_vm2, %v1522_v26, %v1524_v40  ;;  %v1527_v50 = vsel %vm1516_vm2, %v1524_v40, %v1526_v44 }
 0x15b   :  { %971 = vst.msk [vmem:[#allocation2 + $0x40] sm:$0xf] %vm954_vm0, %v16277_v57  ;;  %v16278_v60 = vpack.c.bf16 %v725_v58, %v725_v58  ;;  %16763 = vmatmul.mubr.msk.bf16.gmra.mrb[16].mxu1 %vm1086_vm1, %v17692_v54  ;;  %v17712_v57 = vld [vmem:[%s22630_s4 + $0x80] sm:$0xff]  }
 0x15c   :  { %v582_v61 = vpop.f32.mrb[36].mxu0  ;;  %16766 = vmatprep.mubr.msk.bf16.mxu1 %vm1086_vm1, %v17693_v59  ;;  %16775 = vmatpush3.bf16.msra.mxu1 %v17695_v49 }
 0x15d   :  { %972 = vst.msk [vmem:[#allocation2 + $0x44] sm:$0xf] %vm954_vm0, %v16278_v60  ;;  %v583_v63 = vadd.f32 %v19210_v11, %v582_v61  ;;  %v584_v1 = vpop.f32.mrb[37].mxu0  ;;  %16776 = vmatprep.subr.bf16.mxu1 %v17698_v55  ;;  %v1735_v61 = vrot.slane %v17711_v51, 3 }
 0x15e   :  { %v585_v3 = vpop.f32.mrb[38].mxu0 }
 0x15f   :  { %v726_v4 = vmax.f32 %v583_v63, 0.0  ;;  %v586_v5 = vadd.f32 %v19210_v11, %v585_v3  ;;  %v587_v6 = vpop.f32.mrb[39].mxu0 }
 0x160   :  { %16777 = vmatpush3.bf16.msra.mxu1 %v17698_v55  ;;  %v17710_v55 = vld [vmem:[#allocation2 + $0x4] sm:$0xf8]  }
 0x161   :  { %v16279_v10 = vpack.c.bf16 %v726_v4, %v726_v4  ;;  %v727_v12 = vmax.f32 %v586_v5, 0.0  ;;  %16790 = vmatprep.subr.bf16.mxu1 %v17702_v2  ;;  %v1734_v1 = vrot.slane %v17710_v55, 3  ;;  %v17714_v5 = vld [vmem:[#allocation2 + $0x1c] sm:$0xff]  }
 0x163   :  { %973 = vst.msk [vmem:[#allocation2 + $0x48] sm:$0xf] %vm954_vm0, %v16279_v10  ;;  %v16280_v14 = vpack.c.bf16 %v727_v12, %v727_v12  ;;  %16767 = vmatmul.mubr.msk.bf16.gmra.mrb[20].mxu1 %vm1086_vm1, %v17697_v8  ;;  %v1736_v4 = vsel %vm1516_vm2, %v1734_v1, %v1735_v61 }
 0x164   :  { %v590_v17 = vpop.f32.mrb[40].mxu0  ;;  %16778 = vmatprep.mubr.msk.bf16.mxu1 %vm1086_vm1, %v1519_v15  ;;  %v1739_v15 = vrot.slane %v17714_v5, 3 }
 0x165   :  { %974 = vst.msk [vmem:[#allocation2 + $0x4c] sm:$0xf] %vm954_vm0, %v16280_v14  ;;  %v591_v18 = vadd.f32 %v19210_v11, %v590_v17  ;;  %v592_v19 = vpop.f32.mrb[41].mxu0 }
 0x166   :  { %v593_v20 = vpop.f32.mrb[42].mxu0  ;;  %v17716_v19 = vld [vmem:[#allocation2 + $0x24] sm:$0xff]  }
 0x167   :  { %v728_v23 = vmax.f32 %v591_v18, 0.0  ;;  %v594_v24 = vadd.f32 %v19210_v11, %v593_v20  ;;  %v595_v25 = vpop.f32.mrb[43].mxu0  ;;  %v17715_v18 = vld [vmem:[%s22630_s4 + $0x88] sm:$0xff]  }
 0x169   :  { %v16281_v28 = vpack.c.bf16 %v728_v23, %v728_v23  ;;  %v729_v29 = vmax.f32 %v594_v24, 0.0  ;;  %v19345_v23 = vld [vmem:[%s22630_s4 + $0x1a0] sm:$0xff]  }
 0x16a   :  { %16990 = vmatprep.subr.bf16.mxu0 %v19345_v23 }
 0x16b   :  { %975 = vst.msk [vmem:[#allocation2 + $0x50] sm:$0xf] %vm954_vm0, %v16281_v28  ;;  %v16282_v33 = vpack.c.bf16 %v729_v29, %v729_v29  ;;  %16779 = vmatmul.mubr.msk.bf16.vlgmr.msra.gmra.mrb[0].mxu1 %vm1086_vm1, %v1521_v30  ;;  %v17718_v28 = vld [vmem:[%s22630_s4 + $0x90] sm:$0xff]   ;;  %v1741_v30 = vrot.slane %v17716_v19, 3 }
 0x16c   :  { %v598_v35 = vpop.f32.mrb[44].mxu0  ;;  %16791 = vmatpush3.bf16.msra.mxu1 %v17702_v2  ;;  %16782 = vmatprep.mubr.msk.bf16.mxu1 %vm1086_vm1, %v1523_v34  ;;  %v17713_v2 = vld [vmem:[#allocation2 + $0x14] sm:$0xff]   ;;  %v1743_v34 = vrot.slane %v17717_v21, 3  ;;  %v18903_v21 = vmov 0.0  }
 0x16d   :  { %976 = vst.msk [vmem:[#allocation2 + $0x54] sm:$0xf] %vm954_vm0, %v16282_v33  ;;  %v599_v36 = vadd.f32 %v19210_v11, %v598_v35  ;;  %v600_v37 = vpop.f32.mrb[45].mxu0  ;;  %16792 = vmatprep.subr.bf16.mxu1 %v17705_v27  ;;  %v1737_v10 = vrot.slane %v17713_v2, 3  ;;  %v17719_v35 = vld [vmem:[%s22630_s4 + $0x98] sm:$0xff]  }
 0x16e   :  { %v601_v39 = vpop.f32.mrb[46].mxu0  ;;  %v1744_v40 = vsel %vm1516_vm2, %v1741_v30, %v1743_v34  ;;  %1014 = vst [vmem:[#allocation5 + $0x50] sm:$0xf] %v18903_v21 }
 0x16f   :  { %v730_v41 = vmax.f32 %v599_v36, 0.0  ;;  %v602_v42 = vadd.f32 %v19210_v11, %v601_v39  ;;  %v603_v43 = vpop.f32.mrb[47].mxu0  ;;  %v1738_v20 = vsel %vm1516_vm2, %v1735_v61, %v1737_v10  ;;  %v1740_v24 = vsel %vm1516_vm2, %v1737_v10, %v1739_v15  ;;  %v17726_v10 = vld [vmem:[%s22630_s4 + $0xa8] sm:$0xff]  }
 0x170   :  { %16793 = vmatpush3.bf16.msra.mxu1 %v17705_v27 }
 0x171   :  { %v16283_v46 = vpack.c.bf16 %v730_v41, %v730_v41  ;;  %v731_v47 = vmax.f32 %v602_v42, 0.0  ;;  %16794 = vmatprep.subr.bf16.mxu1 %v17708_v38  ;;  %v17720_v41 = vld [vmem:[#allocation2 + $0x30] sm:$0xfe]   ;;  %v17721_v42 = vld [vmem:[#allocation2 + $0x38] sm:$0xff]  }
 0x173   :  { %977 = vst.msk [vmem:[#allocation2 + $0x58] sm:$0xf] %vm954_vm0, %v16283_v46  ;;  %v16284_v49 = vpack.c.bf16 %v731_v47, %v731_v47  ;;  %16783 = vmatmul.mubr.msk.bf16.gmra.mrb[4].mxu1 %vm1086_vm1, %v1525_v48  ;;  %v17723_v46 = vld [vmem:[%s22630_s4 + $0xa0] sm:$0xff]  }
 0x174   :  { %v606_v52 = vpop.f32.mrb[48].mxu0  ;;  %16786 = vmatprep.mubr.msk.bf16.mxu1 %vm1086_vm1, %v1527_v50  ;;  %16795 = vmatpush3.bf16.msra.mxu1 %v17708_v38  ;;  %v1742_v38 = vsel %vm1516_vm2, %v1739_v15, %v1741_v30 }
 0x175   :  { %978 = vst.msk [vmem:[#allocation2 + $0x5c] sm:$0xf] %vm954_vm0, %v16284_v49  ;;  %v607_v53 = vadd.f32 %v19210_v11, %v606_v52  ;;  %v608_v54 = vpop.f32.mrb[49].mxu0  ;;  %16796 = vmatprep.subr.bf16.mxu1 %v17709_v45  ;;  %v1992_v52 = vrot.slane %v17720_v41, 1  ;;  %v17783_v41 = vld [vmem:[%s22630_s4 + $0x1b0] sm:$0xff]  }
 0x176   :  { %v609_v58 = vpop.f32.mrb[50].mxu0 }
 0x177   :  { %v732_v59 = vmax.f32 %v607_v53, 0.0  ;;  %v610_v60 = vadd.f32 %v19210_v11, %v609_v58  ;;  %v611_v56 = vpop.f32.mrb[51].mxu0  ;;  %v1993_v53 = vrot.slane %v17721_v42, 1  ;;  %v17725_v58 = vld [vmem:[#allocation2 + $0x48] sm:$0xff]  }
 0x178   :  { %16797 = vmatpush3.bf16.msra.mxu1 %v17709_v45 }
 0x179   :  { %v16285_v62 = vpack.c.bf16 %v732_v59, %v732_v59  ;;  %v733_v63 = vmax.f32 %v610_v60, 0.0  ;;  %16810 = vmatprep.subr.bf16.mxu1 %v17712_v57  ;;  %v1994_v56 = vsel %vm1991_vm3, %v1992_v52, %v1993_v53 }
 0x17b   :  { %979 = vst.msk [vmem:[#allocation2 + $0x60] sm:$0xf] %vm954_vm0, %v16285_v62  ;;  %v16286_v3 = vpack.c.bf16 %v733_v63, %v733_v63  ;;  %16787 = vmatmul.mubr.msk.bf16.gmra.mrb[24].mxu1 %vm1086_vm1, %v1526_v44 }
 0x17c   :  { %v614_v6 = vpop.f32.mrb[52].mxu0  ;;  %16798 = vmatprep.mubr.msk.bf16.mxu1 %vm1086_vm1, %v1736_v4 }
 0x17d   :  { %980 = vst.msk [vmem:[#allocation2 + $0x64] sm:$0xf] %vm954_vm0, %v16286_v3  ;;  %v615_v7 = vadd.f32 %v19210_v11, %v614_v6  ;;  %v616_v8 = vpop.f32.mrb[53].mxu0 }
 0x17e   :  { %v617_v9 = vpop.f32.mrb[54].mxu0  ;;  %v1997_v8 = vrot.slane %v17725_v58, 1 }
 0x17f   :  { %v734_v12 = vmax.f32 %v615_v7, 0.0  ;;  %v618_v13 = vadd.f32 %v19210_v11, %v617_v9  ;;  %v619_v14 = vpop.f32.mrb[55].mxu0 }
 0x181   :  { %v16287_v16 = vpack.c.bf16 %v734_v12, %v734_v12  ;;  %v735_v17 = vmax.f32 %v618_v13, 0.0  ;;  %v17727_v12 = vld [vmem:[#allocation2 + $0x50] sm:$0xff]  }
 0x183   :  { %981 = vst.msk [vmem:[#allocation2 + $0x68] sm:$0xf] %vm954_vm0, %v16287_v16  ;;  %v16288_v22 = vpack.c.bf16 %v735_v17, %v735_v17  ;;  %16799 = vmatmul.mubr.msk.bf16.vlgmr.msra.gmra.mrb[28].mxu1 %vm1086_vm1, %v1738_v20  ;;  %v19384_v16 = vld [vmem:[#allocation2 + $0x58] ss:$0 sps:$4 sm:$0x77]  }
 0x184   :  { %v622_v25 = vpop.f32.mrb[56].mxu0  ;;  %16811 = vmatpush3.bf16.msra.mxu1 %v17712_v57  ;;  %16802 = vmatprep.mubr.msk.bf16.mxu1 %vm1086_vm1, %v1740_v24  ;;  %v17724_v57 = vld [vmem:[#allocation2 + $0x40] sm:$0xff]  }
 0x185   :  { %982 = vst.msk [vmem:[#allocation2 + $0x6c] sm:$0xf] %vm954_vm0, %v16288_v22  ;;  %v623_v26 = vadd.f32 %v19210_v11, %v622_v25  ;;  %v624_v27 = vpop.f32.mrb[57].mxu0  ;;  %16812 = vmatprep.subr.bf16.mxu1 %v17715_v18  ;;  %v1995_v4 = vrot.slane %v17724_v57, 1  ;;  %v17729_v25 = vld [vmem:[%s22630_s4 + $0xb0] sm:$0xff]  }
 0x186   :  { %v625_v29 = vpop.f32.mrb[58].mxu0 }
 0x187   :  { %v736_v31 = vmax.f32 %v623_v26, 0.0  ;;  %v626_v32 = vadd.f32 %v19210_v11, %v625_v29  ;;  %v627_v33 = vpop.f32.mrb[59].mxu0  ;;  %v1996_v15 = vsel %vm1991_vm3, %v1993_v53, %v1995_v4  ;;  %v17786_v53 = vld [vmem:[%s22630_s4 + $0x1b8] sm:$0xff]  }
 0x188   :  { %16813 = vmatpush3.bf16.msra.mxu1 %v17715_v18  ;;  %v1998_v18 = vsel %vm1991_vm3, %v1995_v4, %v1997_v8  ;;  %v2001_v33 = vrot.slane %v19384_v16, 1 }
 0x189   :  { %v16289_v36 = vpack.c.bf16 %v736_v31, %v736_v31  ;;  %v737_v37 = vmax.f32 %v626_v32, 0.0  ;;  %16814 = vmatprep.subr.bf16.mxu1 %v17718_v28  ;;  %v17779_v32 = vld [vmem:[%s22630_s4 + $0x1a8] sm:$0xff]  }
 0x18b   :  { %983 = vst.msk [vmem:[#allocation2 + $0x70] sm:$0xf] %vm954_vm0, %v16289_v36  ;;  %v16290_v39 = vpack.c.bf16 %v737_v37, %v737_v37  ;;  %16803 = vmatmul.mubr.msk.bf16.gmra.mrb[32].mxu1 %vm1086_vm1, %v1742_v38 }
 0x18c   :  { %v630_v43 = vpop.f32.mrb[60].mxu0  ;;  %16806 = vmatprep.mubr.msk.bf16.mxu1 %vm1086_vm1, %v1744_v40  ;;  %16815 = vmatpush3.bf16.msra.mxu1 %v17718_v28  ;;  %v17757_v51 = vld [vmem:[#allocation2 + $0x68] sm:$0xfe]   ;;  %v1999_v28 = vrot.slane %v17727_v12, 1 }
 0x18d   :  { %984 = vst.msk [vmem:[#allocation2 + $0x74] sm:$0xf] %vm954_vm0, %v16290_v39  ;;  %v631_v44 = vadd.f32 %v19210_v11, %v630_v43  ;;  %v632_v45 = vpop.f32.mrb[61].mxu0  ;;  %16816 = vmatprep.subr.bf16.mxu1 %v17719_v35  ;;  %v3598_v60 = vrot.slane %v17757_v51, 1  ;;  %v19407_v39 = vld [vmem:[#allocation2 + $0x38] sm:$0xff]  }
 0x18e   :  { %v633_v47 = vpop.f32.mrb[62].mxu0  ;;  %v2000_v38 = vsel %vm1991_vm3, %v1997_v8, %v1999_v28  ;;  %v2002_v42 = vsel %vm1991_vm3, %v1999_v28, %v2001_v33  ;;  %v17739_v28 = vld [vmem:[%s22630_s4 + $0xd0] sm:$0xff]  }
 0x18f   :  { %v738_v48 = vmax.f32 %v631_v44, 0.0  ;;  %v634_v49 = vadd.f32 %v19210_v11, %v633_v47  ;;  %v635_v50 = vpop.f32.mrb[63].mxu0  ;;  %v17733_v47 = vld [vmem:[%s22630_s4 + $0xc0] sm:$0xff]  }
 0x190   :  { %16817 = vmatpush3.bf16.msra.mxu1 %v17719_v35  ;;  %v17730_v35 = vld [vmem:[%s22630_s4 + $0xb8] sm:$0xff]  }
 0x191   :  { %v16291_v54 = vpack.c.bf16 %v738_v48, %v738_v48  ;;  %v739_v55 = vmax.f32 %v634_v49, 0.0  ;;  %16830 = vmatprep.subr.bf16.mxu1 %v17723_v46 }
 0x193   :  { %985 = vst.msk [vmem:[#allocation2 + $0x78] sm:$0xf] %vm954_vm0, %v16291_v54  ;;  %v16292_v59 = vpack.c.bf16 %v739_v55, %v739_v55  ;;  %16807 = vmatmul.mubr.msk.bf16.gmra.mrb[36].mxu1 %vm1086_vm1, %v1743_v34  ;;  %v2207_v55 = vrot.slane %v19407_v39, 1 }
 0x194   :  { %v638_v61 = vpop.f32.mrb[64].mxu0  ;;  %v17758_v62 = vld [vmem:[#allocation2 + $0x70] sm:$0xff]   ;;  %16818 = vmatprep.mubr.msk.bf16.mxu1 %vm1086_vm1, %v1994_v56 }
 0x195   :  { %986 = vst.msk [vmem:[#allocation2 + $0x7c] sm:$0xf] %vm954_vm0, %v16292_v59  ;;  %v639_v63 = vadd.f32 %v19210_v11, %v638_v61  ;;  %v640_v1 = vpop.f32.mrb[65].mxu0  ;;  %v3599_v3 = vrot.slane %v17758_v62, 1  ;;  %v19437_v61 = vld [vmem:[%s22630_s4 + $0x1e0] sm:$0xff]  }
 0x196   :  { %v641_v2 = vpop.f32.mrb[66].mxu0 }
 0x197   :  { %v740_v5 = vmax.f32 %v639_v63, 0.0  ;;  %v642_v6 = vadd.f32 %v19210_v11, %v641_v2  ;;  %v643_v7 = vpop.f32.mrb[67].mxu0  ;;  %v3600_v9 = vsel %vm1991_vm3, %v3598_v60, %v3599_v3  ;;  %v17734_v60 = vld [vmem:[#allocation2 + $0x40] sm:$0xff]   ;;  %v17735_v63 = vld [vmem:[#allocation2 + $0x48] sm:$0xff]  }
 0x198   :  { %16958 = vmatprep.mubr.msk.bf16.mxu0 %vm1086_vm1, %v3600_v9  ;;  %v2209_v7 = vrot.slane %v17734_v60, 1  ;;  %v2211_v12 = vrot.slane %v17735_v63, 1 }
 0x199   :  { %v16293_v13 = vpack.c.bf16 %v740_v5, %v740_v5  ;;  %v741_v14 = vmax.f32 %v642_v6, 0.0 }
 0x19b   :  { %987 = vst.msk [vmem:[#allocation2 + $0x80] sm:$0xf] %vm954_vm0, %v16293_v13  ;;  %v16294_v17 = vpack.c.bf16 %v741_v14, %v741_v14  ;;  %16819 = vmatmul.mubr.msk.bf16.vlgmr.msra.gmra.mrb[0].mxu1 %vm1086_vm1, %v1996_v15  ;;  %v17736_v14 = vld [vmem:[%s22630_s4 + $0xc8] sm:$0xff]  }
 0x19c   :  { %v646_v19 = vpop.f32.mrb[68].mxu0  ;;  %v17760_v20 = vld [vmem:[#allocation2 + $0x78] sm:$0xff]   ;;  %16831 = vmatpush3.bf16.msra.mxu1 %v17723_v46  ;;  %16822 = vmatprep.mubr.msk.bf16.mxu1 %vm1086_vm1, %v1998_v18 }
 0x19d   :  { %988 = vst.msk [vmem:[#allocation2 + $0x84] sm:$0xf] %vm954_vm0, %v16294_v17  ;;  %v647_v22 = vadd.f32 %v19210_v11, %v646_v19  ;;  %v648_v24 = vpop.f32.mrb[69].mxu0  ;;  %16832 = vmatprep.subr.bf16.mxu1 %v17726_v10  ;;  %v3601_v27 = vrot.slane %v17760_v20, 1  ;;  %v17737_v17 = vld [vmem:[#allocation2 + $0x50] sm:$0xff]   ;;  %v2210_v20 = vsel %vm1991_vm3, %v2207_v55, %v2209_v7 }
 0x19e   :  { %v649_v26 = vpop.f32.mrb[70].mxu0  ;;  %v17738_v18 = vld [vmem:[#allocation2 + $0x58] ss:$0 sps:$4 sm:$0x77]  }
 0x19f   :  { %v742_v29 = vmax.f32 %v647_v22, 0.0  ;;  %v650_v30 = vadd.f32 %v19210_v11, %v649_v26  ;;  %v651_v31 = vpop.f32.mrb[71].mxu0  ;;  %v3602_v34 = vsel %vm1991_vm3, %v3599_v3, %v3601_v27  ;;  %v17731_v11 = vld [vmem:[#allocation2 + $0x30] sm:$0xfe]   ;;  %v2212_v22 = vsel %vm1991_vm3, %v2209_v7, %v2211_v12  ;;  %v17744_v7 = vld [vmem:[#allocation2 + $0x40] sm:$0xff]  }
 0x1a0   :  { %16833 = vmatpush3.bf16.msra.mxu1 %v17726_v10  ;;  %16959 = vmatmul.mubr.msk.bf16.vlgmr.msra.gmra.mrb[100].mxu0 %vm1086_vm1, %v3602_v34  ;;  %v2206_v54 = vrot.slane %v17731_v11, 1  ;;  %v2213_v31 = vrot.slane %v17737_v17, 1 }
 0x1a1   :  { %v16295_v36 = vpack.c.bf16 %v742_v29, %v742_v29  ;;  %v743_v37 = vmax.f32 %v650_v30, 0.0  ;;  %16834 = vmatprep.subr.bf16.mxu1 %v17729_v25  ;;  %16991 = vmatpush3.bf16.msra.mxu0 %v19345_v23  ;;  %v19420_v23 = vld [vmem:[%s22631_s3] ss:$0 sm:$0xff] }
 0x1a2   :  { %16992 = vmatprep.subr.bf16.mxu0 %v17779_v32  ;;  %v2208_v62 = vsel %vm1991_vm3, %v2206_v54, %v2207_v55  ;;  %v2214_v39 = vsel %vm1991_vm3, %v2211_v12, %v2213_v31  ;;  %v17745_v12 = vld [vmem:[#allocation2 + $0x48] sm:$0xff]  }
 0x1a3   :  { %989 = vst.msk [vmem:[#allocation2 + $0x88] sm:$0xf] %vm954_vm0, %v16295_v36  ;;  %v16296_v40 = vpack.c.bf16 %v743_v37, %v743_v37  ;;  %16823 = vmatmul.mubr.msk.bf16.gmra.mrb[4].mxu1 %vm1086_vm1, %v2000_v38  ;;  %v2215_v36 = vrot.slane %v17738_v18, 1  ;;  %v17740_v37 = vld [vmem:[%s22630_s4 + $0xd8] sm:$0xff]   ;;  %v17749_v18 = vld [vmem:[%s22630_s4 + $0xf0] sm:$0xff]  }
 0x1a4   :  { %v654_v43 = vpop.f32.mrb[72].mxu0  ;;  %v17764_v44 = vld [vmem:[#allocation2 + $0x80] sm:$0xff]   ;;  %16826 = vmatprep.mubr.msk.bf16.mxu1 %vm1086_vm1, %v2002_v42  ;;  %16835 = vmatpush3.bf16.msra.mxu1 %v17729_v25 }
 0x1a5   :  { %990 = vst.msk [vmem:[#allocation2 + $0x8c] sm:$0xf] %vm954_vm0, %v16296_v40  ;;  %v655_v45 = vadd.f32 %v19420_v23, %v654_v43  ;;  %v656_v46 = vpop.f32.mrb[73].mxu0  ;;  %16836 = vmatprep.subr.bf16.mxu1 %v17730_v35  ;;  %v3603_v48 = vrot.slane %v17764_v44, 1  ;;  %16993 = vmatpush3.bf16.msra.mxu0 %v17779_v32  ;;  %v2216_v42 = vsel %vm1991_vm3, %v2213_v31, %v2215_v36  ;;  %v17748_v31 = vld [vmem:[#allocation2 + $0x58] sm:$0xff]  }
 0x1a6   :  { %v657_v49 = vpop.f32.mrb[74].mxu0  ;;  %16994 = vmatprep.subr.bf16.mxu0 %v17783_v41 }
 0x1a7   :  { %v744_v50 = vmax.f32 %v655_v45, 0.0  ;;  %v658_v51 = vadd.f32 %v19420_v23, %v657_v49  ;;  %v659_v52 = vpop.f32.mrb[75].mxu0  ;;  %v3604_v57 = vsel %vm1991_vm3, %v3601_v27, %v3603_v48 }
 0x1a8   :  { %16837 = vmatpush3.bf16.msra.mxu1 %v17730_v35  ;;  %16962 = vmatprep.mubr.msk.bf16.mxu0 %vm1086_vm1, %v3604_v57  ;;  %v17741_v57 = vld [vmem:[#allocation2 + $0x38] sm:$0xff]  }
 0x1a9   :  { %v16297_v58 = vpack.c.bf16 %v744_v50, %v744_v50  ;;  %v745_v59 = vmax.f32 %v658_v51, 0.0  ;;  %16850 = vmatprep.subr.bf16.mxu1 %v17733_v47  ;;  %16995 = vmatpush3.bf16.msra.mxu0 %v17783_v41 }
 0x1aa   :  { %16996 = vmatprep.subr.bf16.mxu0 %v17786_v53 }
 0x1ab   :  { %991 = vst.msk [vmem:[#allocation2 + $0x90] sm:$0xf] %vm954_vm0, %v16297_v58  ;;  %v16298_v56 = vpack.c.bf16 %v745_v59, %v745_v59  ;;  %16827 = vmatmul.mubr.msk.bf16.gmra.mrb[40].mxu1 %vm1086_vm1, %v2001_v33 }
 0x1ac   :  { %v17765_v1 = vld [vmem:[#allocation2 + $0x88] sm:$0xff]   ;;  %v662_v2 = vpop.f32.mrb[76].mxu0  ;;  %16838 = vmatprep.mubr.msk.bf16.mxu1 %vm1086_vm1, %v2208_v62 }
 0x1ad   :  { %992 = vst.msk [vmem:[#allocation2 + $0x94] sm:$0xf] %vm954_vm0, %v16298_v56  ;;  %v663_v3 = vadd.f32 %v19420_v23, %v662_v2  ;;  %v664_v4 = vpop.f32.mrb[77].mxu0  ;;  %v3605_v5 = vrot.slane %v17765_v1, 1  ;;  %16997 = vmatpush3.bf16.msra.mxu0 %v17786_v53 }
 0x1ae   :  { %v665_v6 = vpop.f32.mrb[78].mxu0  ;;  %17030 = vmatprep.subr.bf16.mxu0 %v19437_v61 }
 0x1af   :  { %v746_v8 = vmax.f32 %v663_v3, 0.0  ;;  %v666_v9 = vadd.f32 %v19420_v23, %v665_v6  ;;  %v667_v10 = vpop.f32.mrb[79].mxu0  ;;  %v3606_v13 = vsel %vm1991_vm3, %v3603_v48, %v3605_v5 }
 0x1b0   :  { %16963 = vmatmul.mubr.msk.bf16.gmra.mrb[104].mxu0 %vm1086_vm1, %v3606_v13 }
 0x1b1   :  { %v16299_v15 = vpack.c.bf16 %v746_v8, %v746_v8  ;;  %v747_v16 = vmax.f32 %v666_v9, 0.0  ;;  %v17746_v8 = vld [vmem:[%s22630_s4 + $0xe8] sm:$0xff]  }
 0x1b2   :  { %v17773_v19 = vld [vmem:[#allocation2 + $0x90] ss:$0 sps:$4 sm:$0x77]  }
 0x1b3   :  { %993 = vst.msk [vmem:[#allocation2 + $0x98] sm:$0xf] %vm954_vm0, %v16299_v15  ;;  %v16300_v21 = vpack.c.bf16 %v747_v16, %v747_v16  ;;  %16839 = vmatmul.mubr.msk.bf16.vlgmr.msra.gmra.mrb[44].mxu1 %vm1086_vm1, %v2210_v20  ;;  %v3607_v24 = vrot.slane %v17773_v19, 1 }
 0x1b4   :  { %v670_v25 = vpop.f32.mrb[80].mxu0  ;;  %16851 = vmatpush3.bf16.msra.mxu1 %v17733_v47  ;;  %16842 = vmatprep.mubr.msk.bf16.mxu1 %vm1086_vm1, %v2212_v22  ;;  %v17788_v35 = vld [vmem:[#allocation2 + $0x90] sm:$0xf8]   ;;  %v17743_v47 = vld [vmem:[%s22630_s4 + $0xe0] sm:$0xff]  }
 0x1b5   :  { %994 = vst.msk [vmem:[#allocation2 + $0x9c] sm:$0xf] %vm954_vm0, %v16300_v21  ;;  %v671_v26 = vadd.f32 %v19420_v23, %v670_v25  ;;  %v672_v27 = vpop.f32.mrb[81].mxu0  ;;  %16852 = vmatprep.subr.bf16.mxu1 %v17736_v14  ;;  %v3608_v29 = vsel %vm1991_vm3, %v3605_v5, %v3607_v24  ;;  %v4075_v41 = vrot.slane %v17788_v35, 3  ;;  %v17798_v5 = vld [vmem:[%s22630_s4 + $0x1e8] sm:$0xff]  }
 0x1b6   :  { %v673_v30 = vpop.f32.mrb[82].mxu0  ;;  %16966 = vmatprep.mubr.msk.bf16.mxu0 %vm1086_vm1, %v3608_v29  ;;  %v17747_v27 = vld [vmem:[#allocation2 + $0x50] sm:$0xff]  }
 0x1b7   :  { %v748_v32 = vmax.f32 %v671_v26, 0.0  ;;  %v674_v33 = vadd.f32 %v19420_v23, %v673_v30  ;;  %v675_v34 = vpop.f32.mrb[83].mxu0 }
 0x1b8   :  { %16853 = vmatpush3.bf16.msra.mxu1 %v17736_v14  ;;  %16967 = vmatmul.mubr.msk.bf16.gmra.mrb[108].mxu0 %vm1086_vm1, %v3607_v24  ;;  %v17803_v14 = vld [vmem:[%s22630_s4 + $0x1f0] sm:$0xff]   ;;  %v17806_v24 = vld [vmem:[%s22630_s4 + $0x1f8] sm:$0xff]  }
 0x1b9   :  { %v16301_v11 = vpack.c.bf16 %v748_v32, %v748_v32  ;;  %v749_v38 = vmax.f32 %v674_v33, 0.0  ;;  %16854 = vmatprep.subr.bf16.mxu1 %v17739_v28 }
 0x1bb   :  { %995 = vst.msk [vmem:[#allocation2 + $0xa0] sm:$0xf] %vm954_vm0, %v16301_v11  ;;  %v16302_v40 = vpack.c.bf16 %v749_v38, %v749_v38  ;;  %16843 = vmatmul.mubr.msk.bf16.gmra.mrb[48].mxu1 %vm1086_vm1, %v2214_v39 }
 0x1bc   :  { %v678_v43 = vpop.f32.mrb[84].mxu0  ;;  %v17789_v44 = vld [vmem:[#allocation2 + $0x98] sm:$0xff]   ;;  %16846 = vmatprep.mubr.msk.bf16.mxu1 %vm1086_vm1, %v2216_v42  ;;  %16855 = vmatpush3.bf16.msra.mxu1 %v17739_v28 }
 0x1bd   :  { %996 = vst.msk [vmem:[#allocation2 + $0xa4] sm:$0xf] %vm954_vm0, %v16302_v40  ;;  %v679_v45 = vadd.f32 %v19420_v23, %v678_v43  ;;  %v680_v46 = vpop.f32.mrb[85].mxu0  ;;  %16856 = vmatprep.subr.bf16.mxu1 %v17740_v37  ;;  %v4076_v49 = vrot.slane %v17789_v44, 3  ;;  %v17751_v28 = vld [vmem:[%s22630_s4 + $0xf8] sm:$0xff]  }
 0x1be   :  { %v681_v48 = vpop.f32.mrb[86].mxu0  ;;  %v17808_v39 = vld [vmem:[#allocation2 + $0x98] sm:$0xfc]   ;;  %v17750_v43 = vld [vmem:[#allocation2 + $0x60] ss:$0 sps:$4 sm:$0x33]  }
 0x1bf   :  { %v750_v50 = vmax.f32 %v679_v45, 0.0  ;;  %v682_v51 = vadd.f32 %v19420_v23, %v681_v48  ;;  %v683_v52 = vpop.f32.mrb[87].mxu0  ;;  %v4077_v53 = vsel %vm1516_vm2, %v4075_v41, %v4076_v49  ;;  %v17752_v45 = vld [vmem:[#allocation2 + $0x38] sm:$0xff]   ;;  %v4546_v46 = vrot.slane %v17808_v39, 2 }
 0x1c0   :  { %16857 = vmatpush3.bf16.msra.mxu1 %v17740_v37  ;;  %16998 = vmatprep.mubr.msk.bf16.mxu0 %vm1086_vm1, %v4077_v53  ;;  %v17753_v37 = vld [vmem:[%s22630_s4 + $0x100] sm:$0xff]  }
 0x1c1   :  { %v16303_v54 = vpack.c.bf16 %v750_v50, %v750_v50  ;;  %v751_v55 = vmax.f32 %v682_v51, 0.0  ;;  %16870 = vmatprep.subr.bf16.mxu1 %v17743_v47 }
 0x1c3   :  { %997 = vst.msk [vmem:[#allocation2 + $0xa8] sm:$0xf] %vm954_vm0, %v16303_v54  ;;  %v16304_v58 = vpack.c.bf16 %v751_v55, %v751_v55  ;;  %16847 = vmatmul.mubr.msk.bf16.gmra.mrb[52].mxu1 %vm1086_vm1, %v2215_v36  ;;  %v17754_v54 = vld [vmem:[#allocation2 + $0x40] sm:$0xff]   ;;  %v17759_v55 = vld [vmem:[%s22630_s4 + $0x108] sm:$0xff]  }
 0x1c4   :  { %v686_v59 = vpop.f32.mrb[88].mxu0  ;;  %v17790_v60 = vld [vmem:[#allocation2 + $0xa0] sm:$0xff]   ;;  %16858 = vmatprep.mubr.msk.bf16.mxu1 %vm1086_vm1, %v17741_v57  ;;  %v17755_v57 = vld [vmem:[#allocation2 + $0x48] sm:$0xff]  }
 0x1c5   :  { %998 = vst.msk [vmem:[#allocation2 + $0xac] sm:$0xf] %vm954_vm0, %v16304_v58  ;;  %v687_v56 = vadd.f32 %v19420_v23, %v686_v59  ;;  %v688_v62 = vpop.f32.mrb[89].mxu0  ;;  %v4078_v1 = vrot.slane %v17790_v60, 3  ;;  %v17809_v40 = vld [vmem:[#allocation2 + $0xa0] sm:$0xff]   ;;  %v17763_v60 = vld [vmem:[%s22630_s4 + $0x110] sm:$0xff]  }
 0x1c6   :  { %v689_v63 = vpop.f32.mrb[90].mxu0 }
 0x1c7   :  { %v752_v2 = vmax.f32 %v687_v56, 0.0  ;;  %v690_v3 = vadd.f32 %v19420_v23, %v689_v63  ;;  %v691_v4 = vpop.f32.mrb[91].mxu0  ;;  %v4079_v6 = vsel %vm1516_vm2, %v4076_v49, %v4078_v1 }
 0x1c8   :  { %16999 = vmatmul.mubr.msk.bf16.vlgmr.msra.gmra.mrb[112].mxu0 %vm1086_vm1, %v4079_v6  ;;  %v17762_v4 = vld [vmem:[#allocation2 + $0x58] sm:$0xff]   ;;  %v17768_v6 = vld [vmem:[#allocation2 + $0x60] sm:$0xfc]  }
 0x1c9   :  { %v16305_v9 = vpack.c.bf16 %v752_v2, %v752_v2  ;;  %v753_v10 = vmax.f32 %v690_v3, 0.0  ;;  %17031 = vmatpush3.bf16.msra.mxu0 %v19437_v61  ;;  %v17761_v2 = vld [vmem:[#allocation2 + $0x50] sm:$0xff]   ;;  %v17767_v3 = vld [vmem:[%s22630_s4 + $0x118] sm:$0xff]  }
 0x1ca   :  { %17032 = vmatprep.subr.bf16.mxu0 %v17798_v5 }
 0x1cb   :  { %999 = vst.msk [vmem:[#allocation2 + $0xb0] sm:$0xf] %vm954_vm0, %v16305_v9  ;;  %v16306_v13 = vpack.c.bf16 %v753_v10, %v753_v10  ;;  %16859 = vmatmul.mubr.msk.bf16.vlgmr.msra.gmra.mrb[0].mxu1 %vm1086_vm1, %v17744_v7  ;;  %v17769_v7 = vld [vmem:[#allocation2 + $0x68] sm:$0xff]   ;;  %v17770_v9 = vld [vmem:[%s22630_s4 + $0x120] sm:$0xff]  }
 0x1cc   :  { %v694_v15 = vpop.f32.mrb[92].mxu0  ;;  %v17795_v16 = vld [vmem:[#allocation2 + $0xa8] sm:$0xff]   ;;  %16871 = vmatpush3.bf16.msra.mxu1 %v17743_v47  ;;  %16862 = vmatprep.mubr.msk.bf16.mxu1 %vm1086_vm1, %v17745_v12  ;;  %v4547_v47 = vrot.slane %v17809_v40, 2  ;;  %v2913_v12 = vrot.slane %v17768_v6, 2 }
 0x1cd   :  { %1000 = vst.msk [vmem:[#allocation2 + $0xb4] sm:$0xf] %vm954_vm0, %v16306_v13  ;;  %v695_v61 = vadd.f32 %v19420_v23, %v694_v15  ;;  %v696_v17 = vpop.f32.mrb[93].mxu0  ;;  %16872 = vmatprep.subr.bf16.mxu1 %v17746_v8  ;;  %v4080_v20 = vrot.slane %v17795_v16, 3  ;;  %17033 = vmatpush3.bf16.msra.mxu0 %v17798_v5  ;;  %v17810_v50 = vld [vmem:[#allocation2 + $0xa8] sm:$0xff]   ;;  %v2914_v13 = vrot.slane %v17769_v7, 2 }
 0x1ce   :  { %v697_v19 = vpop.f32.mrb[94].mxu0  ;;  %17034 = vmatprep.subr.bf16.mxu0 %v17803_v14  ;;  %v4548_v52 = vsel %vm1410_vm4, %v4546_v46, %v4547_v47  ;;  %v4549_v58 = vrot.slane %v17810_v50, 2  ;;  %v17766_v15 = vld [vmem:[#allocation2 + $0x60] ss:$0 sps:$4 sm:$0x33]   ;;  %v17771_v16 = vld [vmem:[#allocation2 + $0x70] sm:$0xff]  }
 0x1cf   :  { %v754_v21 = vmax.f32 %v695_v61, 0.0  ;;  %v698_v22 = vadd.f32 %v19420_v23, %v697_v19  ;;  %v699_v25 = vpop.f32.mrb[95].mxu0  ;;  %v4081_v26 = vsel %vm1516_vm2, %v4078_v1, %v4080_v20  ;;  %v2915_v61 = vsel %vm1410_vm4, %v2913_v12, %v2914_v13  ;;  %v17772_v17 = vld [vmem:[#allocation2 + $0x78] sm:$0xff]   ;;  %v17811_v12 = vld [vmem:[%s22630_s4 + $0x188] sm:$0xff]  }
 0x1d0   :  { %16873 = vmatpush3.bf16.msra.mxu1 %v17746_v8  ;;  %17002 = vmatprep.mubr.msk.bf16.mxu0 %vm1086_vm1, %v4081_v26  ;;  %v4550_v56 = vsel %vm1410_vm4, %v4547_v47, %v4549_v58  ;;  %v2918_v19 = vrot.slane %v17772_v17, 2  ;;  %v17776_v25 = vld [vmem:[#allocation2 + $0x88] ss:$0 sps:$4 sm:$0xff]   ;;  %v17777_v26 = vld [vmem:[%s22630_s4 + $0x130] sm:$0xff]  }
 0x1d1   :  { %v16307_v29 = vpack.c.bf16 %v754_v21, %v754_v21  ;;  %v755_v30 = vmax.f32 %v698_v22, 0.0  ;;  %16874 = vmatprep.subr.bf16.mxu1 %v17749_v18  ;;  %17035 = vmatpush3.bf16.msra.mxu0 %v17803_v14  ;;  %v17775_v22 = vld [vmem:[#allocation2 + $0x80] sm:$0xff]  }
 0x1d2   :  { %17036 = vmatprep.subr.bf16.mxu0 %v17806_v24 }
 0x1d3   :  { %1001 = vst.msk [vmem:[#allocation2 + $0xb8] sm:$0xf] %vm954_vm0, %v16307_v29  ;;  %v16308_v32 = vpack.c.bf16 %v755_v30, %v755_v30  ;;  %16863 = vmatmul.mubr.msk.bf16.gmra.mrb[4].mxu1 %vm1086_vm1, %v17747_v27  ;;  %v2920_v27 = vrot.slane %v17775_v22, 2  ;;  %v17780_v29 = vld [vmem:[%s22630_s4 + $0x138] sm:$0xff]  }
 0x1d4   :  { %v17796_v33 = vld [vmem:[#allocation2 + $0xb0] sm:$0xff]   ;;  %v702_v34 = vpop.f32.mrb[96].mxu0  ;;  %16866 = vmatprep.mubr.msk.bf16.mxu1 %vm1086_vm1, %v17748_v31  ;;  %16875 = vmatpush3.bf16.msra.mxu1 %v17749_v18  ;;  %v2916_v18 = vrot.slane %v17771_v16, 2  ;;  %v17812_v16 = vld [vmem:[#allocation2 + $0x88] sm:$0xff]  }
 0x1d5   :  { %1002 = vst.msk [vmem:[#allocation2 + $0xbc] sm:$0xf] %vm954_vm0, %v16308_v32  ;;  %v703_v35 = vadd.f32 %v19420_v23, %v702_v34  ;;  %v704_v36 = vpop.f32.mrb[97].mxu0  ;;  %16876 = vmatprep.subr.bf16.mxu1 %v17751_v28  ;;  %v4082_v11 = vrot.slane %v17796_v33, 3  ;;  %17037 = vmatpush3.bf16.msra.mxu0 %v17806_v24  ;;  %v17815_v53 = vld [vmem:[#allocation2 + $0xb0] sm:$0xff]   ;;  %v2921_v30 = vsel %vm1410_vm4, %v2918_v19, %v2920_v27  ;;  %v17782_v33 = vld [vmem:[#allocation2 + $0x68] sm:$0xff]  }
 0x1d6   :  { %v705_v38 = vpop.f32.mrb[98].mxu0  ;;  %v4551_v59 = vrot.slane %v17815_v53, 2  ;;  %v2917_v21 = vsel %vm1410_vm4, %v2914_v13, %v2916_v18  ;;  %v2919_v24 = vsel %vm1410_vm4, %v2916_v18, %v2918_v19  ;;  %v17781_v32 = vld [vmem:[#allocation2 + $0x60] sm:$0xfc]   ;;  %v3128_v36 = vrot.slane %v17782_v33, 2 }
 0x1d7   :  { %v756_v41 = vmax.f32 %v703_v35, 0.0  ;;  %v706_v42 = vpop.f32.mrb[99].mxu0  ;;  %v4083_v44 = vsel %vm1516_vm2, %v4080_v20, %v4082_v11  ;;  %v17774_v20 = vld [vmem:[%s22630_s4 + $0x128] sm:$0xff]   ;;  %v17784_v34 = vld [vmem:[%s22630_s4 + $0x140] sm:$0xff]   ;;  %v3127_v35 = vrot.slane %v17781_v32, 2  ;;  %v17787_v38 = vld [vmem:[#allocation2 + $0x78] sm:$0xff]  }
 0x1d8   :  { %16877 = vmatpush3.bf16.msra.mxu1 %v17751_v28  ;;  %17003 = vmatmul.mubr.msk.bf16.gmra.mrb[116].mxu0 %vm1086_vm1, %v4083_v44  ;;  %v4552_v63 = vsel %vm1410_vm4, %v4549_v58, %v4551_v59  ;;  %v2922_v28 = vrot.slane %v17776_v25, 2  ;;  %v3132_v40 = vrot.slane %v17787_v38, 2  ;;  %v1195_v53 = vld [vmem:[#allocation5 + $0x50] sm:$0xf] }
 0x1d9   :  { %v16309_v23 = vpack.c.bf16 %v756_v41, %v756_v41  ;;  %16890 = vmatprep.subr.bf16.mxu1 %v17753_v37  ;;  %v17791_v41 = vld [vmem:[%s22630_s4 + $0x148] sm:$0xff]   ;;  %v17813_v18 = vld [vmem:[#allocation2 + $0x90] ss:$0 sps:$4 sm:$0x77]   ;;  %v17817_v32 = vld [vmem:[%s22630_s4 + $0x198] sm:$0xff]  }
 0x1da   :  { %v2923_v31 = vsel %vm1410_vm4, %v2920_v27, %v2922_v28  ;;  %v17819_v38 = vld [vmem:[#allocation2 + $0x98] sm:$0xff]  }
 0x1db   :  { %1003 = vst.msk [vmem:[#allocation2 + $0xc0] sm:$0xf] %vm954_vm0, %v16309_v23  ;;  %16867 = vmatmul.mubr.msk.bf16.gmra.mrb[56].mxu1 %vm1086_vm1, %v17750_v43  ;;  %v17792_v43 = vld [vmem:[#allocation2 + $0x80] sm:$0xff]   ;;  %v17793_v23 = vld [vmem:[#allocation2 + $0x88] ss:$0 sps:$4 sm:$0xff]  }
 0x1dc   :  { %v17802_v48 = vld [vmem:[#allocation2 + $0xb8] sm:$0x1f]   ;;  %16878 = vmatprep.mubr.msk.bf16.mxu1 %vm1086_vm1, %v17752_v45  ;;  %v17794_v45 = vld [vmem:[%s22630_s4 + $0x150] sm:$0xff]   ;;  %v3134_v46 = vrot.slane %v17792_v43, 2  ;;  %v3136_v47 = vrot.slane %v17793_v23, 2 }
 0x1dd   :  { %v4084_v49 = vrot.slane %v17802_v48, 3  ;;  %v17816_v62 = vld [vmem:[#allocation2 + $0xb8] sm:$0xff]  }
 0x1de   :  { %v4553_v5 = vrot.slane %v17816_v62, 2  ;;  %v17799_v48 = vld [vmem:[%s22630_s4 + $0x158] sm:$0xff]   ;;  %v3137_v50 = vsel %vm1410_vm4, %v3134_v46, %v3136_v47 }
 0x1df   :  { %v4085_v51 = vsel %vm1516_vm2, %v4082_v11, %v4084_v49  ;;  %v3129_v11 = vsel %vm1410_vm4, %v3127_v35, %v3128_v36 }
 0x1e0   :  { %17006 = vmatprep.mubr.msk.bf16.mxu0 %vm1086_vm1, %v4085_v51  ;;  %v4554_v10 = vsel %vm1410_vm4, %v4551_v59, %v4553_v5  ;;  %v17800_v51 = vld [vmem:[#allocation2 + $0x68] sm:$0xfe]  }
 0x1e1   :  { %17007 = vmatmul.mubr.msk.bf16.gmra.mrb[120].mxu0 %vm1086_vm1, %v4084_v49  ;;  %v3135_v49 = vsel %vm1410_vm4, %v3132_v40, %v3134_v46  ;;  %v3384_v59 = vrot.slane %v17800_v51, 1 }
 0x1e2   :  { %17038 = vmatprep.mubr.msk.bf16.mxu0 %vm1086_vm1, %v4548_v52  ;;  %v17823_v1 = vld [vmem:[#allocation2 + $0xc0] ss:$0 sps:$4 sm:$0xff]   ;;  %v17801_v52 = vld [vmem:[#allocation2 + $0x70] sm:$0xff]  }
 0x1e3   :  { %16879 = vmatmul.mubr.msk.bf16.vlgmr.msra.gmra.mrb[60].mxu1 %vm1086_vm1, %v17754_v54  ;;  %v4555_v8 = vrot.slane %v17823_v1, 2  ;;  %v17804_v54 = vld [vmem:[%s22630_s4 + $0x180] sm:$0xff]  }
 0x1e4   :  { %16891 = vmatpush3.bf16.msra.mxu1 %v17753_v37  ;;  %16882 = vmatprep.mubr.msk.bf16.mxu1 %vm1086_vm1, %v17755_v57  ;;  %v17785_v37 = vld [vmem:[#allocation2 + $0x70] sm:$0xff]  }
 0x1e5   :  { %16892 = vmatprep.subr.bf16.mxu1 %v17759_v55  ;;  %v4556_v14 = vsel %vm1410_vm4, %v4553_v5, %v4555_v8  ;;  %v3130_v39 = vrot.slane %v17785_v37, 2 }
 0x1e7   :  { %v3131_v42 = vsel %vm1410_vm4, %v3128_v36, %v3130_v39  ;;  %v3133_v44 = vsel %vm1410_vm4, %v3130_v39, %v3132_v40 }
 0x1e8   :  { %16893 = vmatpush3.bf16.msra.mxu1 %v17759_v55 }
 0x1e9   :  { %16894 = vmatprep.subr.bf16.mxu1 %v17763_v60  ;;  %17039 = vmatmul.mubr.msk.bf16.vlgmr.msra.gmra.mrb[124].mxu0 %vm1086_vm1, %v4550_v56 }
 0x1ea   :  { %17042 = vmatprep.mubr.msk.bf16.mxu0 %vm1086_vm1, %v4552_v63  ;;  %v17805_v63 = vld [vmem:[#allocation2 + $0x78] sm:$0xff]  }
 0x1eb   :  { %16883 = vmatmul.mubr.msk.bf16.gmra.mrb[64].mxu1 %vm1086_vm1, %v17761_v2  ;;  %v17807_v2 = vld [vmem:[#allocation2 + $0x80] sm:$0xff]  }
 0x1ec   :  { %16886 = vmatprep.mubr.msk.bf16.mxu1 %vm1086_vm1, %v17762_v4  ;;  %16895 = vmatpush3.bf16.msra.mxu1 %v17763_v60  ;;  %v3385_v60 = vrot.slane %v17801_v52, 1  ;;  %v3387_v4 = vrot.slane %v17805_v63, 1  ;;  %v3389_v6 = vrot.slane %v17807_v2, 1  ;;  %v17824_v2 = vld [vmem:[%s22630_s4 + $0x1c8] sm:$0xff]  }
 0x1ed   :  { %16896 = vmatprep.subr.bf16.mxu1 %v17767_v3 }
 0x1ee   :  { %v3386_v1 = vsel %vm1991_vm3, %v3384_v59, %v3385_v60  ;;  %v3390_v17 = vsel %vm1991_vm3, %v3387_v4, %v3389_v6 }
 0x1f0   :  { %16897 = vmatpush3.bf16.msra.mxu1 %v17767_v3 }
 0x1f1   :  { %16910 = vmatprep.subr.bf16.mxu1 %v17770_v9  ;;  %17043 = vmatmul.mubr.msk.bf16.gmra.mrb[128].mxu0 %vm1086_vm1, %v4554_v10 }
 0x1f2   :  { %17046 = vmatprep.mubr.msk.bf16.mxu0 %vm1086_vm1, %v4556_v14 }
 0x1f3   :  { %16887 = vmatmul.mubr.msk.bf16.gmra.mrb[68].mxu1 %vm1086_vm1, %v17766_v15  ;;  %v3388_v15 = vsel %vm1991_vm3, %v3385_v60, %v3387_v4  ;;  %v17825_v4 = vld [vmem:[#allocation2 + $0xb0] sm:$0xff]  }
 0x1f4   :  { %16898 = vmatprep.mubr.msk.bf16.mxu1 %vm1086_vm1, %v2915_v61 }
 0x1f9   :  { %17047 = vmatmul.mubr.msk.bf16.gmra.mrb[132].mxu0 %vm1086_vm1, %v4555_v8 }
 0x1fb   :  { %16899 = vmatmul.mubr.msk.bf16.vlgmr.msra.gmra.mrb[0].mxu1 %vm1086_vm1, %v2917_v21  ;;  %v17814_v21 = vld [vmem:[%s22630_s4 + $0x190] sm:$0xff]  }
 0x1fc   :  { %16911 = vmatpush3.bf16.msra.mxu1 %v17770_v9  ;;  %16902 = vmatprep.mubr.msk.bf16.mxu1 %vm1086_vm1, %v2919_v24  ;;  %v3391_v24 = vrot.slane %v17812_v16, 1 }
 0x1fd   :  { %16912 = vmatprep.subr.bf16.mxu1 %v17774_v20 }
 0x1fe   :  { %v3392_v35 = vsel %vm1991_vm3, %v3389_v6, %v3391_v24  ;;  %v17826_v6 = vld [vmem:[#allocation2 + $0xb8] sm:$0x1f]  }
 0x200   :  { %16913 = vmatpush3.bf16.msra.mxu1 %v17774_v20 }
 0x201   :  { %16914 = vmatprep.subr.bf16.mxu1 %v17777_v26 }
 0x203   :  { %16903 = vmatmul.mubr.msk.bf16.gmra.mrb[4].mxu1 %vm1086_vm1, %v2921_v30 }
 0x204   :  { %16906 = vmatprep.mubr.msk.bf16.mxu1 %vm1086_vm1, %v2923_v31  ;;  %16915 = vmatpush3.bf16.msra.mxu1 %v17777_v26  ;;  %v3393_v26 = vrot.slane %v17813_v18, 1 }
 0x205   :  { %16916 = vmatprep.subr.bf16.mxu1 %v17780_v29 }
 0x206   :  { %v3394_v37 = vsel %vm1991_vm3, %v3391_v24, %v3393_v26 }
 0x208   :  { %16917 = vmatpush3.bf16.msra.mxu1 %v17780_v29 }
 0x209   :  { %16930 = vmatprep.subr.bf16.mxu1 %v17784_v34 }
 0x20b   :  { %16907 = vmatmul.mubr.msk.bf16.gmra.mrb[72].mxu1 %vm1086_vm1, %v2922_v28 }
 0x20c   :  { %16918 = vmatprep.mubr.msk.bf16.mxu1 %vm1086_vm1, %v3129_v11  ;;  %v17818_v11 = vld [vmem:[#allocation2 + $0x90] sm:$0xf8]  }
 0x20d   :  { %v3858_v23 = vrot.slane %v17818_v11, 3 }
 0x213   :  { %16919 = vmatmul.mubr.msk.bf16.vlgmr.msra.gmra.mrb[76].mxu1 %vm1086_vm1, %v3131_v42 }
 0x214   :  { %16931 = vmatpush3.bf16.msra.mxu1 %v17784_v34  ;;  %16922 = vmatprep.mubr.msk.bf16.mxu1 %vm1086_vm1, %v3133_v44 }
 0x215   :  { %16932 = vmatprep.subr.bf16.mxu1 %v17791_v41 }
 0x218   :  { %16933 = vmatpush3.bf16.msra.mxu1 %v17791_v41  ;;  %v17820_v41 = vld [vmem:[%s22630_s4 + $0x1c0] sm:$0xff]  }
 0x219   :  { %16934 = vmatprep.subr.bf16.mxu1 %v17794_v45 }
 0x21b   :  { %16923 = vmatmul.mubr.msk.bf16.gmra.mrb[80].mxu1 %vm1086_vm1, %v3135_v49 }
 0x21c   :  { %16926 = vmatprep.mubr.msk.bf16.mxu1 %vm1086_vm1, %v3137_v50  ;;  %16935 = vmatpush3.bf16.msra.mxu1 %v17794_v45  ;;  %v3859_v45 = vrot.slane %v17819_v38, 3 }
 0x21d   :  { %16936 = vmatprep.subr.bf16.mxu1 %v17799_v48 }
 0x21e   :  { %v16748_v55 = vpop.f32.mrb[8].mxu1 }
 0x21f   :  { %v1206_v57 = vadd.f32 %v16748_v55, %v1195_v53  ;;  %v19605_v58 = vpop.f32.mrb[9].mxu1  ;;  %v17821_v53 = vld [vmem:[#allocation2 + $0xa0] sm:$0xff]   ;;  %v17822_v55 = vld [vmem:[#allocation2 + $0xa8] sm:$0xff]  }
 0x220   :  { %v16749_v56 = vpop.f32.mrb[10].mxu1  ;;  %16937 = vmatpush3.bf16.msra.mxu1 %v17799_v48  ;;  %v3861_v63 = vrot.slane %v17821_v53, 3 }
 0x221   :  { %1217 = vst [vmem:[#allocation5 + $0x50] sm:$0xf] %v1206_v57  ;;  %v19607_v62 = vpop.f32.mrb[11].mxu1  ;;  %16970 = vmatprep.subr.bf16.mxu1 %v17804_v54 }
 0x223   :  { %16927 = vmatmul.mubr.msk.bf16.gmra.mrb[84].mxu1 %vm1086_vm1, %v3136_v47 }
 0x224   :  { %16938 = vmatprep.mubr.msk.bf16.mxu1 %vm1086_vm1, %v3386_v1  ;;  %v3863_v1 = vrot.slane %v17822_v55, 3 }
 0x226   :  { %v16760_v3 = vpop.f32.mrb[12].mxu1 }
 0x227   :  { %v1342_v5 = vpop.f32.mrb[13].mxu1  ;;  %v1414_v8 = vrot.slane %v16760_v3, 2  ;;  %v3862_v3 = vsel %vm1516_vm2, %v3859_v45, %v3861_v63 }
 0x228   :  { %v16761_v7 = vpop.f32.mrb[14].mxu1  ;;  %v1411_v13 = vrot.slane %v1342_v5, 2  ;;  %v1398_v46 = vld [vmem:[#allocation5 + $0x50] sm:$0x3]  ;;  %v3864_v5 = vsel %vm1516_vm2, %v3861_v63, %v3863_v1 }
 0x229   :  { %v1416_v9 = vrot.slane %v16761_v7, 2  ;;  %v1345_v10 = vpop.f32.mrb[15].mxu1  ;;  %v3867_v7 = vrot.slane %v17826_v6, 3 }
 0x22a   :  { %v1412_v14 = vrot.slane %v1345_v10, 2 }
 0x22b   :  { %v19617_v61 = vsel %vm1410_vm4, %v1414_v8, %v1416_v9  ;;  %16939 = vmatmul.mubr.msk.bf16.vlgmr.msra.gmra.mrb[0].mxu1 %vm1086_vm1, %v3388_v15 }
 0x22c   :  { %v19622_v19 = vsel %vm1410_vm4, %v1411_v13, %v1412_v14  ;;  %v19625_v20 = vsel %vm1410_vm4, %v1412_v14, %v1414_v8  ;;  %16971 = vmatpush3.bf16.msra.mxu1 %v17804_v54  ;;  %16942 = vmatprep.mubr.msk.bf16.mxu1 %vm1086_vm1, %v3390_v17  ;;  %v3860_v54 = vsel %vm1516_vm2, %v3858_v23, %v3859_v45  ;;  %v17828_v8 = vld [vmem:[%s22630_s4 + $0x1d8] sm:$0xff]   ;;  %v17830_v13 = vld [vmem:[#allocation2 + $0xa0] sm:$0xff]  }
 0x22d   :  { %16972 = vmatprep.subr.bf16.mxu1 %v17811_v12  ;;  %v17834_v23 = vld [vmem:[#allocation2 + $0xc0] ss:$0 sps:$4 sm:$0xff]  }
 0x22e   :  { %v16764_v22 = vpop.f32.mrb[16].mxu1  ;;  %v4341_v55 = vrot.slane %v17834_v23, 2 }
 0x22f   :  { %v1358_v25 = vpop.f32.mrb[17].mxu1  ;;  %v1422_v29 = vrot.slane %v16764_v22, 2 }
 0x230   :  { %v1418_v27 = vrot.slane %v1358_v25, 2  ;;  %v16765_v28 = vpop.f32.mrb[18].mxu1  ;;  %16973 = vmatpush3.bf16.msra.mxu1 %v17811_v12  ;;  %v17829_v12 = vld [vmem:[#allocation2 + $0x98] sm:$0xfc]  }
 0x231   :  { %v1424_v30 = vrot.slane %v16765_v28, 2  ;;  %v1361_v31 = vpop.f32.mrb[19].mxu1  ;;  %16974 = vmatprep.subr.bf16.mxu1 %v17814_v21  ;;  %v4332_v18 = vrot.slane %v17829_v12, 2 }
 0x232   :  { %v19635_v33 = vsel %vm1410_vm4, %v1416_v9, %v1418_v27  ;;  %v1420_v34 = vrot.slane %v1361_v31, 2 }
 0x233   :  { %v19639_v36 = vsel %vm1410_vm4, %v1422_v29, %v1424_v30  ;;  %16943 = vmatmul.mubr.msk.bf16.gmra.mrb[4].mxu1 %vm1086_vm1, %v3392_v35 }
 0x234   :  { %v19644_v39 = vsel %vm1410_vm4, %v1418_v27, %v1420_v34  ;;  %v19647_v40 = vsel %vm1410_vm4, %v1420_v34, %v1422_v29  ;;  %16946 = vmatprep.mubr.msk.bf16.mxu1 %vm1086_vm1, %v3394_v37  ;;  %16975 = vmatpush3.bf16.msra.mxu1 %v17814_v21  ;;  %v4333_v21 = vrot.slane %v17830_v13, 2  ;;  %v17831_v27 = vld [vmem:[#allocation2 + $0xa8] sm:$0xff]   ;;  %v17832_v29 = vld [vmem:[#allocation2 + $0xb0] sm:$0xff]  }
 0x235   :  { %16976 = vmatprep.subr.bf16.mxu1 %v17817_v32  ;;  %v4335_v31 = vrot.slane %v17831_v27, 2  ;;  %v4337_v34 = vrot.slane %v17832_v29, 2 }
 0x236   :  { %v16768_v42 = vpop.f32.mrb[20].mxu1  ;;  %v4334_v28 = vsel %vm1410_vm4, %v4332_v18, %v4333_v21 }
 0x237   :  { %v1430_v43 = vrot.slane %v16768_v42, 2  ;;  %v1374_v44 = vpop.f32.mrb[21].mxu1 }
 0x238   :  { %v1426_v47 = vrot.slane %v1374_v44, 2  ;;  %v16769_v48 = vpop.f32.mrb[22].mxu1  ;;  %16977 = vmatpush3.bf16.msra.mxu1 %v17817_v32  ;;  %v4336_v44 = vsel %vm1410_vm4, %v4333_v21, %v4335_v31 }
 0x239   :  { %v1453_v49 = vadd.f32 %v1430_v43, %v1398_v46  ;;  %v1377_v50 = vpop.f32.mrb[23].mxu1  ;;  %17010 = vmatprep.subr.bf16.mxu1 %v17820_v41  ;;  %v4338_v46 = vsel %vm1410_vm4, %v4335_v31, %v4337_v34 }
 0x23a   :  { %v19654_v51 = vsel %vm1410_vm4, %v1424_v30, %v1426_v47  ;;  %v1428_v52 = vrot.slane %v1377_v50, 2 }
 0x23b   :  { %1464 = vst [vmem:[#allocation5 + $0x50] sm:$0x3] %v1453_v49  ;;  %16947 = vmatmul.mubr.msk.bf16.gmra.mrb[88].mxu1 %vm1086_vm1, %v3393_v26 }
 0x23c   :  { %v1429_v57 = vsel %vm1410_vm4, %v1426_v47, %v1428_v52  ;;  %v1431_v59 = vsel %vm1410_vm4, %v1428_v52, %v1430_v43  ;;  %16978 = vmatprep.mubr.msk.bf16.mxu1 %vm1086_vm1, %v3860_v54 }
 0x23d   :  { %v1451_v60 = vadd.f32 %v1429_v57, %v19605_v58  ;;  %v1452_v56 = vadd.f32 %v1431_v59, %v19607_v62  ;;  %v17827_v58 = vld [vmem:[%s22630_s4 + $0x1d0] sm:$0xff]   ;;  %v3865_v62 = vrot.slane %v17825_v4, 3 }
 0x23f   :  { %v3866_v9 = vsel %vm1516_vm2, %v3863_v1, %v3865_v62  ;;  %v3868_v10 = vsel %vm1516_vm2, %v3865_v62, %v3867_v7 }
 0x242   :  { %v1660_v14 = vld [vmem:[#allocation5 + $0x50] sm:$0xf] }
 0x243   :  { %16979 = vmatmul.mubr.msk.bf16.vlgmr.msra.gmra.mrb[0].mxu1 %vm1086_vm1, %v3862_v3 }
 0x244   :  { %17011 = vmatpush3.bf16.msra.mxu1 %v17820_v41  ;;  %16982 = vmatprep.mubr.msk.bf16.mxu1 %vm1086_vm1, %v3864_v5  ;;  %v17833_v41 = vld [vmem:[#allocation2 + $0xb8] sm:$0xff]  }
 0x245   :  { %17012 = vmatprep.subr.bf16.mxu1 %v17824_v2  ;;  %v4339_v53 = vrot.slane %v17833_v41, 2 }
 0x247   :  { %v4340_v1 = vsel %vm1410_vm4, %v4337_v34, %v4339_v53 }
 0x248   :  { %17013 = vmatpush3.bf16.msra.mxu1 %v17824_v2 }
 0x249   :  { %17014 = vmatprep.subr.bf16.mxu1 %v17827_v58 }
 0x24b   :  { %16983 = vmatmul.mubr.msk.bf16.gmra.mrb[4].mxu1 %vm1086_vm1, %v3866_v9 }
 0x24c   :  { %16986 = vmatprep.mubr.msk.bf16.mxu1 %vm1086_vm1, %v3868_v10  ;;  %17015 = vmatpush3.bf16.msra.mxu1 %v17827_v58 }
 0x24d   :  { %17016 = vmatprep.subr.bf16.mxu1 %v17828_v8 }
 0x24e   :  { %v16788_v15 = vpop.f32.mrb[24].mxu1 }
 0x24f   :  { %v1671_v16 = vadd.f32 %v16788_v15, %v1660_v14  ;;  %v1636_v17 = vpop.f32.mrb[25].mxu1 }
 0x250   :  { %v19680_v22 = vadd.f32 %v1636_v17, %v1451_v60  ;;  %v16789_v24 = vpop.f32.mrb[26].mxu1  ;;  %17017 = vmatpush3.bf16.msra.mxu1 %v17828_v8 }
 0x251   :  { %1682 = vst [vmem:[#allocation5 + $0x50] sm:$0xf] %v1671_v16  ;;  %v1639_v25 = vpop.f32.mrb[27].mxu1 }
 0x252   :  { %v19682_v26 = vadd.f32 %v1639_v25, %v1452_v56 }
 0x253   :  { %16987 = vmatmul.mubr.msk.bf16.gmra.mrb[92].mxu1 %vm1086_vm1, %v3867_v7 }
 0x254   :  { %17018 = vmatprep.mubr.msk.bf16.mxu1 %vm1086_vm1, %v4334_v28 }
 0x256   :  { %v16800_v30 = vpop.f32.mrb[28].mxu1 }
 0x257   :  { %v1821_v32 = vpop.f32.mrb[29].mxu1  ;;  %v1892_v37 = vrot.slane %v16800_v30, 2 }
 0x258   :  { %v16801_v35 = vpop.f32.mrb[30].mxu1  ;;  %v1889_v42 = vrot.slane %v1821_v32, 2  ;;  %v1877_v10 = vld [vmem:[#allocation5 + $0x50] sm:$0x3] }
 0x259   :  { %v1894_v11 = vrot.slane %v16801_v35, 2  ;;  %v1824_v38 = vpop.f32.mrb[31].mxu1 }
 0x25a   :  { %v1890_v43 = vrot.slane %v1824_v38, 2 }
 0x25b   :  { %v1895_v45 = vsel %vm1410_vm4, %v1892_v37, %v1894_v11  ;;  %17019 = vmatmul.mubr.msk.bf16.vlgmr.msra.gmra.mrb[0].mxu1 %vm1086_vm1, %v4336_v44 }
 0x25c   :  { %v19692_v47 = vadd.f32 %v1895_v45, %v19617_v61  ;;  %v1891_v48 = vsel %vm1410_vm4, %v1889_v42, %v1890_v43  ;;  %v1893_v49 = vsel %vm1410_vm4, %v1890_v43, %v1892_v37  ;;  %17022 = vmatprep.mubr.msk.bf16.mxu1 %vm1086_vm1, %v4338_v46 }
 0x25d   :  { %v19698_v50 = vadd.f32 %v1891_v48, %v19622_v19  ;;  %v19701_v52 = vadd.f32 %v1893_v49, %v19625_v20  ;;  %v4342_v19 = vsel %vm1410_vm4, %v4339_v53, %v4341_v55 }
 0x25e   :  { %v16804_v54 = vpop.f32.mrb[32].mxu1 }
 0x25f   :  { %v1837_v57 = vpop.f32.mrb[33].mxu1  ;;  %v1900_v61 = vrot.slane %v16804_v54, 2 }
 0x260   :  { %v1896_v59 = vrot.slane %v1837_v57, 2  ;;  %v16805_v60 = vpop.f32.mrb[34].mxu1 }
 0x261   :  { %v1902_v56 = vrot.slane %v16805_v60, 2  ;;  %v1840_v63 = vpop.f32.mrb[35].mxu1 }
 0x262   :  { %v1897_v2 = vsel %vm1410_vm4, %v1894_v11, %v1896_v59  ;;  %v1898_v3 = vrot.slane %v1840_v63, 2 }
 0x263   :  { %v19707_v4 = vadd.f32 %v1897_v2, %v19635_v33  ;;  %v1903_v20 = vsel %vm1410_vm4, %v1900_v61, %v1902_v56  ;;  %17023 = vmatmul.mubr.msk.bf16.gmra.mrb[4].mxu1 %vm1086_vm1, %v4340_v1 }
 0x264   :  { %v19712_v5 = vadd.f32 %v1903_v20, %v19639_v36  ;;  %v1899_v6 = vsel %vm1410_vm4, %v1896_v59, %v1898_v3  ;;  %v1901_v58 = vsel %vm1410_vm4, %v1898_v3, %v1900_v61  ;;  %17026 = vmatprep.mubr.msk.bf16.mxu1 %vm1086_vm1, %v4342_v19 }
 0x265   :  { %v19718_v62 = vadd.f32 %v1899_v6, %v19644_v39  ;;  %v19721_v7 = vadd.f32 %v1901_v58, %v19647_v40 }
 0x266   :  { %v16808_v33 = vpop.f32.mrb[36].mxu1 }
 0x267   :  { %v1908_v8 = vrot.slane %v16808_v33, 2  ;;  %v1853_v9 = vpop.f32.mrb[37].mxu1 }
 0x268   :  { %v1904_v12 = vrot.slane %v1853_v9, 2  ;;  %v16809_v13 = vpop.f32.mrb[38].mxu1 }
 0x269   :  { %v1931_v36 = vadd.f32 %v1908_v8, %v1877_v10  ;;  %v1856_v14 = vpop.f32.mrb[39].mxu1 }
 0x26a   :  { %v1905_v15 = vsel %vm1410_vm4, %v1902_v56, %v1904_v12  ;;  %v1906_v16 = vrot.slane %v1856_v14, 2 }
 0x26b   :  { %1942 = vst [vmem:[#allocation5 + $0x50] sm:$0x3] %v1931_v36  ;;  %v19725_v17 = vadd.f32 %v1905_v15, %v19654_v51  ;;  %17027 = vmatmul.mubr.msk.bf16.gmra.mrb[96].mxu1 %vm1086_vm1, %v4341_v55 }
 0x26c   :  { %v1907_v39 = vsel %vm1410_vm4, %v1904_v12, %v1906_v16  ;;  %v1909_v40 = vsel %vm1410_vm4, %v1906_v16, %v1908_v8 }
 0x26d   :  { %v1929_v18 = vadd.f32 %v1907_v39, %v19680_v22  ;;  %v1930_v21 = vadd.f32 %v1909_v40, %v19682_v26 }
 0x272   :  { %v2135_v37 = vld [vmem:[#allocation5 + $0x50] sm:$0xf] }
 0x273   :  { %v16960_v24 = vpop.f32.mrb[100].mxu0 }
 0x274   :  { %v3756_v25 = vrot.slane %v16960_v24, 2  ;;  %v3685_v27 = vpop.f32.mrb[101].mxu0 }
 0x275   :  { %v3753_v28 = vrot.slane %v3685_v27, 2  ;;  %v16961_v29 = vpop.f32.mrb[102].mxu0 }
 0x276   :  { %v3758_v30 = vrot.slane %v16961_v29, 2  ;;  %v3688_v31 = vpop.f32.mrb[103].mxu0 }
 0x277   :  { %v3754_v32 = vrot.slane %v3688_v31, 2 }
 0x278   :  { %v19733_v51 = vsel %vm1410_vm4, %v3756_v25, %v3758_v30 }
 0x279   :  { %v19736_v34 = vsel %vm1410_vm4, %v3753_v28, %v3754_v32  ;;  %v19739_v35 = vsel %vm1410_vm4, %v3754_v32, %v3756_v25 }
 0x27e   :  { %v16828_v22 = vpop.f32.mrb[40].mxu1 }
 0x27f   :  { %v2146_v26 = vadd.f32 %v16828_v22, %v2135_v37  ;;  %v2111_v11 = vpop.f32.mrb[41].mxu1 }
 0x280   :  { %v19741_v38 = vadd.f32 %v2111_v11, %v1929_v18  ;;  %v16829_v41 = vpop.f32.mrb[42].mxu1 }
 0x281   :  { %2157 = vst [vmem:[#allocation5 + $0x50] sm:$0xf] %v2146_v26  ;;  %v2114_v42 = vpop.f32.mrb[43].mxu1 }
 0x282   :  { %v19743_v43 = vadd.f32 %v2114_v42, %v1930_v21 }
 0x283   :  { %v16964_v44 = vpop.f32.mrb[104].mxu0 }
 0x284   :  { %v3764_v23 = vrot.slane %v16964_v44, 2  ;;  %v3701_v45 = vpop.f32.mrb[105].mxu0 }
 0x285   :  { %v3760_v46 = vrot.slane %v3701_v45, 2  ;;  %v16965_v48 = vpop.f32.mrb[106].mxu0 }
 0x286   :  { %v16840_v49 = vpop.f32.mrb[44].mxu1  ;;  %v3766_v53 = vrot.slane %v16965_v48, 2  ;;  %v3704_v54 = vpop.f32.mrb[107].mxu0 }
 0x287   :  { %v2293_v55 = vpop.f32.mrb[45].mxu1  ;;  %v19746_v57 = vsel %vm1410_vm4, %v3758_v30, %v3760_v46  ;;  %v3762_v59 = vrot.slane %v3704_v54, 2  ;;  %v2364_v56 = vrot.slane %v16840_v49, 2 }
 0x288   :  { %v16841_v60 = vpop.f32.mrb[46].mxu1  ;;  %v19749_v61 = vsel %vm1410_vm4, %v3764_v23, %v3766_v53  ;;  %v2361_v19 = vrot.slane %v2293_v55, 2 }
 0x289   :  { %v2366_v63 = vrot.slane %v16841_v60, 2  ;;  %v2296_v1 = vpop.f32.mrb[47].mxu1  ;;  %v19752_v2 = vsel %vm1410_vm4, %v3760_v46, %v3762_v59  ;;  %v19755_v3 = vsel %vm1410_vm4, %v3762_v59, %v3764_v23 }
 0x28a   :  { %v2362_v20 = vrot.slane %v2296_v1, 2 }
 0x28b   :  { %v2367_v6 = vsel %vm1410_vm4, %v2364_v56, %v2366_v63  ;;  %v19758_v58 = vpop.f32.mrb[108].mxu0 }
 0x28c   :  { %v19761_v33 = vadd.f32 %v19692_v47, %v2367_v6  ;;  %v2363_v8 = vsel %vm1410_vm4, %v2361_v19, %v2362_v20  ;;  %v2365_v9 = vsel %vm1410_vm4, %v2362_v20, %v2364_v56  ;;  %v3717_v10 = vpop.f32.mrb[109].mxu0  ;;  %v3772_v36 = vrot.slane %v19758_v58, 2  ;;  %v20036_v58 = vld [vmem:[%s22633_s5] ss:$0 sm:$0xff] }
 0x28d   :  { %v19766_v12 = vadd.f32 %v19698_v50, %v2363_v8  ;;  %v19769_v13 = vadd.f32 %v19701_v52, %v2365_v9  ;;  %v3768_v14 = vrot.slane %v3717_v10, 2  ;;  %v16969_v15 = vpop.f32.mrb[110].mxu0 }
 0x28e   :  { %v16844_v16 = vpop.f32.mrb[48].mxu1  ;;  %v3720_v39 = vpop.f32.mrb[111].mxu0  ;;  %v17838_v15 = vld [vmem:[%s22632_s6 + $0x48] sm:$0xff]  }
 0x28f   :  { %v2309_v40 = vpop.f32.mrb[49].mxu1  ;;  %v19773_v47 = vsel %vm1410_vm4, %v3766_v53, %v3768_v14  ;;  %v3770_v18 = vrot.slane %v3720_v39, 2  ;;  %v2372_v25 = vrot.slane %v16844_v16, 2 }
 0x290   :  { %v2368_v21 = vrot.slane %v2309_v40, 2  ;;  %v16845_v24 = vpop.f32.mrb[50].mxu1 }
 0x291   :  { %v2374_v27 = vrot.slane %v16845_v24, 2  ;;  %v2312_v50 = vpop.f32.mrb[51].mxu1  ;;  %v19776_v28 = vsel %vm1410_vm4, %v3768_v14, %v3770_v18  ;;  %v19781_v52 = vsel %vm1410_vm4, %v3770_v18, %v3772_v36  ;;  %v17837_v14 = vld [vmem:[%s22632_s6 + $0x8] sm:$0xff]  }
 0x292   :  { %v2369_v29 = vsel %vm1410_vm4, %v2366_v63, %v2368_v21  ;;  %v2370_v30 = vrot.slane %v2312_v50, 2 }
 0x293   :  { %v19785_v31 = vadd.f32 %v19707_v4, %v2369_v29  ;;  %v2375_v32 = vsel %vm1410_vm4, %v2372_v25, %v2374_v27  ;;  %v2349_v4 = vld [vmem:[#allocation5 + $0x50] sm:$0x3]  ;;  %v17839_v29 = vld [vmem:[%s22632_s6 + $0x10] sm:$0xff]  }
 0x294   :  { %v19789_v22 = vadd.f32 %v19712_v5, %v2375_v32  ;;  %v2371_v37 = vsel %vm1410_vm4, %v2368_v21, %v2370_v30  ;;  %v2373_v26 = vsel %vm1410_vm4, %v2370_v30, %v2372_v25  ;;  %v17840_v30 = vld [vmem:[%s22632_s6 + $0x50] sm:$0xff]  }
 0x295   :  { %v19794_v11 = vadd.f32 %v19718_v62, %v2371_v37  ;;  %v19797_v41 = vadd.f32 %v19721_v7, %v2373_v26 }
 0x296   :  { %v16848_v42 = vpop.f32.mrb[52].mxu1 }
 0x297   :  { %v2380_v44 = vrot.slane %v16848_v42, 2  ;;  %v2325_v23 = vpop.f32.mrb[53].mxu1 }
 0x298   :  { %v2376_v45 = vrot.slane %v2325_v23, 2  ;;  %v16849_v46 = vpop.f32.mrb[54].mxu1 }
 0x299   :  { %v2403_v48 = vadd.f32 %v2380_v44, %v2349_v4  ;;  %v2328_v49 = vpop.f32.mrb[55].mxu1 }
 0x29a   :  { %v2377_v5 = vsel %vm1410_vm4, %v2374_v27, %v2376_v45  ;;  %v2378_v53 = vrot.slane %v2328_v49, 2 }
 0x29b   :  { %2414 = vst [vmem:[#allocation5 + $0x50] sm:$0x3] %v2403_v48  ;;  %v19801_v54 = vadd.f32 %v19725_v17, %v2377_v5  ;;  %v17000_v62 = vpop.f32.mrb[112].mxu0  ;;  %v17841_v5 = vld [vmem:[%s22632_s6 + $0x18] sm:$0xff]  }
 0x29c   :  { %v2379_v55 = vsel %vm1410_vm4, %v2376_v45, %v2378_v53  ;;  %v2381_v7 = vsel %vm1410_vm4, %v2378_v53, %v2380_v44  ;;  %v4233_v59 = vrot.slane %v17000_v62, 2  ;;  %v4162_v60 = vpop.f32.mrb[113].mxu0  ;;  %v17842_v53 = vld [vmem:[%s22632_s6 + $0x58] sm:$0xff]  }
 0x29d   :  { %v2401_v56 = vadd.f32 %v2379_v55, %v19741_v38  ;;  %v2402_v63 = vadd.f32 %v2381_v7, %v19743_v43  ;;  %v4230_v1 = vrot.slane %v4162_v60, 2  ;;  %v17001_v19 = vpop.f32.mrb[114].mxu0  ;;  %v17835_v38 = vld [vmem:[%s22632_s6] sm:$0xff]  }
 0x29e   :  { %v4235_v20 = vrot.slane %v17001_v19, 2  ;;  %v4165_v6 = vpop.f32.mrb[115].mxu0  ;;  %v17836_v43 = vld [vmem:[%s22632_s6 + $0x40] sm:$0xff]   ;;  %17050 = vmatprep.subr.bf16.mxu1 %v17835_v38 }
 0x29f   :  { %v4231_v8 = vrot.slane %v4165_v6, 2  ;;  %17074 = vmatprep.subr.bf16.mxu0 %v17836_v43  ;;  %17051 = vmatpush3.bf16.msra.mxu1 %v17835_v38 }
 0x2a0   :  { %v19808_v9 = vsel %vm1410_vm4, %v4233_v59, %v4235_v20  ;;  %17075 = vmatpush3.bf16.msra.mxu0 %v17836_v43  ;;  %17052 = vmatprep.subr.bf16.mxu1 %v17837_v14 }
 0x2a1   :  { %v19811_v17 = vsel %vm1410_vm4, %v4230_v1, %v4231_v8  ;;  %v19814_v10 = vsel %vm1410_vm4, %v4231_v8, %v4233_v59  ;;  %17076 = vmatprep.subr.bf16.mxu0 %v17838_v15  ;;  %v17844_v1 = vld [vmem:[%s22632_s6 + $0x60] sm:$0xff]  }
 0x2a2   :  { %v2595_v39 = vld [vmem:[#allocation5 + $0x50] sm:$0xf] }
 0x2a3   :  { %17053 = vmatpush3.bf16.msra.mxu1 %v17837_v14 }
 0x2a4   :  { %17077 = vmatpush3.bf16.msra.mxu0 %v17838_v15  ;;  %17054 = vmatprep.subr.bf16.mxu1 %v17839_v29 }
 0x2a5   :  { %17078 = vmatprep.subr.bf16.mxu0 %v17840_v30 }
 0x2a7   :  { %17055 = vmatpush3.bf16.msra.mxu1 %v17839_v29 }
 0x2a8   :  { %17079 = vmatpush3.bf16.msra.mxu0 %v17840_v30  ;;  %17056 = vmatprep.subr.bf16.mxu1 %v17841_v5 }
 0x2a9   :  { %17080 = vmatprep.subr.bf16.mxu0 %v17842_v53 }
 0x2ab   :  { %v17004_v16 = vpop.f32.mrb[116].mxu0  ;;  %17057 = vmatpush3.bf16.msra.mxu1 %v17841_v5 }
 0x2ac   :  { %v4241_v40 = vrot.slane %v17004_v16, 2  ;;  %v4178_v18 = vpop.f32.mrb[117].mxu0  ;;  %17081 = vmatpush3.bf16.msra.mxu0 %v17842_v53  ;;  %v17847_v53 = vld [vmem:[%s22632_s6 + $0x30] sm:$0xff]  }
 0x2ad   :  { %v4237_v21 = vrot.slane %v4178_v18, 2  ;;  %v17005_v24 = vpop.f32.mrb[118].mxu0  ;;  %17082 = vmatprep.subr.bf16.mxu0 %v17844_v1 }
 0x2ae   :  { %v16868_v25 = vpop.f32.mrb[56].mxu1  ;;  %v4243_v27 = vrot.slane %v17005_v24, 2  ;;  %v4181_v50 = vpop.f32.mrb[119].mxu0  ;;  %v17846_v24 = vld [vmem:[%s22632_s6 + $0x68] sm:$0xff]  }
 0x2af   :  { %v2606_v32 = vadd.f32 %v16868_v25, %v2595_v39  ;;  %v2571_v37 = vpop.f32.mrb[57].mxu1  ;;  %v19835_v26 = vsel %vm1410_vm4, %v4235_v20, %v4237_v21  ;;  %v4239_v42 = vrot.slane %v4181_v50, 2 }
 0x2b0   :  { %v19837_v44 = vadd.f32 %v2571_v37, %v2401_v56  ;;  %v16869_v23 = vpop.f32.mrb[58].mxu1  ;;  %v19840_v4 = vsel %vm1410_vm4, %v4241_v40, %v4243_v27  ;;  %17083 = vmatpush3.bf16.msra.mxu0 %v17844_v1 }
 0x2b1   :  { %2617 = vst [vmem:[#allocation5 + $0x50] sm:$0xf] %v2606_v32  ;;  %v2574_v45 = vpop.f32.mrb[59].mxu1  ;;  %v19843_v46 = vsel %vm1410_vm4, %v4237_v21, %v4239_v42  ;;  %v19846_v48 = vsel %vm1410_vm4, %v4239_v42, %v4241_v40  ;;  %v17845_v21 = vld [vmem:[%s22632_s6 + $0x28] sm:$0xff]   ;;  %17084 = vmatprep.subr.bf16.mxu0 %v17846_v24 }
 0x2b2   :  { %v19848_v49 = vadd.f32 %v2574_v45, %v2402_v63  ;;  %v17843_v63 = vld [vmem:[%s22632_s6 + $0x20] sm:$0xff]  }
 0x2b3   :  { %17058 = vmatprep.subr.bf16.mxu1 %v17843_v63 }
 0x2b4   :  { %v19856_v62 = vpop.f32.mrb[120].mxu0  ;;  %17059 = vmatpush3.bf16.msra.mxu1 %v17843_v63  ;;  %17085 = vmatpush3.bf16.msra.mxu0 %v17846_v24 }
 0x2b5   :  { %v4194_v55 = vpop.f32.mrb[121].mxu0  ;;  %v22644_v59 = vrot.slane %v19856_v62, 2  ;;  %17060 = vmatprep.subr.bf16.mxu1 %v17845_v21 }
 0x2b6   :  { %v16880_v7 = vpop.f32.mrb[60].mxu1  ;;  %v4245_v60 = vrot.slane %v4194_v55, 2  ;;  %v17009_v56 = vpop.f32.mrb[122].mxu0  ;;  %v17848_v55 = vld [vmem:[%s22632_s6 + $0x70] sm:$0xff]  }
 0x2b7   :  { %v2742_v19 = vpop.f32.mrb[61].mxu1  ;;  %v4197_v20 = vpop.f32.mrb[123].mxu0  ;;  %v2813_v6 = vrot.slane %v16880_v7, 2  ;;  %17086 = vmatprep.subr.bf16.mxu0 %v17848_v55 }
 0x2b8   :  { %v16881_v8 = vpop.f32.mrb[62].mxu1  ;;  %v19866_v38 = vsel %vm1410_vm4, %v4243_v27, %v4245_v60  ;;  %v4247_v43 = vrot.slane %v4197_v20, 2  ;;  %v2810_v16 = vrot.slane %v2742_v19, 2  ;;  %17061 = vmatpush3.bf16.msra.mxu1 %v17845_v21  ;;  %17087 = vmatpush3.bf16.msra.mxu0 %v17848_v55  ;;  %v17850_v21 = vld [vmem:[%s22632_s6 + $0x78] sm:$0xff]   ;;  %v19934_v55 = vld [vmem:[%s22632_s6 + $0x80] sm:$0xff]  }
 0x2b9   :  { %v2815_v14 = vrot.slane %v16881_v8, 2  ;;  %v2745_v15 = vpop.f32.mrb[63].mxu1  ;;  %17062 = vmatprep.subr.bf16.mxu1 %v17847_v53  ;;  %17088 = vmatprep.subr.bf16.mxu0 %v17850_v21 }
 0x2ba   :  { %v2811_v39 = vrot.slane %v2745_v15, 2  ;;  %v19869_v40 = vsel %vm1410_vm4, %v4245_v60, %v4247_v43  ;;  %v19874_v18 = vsel %vm1410_vm4, %v4247_v43, %v22644_v59 }
 0x2bb   :  { %v2816_v25 = vsel %vm1410_vm4, %v2813_v6, %v2815_v14 }
 0x2bc   :  { %v19884_v27 = vadd.f32 %v19761_v33, %v2816_v25  ;;  %v2812_v50 = vsel %vm1410_vm4, %v2810_v16, %v2811_v39  ;;  %v2814_v29 = vsel %vm1410_vm4, %v2811_v39, %v2813_v6  ;;  %v17040_v30 = vpop.f32.mrb[124].mxu0  ;;  %17063 = vmatpush3.bf16.msra.mxu1 %v17847_v53  ;;  %v17849_v39 = vld [vmem:[%s22632_s6 + $0x38] sm:$0xff]   ;;  %17089 = vmatpush3.bf16.msra.mxu0 %v17850_v21 }
 0x2bd   :  { %v19889_v32 = vadd.f32 %v19766_v12, %v2812_v50  ;;  %v19892_v37 = vadd.f32 %v19769_v13, %v2814_v29  ;;  %v4704_v42 = vrot.slane %v17040_v30, 2  ;;  %v4633_v23 = vpop.f32.mrb[125].mxu0  ;;  %17064 = vmatprep.subr.bf16.mxu1 %v17849_v39 }
 0x2be   :  { %v16884_v45 = vpop.f32.mrb[64].mxu1  ;;  %v4701_v5 = vrot.slane %v4633_v23, 2  ;;  %v17041_v33 = vpop.f32.mrb[126].mxu0 }
 0x2bf   :  { %v2758_v12 = vpop.f32.mrb[65].mxu1  ;;  %v4706_v7 = vrot.slane %v17041_v33, 2  ;;  %v4636_v60 = vpop.f32.mrb[127].mxu0  ;;  %v2821_v13 = vrot.slane %v16884_v45, 2  ;;  %v2798_v33 = vld [vmem:[#allocation5 + $0x50] sm:$0x3] }
 0x2c0   :  { %v2817_v56 = vrot.slane %v2758_v12, 2  ;;  %v16885_v63 = vpop.f32.mrb[66].mxu1  ;;  %v4702_v1 = vrot.slane %v4636_v60, 2  ;;  %17065 = vmatpush3.bf16.msra.mxu1 %v17849_v39 }
 0x2c1   :  { %v2823_v19 = vrot.slane %v16885_v63, 2  ;;  %v2761_v20 = vpop.f32.mrb[67].mxu1  ;;  %v19901_v6 = vsel %vm1410_vm4, %v4704_v42, %v4706_v7  ;;  %17098 = vmatprep.subr.bf16.mxu1 %v19934_v55 }
 0x2c2   :  { %v2818_v8 = vsel %vm1410_vm4, %v2815_v14, %v2817_v56  ;;  %v2819_v43 = vrot.slane %v2761_v20, 2  ;;  %v19905_v15 = vsel %vm1410_vm4, %v4701_v5, %v4702_v1  ;;  %v19908_v16 = vsel %vm1410_vm4, %v4702_v1, %v4704_v42 }
 0x2c3   :  { %v19917_v24 = vadd.f32 %v19785_v31, %v2818_v8  ;;  %v2824_v14 = vsel %vm1410_vm4, %v2821_v13, %v2823_v19 }
 0x2c4   :  { %v19921_v25 = vadd.f32 %v19789_v22, %v2824_v14  ;;  %v2820_v50 = vsel %vm1410_vm4, %v2817_v56, %v2819_v43  ;;  %v2822_v29 = vsel %vm1410_vm4, %v2819_v43, %v2821_v13  ;;  %v17044_v30 = vpop.f32.mrb[128].mxu0 }
 0x2c5   :  { %v19926_v42 = vadd.f32 %v19794_v11, %v2820_v50  ;;  %v19929_v23 = vadd.f32 %v19797_v41, %v2822_v29  ;;  %v4712_v31 = vrot.slane %v17044_v30, 2  ;;  %v4649_v45 = vpop.f32.mrb[129].mxu0  ;;  %v19939_v11 = vld [vmem:[%s22632_s6 + $0x100] sm:$0xff]  }
 0x2c6   :  { %v16888_v5 = vpop.f32.mrb[68].mxu1  ;;  %v4708_v22 = vrot.slane %v4649_v45, 2  ;;  %v17045_v53 = vpop.f32.mrb[130].mxu0  ;;  %17146 = vmatprep.subr.bf16.mxu0 %v19939_v11 }
 0x2c7   :  { %v2829_v41 = vrot.slane %v16888_v5, 2  ;;  %v2774_v12 = vpop.f32.mrb[69].mxu1  ;;  %v4714_v60 = vrot.slane %v17045_v53, 2  ;;  %v4652_v13 = vpop.f32.mrb[131].mxu0 }
 0x2c8   :  { %v2825_v56 = vrot.slane %v2774_v12, 2  ;;  %v16889_v63 = vpop.f32.mrb[70].mxu1  ;;  %v19942_v1 = vsel %vm1410_vm4, %v4706_v7, %v4708_v22  ;;  %v4710_v20 = vrot.slane %v4652_v13, 2 }
 0x2c9   :  { %v2852_v8 = vadd.f32 %v2829_v41, %v2798_v33  ;;  %v2777_v43 = vpop.f32.mrb[71].mxu1  ;;  %v19947_v39 = vsel %vm1410_vm4, %v4712_v31, %v4714_v60 }
 0x2ca   :  { %v2826_v21 = vsel %vm1410_vm4, %v2823_v19, %v2825_v56  ;;  %v2827_v14 = vrot.slane %v2777_v43, 2  ;;  %v19951_v50 = vsel %vm1410_vm4, %v4708_v22, %v4710_v20  ;;  %v19954_v29 = vsel %vm1410_vm4, %v4710_v20, %v4712_v31 }
 0x2cb   :  { %2863 = vst [vmem:[#allocation5 + $0x50] sm:$0x3] %v2852_v8  ;;  %v19957_v7 = vadd.f32 %v19801_v54, %v2826_v21 }
 0x2cc   :  { %v2828_v30 = vsel %vm1410_vm4, %v2825_v56, %v2827_v14  ;;  %v2830_v45 = vsel %vm1410_vm4, %v2827_v14, %v2829_v41  ;;  %v19961_v5 = vpop.f32.mrb[132].mxu0 }
 0x2cd   :  { %v2850_v33 = vadd.f32 %v2828_v30, %v19837_v44  ;;  %v2851_v19 = vadd.f32 %v2830_v45, %v19848_v49  ;;  %v4665_v53 = vpop.f32.mrb[133].mxu0  ;;  %v22645_v22 = vrot.slane %v19961_v5, 2 }
 0x2ce   :  { %v4716_v12 = vrot.slane %v4665_v53, 2  ;;  %v17049_v31 = vpop.f32.mrb[134].mxu0 }
 0x2cf   :  { %v4668_v13 = vpop.f32.mrb[135].mxu0 }
 0x2d0   :  { %v19967_v63 = vsel %vm1410_vm4, %v4714_v60, %v4716_v12  ;;  %v4718_v54 = vrot.slane %v4668_v13, 2 }
 0x2d2   :  { %v19970_v56 = vsel %vm1410_vm4, %v4716_v12, %v4718_v54  ;;  %v19975_v41 = vsel %vm1410_vm4, %v4718_v54, %v22645_v22  ;;  %v3056_v44 = vld [vmem:[#allocation5 + $0x50] sm:$0xf] }
 0x2de   :  { %v16908_v49 = vpop.f32.mrb[72].mxu1 }
 0x2df   :  { %v3067_v20 = vadd.f32 %v16908_v49, %v3056_v44  ;;  %v3032_v8 = vpop.f32.mrb[73].mxu1 }
 0x2e0   :  { %v19977_v43 = vadd.f32 %v3032_v8, %v2850_v33  ;;  %v16909_v21 = vpop.f32.mrb[74].mxu1 }
 0x2e1   :  { %3078 = vst [vmem:[#allocation5 + $0x50] sm:$0xf] %v3067_v20  ;;  %v3035_v14 = vpop.f32.mrb[75].mxu1 }
 0x2e2   :  { %v3066_v60 = vadd.f32 %v3035_v14, %v2851_v19 }
 0x2e6   :  { %v16920_v30 = vpop.f32.mrb[76].mxu1 }
 0x2e7   :  { %v3214_v45 = vpop.f32.mrb[77].mxu1  ;;  %v3285_v12 = vrot.slane %v16920_v30, 2 }
 0x2e8   :  { %v16921_v53 = vpop.f32.mrb[78].mxu1  ;;  %v3282_v0 = vrot.slane %v3214_v45, 2 }
 0x2e9   :  { %v3287_v31 = vrot.slane %v16921_v53, 2  ;;  %v3217_v13 = vpop.f32.mrb[79].mxu1 }
 0x2ea   :  { %v3283_v59 = vrot.slane %v3217_v13, 2 }
 0x2eb   :  { %v3288_v54 = vsel %vm1410_vm4, %v3285_v12, %v3287_v31 }
 0x2ec   :  { %v17280_v22 = vadd.f32 %v19884_v27, %v3288_v54  ;;  %v3284_v44 = vsel %vm1410_vm4, %v3282_v0, %v3283_v59  ;;  %v3286_v33 = vsel %vm1410_vm4, %v3283_v59, %v3285_v12 }
 0x2ed   :  { %v17304_v49 = vadd.f32 %v19889_v32, %v3284_v44  ;;  %v17352_v19 = vadd.f32 %v19892_v37, %v3286_v33 }
 0x2ee   :  { %v17283_v20 = vadd.f32 %v17280_v22, %v19733_v51  ;;  %v16924_v8 = vpop.f32.mrb[80].mxu1 }
 0x2ef   :  { %v17307_v21 = vadd.f32 %v17304_v49, %v19736_v34  ;;  %v17355_v14 = vadd.f32 %v17352_v19, %v19739_v35  ;;  %v3230_v30 = vpop.f32.mrb[81].mxu1  ;;  %v3293_v0 = vrot.slane %v16924_v8, 2  ;;  %v3270_v8 = vld [vmem:[#allocation5 + $0x50] sm:$0x3] }
 0x2f0   :  { %v3289_v45 = vrot.slane %v3230_v30, 2  ;;  %v16925_v53 = vpop.f32.mrb[82].mxu1  ;;  %v19989_v27 = vadd.f32 %v17283_v20, %v19808_v9 }
 0x2f1   :  { %v3295_v13 = vrot.slane %v16925_v53, 2  ;;  %v3233_v59 = vpop.f32.mrb[83].mxu1  ;;  %v19992_v32 = vadd.f32 %v17307_v21, %v19811_v17  ;;  %v19995_v37 = vadd.f32 %v17355_v14, %v19814_v10 }
 0x2f2   :  { %v3290_v51 = vsel %vm1410_vm4, %v3287_v31, %v3289_v45  ;;  %v3291_v34 = vrot.slane %v3233_v59, 2 }
 0x2f3   :  { %v17328_v35 = vadd.f32 %v19917_v24, %v3290_v51  ;;  %v3296_v22 = vsel %vm1410_vm4, %v3293_v0, %v3295_v13 }
 0x2f4   :  { %v17376_v12 = vadd.f32 %v19921_v25, %v3296_v22  ;;  %v3292_v9 = vsel %vm1410_vm4, %v3289_v45, %v3291_v34  ;;  %v3294_v54 = vsel %vm1410_vm4, %v3291_v34, %v3293_v0 }
 0x2f5   :  { %v17331_v44 = vadd.f32 %v17328_v35, %v19746_v57  ;;  %v17400_v17 = vadd.f32 %v19926_v42, %v3292_v9  ;;  %v17448_v10 = vadd.f32 %v19929_v23, %v3294_v54 }
 0x2f6   :  { %v17379_v33 = vadd.f32 %v17376_v12, %v19749_v61  ;;  %v16928_v31 = vpop.f32.mrb[84].mxu1 }
 0x2f7   :  { %v17403_v49 = vadd.f32 %v17400_v17, %v19752_v2  ;;  %v17451_v24 = vadd.f32 %v17448_v10, %v19755_v3  ;;  %v3301_v19 = vrot.slane %v16928_v31, 2  ;;  %v3246_v20 = vpop.f32.mrb[85].mxu1  ;;  %v17334_v25 = vadd.f32 %v17331_v44, %v19835_v26 }
 0x2f8   :  { %v3297_v21 = vrot.slane %v3246_v20, 2  ;;  %v16929_v14 = vpop.f32.mrb[86].mxu1  ;;  %v20011_v57 = vadd.f32 %v17379_v33, %v19840_v4 }
 0x2f9   :  { %v3324_v42 = vadd.f32 %v3301_v19, %v3270_v8  ;;  %v3249_v30 = vpop.f32.mrb[87].mxu1  ;;  %v20014_v23 = vadd.f32 %v17403_v49, %v19843_v46  ;;  %v20017_v61 = vadd.f32 %v17451_v24, %v19846_v48 }
 0x2fa   :  { %v3298_v2 = vsel %vm1410_vm4, %v3295_v13, %v3297_v21  ;;  %v3299_v3 = vrot.slane %v3249_v30, 2 }
 0x2fb   :  { %3335 = vst [vmem:[#allocation5 + $0x50] sm:$0x3] %v3324_v42  ;;  %v17424_v26 = vadd.f32 %v19957_v7, %v3298_v2 }
 0x2fc   :  { %v3300_v45 = vsel %vm1410_vm4, %v3297_v21, %v3299_v3  ;;  %v3302_v53 = vsel %vm1410_vm4, %v3299_v3, %v3301_v19 }
 0x2fd   :  { %v17427_v4 = vadd.f32 %v17424_v26, %v19773_v47  ;;  %v3322_v0 = vadd.f32 %v3300_v45, %v19977_v43  ;;  %v3323_v59 = vadd.f32 %v3302_v53, %v3066_v60 }
 0x2ff   :  { %v17430_v46 = vadd.f32 %v17427_v4, %v19866_v38 }
 0x302   :  { %v3527_v48 = vld [vmem:[#allocation5 + $0x50] sm:$0xf] }
 0x30e   :  { %v16948_v51 = vpop.f32.mrb[88].mxu1 }
 0x30f   :  { %v3538_v34 = vadd.f32 %v16948_v51, %v3527_v48  ;;  %v3503_v35 = vpop.f32.mrb[89].mxu1 }
 0x310   :  { %v3536_v13 = vadd.f32 %v3503_v35, %v3322_v0  ;;  %v16949_v22 = vpop.f32.mrb[90].mxu1 }
 0x311   :  { %3549 = vst [vmem:[#allocation5 + $0x50] sm:$0xf] %v3538_v34  ;;  %v3506_v12 = vpop.f32.mrb[91].mxu1 }
 0x312   :  { %v3537_v7 = vadd.f32 %v3506_v12, %v3323_v59  ;;  %v3793_v9 = vadd.f32 %v19776_v28, %v3536_v13 }
 0x314   :  { %v3794_v54 = vadd.f32 %v19781_v52, %v3537_v7 }
 0x318   :  { %v3741_v44 = vld [vmem:[#allocation5 + $0x50] sm:$0x3] }
 0x319   :  { %v3795_v47 = vadd.f32 %v3772_v36, %v3741_v44 }
 0x31b   :  { %3806 = vst [vmem:[#allocation5 + $0x50] sm:$0x3] %v3795_v47 }
 0x322   :  { %v4001_v38 = vld [vmem:[#allocation5 + $0x50] sm:$0xf] }
 0x326   :  { %v16988_v43 = vpop.f32.mrb[92].mxu1 }
 0x327   :  { %v4012_v60 = vadd.f32 %v16988_v43, %v4001_v38  ;;  %v3977_v17 = vpop.f32.mrb[93].mxu1 }
 0x328   :  { %v4010_v10 = vadd.f32 %v3977_v17, %v3793_v9  ;;  %v16989_v33 = vpop.f32.mrb[94].mxu1 }
 0x329   :  { %4023 = vst [vmem:[#allocation5 + $0x50] sm:$0xf] %v4012_v60  ;;  %v3980_v31 = vpop.f32.mrb[95].mxu1 }
 0x32a   :  { %v4011_v49 = vadd.f32 %v3980_v31, %v3794_v54  ;;  %v4270_v24 = vadd.f32 %v19869_v40, %v4010_v10  ;;  %v22646_v40 = vrot.slane %v19856_v62, 2 }
 0x32c   :  { %v4271_v28 = vadd.f32 %v19874_v18, %v4011_v49 }
 0x32e   :  { %v17020_v19 = vpop.f32.mrb[0].mxu1 }
 0x32f   :  { %v17289_v52 = vadd.f32 %v19989_v27, %v17020_v19  ;;  %v4419_v20 = vpop.f32.mrb[1].mxu1  ;;  %v17857_v19 = vld [vmem:[%s22632_s6 + $0x88] sm:$0xff]  }
 0x330   :  { %v17313_v36 = vadd.f32 %v19992_v32, %v4419_v20  ;;  %v17021_v8 = vpop.f32.mrb[2].mxu1  ;;  %v4218_v21 = vld [vmem:[#allocation5 + $0x50] sm:$0x3] }
 0x331   :  { %v4735_v14 = vadd.f32 %v17289_v52, %v19901_v6  ;;  %v17337_v42 = vadd.f32 %v17334_v25, %v17021_v8  ;;  %v4422_v30 = vpop.f32.mrb[3].mxu1  ;;  %v4272_v18 = vadd.f32 %v22646_v40, %v4218_v21 }
 0x332   :  { %v4733_v2 = vadd.f32 %v17313_v36, %v19905_v15  ;;  %v17361_v27 = vadd.f32 %v19995_v37, %v4422_v30  ;;  %v22647_v30 = vrot.slane %v19961_v5, 2 }
 0x333   :  { %v4775_v3 = vadd.f32 %v20036_v58, %v4735_v14  ;;  %v4736_v26 = vadd.f32 %v17337_v42, %v19942_v1  ;;  %4283 = vst [vmem:[#allocation5 + $0x50] sm:$0x3] %v4272_v18  ;;  %v17861_v14 = vld [vmem:[%s22632_s6 + $0x90] sm:$0xff]  }
 0x334   :  { %v4773_v32 = vadd.f32 %v20036_v58, %v4733_v2  ;;  %v4734_v45 = vadd.f32 %v17361_v27, %v19908_v16 }
 0x335   :  { %v4776_v6 = vadd.f32 %v20036_v58, %v4736_v26  ;;  %v4786_v62 = vmax.f32 %v4775_v3, 0.0 }
 0x336   :  { %v4774_v25 = vadd.f32 %v20036_v58, %v4734_v45  ;;  %v17024_v53 = vpop.f32.mrb[4].mxu1  ;;  %v4784_v51 = vmax.f32 %v4773_v32, 0.0 }
 0x337   :  { %v4787_v4 = vmax.f32 %v4776_v6, 0.0  ;;  %v17385_v15 = vadd.f32 %v20011_v57, %v17024_v53  ;;  %v4435_v0 = vpop.f32.mrb[5].mxu1 }
 0x338   :  { %v17409_v37 = vadd.f32 %v20014_v23, %v4435_v0  ;;  %v17025_v59 = vpop.f32.mrb[6].mxu1  ;;  %v4785_v1 = vmax.f32 %v4774_v25, 0.0  ;;  %v17871_v0 = vld [vmem:[%s22632_s6 + $0x120] sm:$0xff]  }
 0x339   :  { %v16336_v48 = vpack.c.bf16 %v4787_v4, %v4786_v62  ;;  %v4739_v34 = vadd.f32 %v17385_v15, %v19947_v39  ;;  %v17433_v35 = vadd.f32 %v17430_v46, %v17025_v59  ;;  %v4438_v16 = vpop.f32.mrb[7].mxu1  ;;  %v17870_v4 = vld [vmem:[%s22632_s6 + $0xa0] sm:$0xff]   ;;  %v17873_v59 = vld [vmem:[%s22632_s6 + $0x128] sm:$0xff]  }
 0x33a   :  { %v4737_v13 = vadd.f32 %v17409_v37, %v19951_v50  ;;  %v17457_v22 = vadd.f32 %v20017_v61, %v4438_v16  ;;  %v16331_v12 = vpack.c.bf16 %v4785_v1, %v4784_v51  ;;  %v4475_v44 = vld [vmem:[#allocation5 + $0x50] sm:$0xf]  ;;  %v17872_v37 = vld [vmem:[%s22632_s6 + $0xa8] sm:$0xff]   ;;  %v17874_v51 = vld [vmem:[%s22632_s6 + $0xb0] sm:$0xff]  }
 0x33b   :  { %16368 = vst [vmem:[#allocation3 + $0x8] sm:$0xff] %v16336_v48   ;;  %v4779_v7 = vadd.f32 %v20036_v58, %v4739_v34  ;;  %v4740_v57 = vadd.f32 %v17433_v35, %v19967_v63  ;;  %v17875_v1 = vld [vmem:[%s22632_s6 + $0x130] sm:$0xff]   ;;  %v17876_v48 = vld [vmem:[%s22632_s6 + $0xb8] sm:$0xff]  }
 0x33c   :  { %v4777_v23 = vadd.f32 %v20036_v58, %v4737_v13  ;;  %v4738_v9 = vadd.f32 %v17457_v22, %v19954_v29  ;;  %16332 = vst [vmem:[#allocation3] sm:$0xff] %v16331_v12   ;;  %v17877_v34 = vld [vmem:[%s22632_s6 + $0x138] sm:$0xff]   ;;  %v17879_v13 = vld [vmem:[%s22632_s6 + $0xc0] sm:$0xff]  }
 0x33d   :  { %v4780_v54 = vadd.f32 %v20036_v58, %v4740_v57  ;;  %v4790_v61 = vmax.f32 %v4779_v7, 0.0  ;;  %v17881_v22 = vld [vmem:[%s22632_s6 + $0x140] sm:$0xff]  }
 0x33e   :  { %v4778_v39 = vadd.f32 %v20036_v58, %v4738_v9  ;;  %v17028_v46 = vpop.f32.mrb[96].mxu1  ;;  %v4788_v17 = vmax.f32 %v4777_v23, 0.0 }
 0x33f   :  { %v4486_v50 = vadd.f32 %v17028_v46, %v4475_v44  ;;  %v4451_v47 = vpop.f32.mrb[97].mxu1  ;;  %v4791_v43 = vmax.f32 %v4780_v54, 0.0  ;;  %v17884_v46 = vld [vmem:[%s22632_s6 + $0xc8] sm:$0xff]  }
 0x340   :  { %v4484_v38 = vadd.f32 %v4451_v47, %v4270_v24  ;;  %v17029_v60 = vpop.f32.mrb[98].mxu1  ;;  %v4789_v10 = vmax.f32 %v4778_v39, 0.0  ;;  %v17858_v24 = vld [vmem:[%s22632_s6 + $0x108] sm:$0xff]  }
 0x341   :  { %4497 = vst [vmem:[#allocation5 + $0x50] sm:$0xf] %v4486_v50  ;;  %v4454_v63 = vpop.f32.mrb[99].mxu1  ;;  %v16346_v33 = vpack.c.bf16 %v4791_v43, %v4790_v61  ;;  %v17887_v60 = vld [vmem:[%s22632_s6 + $0xd0] sm:$0xff]  }
 0x342   :  { %v4485_v31 = vadd.f32 %v4454_v63, %v4271_v28  ;;  %v4741_v29 = vadd.f32 %v19970_v56, %v4484_v38  ;;  %v17855_v49 = vld [vmem:[#allocation3 + $0x8] sm:$0xff]   ;;  %v16341_v52 = vpack.c.bf16 %v4789_v10, %v4788_v17 }
 0x343   :  { %v17851_v20 = vld [vmem:[#allocation3] sm:$0xff]   ;;  %16370 = vst [vmem:[#allocation3 + $0x18] sm:$0xff] %v16346_v33   ;;  %v17856_v56 = vld [vmem:[#allocation3 + $0x8] sm:$0xff]  }
 0x344   :  { %v4742_v36 = vadd.f32 %v19975_v41, %v4485_v31  ;;  %v17852_v8 = vld [vmem:[#allocation3] sm:$0xff]   ;;  %16369 = vst [vmem:[#allocation3 + $0x10] sm:$0xff] %v16341_v52   ;;  %v4781_v28 = vadd.f32 %v20036_v58, %v4741_v29  ;;  %17066 = vmatprep.mubr.bf16.mxu1 %v17851_v20  ;;  %v17862_v41 = vld [vmem:[%s22632_s6 + $0x110] sm:$0xff]   ;;  %v17894_v20 = vld [vmem:[%s22632_s6 + $0x158] sm:$0xff]  }
 0x345   :  { %17090 = vmatprep.mubr.bf16.mxu0 %v17852_v8  ;;  %17067 = vmatmul.mubr.bf16.vlgmr.msra.gmra.mrb[100].mxu1 %v17855_v49  ;;  %v17866_v18 = vld [vmem:[#allocation3 + $0x4] sm:$0xf8]   ;;  %v17888_v10 = vld [vmem:[%s22632_s6 + $0x150] sm:$0xff]   ;;  %v17896_v8 = vld [vmem:[%s22632_s6 + $0x160] sm:$0xff]  }
 0x346   :  { %v4782_v21 = vadd.f32 %v20036_v58, %v4742_v36  ;;  %17091 = vmatmul.mubr.bf16.vlgmr.msra.gmra.mrb[136].mxu0 %v17856_v56  ;;  %17099 = vmatpush3.bf16.msra.mxu1 %v19934_v55  ;;  %v4792_v2 = vmax.f32 %v4781_v28, 0.0  ;;  %v17868_v55 = vld [vmem:[%s22632_s6 + $0x98] sm:$0xff]   ;;  %v17865_v25 = vld [vmem:[#allocation3] sm:$0xff]   ;;  %v5683_v53 = vrot.slane %v17866_v18, 3  ;;  %v17878_v54 = vld [vmem:[#allocation3 + $0x8] sm:$0xff]  }
 0x347   :  { %17147 = vmatpush3.bf16.msra.mxu0 %v19939_v11  ;;  %17100 = vmatprep.subr.bf16.mxu1 %v17857_v19  ;;  %v17869_v11 = vld [vmem:[%s22632_s6 + $0x118] sm:$0xff]   ;;  %v17889_v38 = vld [vmem:[#allocation3 + $0x4] sm:$0xf8]   ;;  %v17895_v36 = vld [vmem:[%s22632_s6 + $0xe0] sm:$0xff]  }
 0x348   :  { %v4689_v42 = vld [vmem:[#allocation5 + $0x50] sm:$0x3]  ;;  %17148 = vmatprep.subr.bf16.mxu0 %v17858_v24  ;;  %v4793_v27 = vmax.f32 %v4782_v21, 0.0  ;;  %v17891_v17 = vld [vmem:[#allocation3 + $0x4] sm:$0xf8]   ;;  %v5494_v29 = vrot.slane %v17889_v38, 3 }
 0x349   :  { %v4743_v40 = vadd.f32 %v22647_v30, %v4689_v42  ;;  %v5899_v49 = vrot.slane %v17891_v17, 3  ;;  %v17897_v28 = vld [vmem:[%s22632_s6 + $0xe8] sm:$0xff]   ;;  %v17899_v21 = vld [vmem:[%s22632_s6 + $0xf0] sm:$0xff]   ;;  %v17901_v42 = vld [vmem:[%s22632_s6 + $0xf8] sm:$0xff]  }
 0x34a   :  { %v17863_v3 = vld [vmem:[#allocation3 + $0x18] ss:$0 sps:$4 sm:$0xff]   ;;  %17101 = vmatpush3.bf16.msra.mxu1 %v17857_v19  ;;  %v16351_v32 = vpack.c.bf16 %v4793_v27, %v4792_v2  ;;  %v17898_v56 = vld [vmem:[%s22632_s6 + $0x168] sm:$0xff]   ;;  %v17905_v27 = vld [vmem:[%s22632_s6 + $0x180] sm:$0xff]  }
 0x34b   :  { %4754 = vst [vmem:[#allocation5 + $0x50] sm:$0x3] %v4743_v40  ;;  %v17859_v26 = vld [vmem:[#allocation3 + $0x10] sm:$0xff]   ;;  %17149 = vmatpush3.bf16.msra.mxu0 %v17858_v24  ;;  %17102 = vmatprep.subr.bf16.mxu1 %v17861_v14  ;;  %v17864_v45 = vld [vmem:[#allocation3 + $0x18] ss:$0 sps:$4 sm:$0xff]  }
 0x34c   :  { %v17860_v5 = vld [vmem:[#allocation3 + $0x10] sm:$0xff]   ;;  %17070 = vmatprep.mubr.bf16.mxu1 %v17859_v26  ;;  %17150 = vmatprep.subr.bf16.mxu0 %v17862_v41  ;;  %16371 = vst [vmem:[#allocation3 + $0x20] sm:$0xff] %v16351_v32   ;;  %v17886_v31 = vld [vmem:[#allocation3 + $0x18] ss:$0 sps:$4 sm:$0xff]   ;;  %v17906_v26 = vld [vmem:[%s22632_s6 + $0x1c0] sm:$0xff]  }
 0x34d   :  { %v17867_v6 = vld [vmem:[#allocation3 + $0xc] sm:$0xff]   ;;  %17094 = vmatprep.mubr.bf16.mxu0 %v17860_v5  ;;  %17071 = vmatmul.mubr.bf16.gmra.mrb[104].mxu1 %v17863_v3  ;;  %v17880_v35 = vld [vmem:[#allocation3 + $0x14] sm:$0xff]  }
 0x34e   :  { %17095 = vmatmul.mubr.bf16.gmra.mrb[140].mxu0 %v17864_v45  ;;  %17103 = vmatpush3.bf16.msra.mxu1 %v17861_v14  ;;  %v5684_v62 = vrot.slane %v17867_v6, 3  ;;  %v5686_v57 = vrot.slane %v17880_v35, 3  ;;  %v17882_v39 = vld [vmem:[#allocation3 + $0x10] sm:$0xff]   ;;  %v17909_v45 = vld [vmem:[%s22632_s6 + $0x188] sm:$0xff]  }
 0x34f   :  { %17151 = vmatpush3.bf16.msra.mxu0 %v17862_v41  ;;  %17114 = vmatprep.mubr.bf16.mxu1 %v17865_v25  ;;  %v20126_v47 = vld [vmem:[#allocation3 + $0xc] sm:$0xff]   ;;  %v17893_v19 = vld [vmem:[%s22632_s6 + $0xd8] sm:$0xff]  }
 0x350   :  { %v5685_v15 = vsel %vm1516_vm2, %v5683_v53, %v5684_v62  ;;  %17104 = vmatprep.subr.bf16.mxu1 %v17868_v55  ;;  %17152 = vmatprep.subr.bf16.mxu0 %v17869_v11  ;;  %v5687_v50 = vsel %vm1516_vm2, %v5684_v62, %v5686_v57  ;;  %v20129_v43 = vld [vmem:[#allocation3 + $0xc] sm:$0xff]   ;;  %v5495_v63 = vrot.slane %v20126_v47, 3  ;;  %v17902_v41 = vld [vmem:[%s22632_s6 + $0x178] sm:$0xff]   ;;  %v17910_v53 = vld [vmem:[%s22632_s6 + $0x1c8] sm:$0xff]  }
 0x351   :  { %17162 = vmatprep.mubr.bf16.mxu0 %v5685_v15  ;;  %v5900_v33 = vrot.slane %v20129_v43, 3  ;;  %v17900_v14 = vld [vmem:[%s22632_s6 + $0x170] sm:$0xff]   ;;  %v17903_v30 = vld [vmem:[#allocation3 + $0x14] sm:$0xff]   ;;  %v17929_v43 = vld [vmem:[%s22632_s6 + $0x200] sm:$0xff]  }
 0x352   :  { %17105 = vmatpush3.bf16.msra.mxu1 %v17868_v55  ;;  %v4765_v12 = vld [vmem:[#allocation5 + $0x50] sm:$0xf]  ;;  %v5496_v52 = vsel %vm1516_vm2, %v5494_v29, %v5495_v63  ;;  %v5497_v3 = vrot.slane %v17903_v30, 3  ;;  %v17913_v62 = vld [vmem:[#allocation3 + $0xc] sm:$0xfc]  }
 0x353   :  { %17153 = vmatpush3.bf16.msra.mxu0 %v17869_v11  ;;  %17106 = vmatprep.subr.bf16.mxu1 %v17870_v4  ;;  %v17883_v16 = vld [vmem:[#allocation3 + $0x1c] sm:$0x7f]   ;;  %v4783_v7 = vadd.f32 %v20036_v58, %v4765_v12  ;;  %v17885_v58 = vld [vmem:[%s22632_s6 + $0x148] sm:$0xff]   ;;  %v5901_v24 = vsel %vm1516_vm2, %v5899_v49, %v5900_v33  ;;  %v17904_v40 = vld [vmem:[#allocation3 + $0x14] sm:$0xff]  }
 0x354   :  { %17154 = vmatprep.subr.bf16.mxu0 %v17871_v0  ;;  %v5688_v23 = vrot.slane %v17883_v16, 3  ;;  %v17907_v18 = vld [vmem:[#allocation3 + $0x1c] sm:$0x7f]   ;;  %v5902_v55 = vrot.slane %v17904_v40, 3  ;;  %v5498_v5 = vsel %vm1516_vm2, %v5495_v63, %v5497_v3  ;;  %v17917_v16 = vld [vmem:[%s22632_s6 + $0x198] sm:$0xff]  }
 0x355   :  { %v4794_v9 = vmax.f32 %v4783_v7, 0.0  ;;  %v17908_v2 = vld [vmem:[#allocation3 + $0x1c] sm:$0x7f]   ;;  %v5499_v11 = vrot.slane %v17907_v18, 3  ;;  %v17934_v49 = vld [vmem:[#allocation3 + $0xc] sm:$0xfc]  }
 0x356   :  { %17107 = vmatpush3.bf16.msra.mxu1 %v17870_v4  ;;  %v5689_v61 = vsel %vm1516_vm2, %v5686_v57, %v5688_v23  ;;  %v5904_v32 = vrot.slane %v17908_v2, 3  ;;  %v5903_v6 = vsel %vm1516_vm2, %v5900_v33, %v5902_v55  ;;  %v20186_v4 = vld [vmem:[#allocation3 + $0x14] sm:$0xff]   ;;  %v17919_v7 = vld [vmem:[%s22632_s6 + $0x1a0] sm:$0xff]   ;;  %v17932_v33 = vld [vmem:[%s22632_s6 + $0x208] sm:$0xff]  }
 0x357   :  { %17155 = vmatpush3.bf16.msra.mxu0 %v17871_v0  ;;  %17108 = vmatprep.subr.bf16.mxu1 %v17872_v37  ;;  %v16320_v44 = vpack.c.bf16 %v4794_v9, %v4794_v9  ;;  %v5500_v25 = vsel %vm1516_vm2, %v5497_v3, %v5499_v11  ;;  %v17915_v0 = vld [vmem:[#allocation3 + $0xc] sm:$0xfc]   ;;  %v17920_v57 = vld [vmem:[%s22632_s6 + $0x1e0] sm:$0xff]   ;;  %v17922_v9 = vld [vmem:[%s22632_s6 + $0x1e8] sm:$0xff]  }
 0x358   :  { %17156 = vmatprep.subr.bf16.mxu0 %v17873_v59  ;;  %v5905_v15 = vsel %vm1516_vm2, %v5902_v55, %v5904_v32  ;;  %v17941_v30 = vld [vmem:[#allocation3 + $0x1c] sm:$0xff]  }
 0x359   :  { %4850 = vst [vmem:[#allocation3 + $0x28] sm:$0x3] %v16320_v44  ;;  %v17926_v44 = vld [vmem:[%s22632_s6 + $0x1f8] sm:$0xff]   ;;  %v6523_v18 = vrot.slane %v17941_v30, 2  ;;  %v17945_v55 = vld [vmem:[%s22634_s9 + $0x4] ss:$16 sps:$4 sm:$0xff]  }
 0x35a   :  { %17109 = vmatpush3.bf16.msra.mxu1 %v17872_v37  ;;  %v20189_v37 = vld [vmem:[#allocation3 + $0x14] sm:$0xff]   ;;  %v17982_v30 = vld [vmem:[%s22635_s8 + $0x60] ss:$16 sps:$4 sm:$0xff]  }
 0x35b   :  { %17157 = vmatpush3.bf16.msra.mxu0 %v17873_v59  ;;  %17110 = vmatprep.subr.bf16.mxu1 %v17874_v51  ;;  %v17911_v59 = vld [vmem:[%s22632_s6 + $0x190] sm:$0xff]   ;;  %v6305_v35 = vrot.slane %v20189_v37, 2 }
 0x35c   :  { %17158 = vmatprep.subr.bf16.mxu0 %v17875_v1 }
 0x35e   :  { %17111 = vmatpush3.bf16.msra.mxu1 %v17874_v51  ;;  %v17912_v51 = vld [vmem:[%s22632_s6 + $0x1d0] sm:$0xff]  }
 0x35f   :  { %17159 = vmatpush3.bf16.msra.mxu0 %v17875_v1  ;;  %17112 = vmatprep.subr.bf16.mxu1 %v17876_v48  ;;  %v6115_v1 = vrot.slane %v17913_v62, 2  ;;  %v17952_v62 = vld [vmem:[%s22634_s9 + $0x60] ss:$16 sps:$4 sm:$0xff]  }
 0x360   :  { %17160 = vmatprep.subr.bf16.mxu0 %v17877_v34  ;;  %v17930_v47 = vld [vmem:[#allocation3 + $0x24] sm:$0x3f]  }
 0x361   :  { %v6120_v17 = vrot.slane %v17930_v47, 2  ;;  %v17942_v40 = vld [vmem:[#allocation3 + $0x24] sm:$0x3f]   ;;  %v17960_v47 = vld [vmem:[%s22634_s9 + $0xa4] ss:$16 sps:$4 sm:$0xff]  }
 0x362   :  { %17113 = vmatpush3.bf16.msra.mxu1 %v17876_v48  ;;  %v6116_v48 = vrot.slane %v20186_v4, 2  ;;  %v6525_v2 = vrot.slane %v17942_v40, 2 }
 0x363   :  { %17161 = vmatpush3.bf16.msra.mxu0 %v17877_v34  ;;  %17122 = vmatprep.subr.bf16.mxu1 %v17879_v13  ;;  %v6304_v34 = vrot.slane %v17915_v0, 2 }
 0x364   :  { %17170 = vmatprep.subr.bf16.mxu0 %v17881_v22  ;;  %v6526_v3 = vsel %vm1410_vm4, %v6523_v18, %v6525_v2 }
 0x365   :  { %17115 = vmatmul.mubr.bf16.vlgmr.msra.gmra.mrb[108].mxu1 %v17878_v54  ;;  %v6306_v12 = vsel %vm1410_vm4, %v6304_v34, %v6305_v35  ;;  %v17923_v54 = vld [vmem:[%s22632_s6 + $0x1b0] sm:$0xff]  }
 0x366   :  { %17163 = vmatmul.mubr.bf16.vlgmr.msra.gmra.mrb[144].mxu0 %v5687_v50  ;;  %17118 = vmatprep.mubr.bf16.mxu1 %v17882_v39  ;;  %v17924_v39 = vld [vmem:[%s22632_s6 + $0x1f0] sm:$0xff]   ;;  %v17927_v50 = vld [vmem:[#allocation3 + $0x1c] sm:$0xff]  }
 0x367   :  { %17123 = vmatpush3.bf16.msra.mxu1 %v17879_v13  ;;  %17166 = vmatprep.mubr.bf16.mxu0 %v5689_v61  ;;  %v6117_v13 = vsel %vm1410_vm4, %v6115_v1, %v6116_v48  ;;  %v17931_v61 = vld [vmem:[#allocation3 + $0x24] sm:$0x3f]   ;;  %v6118_v38 = vrot.slane %v17927_v50, 2 }
 0x368   :  { %17171 = vmatpush3.bf16.msra.mxu0 %v17881_v22  ;;  %17124 = vmatprep.subr.bf16.mxu1 %v17884_v46  ;;  %v17918_v22 = vld [vmem:[%s22632_s6 + $0x1d8] sm:$0xff]  }
 0x369   :  { %17172 = vmatprep.subr.bf16.mxu0 %v17885_v58  ;;  %v6119_v63 = vsel %vm1410_vm4, %v6116_v48, %v6118_v38  ;;  %v6121_v29 = vsel %vm1410_vm4, %v6118_v38, %v6120_v17 }
 0x36b   :  { %17125 = vmatpush3.bf16.msra.mxu1 %v17884_v46  ;;  %v17925_v46 = vld [vmem:[%s22632_s6 + $0x1b8] sm:$0xff]  }
 0x36c   :  { %17173 = vmatpush3.bf16.msra.mxu0 %v17885_v58  ;;  %17126 = vmatprep.subr.bf16.mxu1 %v17887_v60  ;;  %v17928_v58 = vld [vmem:[#allocation3 + $0x1c] sm:$0xff]  }
 0x36d   :  { %17119 = vmatmul.mubr.bf16.gmra.mrb[112].mxu1 %v17886_v31  ;;  %17174 = vmatprep.subr.bf16.mxu0 %v17888_v10 }
 0x36e   :  { %17167 = vmatmul.mubr.bf16.gmra.mrb[148].mxu0 %v5688_v23  ;;  %17138 = vmatprep.mubr.bf16.mxu1 %v5496_v52  ;;  %v17921_v23 = vld [vmem:[%s22632_s6 + $0x1a8] sm:$0xff]  }
 0x36f   :  { %17127 = vmatpush3.bf16.msra.mxu1 %v17887_v60  ;;  %17186 = vmatprep.mubr.bf16.mxu0 %v5901_v24  ;;  %v6307_v60 = vrot.slane %v17928_v58, 2  ;;  %v6520_v24 = vrot.slane %v17934_v49, 2  ;;  %v17958_v58 = vld [vmem:[%s22634_s9 + $0xa0] ss:$16 sps:$4 sm:$0xff]   ;;  %v17966_v49 = vld [vmem:[%s22635_s8 + $0x4] ss:$16 sps:$4 sm:$0xff]  }
 0x370   :  { %17175 = vmatpush3.bf16.msra.mxu0 %v17888_v10  ;;  %17128 = vmatprep.subr.bf16.mxu1 %v17893_v19  ;;  %v6309_v10 = vrot.slane %v17931_v61, 2 }
 0x371   :  { %17176 = vmatprep.subr.bf16.mxu0 %v17894_v20  ;;  %v6308_v31 = vsel %vm1410_vm4, %v6305_v35, %v6307_v60 }
 0x372   :  { %v6310_v52 = vsel %vm1410_vm4, %v6307_v60, %v6309_v10 }
 0x373   :  { %17129 = vmatpush3.bf16.msra.mxu1 %v17893_v19  ;;  %v17935_v19 = vld [vmem:[#allocation3 + $0x14] sm:$0xff]  }
 0x374   :  { %17177 = vmatpush3.bf16.msra.mxu0 %v17894_v20  ;;  %17130 = vmatprep.subr.bf16.mxu1 %v17895_v36  ;;  %v17933_v20 = vld [vmem:[%s22632_s6 + $0x210] sm:$0xff]  }
 0x375   :  { %17178 = vmatprep.subr.bf16.mxu0 %v17896_v8 }
 0x377   :  { %17131 = vmatpush3.bf16.msra.mxu1 %v17895_v36  ;;  %v6521_v36 = vrot.slane %v17935_v19, 2  ;;  %v17967_v19 = vld [vmem:[%s22634_s9 + $0xe0] ss:$16 sps:$4 sm:$0xff]  }
 0x378   :  { %17179 = vmatpush3.bf16.msra.mxu0 %v17896_v8  ;;  %17132 = vmatprep.subr.bf16.mxu1 %v17897_v28  ;;  %v17936_v8 = vld [vmem:[%s22632_s6 + $0x218] sm:$0xff]  }
 0x379   :  { %17180 = vmatprep.subr.bf16.mxu0 %v17898_v56 }
 0x37b   :  { %17133 = vmatpush3.bf16.msra.mxu1 %v17897_v28  ;;  %v6522_v28 = vsel %vm1410_vm4, %v6520_v24, %v6521_v36  ;;  %v17970_v24 = vld [vmem:[%s22635_s8 + $0x20] ss:$16 sps:$4 sm:$0xff]  }
 0x37c   :  { %17181 = vmatpush3.bf16.msra.mxu0 %v17898_v56  ;;  %17134 = vmatprep.subr.bf16.mxu1 %v17899_v21  ;;  %v22648_v56 = vmov 0  }
 0x37d   :  { %17182 = vmatprep.subr.bf16.mxu0 %v17900_v14 }
 0x37f   :  { %17135 = vmatpush3.bf16.msra.mxu1 %v17899_v21  ;;  %v17937_v21 = vld [vmem:[%s22632_s6 + $0x220] sm:$0xff]  }
 0x380   :  { %17183 = vmatpush3.bf16.msra.mxu0 %v17900_v14  ;;  %17136 = vmatprep.subr.bf16.mxu1 %v17901_v42  ;;  %v17938_v14 = vld [vmem:[%s22632_s6 + $0x228] sm:$0xff]  }
 0x381   :  { %17184 = vmatprep.subr.bf16.mxu0 %v17902_v41 }
 0x383   :  { %17137 = vmatpush3.bf16.msra.mxu1 %v17901_v42  ;;  %v17939_v42 = vld [vmem:[%s22632_s6 + $0x230] sm:$0xff]  }
 0x384   :  { %17185 = vmatpush3.bf16.msra.mxu0 %v17902_v41  ;;  %17194 = vmatprep.subr.bf16.mxu1 %v17905_v27  ;;  %v17940_v41 = vld [vmem:[%s22632_s6 + $0x238] sm:$0xff]  }
 0x385   :  { %17218 = vmatprep.subr.bf16.mxu0 %v17906_v26 }
 0x386   :  { %17139 = vmatmul.mubr.bf16.vlgmr.msra.gmra.mrb[100].mxu1 %v5498_v5  ;;  %v17951_v5 = vld [vmem:[%s22634_s9 + $0x44] ss:$16 sps:$4 sm:$0xff]  }
 0x387   :  { %17187 = vmatmul.mubr.bf16.vlgmr.msra.gmra.mrb[152].mxu0 %v5903_v6  ;;  %17142 = vmatprep.mubr.bf16.mxu1 %v5500_v25  ;;  %v17954_v6 = vld [vmem:[%s22634_s9 + $0x64] ss:$16 sps:$4 sm:$0xff]  }
 0x388   :  { %17190 = vmatprep.mubr.bf16.mxu0 %v5905_v15  ;;  %17195 = vmatpush3.bf16.msra.mxu1 %v17905_v27  ;;  %v6524_v27 = vsel %vm1410_vm4, %v6521_v36, %v6523_v18  ;;  %v17978_v36 = vld [vmem:[%s22635_s8 + $0x44] ss:$16 sps:$4 sm:$0xff]  }
 0x389   :  { %17219 = vmatpush3.bf16.msra.mxu0 %v17906_v26  ;;  %17196 = vmatprep.subr.bf16.mxu1 %v17909_v45  ;;  %v17943_v26 = vld [vmem:[%s22634_s9] ss:$16 sps:$4 sm:$0xff]   ;;  %v17987_v18 = vld [vmem:[%s22635_s8 + $0xc4] ss:$16 sps:$4 sm:$0xff]  }
 0x38a   :  { %17220 = vmatprep.subr.bf16.mxu0 %v17910_v53 }
 0x38c   :  { %17197 = vmatpush3.bf16.msra.mxu1 %v17909_v45  ;;  %v17949_v45 = vld [vmem:[%s22634_s9 + $0x40] ss:$16 sps:$4 sm:$0xff]  }
 0x38d   :  { %17221 = vmatpush3.bf16.msra.mxu0 %v17910_v53  ;;  %17198 = vmatprep.subr.bf16.mxu1 %v17911_v59 }
 0x38e   :  { %17143 = vmatmul.mubr.bf16.gmra.mrb[116].mxu1 %v5499_v11  ;;  %17222 = vmatprep.subr.bf16.mxu0 %v17912_v51  ;;  %v17948_v11 = vld [vmem:[%s22634_s9 + $0x24] ss:$16 sps:$4 sm:$0xff]  }
 0x38f   :  { %17191 = vmatmul.mubr.bf16.gmra.mrb[156].mxu0 %v5904_v32  ;;  %17210 = vmatprep.mubr.bf16.mxu1 %v6117_v13  ;;  %v17946_v32 = vld [vmem:[%s22634_s9 + $0x20] ss:$16 sps:$4 sm:$0xff]  }
 0x390   :  { %17199 = vmatpush3.bf16.msra.mxu1 %v17911_v59  ;;  %17234 = vmatprep.mubr.bf16.mxu0 %v6306_v12 }
 0x391   :  { %17223 = vmatpush3.bf16.msra.mxu0 %v17912_v51  ;;  %17200 = vmatprep.subr.bf16.mxu1 %v17917_v16 }
 0x392   :  { %17224 = vmatprep.subr.bf16.mxu0 %v17918_v22 }
 0x394   :  { %17201 = vmatpush3.bf16.msra.mxu1 %v17917_v16 }
 0x395   :  { %17225 = vmatpush3.bf16.msra.mxu0 %v17918_v22  ;;  %17202 = vmatprep.subr.bf16.mxu1 %v17919_v7 }
 0x396   :  { %17226 = vmatprep.subr.bf16.mxu0 %v17920_v57 }
 0x398   :  { %17203 = vmatpush3.bf16.msra.mxu1 %v17919_v7 }
 0x399   :  { %17227 = vmatpush3.bf16.msra.mxu0 %v17920_v57  ;;  %17204 = vmatprep.subr.bf16.mxu1 %v17921_v23 }
 0x39a   :  { %17228 = vmatprep.subr.bf16.mxu0 %v17922_v9 }
 0x39c   :  { %17205 = vmatpush3.bf16.msra.mxu1 %v17921_v23 }
 0x39d   :  { %17229 = vmatpush3.bf16.msra.mxu0 %v17922_v9  ;;  %17206 = vmatprep.subr.bf16.mxu1 %v17923_v54  ;;  %v17955_v9 = vld [vmem:[%s22634_s9 + $0x80] ss:$16 sps:$4 sm:$0xff]  }
 0x39e   :  { %17230 = vmatprep.subr.bf16.mxu0 %v17924_v39 }
 0x3a0   :  { %17207 = vmatpush3.bf16.msra.mxu1 %v17923_v54 }
 0x3a1   :  { %17231 = vmatpush3.bf16.msra.mxu0 %v17924_v39  ;;  %17208 = vmatprep.subr.bf16.mxu1 %v17925_v46  ;;  %v17957_v39 = vld [vmem:[%s22634_s9 + $0x84] ss:$16 sps:$4 sm:$0xff]  }
 0x3a2   :  { %17232 = vmatprep.subr.bf16.mxu0 %v17926_v44 }
 0x3a4   :  { %17209 = vmatpush3.bf16.msra.mxu1 %v17925_v46 }
 0x3a5   :  { %17233 = vmatpush3.bf16.msra.mxu0 %v17926_v44  ;;  %17242 = vmatprep.subr.bf16.mxu1 %v17929_v43 }
 0x3a6   :  { %6888 = vmatprep.subr.bf16.mxu0 %v17966_v49 }
 0x3a7   :  { %17211 = vmatmul.mubr.bf16.vlgmr.msra.gmra.mrb[100].mxu1 %v6119_v63 }
 0x3a8   :  { %17235 = vmatmul.mubr.bf16.vlgmr.msra.gmra.mrb[160].mxu0 %v6308_v31  ;;  %17214 = vmatprep.mubr.bf16.mxu1 %v6121_v29  ;;  %v17969_v31 = vld [vmem:[%s22634_s9 + $0xe4] ss:$16 sps:$4 sm:$0xff]   ;;  %v17964_v29 = vld [vmem:[%s22635_s8] ss:$16 sps:$4 sm:$0xff]  }
 0x3a9   :  { %17238 = vmatprep.mubr.bf16.mxu0 %v6310_v52  ;;  %17243 = vmatpush3.bf16.msra.mxu1 %v17929_v43  ;;  %v17972_v52 = vld [vmem:[%s22635_s8 + $0x24] ss:$16 sps:$4 sm:$0xff]  }
 0x3aa   :  { %17244 = vmatprep.subr.bf16.mxu1 %v17932_v33  ;;  %6889 = vmatpush1.bf16.msra.mxu0 %v17964_v29 }
 0x3ab   :  { %6890 = vmatprep.subr.bf16.mxu0 %v17972_v52 }
 0x3ad   :  { %17245 = vmatpush3.bf16.msra.mxu1 %v17932_v33  ;;  %v17961_v33 = vld [vmem:[%s22634_s9 + $0xc0] ss:$16 sps:$4 sm:$0xff]  }
 0x3ae   :  { %17246 = vmatprep.subr.bf16.mxu1 %v17933_v20  ;;  %6891 = vmatpush1.bf16.msra.mxu0 %v17970_v24 }
 0x3af   :  { %17215 = vmatmul.mubr.bf16.gmra.mrb[120].mxu1 %v6120_v17  ;;  %6892 = vmatprep.subr.bf16.mxu0 %v17978_v36 }
 0x3b0   :  { %17239 = vmatmul.mubr.bf16.gmra.mrb[164].mxu0 %v6309_v10  ;;  %17258 = vmatprep.mubr.bf16.mxu1 %v6522_v28  ;;  %v17963_v10 = vld [vmem:[%s22634_s9 + $0xc4] ss:$16 sps:$4 sm:$0xff]   ;;  %v6755_v28 = vld [vmem:[%s22636_s1] sm:$0x1] }
 0x3b1   :  { %17247 = vmatpush3.bf16.msra.mxu1 %v17933_v20  ;;  %6920 = vmatprep.mubr.bf16.mxu0 %v22648_v56  ;;  %v17975_v20 = vld [vmem:[%s22635_s8 + $0x84] ss:$16 sps:$4 sm:$0xff]  }
 0x3b2   :  { %17248 = vmatprep.subr.bf16.mxu1 %v17936_v8 }
 0x3b5   :  { %17249 = vmatpush3.bf16.msra.mxu1 %v17936_v8  ;;  %v17973_v8 = vld [vmem:[%s22635_s8 + $0x80] ss:$16 sps:$4 sm:$0xff]  }
 0x3b6   :  { %17250 = vmatprep.subr.bf16.mxu1 %v17937_v21 }
 0x3b9   :  { %17251 = vmatpush3.bf16.msra.mxu1 %v17937_v21  ;;  %v17981_v21 = vld [vmem:[%s22635_s8 + $0xa4] ss:$16 sps:$4 sm:$0xff]  }
 0x3ba   :  { %17252 = vmatprep.subr.bf16.mxu1 %v17938_v14 }
 0x3bd   :  { %17253 = vmatpush3.bf16.msra.mxu1 %v17938_v14  ;;  %v17976_v14 = vld [vmem:[%s22635_s8 + $0x40] ss:$16 sps:$4 sm:$0xff]  }
 0x3be   :  { %17254 = vmatprep.subr.bf16.mxu1 %v17939_v42  ;;  %6893 = vmatpush1.bf16.msra.mxu0 %v17976_v14 }
 0x3c1   :  { %17255 = vmatpush3.bf16.msra.mxu1 %v17939_v42  ;;  %v17979_v42 = vld [vmem:[%s22635_s8 + $0xa0] ss:$16 sps:$4 sm:$0xff]  }
 0x3c2   :  { %17256 = vmatprep.subr.bf16.mxu1 %v17940_v41 }
 0x3c5   :  { %17257 = vmatpush3.bf16.msra.mxu1 %v17940_v41  ;;  %v17984_v41 = vld [vmem:[%s22635_s8 + $0x64] ss:$16 sps:$4 sm:$0xff]  }
 0x3c6   :  { %7130 = vmatprep.subr.bf16.mxu1 %v17945_v55  ;;  %6894 = vmatprep.subr.bf16.mxu0 %v17984_v41 }
 0x3c7   :  { %6895 = vmatpush1.bf16.msra.mxu0 %v17982_v30 }
 0x3c8   :  { %17259 = vmatmul.mubr.bf16.vlgmr.msra.gmra.mrb[124].mxu1 %v6524_v27 }
 0x3c9   :  { %17262 = vmatprep.mubr.bf16.mxu1 %v6526_v3  ;;  %7131 = vmatpush1.bf16.msra.mxu1 %v17943_v26  ;;  %v17985_v3 = vld [vmem:[%s22635_s8 + $0xc0] ss:$16 sps:$4 sm:$0xff]  }
 0x3ca   :  { %7132 = vmatprep.subr.bf16.mxu1 %v17948_v11 }
 0x3cd   :  { %7133 = vmatpush1.bf16.msra.mxu1 %v17946_v32 }
 0x3ce   :  { %7134 = vmatprep.subr.bf16.mxu1 %v17951_v5  ;;  %v17990_v5 = vld [vmem:[%s22635_s8 + $0xc] ss:$16 sps:$4 sm:$0xff]  }
 0x3cf   :  { %6929 = vmatprep.subr.bf16.mxu0 %v17990_v5 }
 0x3d0   :  { %17263 = vmatmul.mubr.bf16.gmra.mrb[128].mxu1 %v6525_v2 }
 0x3d1   :  { %7162 = vmatprep.mubr.bf16.mxu1 %v22648_v56  ;;  %7135 = vmatpush1.bf16.msra.mxu1 %v17949_v45 }
 0x3d2   :  { %7136 = vmatprep.subr.bf16.mxu1 %v17954_v6 }
 0x3d5   :  { %7137 = vmatpush1.bf16.msra.mxu1 %v17952_v62 }
 0x3d6   :  { %7138 = vmatprep.subr.bf16.mxu1 %v17957_v39  ;;  %v18000_v39 = vld [vmem:[%s22635_s8 + $0x104] ss:$16 sps:$4 sm:$0xff]  }
 0x3d9   :  { %7139 = vmatpush1.bf16.msra.mxu1 %v17955_v9 }
 0x3da   :  { %7140 = vmatprep.subr.bf16.mxu1 %v17960_v47 }
 0x3dd   :  { %7141 = vmatpush1.bf16.msra.mxu1 %v17958_v58 }
 0x3de   :  { %7142 = vmatprep.subr.bf16.mxu1 %v17963_v10 }
 0x3e1   :  { %7143 = vmatpush1.bf16.msra.mxu1 %v17961_v33 }
 0x3e2   :  { %7144 = vmatprep.subr.bf16.mxu1 %v17969_v31 }
 0x3e5   :  { %7145 = vmatpush1.bf16.msra.mxu1 %v17967_v19 }
 0x3e6   :  { %7317 = vmatprep.subr.bf16.mxu1 %v17975_v20 }
 0x3e8   :  { %7163 = vmatmul.mubr.bf16.vlgmr.msra.gmra.mrb[132].mxu1 %v6755_v28 }
 0x3e9   :  { %7318 = vmatpush1.bf16.msra.mxu1 %v17973_v8  ;;  %7349 = vmatprep.mubr.bf16.mxu1 %v22648_v56 }
 0x3ea   :  { %7319 = vmatprep.subr.bf16.mxu1 %v17981_v21 }
 0x3ed   :  { %7320 = vmatpush1.bf16.msra.mxu1 %v17979_v42 }
 0x3ee   :  { %7321 = vmatprep.subr.bf16.mxu1 %v17987_v18 }
 0x3f1   :  { %7322 = vmatpush1.bf16.msra.mxu1 %v17985_v3 }
 0x419   :  { %v17092_v25 = vpop.f32.mrb[136].mxu0 }
 0x41a   :  { %v5164_v53 = vpop.f32.mrb[137].mxu0  ;;  %v5211_v15 = vrot.slane %v17092_v25, 2 }
 0x41b   :  { %v17093_v4 = vpop.f32.mrb[138].mxu0  ;;  %v5208_v59 = vrot.slane %v5164_v53, 2 }
 0x41c   :  { %v5213_v0 = vrot.slane %v17093_v4, 2  ;;  %v5167_v37 = vpop.f32.mrb[139].mxu0 }
 0x41d   :  { %v5209_v51 = vrot.slane %v5167_v37, 2 }
 0x41e   :  { %v20289_v1 = vsel %vm1410_vm4, %v5211_v15, %v5213_v0 }
 0x41f   :  { %v20292_v48 = vsel %vm1410_vm4, %v5208_v59, %v5209_v51  ;;  %v20295_v34 = vsel %vm1410_vm4, %v5209_v51, %v5211_v15 }
 0x420   :  { %v17072_v35 = vpop.f32.mrb[104].mxu1 }
 0x421   :  { %v17096_v16 = vpop.f32.mrb[140].mxu0  ;;  %v5001_v13 = vpop.f32.mrb[105].mxu1  ;;  %5035 = vst [vmem:[#allocation6 + $0x30] sm:$0xff] %v17072_v35 }
 0x422   :  { %v5180_v22 = vpop.f32.mrb[141].mxu0  ;;  %v17073_v12 = vpop.f32.mrb[106].mxu1  ;;  %v5219_v46 = vrot.slane %v17096_v16, 2 }
 0x423   :  { %v5215_v7 = vrot.slane %v5180_v22, 2  ;;  %v17097_v57 = vpop.f32.mrb[142].mxu0  ;;  %v5004_v23 = vpop.f32.mrb[107].mxu1 }
 0x424   :  { %v5183_v54 = vpop.f32.mrb[143].mxu0 }
 0x425   :  { %v20304_v44 = vsel %vm1410_vm4, %v5213_v0, %v5215_v7  ;;  %v5217_v50 = vrot.slane %v5183_v54, 2  ;;  %v17993_v0 = vld [vmem:[%s22635_s8 + $0xe4] ss:$16 sps:$4 sm:$0xff]  }
 0x426   :  { %7323 = vmatprep.subr.bf16.mxu1 %v17993_v0 }
 0x427   :  { %v5218_v61 = vsel %vm1410_vm4, %v5215_v7, %v5217_v50  ;;  %v5220_v43 = vsel %vm1410_vm4, %v5217_v50, %v5219_v46 }
 0x428   :  { %v20314_v38 = vadd.f32 %v5218_v61, %v5001_v13  ;;  %v20316_v60 = vadd.f32 %v5220_v43, %v5004_v23  ;;  %v5200_v17 = vld [vmem:[#allocation6 + $0x30] sm:$0x3f] }
 0x429   :  { %v5234_v63 = vadd.f32 %v5219_v46, %v5200_v17 }
 0x42b   :  { %5241 = vst [vmem:[#allocation6 + $0x30] sm:$0x3f] %v5234_v63 }
 0x432   :  { %v5406_v47 = vld [vmem:[#allocation6 + $0x30] sm:$0xf] }
 0x438   :  { %v17116_v40 = vpop.f32.mrb[108].mxu1 }
 0x439   :  { %v17164_v2 = vpop.f32.mrb[144].mxu0  ;;  %v5370_v27 = vpop.f32.mrb[109].mxu1  ;;  %v5418_v26 = vrot.slane %v17116_v40, 4 }
 0x43a   :  { %v5823_v55 = vrot.slane %v17164_v2, 2  ;;  %v5776_v11 = vpop.f32.mrb[145].mxu0  ;;  %v17117_v32 = vpop.f32.mrb[110].mxu1  ;;  %v5415_v45 = vrot.slane %v5370_v27, 4 }
 0x43b   :  { %v5420_v6 = vrot.slane %v17117_v32, 4  ;;  %v17165_v25 = vpop.f32.mrb[146].mxu0  ;;  %v5373_v53 = vpop.f32.mrb[111].mxu1  ;;  %v5820_v37 = vrot.slane %v5776_v11, 2 }
 0x43c   :  { %v5825_v62 = vrot.slane %v17165_v25, 2  ;;  %v5416_v4 = vrot.slane %v5373_v53, 4  ;;  %v5779_v15 = vpop.f32.mrb[147].mxu0 }
 0x43d   :  { %v5421_v59 = vsel %vm5414_vm5, %v5418_v26, %v5420_v6  ;;  %v5821_v51 = vrot.slane %v5779_v15, 2 }
 0x43e   :  { %v17463_v35 = vadd.f32 %v5421_v59, %v20289_v1  ;;  %v5826_v16 = vsel %vm1410_vm4, %v5823_v55, %v5825_v62  ;;  %v5417_v13 = vsel %vm5414_vm5, %v5415_v45, %v5416_v4  ;;  %v5419_v22 = vsel %vm5414_vm5, %v5416_v4, %v5418_v26  ;;  %v17991_v1 = vld [vmem:[%s22635_s8 + $0xe0] ss:$16 sps:$4 sm:$0xff]  }
 0x43f   :  { %v17478_v12 = vadd.f32 %v5417_v13, %v20292_v48  ;;  %v17508_v7 = vadd.f32 %v5419_v22, %v20295_v34  ;;  %v5822_v57 = vsel %vm1410_vm4, %v5820_v37, %v5821_v51  ;;  %v5824_v23 = vsel %vm1410_vm4, %v5821_v51, %v5823_v55  ;;  %7324 = vmatpush1.bf16.msra.mxu1 %v17991_v1 }
 0x440   :  { %v17466_v9 = vadd.f32 %v17463_v35, %v5826_v16  ;;  %v17120_v54 = vpop.f32.mrb[112].mxu1  ;;  %7508 = vmatprep.subr.bf16.mxu1 %v18000_v39 }
 0x441   :  { %v17481_v46 = vadd.f32 %v17478_v12, %v5822_v57  ;;  %v17511_v48 = vadd.f32 %v17508_v7, %v5824_v23  ;;  %v5426_v50 = vrot.slane %v17120_v54, 4  ;;  %v20397_v34 = vpop.f32.mrb[148].mxu0  ;;  %v5386_v58 = vpop.f32.mrb[113].mxu1 }
 0x442   :  { %v5422_v61 = vrot.slane %v5386_v58, 4  ;;  %v5792_v43 = vpop.f32.mrb[149].mxu0  ;;  %v17121_v17 = vpop.f32.mrb[114].mxu1  ;;  %v5831_v36 = vrot.slane %v20397_v34, 2 }
 0x443   :  { %v5441_v10 = vadd.f32 %v5426_v50, %v5406_v47  ;;  %v5827_v63 = vrot.slane %v5792_v43, 2  ;;  %v17169_v33 = vpop.f32.mrb[150].mxu0  ;;  %v5389_v31 = vpop.f32.mrb[115].mxu1 }
 0x444   :  { %v5423_v29 = vsel %vm5414_vm5, %v5420_v6, %v5422_v61  ;;  %v5424_v49 = vrot.slane %v5389_v31, 4  ;;  %v5795_v19 = vpop.f32.mrb[151].mxu0 }
 0x445   :  { %5448 = vst [vmem:[#allocation6 + $0x30] sm:$0xf] %v5441_v10  ;;  %v17493_v52 = vadd.f32 %v5423_v29, %v20304_v44  ;;  %v5828_v20 = vsel %vm1410_vm4, %v5825_v62, %v5827_v63  ;;  %v5829_v24 = vrot.slane %v5795_v19, 2 }
 0x446   :  { %v5425_v8 = vsel %vm5414_vm5, %v5422_v61, %v5424_v49  ;;  %v5427_v28 = vsel %vm5414_vm5, %v5424_v49, %v5426_v50 }
 0x447   :  { %v17496_v21 = vadd.f32 %v17493_v52, %v5828_v20  ;;  %v5439_v14 = vadd.f32 %v5425_v8, %v20314_v38  ;;  %v5440_v42 = vadd.f32 %v5427_v28, %v20316_v60  ;;  %v5830_v41 = vsel %vm1410_vm4, %v5827_v63, %v5829_v24 }
 0x448   :  { %v5832_v30 = vsel %vm1410_vm4, %v5829_v24, %v5831_v36 }
 0x44c   :  { %v5623_v32 = vld [vmem:[#allocation6 + $0x30] sm:$0xff] }
 0x45a   :  { %v17188_v40 = vpop.f32.mrb[152].mxu0 }
 0x45b   :  { %v5992_v44 = vpop.f32.mrb[153].mxu0  ;;  %v6039_v2 = vrot.slane %v17188_v40, 4 }
 0x45c   :  { %v17189_v18 = vpop.f32.mrb[154].mxu0  ;;  %v6036_v26 = vrot.slane %v5992_v44, 4 }
 0x45d   :  { %v6041_v27 = vrot.slane %v17189_v18, 4  ;;  %v5995_v3 = vpop.f32.mrb[155].mxu0 }
 0x45e   :  { %v6037_v55 = vrot.slane %v5995_v3, 4 }
 0x45f   :  { %v6042_v11 = vsel %vm5414_vm5, %v6039_v2, %v6041_v27 }
 0x460   :  { %v17469_v5 = vadd.f32 %v17466_v9, %v6042_v11  ;;  %v6038_v38 = vsel %vm5414_vm5, %v6036_v26, %v6037_v55  ;;  %v6040_v60 = vsel %vm5414_vm5, %v6037_v55, %v6039_v2 }
 0x461   :  { %v17484_v45 = vadd.f32 %v17481_v46, %v6038_v38  ;;  %v17514_v6 = vadd.f32 %v17511_v48, %v6040_v60  ;;  %v17144_v25 = vpop.f32.mrb[116].mxu1 }
 0x462   :  { %v5630_v53 = vadd.f32 %v17144_v25, %v5623_v32  ;;  %v17192_v62 = vpop.f32.mrb[156].mxu0  ;;  %v5603_v4 = vpop.f32.mrb[117].mxu1 }
 0x463   :  { %v5628_v15 = vadd.f32 %v5603_v4, %v5439_v14  ;;  %v6008_v0 = vpop.f32.mrb[157].mxu0  ;;  %v17145_v37 = vpop.f32.mrb[118].mxu1  ;;  %v6047_v12 = vrot.slane %v17192_v62, 4 }
 0x464   :  { %5637 = vst [vmem:[#allocation6 + $0x30] sm:$0xff] %v5630_v53  ;;  %v6043_v59 = vrot.slane %v6008_v0, 4  ;;  %v17193_v51 = vpop.f32.mrb[158].mxu0  ;;  %v5606_v35 = vpop.f32.mrb[119].mxu1 }
 0x465   :  { %v5844_v16 = vadd.f32 %v5830_v41, %v5628_v15  ;;  %v5629_v13 = vadd.f32 %v5606_v35, %v5440_v42  ;;  %v6011_v22 = vpop.f32.mrb[159].mxu0 }
 0x466   :  { %v6044_v7 = vsel %vm5414_vm5, %v6041_v27, %v6043_v59  ;;  %v6045_v57 = vrot.slane %v6011_v22, 4 }
 0x467   :  { %v17499_v23 = vadd.f32 %v17496_v21, %v6044_v7  ;;  %v5845_v1 = vadd.f32 %v5832_v30, %v5629_v13 }
 0x468   :  { %v6046_v9 = vsel %vm5414_vm5, %v6043_v59, %v6045_v57  ;;  %v6048_v54 = vsel %vm5414_vm5, %v6045_v57, %v6047_v12 }
 0x469   :  { %v6060_v39 = vadd.f32 %v6046_v9, %v5844_v16  ;;  %v6061_v46 = vadd.f32 %v6048_v54, %v5845_v1 }
 0x46b   :  { %v5812_v48 = vld [vmem:[#allocation6 + $0x30] sm:$0x3f] }
 0x46c   :  { %v5846_v50 = vadd.f32 %v5831_v36, %v5812_v48 }
 0x46e   :  { %5853 = vst [vmem:[#allocation6 + $0x30] sm:$0x3f] %v5846_v50 }
 0x475   :  { %v6028_v34 = vld [vmem:[#allocation6 + $0x30] sm:$0xf] }
 0x476   :  { %v6062_v58 = vadd.f32 %v6047_v12, %v6028_v34 }
 0x478   :  { %6069 = vst [vmem:[#allocation6 + $0x30] sm:$0xf] %v6062_v58 }
 0x47a   :  { %v17212_v47 = vpop.f32.mrb[100].mxu1 }
 0x47b   :  { %v17472_v61 = vadd.f32 %v17469_v5, %v17212_v47  ;;  %v17236_v43 = vpop.f32.mrb[160].mxu0  ;;  %v6208_v17 = vpop.f32.mrb[101].mxu1 }
 0x47c   :  { %v17487_v10 = vadd.f32 %v17484_v45, %v6208_v17  ;;  %v6397_v63 = vpop.f32.mrb[161].mxu0  ;;  %v17213_v33 = vpop.f32.mrb[102].mxu1  ;;  %v6444_v19 = vrot.slane %v17236_v43, 2 }
 0x47d   :  { %v17502_v31 = vadd.f32 %v17499_v23, %v17213_v33  ;;  %v17237_v29 = vpop.f32.mrb[162].mxu0  ;;  %v6211_v49 = vpop.f32.mrb[103].mxu1  ;;  %v6441_v8 = vrot.slane %v6397_v63, 2  ;;  %v14924_v23 = vld [vmem:[%s22637_s7] ss:$0 sm:$0xff] }
 0x47e   :  { %v6446_v52 = vrot.slane %v17237_v29, 2  ;;  %v17517_v20 = vadd.f32 %v17514_v6, %v6211_v49  ;;  %v6400_v24 = vpop.f32.mrb[163].mxu0 }
 0x47f   :  { %v6442_v36 = vrot.slane %v6400_v24, 2  ;;  %v6244_v44 = vld [vmem:[#allocation6 + $0x30] sm:$0xff] }
 0x480   :  { %v6447_v28 = vsel %vm1410_vm4, %v6444_v19, %v6446_v52 }
 0x481   :  { %v6463_v21 = vadd.f32 %v17472_v61, %v6447_v28  ;;  %v6443_v14 = vsel %vm1410_vm4, %v6441_v8, %v6442_v36  ;;  %v6445_v42 = vsel %vm1410_vm4, %v6442_v36, %v6444_v19 }
 0x482   :  { %v6461_v41 = vadd.f32 %v17487_v10, %v6443_v14  ;;  %v6462_v30 = vadd.f32 %v17517_v20, %v6445_v42  ;;  %v17216_v40 = vpop.f32.mrb[120].mxu1 }
 0x483   :  { %v6251_v18 = vadd.f32 %v17216_v40, %v6244_v44  ;;  %v17240_v2 = vpop.f32.mrb[164].mxu0  ;;  %v6224_v27 = vpop.f32.mrb[121].mxu1  ;;  %v17988_v44 = vld [vmem:[%s22635_s8 + $0x8] ss:$16 sps:$4 sm:$0xff]  }
 0x484   :  { %v6249_v3 = vadd.f32 %v6224_v27, %v6060_v39  ;;  %v6413_v26 = vpop.f32.mrb[165].mxu0  ;;  %v17217_v55 = vpop.f32.mrb[122].mxu1  ;;  %v6452_v45 = vrot.slane %v17240_v2, 2 }
 0x485   :  { %6258 = vst [vmem:[#allocation6 + $0x30] sm:$0xff] %v6251_v18  ;;  %v6448_v11 = vrot.slane %v6413_v26, 2  ;;  %v17241_v32 = vpop.f32.mrb[166].mxu0  ;;  %v6227_v5 = vpop.f32.mrb[123].mxu1  ;;  %v17997_v18 = vld [vmem:[%s22635_s8 + $0x2c] ss:$16 sps:$4 sm:$0xff]  }
 0x486   :  { %v6250_v38 = vadd.f32 %v6227_v5, %v6061_v46  ;;  %v6416_v60 = vpop.f32.mrb[167].mxu0  ;;  %v17995_v5 = vld [vmem:[%s22635_s8 + $0x28] ss:$16 sps:$4 sm:$0xff]  }
 0x487   :  { %v6449_v6 = vsel %vm1410_vm4, %v6446_v52, %v6448_v11  ;;  %v6450_v25 = vrot.slane %v6416_v60, 2  ;;  %v17998_v60 = vld [vmem:[%s22635_s8 + $0x100] ss:$16 sps:$4 sm:$0xff]  }
 0x488   :  { %v6464_v53 = vadd.f32 %v17502_v31, %v6449_v6 }
 0x489   :  { %v6451_v62 = vsel %vm1410_vm4, %v6448_v11, %v6450_v25  ;;  %v6453_v4 = vsel %vm1410_vm4, %v6450_v25, %v6452_v45  ;;  %v18006_v25 = vld [vmem:[%s22635_s8 + $0x4c] ss:$16 sps:$4 sm:$0xff]  }
 0x48a   :  { %v6465_v15 = vadd.f32 %v6451_v62, %v6249_v3  ;;  %v6466_v0 = vadd.f32 %v6453_v4, %v6250_v38 }
 0x48c   :  { %v6433_v37 = vld [vmem:[#allocation6 + $0x30] sm:$0x3f] }
 0x48d   :  { %v6467_v59 = vadd.f32 %v6452_v45, %v6433_v37 }
 0x48f   :  { %6474 = vst [vmem:[#allocation6 + $0x30] sm:$0x3f] %v6467_v59 }
 0x496   :  { %v6649_v47 = vld [vmem:[#allocation6 + $0x30] sm:$0xf] }
 0x49b   :  { %v17260_v51 = vpop.f32.mrb[124].mxu1 }
 0x49c   :  { %v6613_v35 = vpop.f32.mrb[125].mxu1  ;;  %v6660_v13 = vrot.slane %v17260_v51, 4 }
 0x49d   :  { %v17261_v16 = vpop.f32.mrb[126].mxu1  ;;  %v6657_v7 = vrot.slane %v6613_v35, 4 }
 0x49e   :  { %v6662_v22 = vrot.slane %v17261_v16, 4  ;;  %v6616_v12 = vpop.f32.mrb[127].mxu1  ;;  %v18004_v16 = vld [vmem:[%s22635_s8 + $0x48] ss:$16 sps:$4 sm:$0xff]  }
 0x49f   :  { %v6658_v57 = vrot.slane %v6616_v12, 4  ;;  %v18014_v12 = vld [vmem:[%s22635_s8 + $0x6c] ss:$16 sps:$4 sm:$0xff]  }
 0x4a0   :  { %v6663_v1 = vsel %vm5414_vm5, %v6660_v13, %v6662_v22 }
 0x4a1   :  { %v6679_v9 = vadd.f32 %v6663_v1, %v6463_v21  ;;  %v6659_v54 = vsel %vm5414_vm5, %v6657_v7, %v6658_v57  ;;  %v6661_v39 = vsel %vm5414_vm5, %v6658_v57, %v6660_v13  ;;  %v18007_v13 = vld [vmem:[%s22635_s8 + $0x120] ss:$16 sps:$4 sm:$0xff]   ;;  %v18012_v7 = vld [vmem:[%s22635_s8 + $0x68] ss:$16 sps:$4 sm:$0xff]   ;;  %v18017_v57 = vld [vmem:[%s22635_s8 + $0x144] ss:$16 sps:$4 sm:$0xff]  }
 0x4a2   :  { %v6677_v46 = vadd.f32 %v6659_v54, %v6461_v41  ;;  %v6678_v48 = vadd.f32 %v6661_v39, %v6462_v30  ;;  %v18015_v1 = vld [vmem:[%s22635_s8 + $0x140] ss:$16 sps:$4 sm:$0xff]   ;;  %v18022_v39 = vld [vmem:[%s22634_s9 + $0xc] ss:$16 sps:$4 sm:$0xff]  }
 0x4a3   :  { %v17264_v50 = vpop.f32.mrb[128].mxu1  ;;  %v6707_v24 = vadd.f32 %v14924_v23, %v6679_v9 }
 0x4a4   :  { %v6705_v34 = vadd.f32 %v14924_v23, %v6677_v46  ;;  %v6706_v58 = vadd.f32 %v14924_v23, %v6678_v48  ;;  %v6668_v61 = vrot.slane %v17264_v50, 4  ;;  %v6629_v43 = vpop.f32.mrb[129].mxu1  ;;  %v18025_v46 = vld [vmem:[%s22635_s8 + $0x164] ss:$16 sps:$4 sm:$0xff]   ;;  %v18020_v50 = vld [vmem:[%s22634_s9 + $0x8] ss:$16 sps:$4 sm:$0xff]  }
 0x4a5   :  { %v6664_v17 = vrot.slane %v6629_v43, 4  ;;  %v17265_v10 = vpop.f32.mrb[130].mxu1  ;;  %v6714_v42 = vmax.f32 %v6707_v24, 0.0  ;;  %v18023_v43 = vld [vmem:[%s22635_s8 + $0x160] ss:$16 sps:$4 sm:$0xff]  }
 0x4a6   :  { %v6712_v63 = vmax.f32 %v6705_v34, 0.0  ;;  %v6713_v33 = vmax.f32 %v6706_v58, 0.0  ;;  %v6683_v31 = vadd.f32 %v6668_v61, %v6649_v47  ;;  %v6632_v29 = vpop.f32.mrb[131].mxu1  ;;  %v18028_v10 = vld [vmem:[%s22634_s9 + $0x28] ss:$16 sps:$4 sm:$0xff]  }
 0x4a7   :  { %v6665_v49 = vsel %vm5414_vm5, %v6662_v22, %v6664_v17  ;;  %v6666_v19 = vrot.slane %v6632_v29, 4  ;;  %v18032_v29 = vld [vmem:[%s22635_s8 + $0x180] ss:$16 sps:$4 sm:$0xff]  }
 0x4a8   :  { %6690 = vst [vmem:[#allocation6 + $0x30] sm:$0xf] %v6683_v31  ;;  %v6680_v52 = vadd.f32 %v6665_v49, %v6464_v53  ;;  %v16356_v20 = vpack.c.bf16 %v6713_v33, %v6712_v63  ;;  %v18009_v53 = vld [vmem:[%s22635_s8 + $0x124] ss:$16 sps:$4 sm:$0xff]   ;;  %v18030_v63 = vld [vmem:[%s22634_s9 + $0x2c] ss:$16 sps:$4 sm:$0xff]  }
 0x4a9   :  { %v6667_v8 = vsel %vm5414_vm5, %v6664_v17, %v6666_v19  ;;  %v6669_v36 = vsel %vm5414_vm5, %v6666_v19, %v6668_v61  ;;  %v18034_v33 = vld [vmem:[%s22635_s8 + $0x184] ss:$16 sps:$4 sm:$0xff]  }
 0x4aa   :  { %v6681_v28 = vadd.f32 %v6667_v8, %v6465_v15  ;;  %v6682_v21 = vadd.f32 %v6669_v36, %v6466_v0  ;;  %16357 = vst [vmem:[#allocation4] sm:$0xff] %v16356_v20   ;;  %v6708_v14 = vadd.f32 %v14924_v23, %v6680_v52  ;;  %v18039_v52 = vld [vmem:[%s22634_s9 + $0x4c] ss:$16 sps:$4 sm:$0xff]   ;;  %v18042_v20 = vld [vmem:[%s22635_s8 + $0x1a4] ss:$16 sps:$4 sm:$0xff]  }
 0x4ac   :  { %v6715_v41 = vmax.f32 %v6708_v14, 0.0  ;;  %v6709_v30 = vadd.f32 %v14924_v23, %v6681_v28  ;;  %v6710_v40 = vadd.f32 %v14924_v23, %v6682_v21  ;;  %v18037_v28 = vld [vmem:[%s22634_s9 + $0x48] ss:$16 sps:$4 sm:$0xff]   ;;  %v18040_v21 = vld [vmem:[%s22635_s8 + $0x1a0] ss:$16 sps:$4 sm:$0xff]  }
 0x4ae   :  { %v16361_v2 = vpack.c.bf16 %v6715_v41, %v6714_v42  ;;  %v6716_v27 = vmax.f32 %v6709_v30, 0.0  ;;  %v6717_v3 = vmax.f32 %v6710_v40, 0.0  ;;  %v18047_v41 = vld [vmem:[%s22634_s9 + $0x6c] ss:$16 sps:$4 sm:$0xff]   ;;  %v18050_v30 = vld [vmem:[%s22635_s8 + $0x1c4] ss:$16 sps:$4 sm:$0xff]  }
 0x4af   :  { %v6697_v26 = vld [vmem:[#allocation6 + $0x30] sm:$0xff] }
 0x4b0   :  { %16372 = vst [vmem:[#allocation4 + $0x8] sm:$0xff] %v16361_v2   ;;  %v16366_v55 = vpack.c.bf16 %v6717_v3, %v6716_v27  ;;  %v6711_v11 = vadd.f32 %v14924_v23, %v6697_v26  ;;  %v18048_v2 = vld [vmem:[%s22635_s8 + $0x1c0] ss:$16 sps:$4 sm:$0xff]   ;;  %v18055_v3 = vld [vmem:[%s22634_s9 + $0x8c] ss:$16 sps:$4 sm:$0xff]  }
 0x4b1   :  { %v20436_v32 = vld [vmem:[#allocation4] sm:$0x1]  ;;  %v18011_v35 = vld [vmem:[#allocation4 + $0x4] ss:$0 sps:$4 sm:$0x88]  }
 0x4b2   :  { %14948 = vmatmul.mubr.msk.bf16.vlgmr.msra.gmra.mrb[168].mxu0 %vm1086_vm1, %v20436_v32  ;;  %v17994_v38 = vld [vmem:[#allocation4] ss:$0 sps:$4 sm:$0x11]   ;;  %16373 = vst [vmem:[#allocation4 + $0x10] sm:$0xff] %v16366_v55   ;;  %v6718_v62 = vmax.f32 %v6711_v11, 0.0  ;;  %v11506_v23 = vrot.slane %v18011_v35, 3 }
 0x4b3   :  { %v18001_v45 = vld [vmem:[#allocation4] ss:$0 sps:$4 sm:$0x44]   ;;  %6930 = vmatpush1.bf16.msra.mxu0 %v17988_v44  ;;  %6961 = vmatprep.mubr.bf16.mxu0 %v22648_v56  ;;  %v18058_v26 = vld [vmem:[%s22635_s8 + $0x1e4] ss:$16 sps:$4 sm:$0xff]  }
 0x4b4   :  { %v20446_v6 = vld [vmem:[#allocation4] ss:$0 sps:$4 sm:$0x22]   ;;  %10497 = vrot.lane.b32.xlu0 %v17994_v38, %s18904_s14  ;;  %6931 = vmatprep.subr.bf16.mxu0 %v17997_v18  ;;  %v11120_v4 = vrot.slane %v18001_v45, 2  ;;  %v16327_v59 = vpack.c.bf16 %v6718_v62, %v6718_v62  ;;  %v18045_v18 = vld [vmem:[%s22634_s9 + $0x68] ss:$16 sps:$4 sm:$0xff]  }
 0x4b5   :  { %v18003_v15 = vld [vmem:[#allocation4] ss:$0 sps:$4 sm:$0x22]   ;;  %v7233_v0 = vrot.slane %v20446_v6, 1  ;;  %v18053_v11 = vld [vmem:[%s22634_s9 + $0x88] ss:$16 sps:$4 sm:$0xff]  }
 0x4b6   :  { %v18010_v37 = vld [vmem:[#allocation4] ss:$0 sps:$4 sm:$0x88]   ;;  %11121 = vrot.lane.b32.xlu1 %v11120_v4, %s18904_s14  ;;  %v10927_v51 = vrot.slane %v18003_v15, 1  ;;  %6754 = vst [vmem:[#allocation4 + $0x18] sm:$0xf] %v16327_v59 }
 0x4b7   :  { %6932 = vmatpush1.bf16.msra.mxu0 %v17995_v5  ;;  %15015 = vmatmul.mubr.msk.bf16.vlgmr.msra.gmra.mrb[136].mxu1 %vm1086_vm1, %v7233_v0  ;;  %v11313_v22 = vrot.slane %v18010_v37, 3  ;;  %v18019_v9 = vld [vmem:[#allocation4 + $0x8] ss:$0 sps:$4 sm:$0x22]   ;;  %v18062_v38 = vld [vmem:[%s22634_s9 + $0xac] ss:$16 sps:$4 sm:$0xff]  }
 0x4b8   :  { %7509 = vmatpush1.bf16.msra.mxu1 %v17998_v60  ;;  %10928 = vrot.lane.b32.xlu0 %v10927_v51, %s18904_s14  ;;  %v18018_v54 = vld [vmem:[#allocation4 + $0x8] ss:$0 sps:$4 sm:$0x11]   ;;  %v18027_v34 = vld [vmem:[#allocation4 + $0xc] ss:$0 sps:$4 sm:$0x44]  }
 0x4b9   :  { %6933 = vmatprep.subr.bf16.mxu0 %v18006_v25  ;;  %7510 = vmatprep.subr.bf16.mxu1 %v18009_v53  ;;  %v18026_v48 = vld [vmem:[#allocation4 + $0x8] ss:$0 sps:$4 sm:$0x44]   ;;  %v11891_v58 = vrot.slane %v18019_v9, 1  ;;  %v12277_v31 = vrot.slane %v18027_v34, 2 }
 0x4ba   :  { %11314 = vrot.lane.b32.xlu1 %v11313_v22, %s18904_s14  ;;  %7540 = vmatprep.mubr.bf16.mxu1 %v22648_v56  ;;  %v20493_v47 = vld [vmem:[#allocation4] ss:$0 sps:$4 sm:$0x44]   ;;  %v18035_v61 = vld [vmem:[#allocation4 + $0xc] ss:$0 sps:$4 sm:$0x88]  }
 0x4bb   :  { %6934 = vmatpush1.bf16.msra.mxu0 %v18004_v16  ;;  %v12084_v17 = vrot.slane %v18026_v48, 2  ;;  %v7424_v49 = vrot.slane %v20493_v47, 2  ;;  %v12470_v19 = vrot.slane %v18035_v61, 3  ;;  %v18043_v24 = vld [vmem:[#allocation4 + $0x10] ss:$0 sps:$4 sm:$0x22]  }
 0x4bc   :  { %7511 = vmatpush1.bf16.msra.mxu1 %v18007_v13  ;;  %11507 = vrot.lane.b32.xlu0 %v11506_v23, %s18904_s14  ;;  %v18036_v8 = vld [vmem:[#allocation4 + $0x10] ss:$0 sps:$4 sm:$0x11]   ;;  %v18044_v36 = vld [vmem:[#allocation4 + $0x14] ss:$0 sps:$4 sm:$0x22]  }
 0x4bd   :  { %6935 = vmatprep.subr.bf16.mxu0 %v18014_v12  ;;  %7512 = vmatprep.subr.bf16.mxu1 %v18017_v57  ;;  %v12855_v14 = vrot.slane %v18043_v24, 1  ;;  %v18051_v42 = vld [vmem:[#allocation4 + $0x14] ss:$0 sps:$4 sm:$0x44]   ;;  %v13048_v40 = vrot.slane %v18044_v36, 1 }
 0x4be   :  { %11699 = vrot.lane.b32.xlu1 %v18018_v54, %s18904_s14  ;;  %v18052_v44 = vld [vmem:[#allocation4 + $0x14] ss:$0 sps:$4 sm:$0x88]   ;;  %v13241_v27 = vrot.slane %v18051_v42, 2  ;;  %v18060_v25 = vld [vmem:[%s22634_s9 + $0xa8] ss:$16 sps:$4 sm:$0xff]  }
 0x4bf   :  { %6936 = vmatpush1.bf16.msra.mxu0 %v18012_v7  ;;  %v13434_v55 = vrot.slane %v18052_v44, 3  ;;  %v18059_v5 = vld [vmem:[#allocation4 + $0x18] ss:$0 sps:$4 sm:$0x11]   ;;  %v18066_v45 = vld [vmem:[%s22635_s8 + $0x204] ss:$16 sps:$4 sm:$0xff]  }
 0x4c0   :  { %7513 = vmatpush1.bf16.msra.mxu1 %v18015_v1  ;;  %11892 = vrot.lane.b32.xlu0 %v11891_v58, %s18904_s14  ;;  %v20566_v60 = vld [vmem:[#allocation4] ss:$0 sps:$4 sm:$0x88]   ;;  %v18069_v62 = vld [vmem:[%s22634_s9 + $0xcc] ss:$16 sps:$4 sm:$0xff]  }
 0x4c1   :  { %7171 = vmatprep.subr.bf16.mxu0 %v18022_v39  ;;  %7514 = vmatprep.subr.bf16.mxu1 %v18025_v46  ;;  %v18064_v53 = vld [vmem:[%s22635_s8 + $0x200] ss:$16 sps:$4 sm:$0xff]   ;;  %v7615_v4 = vrot.slane %v20566_v60, 3  ;;  %v18072_v15 = vld [vmem:[%s22635_s8 + $0x224] ss:$16 sps:$4 sm:$0xff]  }
 0x4c2   :  { %14949 = vmatmul.mubr.msk.bf16.vlgmr.msra.gmra.mrb[172].mxu0 %vm1086_vm1, %v20436_v32  ;;  %12085 = vrot.lane.b32.xlu1 %v12084_v17, %s18904_s14  ;;  %v18056_v32 = vld [vmem:[%s22635_s8 + $0x1e0] ss:$16 sps:$4 sm:$0xff]   ;;  %v18067_v37 = vld [vmem:[%s22634_s9 + $0xc8] ss:$16 sps:$4 sm:$0xff]   ;;  %v18075_v51 = vld [vmem:[%s22634_s9 + $0xec] ss:$16 sps:$4 sm:$0xff]  }
 0x4c3   :  { %7172 = vmatpush1.bf16.msra.mxu0 %v18020_v50  ;;  %7203 = vmatprep.mubr.bf16.mxu0 %v22648_v56  ;;  %v18070_v59 = vld [vmem:[%s22635_s8 + $0x220] ss:$16 sps:$4 sm:$0xff]   ;;  %v18078_v35 = vld [vmem:[%s22635_s8 + $0x244] ss:$16 sps:$4 sm:$0xff]   ;;  %v18073_v16 = vld [vmem:[%s22634_s9 + $0xe8] ss:$16 sps:$4 sm:$0xff]  }
 0x4c4   :  { %7515 = vmatpush1.bf16.msra.mxu1 %v18023_v43  ;;  %12278 = vrot.lane.b32.xlu0 %v12277_v31, %s18904_s14  ;;  %v18076_v13 = vld [vmem:[%s22635_s8 + $0x240] ss:$16 sps:$4 sm:$0xff]   ;;  %v18081_v22 = vld [vmem:[%s22635_s8 + $0x8c] ss:$16 sps:$4 sm:$0xff]   ;;  %v18079_v12 = vld [vmem:[%s22635_s8 + $0x88] ss:$16 sps:$4 sm:$0xff]  }
 0x4c5   :  { %7173 = vmatprep.subr.bf16.mxu0 %v18030_v63  ;;  %7699 = vmatprep.subr.bf16.mxu1 %v18034_v33  ;;  %v18084_v7 = vld [vmem:[%s22635_s8 + $0x264] ss:$16 sps:$4 sm:$0xff]   ;;  %v18082_v57 = vld [vmem:[%s22635_s8 + $0x260] ss:$16 sps:$4 sm:$0xff]   ;;  %v18087_v23 = vld [vmem:[%s22635_s8 + $0xac] ss:$16 sps:$4 sm:$0xff]  }
 0x4c6   :  { %12471 = vrot.lane.b32.xlu1 %v12470_v19, %s18904_s14  ;;  %v20622_v1 = vld [vmem:[#allocation4 + $0x4] ss:$0 sps:$4 sm:$0x88]   ;;  %v18900_v54 = vld [vmem:[%s22636_s1] sm:$0x1] }
 0x4c7   :  { %15050 = vmatmul.mubr.msk.bf16.vlgmr.msra.gmra.mrb[140].mxu1 %vm1086_vm1, %v7424_v49  ;;  %7174 = vmatpush1.bf16.msra.mxu0 %v18028_v10  ;;  %v18091_v9 = vld [vmem:[%s22635_s8 + $0x284] ss:$16 sps:$4 sm:$0xff]   ;;  %v18085_v39 = vld [vmem:[%s22635_s8 + $0xa8] ss:$16 sps:$4 sm:$0xff]   ;;  %v18089_v46 = vld [vmem:[%s22635_s8 + $0x280] ss:$16 sps:$4 sm:$0xff]  }
 0x4c8   :  { %7700 = vmatpush1.bf16.msra.mxu1 %v18032_v29  ;;  %12663 = vrot.lane.b32.xlu0 %v18036_v8, %s18904_s14  ;;  %v18094_v48 = vld [vmem:[%s22635_s8 + $0xcc] ss:$16 sps:$4 sm:$0xff]   ;;  %v18097_v50 = vld [vmem:[%s22635_s8 + $0x2a4] ss:$16 sps:$4 sm:$0xff]   ;;  %v7806_v34 = vrot.slane %v20622_v1, 3 }
 0x4c9   :  { %7175 = vmatprep.subr.bf16.mxu0 %v18039_v52  ;;  %7701 = vmatprep.subr.bf16.mxu1 %v18042_v20  ;;  %v18092_v58 = vld [vmem:[%s22635_s8 + $0xc8] ss:$16 sps:$4 sm:$0xff]   ;;  %v18095_v61 = vld [vmem:[%s22635_s8 + $0x2a0] ss:$16 sps:$4 sm:$0xff]   ;;  %v18100_v43 = vld [vmem:[%s22635_s8 + $0xec] ss:$16 sps:$4 sm:$0xff]  }
 0x4ca   :  { %12856 = vrot.lane.b32.xlu1 %v12855_v14, %s18904_s14  ;;  %7731 = vmatprep.mubr.bf16.mxu1 %v22648_v56  ;;  %v18098_v17 = vld [vmem:[%s22635_s8 + $0xe8] ss:$16 sps:$4 sm:$0xff]   ;;  %v18103_v10 = vld [vmem:[%s22635_s8 + $0x2c4] ss:$16 sps:$4 sm:$0xff]   ;;  %v18101_v63 = vld [vmem:[%s22635_s8 + $0x2c0] ss:$16 sps:$4 sm:$0xff]  }
 0x4cb   :  { %7176 = vmatpush1.bf16.msra.mxu0 %v18037_v28  ;;  %v18106_v33 = vld [vmem:[%s22635_s8 + $0x10c] ss:$16 sps:$4 sm:$0xff]   ;;  %v18104_v31 = vld [vmem:[%s22635_s8 + $0x108] ss:$16 sps:$4 sm:$0xff]   ;;  %v18109_v29 = vld [vmem:[%s22635_s8 + $0x2e4] ss:$16 sps:$4 sm:$0xff]  }
 0x4cc   :  { %7702 = vmatpush1.bf16.msra.mxu1 %v18040_v21  ;;  %13049 = vrot.lane.b32.xlu0 %v13048_v40, %s18904_s14  ;;  %v18107_v19 = vld [vmem:[%s22635_s8 + $0x2e0] ss:$16 sps:$4 sm:$0xff]   ;;  %v18112_v52 = vld [vmem:[%s22635_s8 + $0x12c] ss:$16 sps:$4 sm:$0xff]   ;;  %v18115_v20 = vld [vmem:[%s22635_s8 + $0x304] ss:$16 sps:$4 sm:$0xff]  }
 0x4cd   :  { %7177 = vmatprep.subr.bf16.mxu0 %v18047_v41  ;;  %7703 = vmatprep.subr.bf16.mxu1 %v18050_v30  ;;  %v18110_v24 = vld [vmem:[%s22635_s8 + $0x128] ss:$16 sps:$4 sm:$0xff]   ;;  %v18113_v8 = vld [vmem:[%s22635_s8 + $0x300] ss:$16 sps:$4 sm:$0xff]   ;;  %v18118_v36 = vld [vmem:[%s22635_s8 + $0x14c] ss:$16 sps:$4 sm:$0xff]  }
 0x4ce   :  { %13242 = vrot.lane.b32.xlu1 %v13241_v27, %s18904_s14  ;;  %v20697_v6 = vld [vmem:[#allocation4 + $0x8] sm:$0x1]  ;;  %v18119_v21 = vld [vmem:[%s22635_s8 + $0x320] ss:$16 sps:$4 sm:$0xff]   ;;  %v18124_v14 = vld [vmem:[%s22635_s8 + $0x16c] ss:$16 sps:$4 sm:$0xff]  }
 0x4cf   :  { %7178 = vmatpush1.bf16.msra.mxu0 %v18045_v18  ;;  %v18116_v28 = vld [vmem:[%s22635_s8 + $0x148] ss:$16 sps:$4 sm:$0xff]   ;;  %v18127_v41 = vld [vmem:[%s22635_s8 + $0x344] ss:$16 sps:$4 sm:$0xff]   ;;  %v18125_v30 = vld [vmem:[%s22635_s8 + $0x340] ss:$16 sps:$4 sm:$0xff]  }
 0x4d0   :  { %7704 = vmatpush1.bf16.msra.mxu1 %v18048_v2  ;;  %13435 = vrot.lane.b32.xlu0 %v13434_v55, %s18904_s14  ;;  %v18122_v42 = vld [vmem:[%s22635_s8 + $0x168] ss:$16 sps:$4 sm:$0xff]   ;;  %v18130_v40 = vld [vmem:[%s22635_s8 + $0x18c] ss:$16 sps:$4 sm:$0xff]   ;;  %v18133_v18 = vld [vmem:[%s22635_s8 + $0x364] ss:$16 sps:$4 sm:$0xff]  }
 0x4d1   :  { %7179 = vmatprep.subr.bf16.mxu0 %v18055_v3  ;;  %7705 = vmatprep.subr.bf16.mxu1 %v18058_v26  ;;  %v18128_v44 = vld [vmem:[%s22635_s8 + $0x188] ss:$16 sps:$4 sm:$0xff]   ;;  %v18131_v2 = vld [vmem:[%s22635_s8 + $0x360] ss:$16 sps:$4 sm:$0xff]   ;;  %v18136_v27 = vld [vmem:[%s22635_s8 + $0x1ac] ss:$16 sps:$4 sm:$0xff]  }
 0x4d2   :  { %13627 = vrot.lane.b32.xlu1 %v18059_v5, %s18904_s14  ;;  %v20738_v3 = vld [vmem:[#allocation4 + $0x8] ss:$0 sps:$4 sm:$0x22]   ;;  %v18140_v26 = vld [vmem:[%s22635_s8 + $0x384] ss:$16 sps:$4 sm:$0xff]  }
 0x4d3   :  { %7180 = vmatpush1.bf16.msra.mxu0 %v18053_v11  ;;  %v18134_v55 = vld [vmem:[%s22635_s8 + $0x1a8] ss:$16 sps:$4 sm:$0xff]   ;;  %v18138_v11 = vld [vmem:[%s22635_s8 + $0x380] ss:$16 sps:$4 sm:$0xff]   ;;  %v18146_v5 = vld [vmem:[%s22635_s8 + $0x3a4] ss:$16 sps:$4 sm:$0xff]  }
 0x4d4   :  { %7706 = vmatpush1.bf16.msra.mxu1 %v18056_v32  ;;  %7181 = vmatprep.subr.bf16.mxu0 %v18062_v38  ;;  %v18143_v32 = vld [vmem:[%s22635_s8 + $0x1cc] ss:$16 sps:$4 sm:$0xff]   ;;  %v8184_v47 = vrot.slane %v20738_v3, 1  ;;  %v18144_v38 = vld [vmem:[%s22635_s8 + $0x3a0] ss:$16 sps:$4 sm:$0xff]  }
 0x4d5   :  { %7890 = vmatprep.subr.bf16.mxu1 %v18066_v45  ;;  %v18149_v45 = vld [vmem:[%s22635_s8 + $0x1ec] ss:$16 sps:$4 sm:$0xff]   ;;  %v20996_v3 = vld [vmem:[#allocation4 + $0x10] sm:$0x1] }
 0x4d7   :  { %15085 = vmatmul.mubr.msk.bf16.vlgmr.msra.gmra.mrb[144].mxu1 %vm1086_vm1, %v7615_v4  ;;  %7182 = vmatpush1.bf16.msra.mxu0 %v18060_v25  ;;  %v18152_v25 = vld [vmem:[%s22635_s8 + $0x3c4] ss:$16 sps:$4 sm:$0xff]  }
 0x4d8   :  { %7891 = vmatpush1.bf16.msra.mxu1 %v18064_v53  ;;  %7183 = vmatprep.subr.bf16.mxu0 %v18069_v62  ;;  %v20776_v53 = vpop.f32.mrb[132].mxu1 }
 0x4d9   :  { %7892 = vmatprep.subr.bf16.mxu1 %v18072_v15  ;;  %7922 = vmatprep.mubr.bf16.mxu1 %v22648_v56  ;;  %v20778_v62 = vpop.f32.mrb[133].mxu1  ;;  %v18147_v15 = vld [vmem:[%s22635_s8 + $0x1e8] ss:$16 sps:$4 sm:$0xff]  }
 0x4db   :  { %7184 = vmatpush1.bf16.msra.mxu0 %v18067_v37  ;;  %v7168_v37 = vpop.f32.mrb[134].mxu1 }
 0x4dc   :  { %7893 = vmatpush1.bf16.msra.mxu1 %v18070_v59  ;;  %7185 = vmatprep.subr.bf16.mxu0 %v18075_v51  ;;  %v18150_v59 = vld [vmem:[%s22635_s8 + $0x3c0] ss:$16 sps:$4 sm:$0xff]   ;;  %v18155_v51 = vld [vmem:[%s22635_s8 + $0x20c] ss:$16 sps:$4 sm:$0xff]   ;;  %v18233_v37 = vld [vmem:[%s22635_s8 + $0x564] ss:$16 sps:$4 sm:$0xff]  }
 0x4dd   :  { %7894 = vmatprep.subr.bf16.mxu1 %v18078_v35  ;;  %v7169_v35 = vpop.f32.mrb[135].mxu1 }
 0x4de   :  { %v18239_v35 = vld [vmem:[%s22635_s8 + $0x584] ss:$16 sps:$4 sm:$0xff]  }
 0x4df   :  { %7186 = vmatpush1.bf16.msra.mxu0 %v18073_v16  ;;  %v18153_v16 = vld [vmem:[%s22635_s8 + $0x208] ss:$16 sps:$4 sm:$0xff]  }
 0x4e0   :  { %7895 = vmatpush1.bf16.msra.mxu1 %v18076_v13  ;;  %7358 = vmatprep.subr.bf16.mxu0 %v18081_v22  ;;  %v18158_v13 = vld [vmem:[%s22635_s8 + $0x3e4] ss:$16 sps:$4 sm:$0xff]   ;;  %v18156_v22 = vld [vmem:[%s22635_s8 + $0x3e0] ss:$16 sps:$4 sm:$0xff]  }
 0x4e1   :  { %7896 = vmatprep.subr.bf16.mxu1 %v18084_v7  ;;  %v20801_v7 = vld [vmem:[#allocation4 + $0x8] ss:$0 sps:$4 sm:$0x44]  }
 0x4e2   :  { %7204 = vmatmul.mubr.bf16.vlgmr.msra.gmra.mrb[176].mxu0 %v18900_v54  ;;  %v18168_v54 = vld [vmem:[%s22635_s8 + $0x24c] ss:$16 sps:$4 sm:$0xff]   ;;  %v8375_v60 = vrot.slane %v20801_v7, 2 }
 0x4e3   :  { %7359 = vmatpush1.bf16.msra.mxu0 %v18079_v12  ;;  %7390 = vmatprep.mubr.bf16.mxu0 %v22648_v56  ;;  %v18161_v12 = vld [vmem:[%s22635_s8 + $0x22c] ss:$16 sps:$4 sm:$0xff]  }
 0x4e4   :  { %7897 = vmatpush1.bf16.msra.mxu1 %v18082_v57  ;;  %7360 = vmatprep.subr.bf16.mxu0 %v18087_v23  ;;  %v18165_v57 = vld [vmem:[%s22635_s8 + $0x404] ss:$16 sps:$4 sm:$0xff]   ;;  %v18159_v23 = vld [vmem:[%s22635_s8 + $0x228] ss:$16 sps:$4 sm:$0xff]  }
 0x4e5   :  { %8077 = vmatprep.subr.bf16.mxu1 %v18091_v9  ;;  %v18163_v9 = vld [vmem:[%s22635_s8 + $0x400] ss:$16 sps:$4 sm:$0xff]  }
 0x4e7   :  { %15120 = vmatmul.mubr.msk.bf16.vlgmr.msra.gmra.mrb[148].mxu1 %vm1086_vm1, %v7806_v34  ;;  %7361 = vmatpush1.bf16.msra.mxu0 %v18085_v39  ;;  %v18171_v39 = vld [vmem:[%s22635_s8 + $0x424] ss:$16 sps:$4 sm:$0xff]  }
 0x4e8   :  { %8078 = vmatpush1.bf16.msra.mxu1 %v18089_v46  ;;  %7362 = vmatprep.subr.bf16.mxu0 %v18094_v48  ;;  %v18169_v46 = vld [vmem:[%s22635_s8 + $0x420] ss:$16 sps:$4 sm:$0xff]   ;;  %v18174_v48 = vld [vmem:[%s22635_s8 + $0x26c] ss:$16 sps:$4 sm:$0xff]  }
 0x4e9   :  { %8079 = vmatprep.subr.bf16.mxu1 %v18097_v50  ;;  %8109 = vmatprep.mubr.bf16.mxu1 %v22648_v56  ;;  %v18177_v50 = vld [vmem:[%s22635_s8 + $0x444] ss:$16 sps:$4 sm:$0xff]  }
 0x4eb   :  { %7363 = vmatpush1.bf16.msra.mxu0 %v18092_v58  ;;  %v18172_v58 = vld [vmem:[%s22635_s8 + $0x268] ss:$16 sps:$4 sm:$0xff]  }
 0x4ec   :  { %8080 = vmatpush1.bf16.msra.mxu1 %v18095_v61  ;;  %7364 = vmatprep.subr.bf16.mxu0 %v18100_v43  ;;  %v18175_v61 = vld [vmem:[%s22635_s8 + $0x440] ss:$16 sps:$4 sm:$0xff]   ;;  %v18180_v43 = vld [vmem:[%s22635_s8 + $0x28c] ss:$16 sps:$4 sm:$0xff]  }
 0x4ed   :  { %8081 = vmatprep.subr.bf16.mxu1 %v18103_v10  ;;  %v18183_v10 = vld [vmem:[%s22635_s8 + $0x464] ss:$16 sps:$4 sm:$0xff]  }
 0x4ef   :  { %7365 = vmatpush1.bf16.msra.mxu0 %v18098_v17  ;;  %v18178_v17 = vld [vmem:[%s22635_s8 + $0x288] ss:$16 sps:$4 sm:$0xff]  }
 0x4f0   :  { %8082 = vmatpush1.bf16.msra.mxu1 %v18101_v63  ;;  %7549 = vmatprep.subr.bf16.mxu0 %v18106_v33  ;;  %v18181_v63 = vld [vmem:[%s22635_s8 + $0x460] ss:$16 sps:$4 sm:$0xff]   ;;  %v18186_v33 = vld [vmem:[%s22635_s8 + $0x2ac] ss:$16 sps:$4 sm:$0xff]  }
 0x4f1   :  { %8083 = vmatprep.subr.bf16.mxu1 %v18109_v29  ;;  %v18190_v29 = vld [vmem:[%s22635_s8 + $0x484] ss:$16 sps:$4 sm:$0xff]  }
 0x4f2   :  { %15016 = vmatmul.mubr.msk.bf16.vlgmr.msra.gmra.mrb[180].mxu0 %vm1086_vm1, %v7233_v0  ;;  %v18121_v0 = vld [vmem:[%s22635_s8 + $0x324] ss:$16 sps:$4 sm:$0xff]  }
 0x4f3   :  { %7550 = vmatpush1.bf16.msra.mxu0 %v18104_v31  ;;  %7581 = vmatprep.mubr.bf16.mxu0 %v22648_v56  ;;  %v20860_v31 = vld [vmem:[#allocation4 + $0xc] ss:$0 sps:$4 sm:$0x44]  }
 0x4f4   :  { %8084 = vmatpush1.bf16.msra.mxu1 %v18107_v19  ;;  %7551 = vmatprep.subr.bf16.mxu0 %v18112_v52  ;;  %v18184_v19 = vld [vmem:[%s22635_s8 + $0x2a8] ss:$16 sps:$4 sm:$0xff]   ;;  %v18188_v52 = vld [vmem:[%s22635_s8 + $0x480] ss:$16 sps:$4 sm:$0xff]   ;;  %v8566_v1 = vrot.slane %v20860_v31, 2 }
 0x4f5   :  { %8268 = vmatprep.subr.bf16.mxu1 %v18115_v20  ;;  %v18193_v20 = vld [vmem:[%s22635_s8 + $0x2cc] ss:$16 sps:$4 sm:$0xff]  }
 0x4f7   :  { %15154 = vmatmul.mubr.msk.bf16.vlgmr.msra.gmra.mrb[152].mxu1 %vm1086_vm1, %v20697_v6  ;;  %7552 = vmatpush1.bf16.msra.mxu0 %v18110_v24  ;;  %v18196_v24 = vld [vmem:[%s22635_s8 + $0x4a4] ss:$16 sps:$4 sm:$0xff]  }
 0x4f8   :  { %8269 = vmatpush1.bf16.msra.mxu1 %v18113_v8  ;;  %7553 = vmatprep.subr.bf16.mxu0 %v18118_v36  ;;  %v18194_v8 = vld [vmem:[%s22635_s8 + $0x4a0] ss:$16 sps:$4 sm:$0xff]   ;;  %v18199_v36 = vld [vmem:[%s22635_s8 + $0x2ec] ss:$16 sps:$4 sm:$0xff]  }
 0x4f9   :  { %8270 = vmatprep.subr.bf16.mxu1 %v18121_v0  ;;  %8300 = vmatprep.mubr.bf16.mxu1 %v22648_v56  ;;  %v18202_v0 = vld [vmem:[%s22635_s8 + $0x4c4] ss:$16 sps:$4 sm:$0xff]  }
 0x4fb   :  { %7554 = vmatpush1.bf16.msra.mxu0 %v18116_v28  ;;  %v18197_v28 = vld [vmem:[%s22635_s8 + $0x2e8] ss:$16 sps:$4 sm:$0xff]  }
 0x4fc   :  { %8271 = vmatpush1.bf16.msra.mxu1 %v18119_v21  ;;  %7555 = vmatprep.subr.bf16.mxu0 %v18124_v14  ;;  %v18200_v21 = vld [vmem:[%s22635_s8 + $0x4c0] ss:$16 sps:$4 sm:$0xff]   ;;  %v18205_v14 = vld [vmem:[%s22635_s8 + $0x30c] ss:$16 sps:$4 sm:$0xff]  }
 0x4fd   :  { %8272 = vmatprep.subr.bf16.mxu1 %v18127_v41  ;;  %v18208_v41 = vld [vmem:[%s22635_s8 + $0x4e4] ss:$16 sps:$4 sm:$0xff]  }
 0x4ff   :  { %7556 = vmatpush1.bf16.msra.mxu0 %v18122_v42  ;;  %v18203_v42 = vld [vmem:[%s22635_s8 + $0x308] ss:$16 sps:$4 sm:$0xff]  }
 0x500   :  { %8273 = vmatpush1.bf16.msra.mxu1 %v18125_v30  ;;  %7740 = vmatprep.subr.bf16.mxu0 %v18130_v40  ;;  %v18206_v30 = vld [vmem:[%s22635_s8 + $0x4e0] ss:$16 sps:$4 sm:$0xff]   ;;  %v18211_v40 = vld [vmem:[%s22635_s8 + $0x32c] ss:$16 sps:$4 sm:$0xff]  }
 0x501   :  { %8274 = vmatprep.subr.bf16.mxu1 %v18133_v18  ;;  %v18215_v18 = vld [vmem:[%s22635_s8 + $0x504] ss:$16 sps:$4 sm:$0xff]  }
 0x502   :  { %15051 = vmatmul.mubr.msk.bf16.vlgmr.msra.gmra.mrb[184].mxu0 %vm1086_vm1, %v7424_v49  ;;  %v18141_v49 = vld [vmem:[%s22635_s8 + $0x1c8] ss:$16 sps:$4 sm:$0xff]  }
 0x503   :  { %7741 = vmatpush1.bf16.msra.mxu0 %v18128_v44  ;;  %7772 = vmatprep.mubr.bf16.mxu0 %v22648_v56  ;;  %v20919_v44 = vld [vmem:[#allocation4 + $0xc] ss:$0 sps:$4 sm:$0x88]  }
 0x504   :  { %8275 = vmatpush1.bf16.msra.mxu1 %v18131_v2  ;;  %7742 = vmatprep.subr.bf16.mxu0 %v18136_v27  ;;  %v18209_v2 = vld [vmem:[%s22635_s8 + $0x328] ss:$16 sps:$4 sm:$0xff]   ;;  %v18213_v27 = vld [vmem:[%s22635_s8 + $0x500] ss:$16 sps:$4 sm:$0xff]  }
 0x505   :  { %8459 = vmatprep.subr.bf16.mxu1 %v18140_v26  ;;  %v18218_v26 = vld [vmem:[%s22635_s8 + $0x34c] ss:$16 sps:$4 sm:$0xff]  }
 0x507   :  { %15189 = vmatmul.mubr.msk.bf16.vlgmr.msra.gmra.mrb[156].mxu1 %vm1086_vm1, %v8184_v47  ;;  %7743 = vmatpush1.bf16.msra.mxu0 %v18134_v55  ;;  %v18221_v55 = vld [vmem:[%s22635_s8 + $0x524] ss:$16 sps:$4 sm:$0xff]  }
 0x508   :  { %8460 = vmatpush1.bf16.msra.mxu1 %v18138_v11  ;;  %7744 = vmatprep.subr.bf16.mxu0 %v18143_v32  ;;  %v8757_v11 = vrot.slane %v20919_v44, 3  ;;  %v18219_v32 = vld [vmem:[%s22635_s8 + $0x520] ss:$16 sps:$4 sm:$0xff]  }
 0x509   :  { %8461 = vmatprep.subr.bf16.mxu1 %v18146_v5  ;;  %8491 = vmatprep.mubr.bf16.mxu1 %v22648_v56  ;;  %v18224_v5 = vld [vmem:[%s22635_s8 + $0x36c] ss:$16 sps:$4 sm:$0xff]  }
 0x50b   :  { %7745 = vmatpush1.bf16.msra.mxu0 %v18141_v49  ;;  %v18227_v49 = vld [vmem:[%s22635_s8 + $0x544] ss:$16 sps:$4 sm:$0xff]  }
 0x50c   :  { %8462 = vmatpush1.bf16.msra.mxu1 %v18144_v38  ;;  %7746 = vmatprep.subr.bf16.mxu0 %v18149_v45  ;;  %v18222_v38 = vld [vmem:[%s22635_s8 + $0x368] ss:$16 sps:$4 sm:$0xff]   ;;  %v18225_v45 = vld [vmem:[%s22635_s8 + $0x540] ss:$16 sps:$4 sm:$0xff]  }
 0x50d   :  { %8463 = vmatprep.subr.bf16.mxu1 %v18152_v25  ;;  %v18230_v25 = vld [vmem:[%s22635_s8 + $0x38c] ss:$16 sps:$4 sm:$0xff]  }
 0x50f   :  { %7747 = vmatpush1.bf16.msra.mxu0 %v18147_v15  ;;  %v18228_v15 = vld [vmem:[%s22635_s8 + $0x388] ss:$16 sps:$4 sm:$0xff]  }
 0x510   :  { %8464 = vmatpush1.bf16.msra.mxu1 %v18150_v59  ;;  %7931 = vmatprep.subr.bf16.mxu0 %v18155_v51  ;;  %v18231_v59 = vld [vmem:[%s22635_s8 + $0x560] ss:$16 sps:$4 sm:$0xff]   ;;  %v18236_v51 = vld [vmem:[%s22635_s8 + $0x3ac] ss:$16 sps:$4 sm:$0xff]  }
 0x511   :  { %8465 = vmatprep.subr.bf16.mxu1 %v18158_v13  ;;  %v18237_v13 = vld [vmem:[%s22635_s8 + $0x580] ss:$16 sps:$4 sm:$0xff]  }
 0x512   :  { %15086 = vmatmul.mubr.msk.bf16.vlgmr.msra.gmra.mrb[188].mxu0 %vm1086_vm1, %v7615_v4  ;;  %v18166_v4 = vld [vmem:[%s22635_s8 + $0x248] ss:$16 sps:$4 sm:$0xff]  }
 0x513   :  { %7932 = vmatpush1.bf16.msra.mxu0 %v18153_v16  ;;  %7963 = vmatprep.mubr.bf16.mxu0 %v22648_v56  ;;  %v18234_v16 = vld [vmem:[%s22635_s8 + $0x3a8] ss:$16 sps:$4 sm:$0xff]  }
 0x514   :  { %8466 = vmatpush1.bf16.msra.mxu1 %v18156_v22  ;;  %7933 = vmatprep.subr.bf16.mxu0 %v18161_v12  ;;  %v18242_v22 = vld [vmem:[%s22635_s8 + $0x3cc] ss:$16 sps:$4 sm:$0xff]   ;;  %v18245_v12 = vld [vmem:[%s22635_s8 + $0x5a4] ss:$16 sps:$4 sm:$0xff]  }
 0x515   :  { %8650 = vmatprep.subr.bf16.mxu1 %v18165_v57  ;;  %v18243_v57 = vld [vmem:[%s22635_s8 + $0x5a0] ss:$16 sps:$4 sm:$0xff]  }
 0x517   :  { %15224 = vmatmul.mubr.msk.bf16.vlgmr.msra.gmra.mrb[160].mxu1 %vm1086_vm1, %v8375_v60  ;;  %7934 = vmatpush1.bf16.msra.mxu0 %v18159_v23  ;;  %v18248_v23 = vld [vmem:[%s22635_s8 + $0x3ec] ss:$16 sps:$4 sm:$0xff]  }
 0x518   :  { %8651 = vmatpush1.bf16.msra.mxu1 %v18163_v9  ;;  %7935 = vmatprep.subr.bf16.mxu0 %v18168_v54  ;;  %v18251_v9 = vld [vmem:[%s22635_s8 + $0x5c4] ss:$16 sps:$4 sm:$0xff]   ;;  %v18246_v54 = vld [vmem:[%s22635_s8 + $0x3e8] ss:$16 sps:$4 sm:$0xff]  }
 0x519   :  { %8652 = vmatprep.subr.bf16.mxu1 %v18171_v39  ;;  %8682 = vmatprep.mubr.bf16.mxu1 %v22648_v56  ;;  %v18249_v39 = vld [vmem:[%s22635_s8 + $0x5c0] ss:$16 sps:$4 sm:$0xff]  }
 0x51b   :  { %7936 = vmatpush1.bf16.msra.mxu0 %v18166_v4  ;;  %v18254_v4 = vld [vmem:[%s22635_s8 + $0x40c] ss:$16 sps:$4 sm:$0xff]  }
 0x51c   :  { %8653 = vmatpush1.bf16.msra.mxu1 %v18169_v46  ;;  %7937 = vmatprep.subr.bf16.mxu0 %v18174_v48  ;;  %v18252_v46 = vld [vmem:[%s22635_s8 + $0x408] ss:$16 sps:$4 sm:$0xff]   ;;  %v18257_v48 = vld [vmem:[%s22635_s8 + $0x5e4] ss:$16 sps:$4 sm:$0xff]  }
 0x51d   :  { %8654 = vmatprep.subr.bf16.mxu1 %v18177_v50  ;;  %v18255_v50 = vld [vmem:[%s22635_s8 + $0x5e0] ss:$16 sps:$4 sm:$0xff]  }
 0x51f   :  { %7938 = vmatpush1.bf16.msra.mxu0 %v18172_v58  ;;  %v18260_v58 = vld [vmem:[%s22635_s8 + $0x42c] ss:$16 sps:$4 sm:$0xff]  }
 0x520   :  { %8655 = vmatpush1.bf16.msra.mxu1 %v18175_v61  ;;  %8118 = vmatprep.subr.bf16.mxu0 %v18180_v43  ;;  %v21034_v61 = vld [vmem:[#allocation4 + $0x10] ss:$0 sps:$4 sm:$0x22]   ;;  %v18264_v43 = vld [vmem:[%s22635_s8 + $0x604] ss:$16 sps:$4 sm:$0xff]  }
 0x521   :  { %8656 = vmatprep.subr.bf16.mxu1 %v18183_v10  ;;  %v18262_v10 = vld [vmem:[%s22635_s8 + $0x600] ss:$16 sps:$4 sm:$0xff]   ;;  %v9135_v7 = vrot.slane %v21034_v61, 1 }
 0x522   :  { %15121 = vmatmul.mubr.msk.bf16.vlgmr.msra.gmra.mrb[192].mxu0 %vm1086_vm1, %v7806_v34  ;;  %v18191_v34 = vld [vmem:[%s22635_s8 + $0x2c8] ss:$16 sps:$4 sm:$0xff]  }
 0x523   :  { %8119 = vmatpush1.bf16.msra.mxu0 %v18178_v17  ;;  %8150 = vmatprep.mubr.bf16.mxu0 %v22648_v56  ;;  %v18258_v17 = vld [vmem:[%s22635_s8 + $0x428] ss:$16 sps:$4 sm:$0xff]  }
 0x524   :  { %8657 = vmatpush1.bf16.msra.mxu1 %v18181_v63  ;;  %8120 = vmatprep.subr.bf16.mxu0 %v18186_v33  ;;  %v18267_v63 = vld [vmem:[%s22635_s8 + $0x44c] ss:$16 sps:$4 sm:$0xff]   ;;  %v18270_v33 = vld [vmem:[%s22635_s8 + $0x624] ss:$16 sps:$4 sm:$0xff]  }
 0x525   :  { %8841 = vmatprep.subr.bf16.mxu1 %v18190_v29  ;;  %v18268_v29 = vld [vmem:[%s22635_s8 + $0x620] ss:$16 sps:$4 sm:$0xff]  }
 0x527   :  { %15259 = vmatmul.mubr.msk.bf16.vlgmr.msra.gmra.mrb[164].mxu1 %vm1086_vm1, %v8566_v1  ;;  %8121 = vmatpush1.bf16.msra.mxu0 %v18184_v19  ;;  %v18273_v19 = vld [vmem:[%s22635_s8 + $0x46c] ss:$16 sps:$4 sm:$0xff]  }
 0x528   :  { %8842 = vmatpush1.bf16.msra.mxu1 %v18188_v52  ;;  %8122 = vmatprep.subr.bf16.mxu0 %v18193_v20  ;;  %v18276_v52 = vld [vmem:[%s22635_s8 + $0x644] ss:$16 sps:$4 sm:$0xff]   ;;  %v18271_v20 = vld [vmem:[%s22635_s8 + $0x468] ss:$16 sps:$4 sm:$0xff]  }
 0x529   :  { %8843 = vmatprep.subr.bf16.mxu1 %v18196_v24  ;;  %8873 = vmatprep.mubr.bf16.mxu1 %v22648_v56  ;;  %v18274_v24 = vld [vmem:[%s22635_s8 + $0x640] ss:$16 sps:$4 sm:$0xff]  }
 0x52b   :  { %8123 = vmatpush1.bf16.msra.mxu0 %v18191_v34  ;;  %v18279_v34 = vld [vmem:[%s22635_s8 + $0x48c] ss:$16 sps:$4 sm:$0xff]  }
 0x52c   :  { %8844 = vmatpush1.bf16.msra.mxu1 %v18194_v8  ;;  %8124 = vmatprep.subr.bf16.mxu0 %v18199_v36  ;;  %v18282_v8 = vld [vmem:[%s22635_s8 + $0x664] ss:$16 sps:$4 sm:$0xff]   ;;  %v18277_v36 = vld [vmem:[%s22635_s8 + $0x488] ss:$16 sps:$4 sm:$0xff]  }
 0x52d   :  { %8845 = vmatprep.subr.bf16.mxu1 %v18202_v0  ;;  %v18280_v0 = vld [vmem:[%s22635_s8 + $0x660] ss:$16 sps:$4 sm:$0xff]  }
 0x52f   :  { %8125 = vmatpush1.bf16.msra.mxu0 %v18197_v28  ;;  %v18285_v28 = vld [vmem:[%s22635_s8 + $0x4ac] ss:$16 sps:$4 sm:$0xff]  }
 0x530   :  { %8846 = vmatpush1.bf16.msra.mxu1 %v18200_v21  ;;  %8309 = vmatprep.subr.bf16.mxu0 %v18205_v14  ;;  %v21093_v21 = vld [vmem:[#allocation4 + $0x14] ss:$0 sps:$4 sm:$0x22]  }
 0x531   :  { %8847 = vmatprep.subr.bf16.mxu1 %v18208_v41  ;;  %v18289_v14 = vld [vmem:[%s22635_s8 + $0x684] ss:$16 sps:$4 sm:$0xff]   ;;  %v18287_v41 = vld [vmem:[%s22635_s8 + $0x680] ss:$16 sps:$4 sm:$0xff]   ;;  %v9326_v31 = vrot.slane %v21093_v21, 1 }
 0x532   :  { %15155 = vmatmul.mubr.msk.bf16.vlgmr.msra.gmra.mrb[196].mxu0 %vm1086_vm1, %v20697_v6  ;;  %v18216_v6 = vld [vmem:[%s22635_s8 + $0x348] ss:$16 sps:$4 sm:$0xff]   ;;  %v18378_v21 = vld [vmem:[%s22635_s8 + $0x6ec] ss:$16 sps:$4 sm:$0xff]  }
 0x533   :  { %8310 = vmatpush1.bf16.msra.mxu0 %v18203_v42  ;;  %8341 = vmatprep.mubr.bf16.mxu0 %v22648_v56  ;;  %v18283_v42 = vld [vmem:[%s22635_s8 + $0x4a8] ss:$16 sps:$4 sm:$0xff]  }
 0x534   :  { %8848 = vmatpush1.bf16.msra.mxu1 %v18206_v30  ;;  %8311 = vmatprep.subr.bf16.mxu0 %v18211_v40  ;;  %v18292_v30 = vld [vmem:[%s22635_s8 + $0x4cc] ss:$16 sps:$4 sm:$0xff]   ;;  %v18290_v40 = vld [vmem:[%s22635_s8 + $0x4c8] ss:$16 sps:$4 sm:$0xff]  }
 0x535   :  { %9028 = vmatprep.subr.bf16.mxu1 %v18215_v18  ;;  %v18293_v18 = vld [vmem:[%s22635_s8 + $0x6a0] ss:$16 sps:$4 sm:$0xff]  }
 0x537   :  { %15294 = vmatmul.mubr.msk.bf16.vlgmr.msra.gmra.mrb[168].mxu1 %vm1086_vm1, %v8757_v11  ;;  %8312 = vmatpush1.bf16.msra.mxu0 %v18209_v2  ;;  %v18298_v2 = vld [vmem:[%s22635_s8 + $0x4ec] ss:$16 sps:$4 sm:$0xff]  }
 0x538   :  { %9029 = vmatpush1.bf16.msra.mxu1 %v18213_v27  ;;  %8313 = vmatprep.subr.bf16.mxu0 %v18218_v26  ;;  %v18301_v27 = vld [vmem:[%s22635_s8 + $0x6c4] ss:$16 sps:$4 sm:$0xff]   ;;  %v18296_v26 = vld [vmem:[%s22635_s8 + $0x4e8] ss:$16 sps:$4 sm:$0xff]  }
 0x539   :  { %9030 = vmatprep.subr.bf16.mxu1 %v18221_v55  ;;  %9060 = vmatprep.mubr.bf16.mxu1 %v22648_v56  ;;  %v18299_v55 = vld [vmem:[%s22635_s8 + $0x6c0] ss:$16 sps:$4 sm:$0xff]  }
 0x53b   :  { %8314 = vmatpush1.bf16.msra.mxu0 %v18216_v6  ;;  %v18304_v6 = vld [vmem:[%s22635_s8 + $0x50c] ss:$16 sps:$4 sm:$0xff]  }
 0x53c   :  { %9031 = vmatpush1.bf16.msra.mxu1 %v18219_v32  ;;  %8315 = vmatprep.subr.bf16.mxu0 %v18224_v5  ;;  %v18307_v32 = vld [vmem:[%s22635_s8 + $0x6e4] ss:$16 sps:$4 sm:$0xff]   ;;  %v18302_v5 = vld [vmem:[%s22635_s8 + $0x508] ss:$16 sps:$4 sm:$0xff]  }
 0x53d   :  { %9032 = vmatprep.subr.bf16.mxu1 %v18227_v49  ;;  %v18305_v49 = vld [vmem:[%s22635_s8 + $0x6e0] ss:$16 sps:$4 sm:$0xff]  }
 0x53f   :  { %8316 = vmatpush1.bf16.msra.mxu0 %v18222_v38  ;;  %v18310_v38 = vld [vmem:[%s22635_s8 + $0x52c] ss:$16 sps:$4 sm:$0xff]  }
 0x540   :  { %9033 = vmatpush1.bf16.msra.mxu1 %v18225_v45  ;;  %8500 = vmatprep.subr.bf16.mxu0 %v18230_v25  ;;  %v21152_v45 = vld [vmem:[#allocation4 + $0x14] ss:$0 sps:$4 sm:$0x44]  }
 0x541   :  { %9034 = vmatprep.subr.bf16.mxu1 %v18233_v37  ;;  %v18314_v25 = vld [vmem:[%s22635_s8 + $0x704] ss:$16 sps:$4 sm:$0xff]   ;;  %v18312_v37 = vld [vmem:[%s22635_s8 + $0x700] ss:$16 sps:$4 sm:$0xff]   ;;  %v9517_v44 = vrot.slane %v21152_v45, 2 }
 0x542   :  { %15190 = vmatmul.mubr.msk.bf16.vlgmr.msra.gmra.mrb[200].mxu0 %vm1086_vm1, %v8184_v47  ;;  %v18240_v47 = vld [vmem:[%s22635_s8 + $0x3c8] ss:$16 sps:$4 sm:$0xff]  }
 0x543   :  { %8501 = vmatpush1.bf16.msra.mxu0 %v18228_v15  ;;  %8532 = vmatprep.mubr.bf16.mxu0 %v22648_v56  ;;  %v18308_v15 = vld [vmem:[%s22635_s8 + $0x528] ss:$16 sps:$4 sm:$0xff]  }
 0x544   :  { %9035 = vmatpush1.bf16.msra.mxu1 %v18231_v59  ;;  %8502 = vmatprep.subr.bf16.mxu0 %v18236_v51  ;;  %v18317_v59 = vld [vmem:[%s22635_s8 + $0x54c] ss:$16 sps:$4 sm:$0xff]   ;;  %v18315_v51 = vld [vmem:[%s22635_s8 + $0x548] ss:$16 sps:$4 sm:$0xff]  }
 0x545   :  { %9219 = vmatprep.subr.bf16.mxu1 %v18239_v35  ;;  %v18318_v35 = vld [vmem:[%s22635_s8 + $0x720] ss:$16 sps:$4 sm:$0xff]   ;;  %v18385_v45 = vld [vmem:[%s22635_s8 + $0x748] ss:$16 sps:$4 sm:$0xff]  }
 0x547   :  { %15328 = vmatmul.mubr.msk.bf16.vlgmr.msra.gmra.mrb[172].mxu1 %vm1086_vm1, %v20996_v3  ;;  %8503 = vmatpush1.bf16.msra.mxu0 %v18234_v16  ;;  %v18323_v16 = vld [vmem:[%s22635_s8 + $0x56c] ss:$16 sps:$4 sm:$0xff]  }
 0x548   :  { %9220 = vmatpush1.bf16.msra.mxu1 %v18237_v13  ;;  %8504 = vmatprep.subr.bf16.mxu0 %v18242_v22  ;;  %v18326_v13 = vld [vmem:[%s22635_s8 + $0x744] ss:$16 sps:$4 sm:$0xff]   ;;  %v18321_v22 = vld [vmem:[%s22635_s8 + $0x568] ss:$16 sps:$4 sm:$0xff]  }
 0x549   :  { %9221 = vmatprep.subr.bf16.mxu1 %v18245_v12  ;;  %9251 = vmatprep.mubr.bf16.mxu1 %v22648_v56  ;;  %v18324_v12 = vld [vmem:[%s22635_s8 + $0x740] ss:$16 sps:$4 sm:$0xff]  }
 0x54b   :  { %8505 = vmatpush1.bf16.msra.mxu0 %v18240_v47  ;;  %v18329_v47 = vld [vmem:[%s22635_s8 + $0x58c] ss:$16 sps:$4 sm:$0xff]  }
 0x54c   :  { %9222 = vmatpush1.bf16.msra.mxu1 %v18243_v57  ;;  %8506 = vmatprep.subr.bf16.mxu0 %v18248_v23  ;;  %v18332_v57 = vld [vmem:[%s22635_s8 + $0x764] ss:$16 sps:$4 sm:$0xff]   ;;  %v18327_v23 = vld [vmem:[%s22635_s8 + $0x588] ss:$16 sps:$4 sm:$0xff]  }
 0x54d   :  { %9223 = vmatprep.subr.bf16.mxu1 %v18251_v9  ;;  %v18330_v9 = vld [vmem:[%s22635_s8 + $0x760] ss:$16 sps:$4 sm:$0xff]  }
 0x54f   :  { %8507 = vmatpush1.bf16.msra.mxu0 %v18246_v54  ;;  %v18335_v54 = vld [vmem:[%s22635_s8 + $0x5ac] ss:$16 sps:$4 sm:$0xff]  }
 0x550   :  { %9224 = vmatpush1.bf16.msra.mxu1 %v18249_v39  ;;  %8691 = vmatprep.subr.bf16.mxu0 %v18254_v4  ;;  %v21211_v39 = vld [vmem:[#allocation4 + $0x14] ss:$0 sps:$4 sm:$0x88]  }
 0x551   :  { %9225 = vmatprep.subr.bf16.mxu1 %v18257_v48  ;;  %v18339_v4 = vld [vmem:[%s22635_s8 + $0x784] ss:$16 sps:$4 sm:$0xff]   ;;  %v18337_v48 = vld [vmem:[%s22635_s8 + $0x780] ss:$16 sps:$4 sm:$0xff]  }
 0x552   :  { %15225 = vmatmul.mubr.msk.bf16.vlgmr.msra.gmra.mrb[204].mxu0 %vm1086_vm1, %v8375_v60  ;;  %v18265_v60 = vld [vmem:[%s22635_s8 + $0x448] ss:$16 sps:$4 sm:$0xff]  }
 0x553   :  { %8692 = vmatpush1.bf16.msra.mxu0 %v18252_v46  ;;  %8723 = vmatprep.mubr.bf16.mxu0 %v22648_v56  ;;  %v18333_v46 = vld [vmem:[%s22635_s8 + $0x5a8] ss:$16 sps:$4 sm:$0xff]  }
 0x554   :  { %9226 = vmatpush1.bf16.msra.mxu1 %v18255_v50  ;;  %8693 = vmatprep.subr.bf16.mxu0 %v18260_v58  ;;  %v18342_v50 = vld [vmem:[%s22635_s8 + $0x5cc] ss:$16 sps:$4 sm:$0xff]  }
 0x555   :  { %9410 = vmatprep.subr.bf16.mxu1 %v18264_v43  ;;  %v18345_v43 = vld [vmem:[%s22635_s8 + $0x7a4] ss:$16 sps:$4 sm:$0xff]  }
 0x557   :  { %15363 = vmatmul.mubr.msk.bf16.vlgmr.msra.gmra.mrb[176].mxu1 %vm1086_vm1, %v9135_v7  ;;  %8694 = vmatpush1.bf16.msra.mxu0 %v18258_v17 }
 0x558   :  { %9411 = vmatpush1.bf16.msra.mxu1 %v18262_v10  ;;  %8695 = vmatprep.subr.bf16.mxu0 %v18267_v63 }
 0x559   :  { %9412 = vmatprep.subr.bf16.mxu1 %v18270_v33  ;;  %9442 = vmatprep.mubr.bf16.mxu1 %v22648_v56 }
 0x55b   :  { %8696 = vmatpush1.bf16.msra.mxu0 %v18265_v60  ;;  %v18340_v60 = vld [vmem:[%s22635_s8 + $0x5c8] ss:$16 sps:$4 sm:$0xff]  }
 0x55c   :  { %9413 = vmatpush1.bf16.msra.mxu1 %v18268_v29  ;;  %8697 = vmatprep.subr.bf16.mxu0 %v18273_v19  ;;  %v18348_v19 = vld [vmem:[%s22635_s8 + $0x5ec] ss:$16 sps:$4 sm:$0xff]  }
 0x55d   :  { %9414 = vmatprep.subr.bf16.mxu1 %v18276_v52 }
 0x55f   :  { %8698 = vmatpush1.bf16.msra.mxu0 %v18271_v20 }
 0x560   :  { %9415 = vmatpush1.bf16.msra.mxu1 %v18274_v24  ;;  %8882 = vmatprep.subr.bf16.mxu0 %v18279_v34  ;;  %v18346_v34 = vld [vmem:[%s22635_s8 + $0x5e8] ss:$16 sps:$4 sm:$0xff]  }
 0x561   :  { %9416 = vmatprep.subr.bf16.mxu1 %v18282_v8 }
 0x562   :  { %15260 = vmatmul.mubr.msk.bf16.vlgmr.msra.gmra.mrb[208].mxu0 %vm1086_vm1, %v8566_v1  ;;  %v18295_v1 = vld [vmem:[%s22635_s8 + $0x6a4] ss:$16 sps:$4 sm:$0xff]  }
 0x563   :  { %8883 = vmatpush1.bf16.msra.mxu0 %v18277_v36  ;;  %8914 = vmatprep.mubr.bf16.mxu0 %v22648_v56 }
 0x564   :  { %9417 = vmatpush1.bf16.msra.mxu1 %v18280_v0  ;;  %8884 = vmatprep.subr.bf16.mxu0 %v18285_v28  ;;  %v18349_v0 = vld [vmem:[%s22635_s8 + $0x7c0] ss:$16 sps:$4 sm:$0xff]   ;;  %v18354_v28 = vld [vmem:[%s22635_s8 + $0x60c] ss:$16 sps:$4 sm:$0xff]  }
 0x565   :  { %9601 = vmatprep.subr.bf16.mxu1 %v18289_v14 }
 0x567   :  { %15398 = vmatmul.mubr.msk.bf16.vlgmr.msra.gmra.mrb[180].mxu1 %vm1086_vm1, %v9326_v31  ;;  %8885 = vmatpush1.bf16.msra.mxu0 %v18283_v42  ;;  %v18357_v42 = vld [vmem:[%s22635_s8 + $0x7e4] ss:$16 sps:$4 sm:$0xff]  }
 0x568   :  { %9602 = vmatpush1.bf16.msra.mxu1 %v18287_v41  ;;  %8886 = vmatprep.subr.bf16.mxu0 %v18292_v30  ;;  %v18352_v41 = vld [vmem:[%s22635_s8 + $0x608] ss:$16 sps:$4 sm:$0xff]   ;;  %v18355_v30 = vld [vmem:[%s22635_s8 + $0x7e0] ss:$16 sps:$4 sm:$0xff]  }
 0x569   :  { %9603 = vmatprep.subr.bf16.mxu1 %v18295_v1  ;;  %9633 = vmatprep.mubr.bf16.mxu1 %v22648_v56  ;;  %v18360_v1 = vld [vmem:[%s22635_s8 + $0x62c] ss:$16 sps:$4 sm:$0xff]  }
 0x56b   :  { %8887 = vmatpush1.bf16.msra.mxu0 %v18290_v40  ;;  %v18358_v40 = vld [vmem:[%s22635_s8 + $0x628] ss:$16 sps:$4 sm:$0xff]  }
 0x56c   :  { %9604 = vmatpush1.bf16.msra.mxu1 %v18293_v18  ;;  %8888 = vmatprep.subr.bf16.mxu0 %v18298_v2  ;;  %v18363_v18 = vld [vmem:[%s22635_s8 + $0x64c] ss:$16 sps:$4 sm:$0xff]  }
 0x56d   :  { %9605 = vmatprep.subr.bf16.mxu1 %v18301_v27 }
 0x56f   :  { %8889 = vmatpush1.bf16.msra.mxu0 %v18296_v26  ;;  %v21281_v26 = vld [vmem:[#allocation4 + $0x18] sm:$0x1] }
 0x570   :  { %9606 = vmatpush1.bf16.msra.mxu1 %v18299_v55  ;;  %9069 = vmatprep.subr.bf16.mxu0 %v18304_v6  ;;  %v18366_v6 = vld [vmem:[%s22635_s8 + $0x66c] ss:$16 sps:$4 sm:$0xff]  }
 0x571   :  { %9607 = vmatprep.subr.bf16.mxu1 %v18307_v32 }
 0x572   :  { %15295 = vmatmul.mubr.msk.bf16.vlgmr.msra.gmra.mrb[212].mxu0 %vm1086_vm1, %v8757_v11  ;;  %v18320_v11 = vld [vmem:[%s22635_s8 + $0x724] ss:$16 sps:$4 sm:$0xff]  }
 0x573   :  { %9070 = vmatpush1.bf16.msra.mxu0 %v18302_v5  ;;  %9101 = vmatprep.mubr.bf16.mxu0 %v22648_v56 }
 0x574   :  { %9608 = vmatpush1.bf16.msra.mxu1 %v18305_v49  ;;  %9071 = vmatprep.subr.bf16.mxu0 %v18310_v38  ;;  %v18364_v38 = vld [vmem:[%s22635_s8 + $0x668] ss:$16 sps:$4 sm:$0xff]  }
 0x575   :  { %9792 = vmatprep.subr.bf16.mxu1 %v18314_v25 }
 0x577   :  { %15433 = vmatmul.mubr.msk.bf16.vlgmr.msra.gmra.mrb[184].mxu1 %vm1086_vm1, %v9517_v44  ;;  %9072 = vmatpush1.bf16.msra.mxu0 %v18308_v15 }
 0x578   :  { %9793 = vmatpush1.bf16.msra.mxu1 %v18312_v37  ;;  %9073 = vmatprep.subr.bf16.mxu0 %v18317_v59  ;;  %v18369_v37 = vld [vmem:[%s22635_s8 + $0x68c] ss:$16 sps:$4 sm:$0xff]  }
 0x579   :  { %9794 = vmatprep.subr.bf16.mxu1 %v18320_v11  ;;  %9824 = vmatprep.mubr.bf16.mxu1 %v22648_v56  ;;  %v18367_v11 = vld [vmem:[%s22635_s8 + $0x688] ss:$16 sps:$4 sm:$0xff]  }
 0x57b   :  { %9074 = vmatpush1.bf16.msra.mxu0 %v18315_v51  ;;  %v18372_v51 = vld [vmem:[%s22635_s8 + $0x6ac] ss:$16 sps:$4 sm:$0xff]  }
 0x57c   :  { %9795 = vmatpush1.bf16.msra.mxu1 %v18318_v35  ;;  %9075 = vmatprep.subr.bf16.mxu0 %v18323_v16  ;;  %v18370_v35 = vld [vmem:[%s22635_s8 + $0x6a8] ss:$16 sps:$4 sm:$0xff]   ;;  %v18375_v16 = vld [vmem:[%s22635_s8 + $0x6cc] ss:$16 sps:$4 sm:$0xff]  }
 0x57d   :  { %9796 = vmatprep.subr.bf16.mxu1 %v18326_v13  ;;  %v18373_v13 = vld [vmem:[%s22635_s8 + $0x6c8] ss:$16 sps:$4 sm:$0xff]  }
 0x57f   :  { %9076 = vmatpush1.bf16.msra.mxu0 %v18321_v22 }
 0x580   :  { %9797 = vmatpush1.bf16.msra.mxu1 %v18324_v12  ;;  %9260 = vmatprep.subr.bf16.mxu0 %v18329_v47  ;;  %v18376_v47 = vld [vmem:[%s22635_s8 + $0x6e8] ss:$16 sps:$4 sm:$0xff]  }
 0x581   :  { %9798 = vmatprep.subr.bf16.mxu1 %v18332_v57 }
 0x582   :  { %15329 = vmatmul.mubr.msk.bf16.vlgmr.msra.gmra.mrb[216].mxu0 %vm1086_vm1, %v20996_v3  ;;  %v9708_v3 = vrot.slane %v21211_v39, 3  ;;  %v18397_v39 = vld [vmem:[%s22635_s8 + $0x7c8] ss:$16 sps:$4 sm:$0xff]  }
 0x583   :  { %9261 = vmatpush1.bf16.msra.mxu0 %v18327_v23  ;;  %9292 = vmatprep.mubr.bf16.mxu0 %v22648_v56 }
 0x584   :  { %9799 = vmatpush1.bf16.msra.mxu1 %v18330_v9  ;;  %9262 = vmatprep.subr.bf16.mxu0 %v18335_v54  ;;  %v18381_v9 = vld [vmem:[%s22635_s8 + $0x70c] ss:$16 sps:$4 sm:$0xff]  }
 0x585   :  { %v6922_v58 = vpop.f32.mrb[168].mxu0  ;;  %9979 = vmatprep.subr.bf16.mxu1 %v18339_v4  ;;  %v18379_v4 = vld [vmem:[%s22635_s8 + $0x708] ss:$16 sps:$4 sm:$0xff]  }
 0x586   :  { %v7165_v17 = vadd.f32 %v20776_v53, %v6922_v58  ;;  %v6924_v10 = vpop.f32.mrb[169].mxu0  ;;  %v18343_v53 = vld [vmem:[%s22635_s8 + $0x7a0] ss:$16 sps:$4 sm:$0xff]  }
 0x587   :  { %15468 = vmatmul.mubr.msk.bf16.vlgmr.msra.gmra.mrb[188].mxu1 %vm1086_vm1, %v9708_v3  ;;  %v7167_v63 = vadd.f32 %v20778_v62, %v6924_v10  ;;  %9263 = vmatpush1.bf16.msra.mxu0 %v18333_v46  ;;  %v6926_v33 = vpop.f32.mrb[170].mxu0  ;;  %v18351_v62 = vld [vmem:[%s22635_s8 + $0x7c4] ss:$16 sps:$4 sm:$0xff]   ;;  %v18384_v46 = vld [vmem:[%s22635_s8 + $0x72c] ss:$16 sps:$4 sm:$0xff]  }
 0x588   :  { %9980 = vmatpush1.bf16.msra.mxu1 %v18337_v48  ;;  %v6927_v29 = vpop.f32.mrb[171].mxu0  ;;  %9264 = vmatprep.subr.bf16.mxu0 %v18342_v50  ;;  %v18382_v48 = vld [vmem:[%s22635_s8 + $0x728] ss:$16 sps:$4 sm:$0xff]   ;;  %v18387_v50 = vld [vmem:[%s22635_s8 + $0x74c] ss:$16 sps:$4 sm:$0xff]  }
 0x589   :  { %9981 = vmatprep.subr.bf16.mxu1 %v18345_v43  ;;  %10011 = vmatprep.mubr.bf16.mxu1 %v22648_v56  ;;  %v18390_v33 = vld [vmem:[%s22635_s8 + $0x76c] ss:$16 sps:$4 sm:$0xff]  }
 0x58a   :  { %v7351_v52 = vpop.f32.mrb[136].mxu1 }
 0x58b   :  { %v7399_v20 = vadd.f32 %v7351_v52, %v7165_v17  ;;  %v7353_v24 = vpop.f32.mrb[137].mxu1  ;;  %9265 = vmatpush1.bf16.msra.mxu0 %v18340_v60 }
 0x58c   :  { %v7400_v8 = vadd.f32 %v7353_v24, %v7167_v63  ;;  %9982 = vmatpush1.bf16.msra.mxu1 %v18343_v53  ;;  %v7355_v36 = vpop.f32.mrb[138].mxu1  ;;  %9266 = vmatprep.subr.bf16.mxu0 %v18348_v19  ;;  %v18388_v19 = vld [vmem:[%s22635_s8 + $0x768] ss:$16 sps:$4 sm:$0xff]  }
 0x58d   :  { %v7356_v14 = vpop.f32.mrb[139].mxu1  ;;  %9983 = vmatprep.subr.bf16.mxu1 %v18351_v62  ;;  %v18394_v36 = vld [vmem:[%s22635_s8 + $0x7a8] ss:$16 sps:$4 sm:$0xff]  }
 0x58f   :  { %9267 = vmatpush1.bf16.msra.mxu0 %v18346_v34  ;;  %v18391_v34 = vld [vmem:[%s22635_s8 + $0x788] ss:$16 sps:$4 sm:$0xff]  }
 0x590   :  { %9984 = vmatpush1.bf16.msra.mxu1 %v18349_v0  ;;  %9451 = vmatprep.subr.bf16.mxu0 %v18354_v28  ;;  %v18399_v0 = vld [vmem:[%s22635_s8 + $0x7cc] ss:$16 sps:$4 sm:$0xff]  }
 0x591   :  { %9985 = vmatprep.subr.bf16.mxu1 %v18357_v42 }
 0x592   :  { %15364 = vmatmul.mubr.msk.bf16.vlgmr.msra.gmra.mrb[220].mxu0 %vm1086_vm1, %v9135_v7  ;;  %v18361_v7 = vld [vmem:[%s22635_s8 + $0x648] ss:$16 sps:$4 sm:$0xff]  }
 0x593   :  { %9452 = vmatpush1.bf16.msra.mxu0 %v18352_v41  ;;  %9483 = vmatprep.mubr.bf16.mxu0 %v22648_v56 }
 0x594   :  { %9986 = vmatpush1.bf16.msra.mxu1 %v18355_v30  ;;  %9453 = vmatprep.subr.bf16.mxu0 %v18360_v1  ;;  %v18402_v1 = vld [vmem:[%s22635_s8 + $0x7ec] ss:$16 sps:$4 sm:$0xff]  }
 0x595   :  { %v6963_v2 = vpop.f32.mrb[172].mxu0 }
 0x596   :  { %v6965_v27 = vpop.f32.mrb[173].mxu0 }
 0x597   :  { %15502 = vmatmul.mubr.msk.bf16.vlgmr.msra.gmra.mrb[192].mxu1 %vm1086_vm1, %v21281_v26  ;;  %v6967_v61 = vpop.f32.mrb[174].mxu0  ;;  %9454 = vmatpush1.bf16.msra.mxu0 %v18358_v40 }
 0x598   :  { %v6968_v55 = vpop.f32.mrb[175].mxu0  ;;  %9455 = vmatprep.subr.bf16.mxu0 %v18363_v18 }
 0x59a   :  { %v7542_v32 = vpop.f32.mrb[140].mxu1 }
 0x59b   :  { %v7590_v5 = vadd.f32 %v7542_v32, %v7399_v20  ;;  %v7544_v49 = vpop.f32.mrb[141].mxu1  ;;  %9456 = vmatpush1.bf16.msra.mxu0 %v18361_v7  ;;  %v18393_v20 = vld [vmem:[%s22635_s8 + $0x78c] ss:$16 sps:$4 sm:$0xff]   ;;  %v18404_v32 = vld [vmem:[%s22638_s11] sm:$0xff]  }
 0x59c   :  { %v7591_v25 = vadd.f32 %v7544_v49, %v7400_v8  ;;  %v7546_v15 = vpop.f32.mrb[142].mxu1  ;;  %9457 = vmatprep.subr.bf16.mxu0 %v18366_v6  ;;  %v18396_v8 = vld [vmem:[%s22635_s8 + $0x7ac] ss:$16 sps:$4 sm:$0xff]   ;;  %v18403_v6 = vld [vmem:[%s22638_s11 + $0x40] sm:$0xff]  }
 0x59d   :  { %v7547_v59 = vpop.f32.mrb[143].mxu1  ;;  %16642 = vmatprep.subr.bf16.mxu1 %v18403_v6 }
 0x59e   :  { %16643 = vmatpush3.bf16.msra.mxu1 %v18404_v32 }
 0x59f   :  { %9458 = vmatpush1.bf16.msra.mxu0 %v18364_v38 }
 0x5a0   :  { %9642 = vmatprep.subr.bf16.mxu0 %v18369_v37  ;;  %v18405_v37 = vld [vmem:[%s22638_s11 + $0x48] sm:$0xff]  }
 0x5a1   :  { %16644 = vmatprep.subr.bf16.mxu1 %v18405_v37 }
 0x5a2   :  { %15399 = vmatmul.mubr.msk.bf16.vlgmr.msra.gmra.mrb[224].mxu0 %vm1086_vm1, %v9326_v31 }
 0x5a3   :  { %9643 = vmatpush1.bf16.msra.mxu0 %v18367_v11  ;;  %9674 = vmatprep.mubr.bf16.mxu0 %v22648_v56  ;;  %v18406_v11 = vld [vmem:[%s22638_s11 + $0x8] sm:$0xff]  }
 0x5a4   :  { %9644 = vmatprep.subr.bf16.mxu0 %v18372_v51  ;;  %16645 = vmatpush3.bf16.msra.mxu1 %v18406_v11 }
 0x5a7   :  { %9645 = vmatpush1.bf16.msra.mxu0 %v18370_v35 }
 0x5a8   :  { %9646 = vmatprep.subr.bf16.mxu0 %v18375_v16 }
 0x5aa   :  { %v7733_v31 = vpop.f32.mrb[144].mxu1 }
 0x5ab   :  { %v7781_v22 = vadd.f32 %v7733_v31, %v7590_v5  ;;  %v7735_v12 = vpop.f32.mrb[145].mxu1  ;;  %9647 = vmatpush1.bf16.msra.mxu0 %v18373_v13 }
 0x5ac   :  { %v7782_v57 = vadd.f32 %v7735_v12, %v7591_v25  ;;  %v7737_v23 = vpop.f32.mrb[146].mxu1  ;;  %9648 = vmatprep.subr.bf16.mxu0 %v18378_v21  ;;  %v18407_v21 = vld [vmem:[%s22638_s11 + $0x50] sm:$0xff]   ;;  %v18409_v12 = vld [vmem:[%s22638_s11 + $0x58] sm:$0xff]  }
 0x5ad   :  { %v7738_v54 = vpop.f32.mrb[147].mxu1  ;;  %16646 = vmatprep.subr.bf16.mxu1 %v18407_v21  ;;  %v18412_v23 = vld [vmem:[%s22638_s11 + $0x20] sm:$0xff]   ;;  %v18455_v21 = vld [vmem:[%s22638_s11 + $0xd8] sm:$0xff]  }
 0x5af   :  { %9649 = vmatpush1.bf16.msra.mxu0 %v18376_v47  ;;  %v18410_v47 = vld [vmem:[%s22638_s11 + $0x18] sm:$0xff]  }
 0x5b0   :  { %9833 = vmatprep.subr.bf16.mxu0 %v18381_v9 }
 0x5b2   :  { %15434 = vmatmul.mubr.msk.bf16.vlgmr.msra.gmra.mrb[228].mxu0 %vm1086_vm1, %v9517_v44 }
 0x5b3   :  { %9834 = vmatpush1.bf16.msra.mxu0 %v18379_v4  ;;  %9865 = vmatprep.mubr.bf16.mxu0 %v22648_v56 }
 0x5b4   :  { %9835 = vmatprep.subr.bf16.mxu0 %v18384_v46 }
 0x5b5   :  { %v7205_v58 = vpop.f32.mrb[176].mxu0 }
 0x5b6   :  { %v7206_v43 = vadd.f32 %v7205_v58, %v6963_v2  ;;  %v7207_v17 = vpop.f32.mrb[177].mxu0 }
 0x5b7   :  { %v7208_v10 = vadd.f32 %v7207_v17, %v6965_v27  ;;  %v7209_v63 = vpop.f32.mrb[178].mxu0  ;;  %9836 = vmatpush1.bf16.msra.mxu0 %v18382_v48  ;;  %v18400_v27 = vld [vmem:[%s22635_s8 + $0x7e8] ss:$16 sps:$4 sm:$0xff]  }
 0x5b8   :  { %v7210_v44 = vpop.f32.mrb[179].mxu0  ;;  %9837 = vmatprep.subr.bf16.mxu0 %v18387_v50  ;;  %v18413_v50 = vld [vmem:[%s22638_s11 + $0x68] sm:$0xff]  }
 0x5ba   :  { %v7924_v60 = vpop.f32.mrb[148].mxu1 }
 0x5bb   :  { %v7972_v29 = vadd.f32 %v7924_v60, %v7781_v22  ;;  %v7926_v53 = vpop.f32.mrb[149].mxu1  ;;  %9838 = vmatpush1.bf16.msra.mxu0 %v18385_v45  ;;  %v18408_v22 = vld [vmem:[%s22638_s11 + $0x10] sm:$0xff]  }
 0x5bc   :  { %v7973_v62 = vadd.f32 %v7926_v53, %v7782_v57  ;;  %v7928_v52 = vpop.f32.mrb[150].mxu1  ;;  %9839 = vmatprep.subr.bf16.mxu0 %v18390_v33  ;;  %v18411_v57 = vld [vmem:[%s22638_s11 + $0x60] sm:$0xff]   ;;  %16647 = vmatpush3.bf16.msra.mxu1 %v18408_v22  ;;  %v18415_v60 = vld [vmem:[%s22638_s11 + $0x70] sm:$0xff]   ;;  %v18417_v53 = vld [vmem:[%s22638_s11 + $0x78] sm:$0xff]  }
 0x5bd   :  { %v7929_v24 = vpop.f32.mrb[151].mxu1  ;;  %16648 = vmatprep.subr.bf16.mxu1 %v18409_v12  ;;  %v18418_v52 = vld [vmem:[%s22638_s11 + $0x38] sm:$0xff]  }
 0x5be   :  { %v18459_v12 = vld [vmem:[%s22638_s11 + $0x98] sm:$0xff]  }
 0x5bf   :  { %9840 = vmatpush1.bf16.msra.mxu0 %v18388_v19  ;;  %v18421_v19 = vld [vmem:[%s22635_s8 + $0x804] ss:$16 sps:$4 sm:$0xff]  }
 0x5c0   :  { %10020 = vmatprep.subr.bf16.mxu0 %v18393_v20  ;;  %16649 = vmatpush3.bf16.msra.mxu1 %v18410_v47 }
 0x5c1   :  { %16650 = vmatprep.subr.bf16.mxu1 %v18411_v57 }
 0x5c2   :  { %15469 = vmatmul.mubr.msk.bf16.vlgmr.msra.gmra.mrb[232].mxu0 %vm1086_vm1, %v9708_v3 }
 0x5c3   :  { %10021 = vmatpush1.bf16.msra.mxu0 %v18391_v34  ;;  %10052 = vmatprep.mubr.bf16.mxu0 %v22648_v56 }
 0x5c4   :  { %10022 = vmatprep.subr.bf16.mxu0 %v18396_v8  ;;  %16651 = vmatpush3.bf16.msra.mxu1 %v18412_v23 }
 0x5c5   :  { %v7392_v28 = vpop.f32.mrb[180].mxu0  ;;  %16652 = vmatprep.subr.bf16.mxu1 %v18413_v50 }
 0x5c6   :  { %v7401_v14 = vadd.f32 %v7392_v28, %v7206_v43  ;;  %v7394_v42 = vpop.f32.mrb[181].mxu0  ;;  %v18414_v43 = vld [vmem:[%s22638_s11 + $0x28] sm:$0xff]  }
 0x5c7   :  { %v7402_v41 = vadd.f32 %v7394_v42, %v7208_v10  ;;  %v7396_v30 = vpop.f32.mrb[182].mxu0  ;;  %10023 = vmatpush1.bf16.msra.mxu0 %v18394_v36 }
 0x5c8   :  { %v7397_v3 = vpop.f32.mrb[183].mxu0  ;;  %10024 = vmatprep.subr.bf16.mxu0 %v18399_v0  ;;  %16653 = vmatpush3.bf16.msra.mxu1 %v18414_v43 }
 0x5c9   :  { %16654 = vmatprep.subr.bf16.mxu1 %v18415_v60 }
 0x5ca   :  { %v8111_v40 = vpop.f32.mrb[152].mxu1 }
 0x5cb   :  { %v8159_v18 = vadd.f32 %v8111_v40, %v7972_v29  ;;  %v8113_v2 = vpop.f32.mrb[153].mxu1  ;;  %10025 = vmatpush1.bf16.msra.mxu0 %v18397_v39  ;;  %v18416_v29 = vld [vmem:[%s22638_s11 + $0x30] sm:$0xff]  }
 0x5cc   :  { %v8160_v61 = vadd.f32 %v8113_v2, %v7973_v62  ;;  %v8115_v7 = vpop.f32.mrb[154].mxu1  ;;  %10026 = vmatprep.subr.bf16.mxu0 %v18402_v1  ;;  %16655 = vmatpush3.bf16.msra.mxu1 %v18416_v29 }
 0x5cd   :  { %v8116_v55 = vpop.f32.mrb[155].mxu1  ;;  %16656 = vmatprep.subr.bf16.mxu1 %v18417_v53  ;;  %v18470_v53 = vld [vmem:[%s22638_s11 + $0xf0] sm:$0xff]  }
 0x5cf   :  { %10027 = vmatpush1.bf16.msra.mxu0 %v18400_v27 }
 0x5d0   :  { %16657 = vmatpush3.bf16.msra.mxu1 %v18418_v52  ;;  %v18479_v52 = vld [vmem:[%s22638_s11 + $0xb8] sm:$0xff]  }
 0x5d1   :  { %10582 = vmatprep.subr.bf16.mxu1 %v18421_v19  ;;  %v18474_v19 = vld [vmem:[%s22638_s11 + $0xb0] sm:$0xff]  }
 0x5d2   :  { %15503 = vmatmul.mubr.msk.bf16.vlgmr.msra.gmra.mrb[236].mxu0 %vm1086_vm1, %v21281_v26 }
 0x5d5   :  { %v7583_v5 = vpop.f32.mrb[184].mxu0 }
 0x5d6   :  { %v7592_v49 = vadd.f32 %v7583_v5, %v7401_v14  ;;  %v7585_v38 = vpop.f32.mrb[185].mxu0  ;;  %v18440_v5 = vld [vmem:[%s22638_s11 + $0xc0] sm:$0xff]  }
 0x5d7   :  { %v7593_v25 = vadd.f32 %v7585_v38, %v7402_v41  ;;  %v7587_v15 = vpop.f32.mrb[186].mxu0  ;;  %16664 = vmatprep.subr.bf16.mxu0 %v18440_v5  ;;  %v18445_v38 = vld [vmem:[%s22638_s11 + $0xc8] sm:$0xff]  }
 0x5d8   :  { %v7588_v59 = vpop.f32.mrb[187].mxu0 }
 0x5da   :  { %v8302_v51 = vpop.f32.mrb[156].mxu1 }
 0x5db   :  { %v8350_v35 = vadd.f32 %v8302_v51, %v8159_v18  ;;  %v8304_v16 = vpop.f32.mrb[157].mxu1 }
 0x5dc   :  { %v8351_v26 = vadd.f32 %v8304_v16, %v8160_v61  ;;  %v8306_v13 = vpop.f32.mrb[158].mxu1 }
 0x5dd   :  { %v8307_v31 = vpop.f32.mrb[159].mxu1 }
 0x5e5   :  { %v7774_v9 = vpop.f32.mrb[188].mxu0 }
 0x5e6   :  { %v7783_v54 = vadd.f32 %v7774_v9, %v7592_v49  ;;  %v7776_v4 = vpop.f32.mrb[189].mxu0  ;;  %v18444_v49 = vld [vmem:[%s22638_s11 + $0x80] sm:$0xff]  }
 0x5e7   :  { %v7784_v46 = vadd.f32 %v7776_v4, %v7593_v25  ;;  %v7778_v48 = vpop.f32.mrb[190].mxu0  ;;  %16665 = vmatpush3.bf16.msra.mxu0 %v18444_v49  ;;  %v18449_v25 = vld [vmem:[%s22638_s11 + $0x88] sm:$0xff]   ;;  %v18460_v9 = vld [vmem:[%s22638_s11 + $0xe0] sm:$0xff]  }
 0x5e8   :  { %v7779_v58 = vpop.f32.mrb[191].mxu0  ;;  %16666 = vmatprep.subr.bf16.mxu0 %v18445_v38  ;;  %v18465_v4 = vld [vmem:[%s22638_s11 + $0xe8] sm:$0xff]  }
 0x5e9   :  { %v18469_v48 = vld [vmem:[%s22638_s11 + $0xa8] sm:$0xff]  }
 0x5ea   :  { %v8493_v17 = vpop.f32.mrb[160].mxu1 }
 0x5eb   :  { %v8541_v10 = vadd.f32 %v8493_v17, %v8350_v35  ;;  %v8495_v63 = vpop.f32.mrb[161].mxu1  ;;  %16667 = vmatpush3.bf16.msra.mxu0 %v18449_v25  ;;  %v18450_v35 = vld [vmem:[%s22638_s11 + $0xd0] sm:$0xff]  }
 0x5ec   :  { %v8542_v45 = vadd.f32 %v8495_v63, %v8351_v26  ;;  %v8497_v44 = vpop.f32.mrb[162].mxu1  ;;  %v18454_v26 = vld [vmem:[%s22638_s11 + $0x90] sm:$0xff]   ;;  %16668 = vmatprep.subr.bf16.mxu0 %v18450_v35 }
 0x5ed   :  { %v8498_v33 = vpop.f32.mrb[163].mxu1 }
 0x5ef   :  { %16669 = vmatpush3.bf16.msra.mxu0 %v18454_v26 }
 0x5f0   :  { %16670 = vmatprep.subr.bf16.mxu0 %v18455_v21 }
 0x5f3   :  { %16671 = vmatpush3.bf16.msra.mxu0 %v18459_v12 }
 0x5f4   :  { %16672 = vmatprep.subr.bf16.mxu0 %v18460_v9  ;;  %v21488_v9 = vld [vmem:[%s22639_s10] sm:$0xf] }
 0x5f5   :  { %v7965_v62 = vpop.f32.mrb[192].mxu0 }
 0x5f6   :  { %v7974_v20 = vadd.f32 %v7965_v62, %v7783_v54  ;;  %v7967_v24 = vpop.f32.mrb[193].mxu0  ;;  %v18464_v54 = vld [vmem:[%s22638_s11 + $0xa0] sm:$0xff]   ;;  %v18475_v62 = vld [vmem:[%s22638_s11 + $0xf8] sm:$0xff]  }
 0x5f7   :  { %v7975_v34 = vadd.f32 %v7967_v24, %v7784_v46  ;;  %v7969_v8 = vpop.f32.mrb[194].mxu0  ;;  %16673 = vmatpush3.bf16.msra.mxu0 %v18464_v54 }
 0x5f8   :  { %v7970_v36 = vpop.f32.mrb[195].mxu0  ;;  %16674 = vmatprep.subr.bf16.mxu0 %v18465_v4 }
 0x5fa   :  { %v8684_v0 = vpop.f32.mrb[164].mxu1 }
 0x5fb   :  { %v8732_v28 = vadd.f32 %v8684_v0, %v8541_v10  ;;  %v8686_v14 = vpop.f32.mrb[165].mxu1  ;;  %16675 = vmatpush3.bf16.msra.mxu0 %v18469_v48 }
 0x5fc   :  { %v8733_v42 = vadd.f32 %v8686_v14, %v8542_v45  ;;  %v8688_v41 = vpop.f32.mrb[166].mxu1  ;;  %16676 = vmatprep.subr.bf16.mxu0 %v18470_v53 }
 0x5fd   :  { %v8689_v30 = vpop.f32.mrb[167].mxu1 }
 0x5ff   :  { %16677 = vmatpush3.bf16.msra.mxu0 %v18474_v19 }
 0x600   :  { %16678 = vmatprep.subr.bf16.mxu0 %v18475_v62  ;;  %v18419_v62 = vld [vmem:[%s22635_s8 + $0x800] ss:$16 sps:$4 sm:$0xff]  }
 0x603   :  { %16679 = vmatpush3.bf16.msra.mxu0 %v18479_v52 }
 0x605   :  { %v8152_v39 = vpop.f32.mrb[196].mxu0 }
 0x606   :  { %v8161_v3 = vadd.f32 %v8152_v39, %v7974_v20  ;;  %v8154_v1 = vpop.f32.mrb[197].mxu0  ;;  %v18482_v20 = vld [vmem:[%s22635_s8 + $0x80c] ss:$16 sps:$4 sm:$0xff]  }
 0x607   :  { %v8162_v40 = vadd.f32 %v8154_v1, %v7975_v34  ;;  %v8156_v18 = vpop.f32.mrb[198].mxu0  ;;  %10623 = vmatprep.subr.bf16.mxu0 %v18482_v20  ;;  %v18424_v20 = vld [vmem:[%s22635_s8 + $0x824] ss:$16 sps:$4 sm:$0xff]  }
 0x608   :  { %v8157_v2 = vpop.f32.mrb[199].mxu0 }
 0x60a   :  { %v8875_v27 = vpop.f32.mrb[168].mxu1 }
 0x60b   :  { %v8923_v61 = vadd.f32 %v8875_v27, %v8732_v28  ;;  %v8877_v7 = vpop.f32.mrb[169].mxu1 }
 0x60c   :  { %v8924_v55 = vadd.f32 %v8877_v7, %v8733_v42  ;;  %v8879_v6 = vpop.f32.mrb[170].mxu1 }
 0x60d   :  { %v8880_v32 = vpop.f32.mrb[171].mxu1 }
 0x615   :  { %v8343_v15 = vpop.f32.mrb[200].mxu0 }
 0x616   :  { %v8352_v37 = vadd.f32 %v8343_v15, %v8161_v3  ;;  %v8345_v59 = vpop.f32.mrb[201].mxu0 }
 0x617   :  { %v8353_v11 = vadd.f32 %v8345_v59, %v8162_v40  ;;  %v8347_v51 = vpop.f32.mrb[202].mxu0 }
 0x618   :  { %v8348_v16 = vpop.f32.mrb[203].mxu0 }
 0x61a   :  { %v9062_v13 = vpop.f32.mrb[172].mxu1 }
 0x61b   :  { %v9110_v31 = vadd.f32 %v9062_v13, %v8923_v61  ;;  %v9064_v22 = vpop.f32.mrb[173].mxu1 }
 0x61c   :  { %v9111_v47 = vadd.f32 %v9064_v22, %v8924_v55  ;;  %v9066_v57 = vpop.f32.mrb[174].mxu1 }
 0x61d   :  { %v9067_v23 = vpop.f32.mrb[175].mxu1 }
 0x625   :  { %v8534_v46 = vpop.f32.mrb[204].mxu0 }
 0x626   :  { %v8543_v50 = vadd.f32 %v8534_v46, %v8352_v37  ;;  %v8536_v58 = vpop.f32.mrb[205].mxu0 }
 0x627   :  { %v8544_v43 = vadd.f32 %v8536_v58, %v8353_v11  ;;  %v8538_v17 = vpop.f32.mrb[206].mxu0 }
 0x628   :  { %v8539_v10 = vpop.f32.mrb[207].mxu0 }
 0x62a   :  { %v9253_v63 = vpop.f32.mrb[176].mxu1 }
 0x62b   :  { %v9301_v45 = vadd.f32 %v9253_v63, %v9110_v31  ;;  %v9255_v44 = vpop.f32.mrb[177].mxu1  ;;  %v10067_v31 = vlaneseq }
 0x62c   :  { %v9302_v33 = vadd.f32 %v9255_v44, %v9111_v47  ;;  %v9257_v60 = vpop.f32.mrb[178].mxu1 }
 0x62d   :  { %v9258_v29 = vpop.f32.mrb[179].mxu1  ;;  %v21482_v22 = vshrl.u32 %v10067_v31, 7 }
 0x62f   :  { %v10069_v47 = vsub.s32 0, %v21482_v22  ;;  %v10073_v54 = vsub.s32 1, %v21482_v22 }
 0x635   :  { %v8725_v24 = vpop.f32.mrb[208].mxu0 }
 0x636   :  { %v8734_v34 = vadd.f32 %v8725_v24, %v8543_v50  ;;  %v8727_v8 = vpop.f32.mrb[209].mxu0  ;;  %v10070_v50 = vrot.slane %v21488_v9, %v10069_v47 }
 0x637   :  { %v8735_v36 = vadd.f32 %v8727_v8, %v8544_v43  ;;  %v8729_v0 = vpop.f32.mrb[210].mxu0  ;;  %v10074_v43 = vrot.slane %v21488_v9, %v10073_v54 }
 0x638   :  { %v8730_v28 = vpop.f32.mrb[211].mxu0 }
 0x63a   :  { %v9444_v14 = vpop.f32.mrb[180].mxu1 }
 0x63b   :  { %v9492_v42 = vadd.f32 %v9444_v14, %v9301_v45  ;;  %v9446_v41 = vpop.f32.mrb[181].mxu1  ;;  %v18427_v14 = vld [vmem:[%s22635_s8 + $0x844] ss:$16 sps:$4 sm:$0xff]  }
 0x63c   :  { %v9493_v30 = vadd.f32 %v9446_v41, %v9302_v33  ;;  %v9448_v39 = vpop.f32.mrb[182].mxu1  ;;  %v18425_v41 = vld [vmem:[%s22635_s8 + $0x840] ss:$16 sps:$4 sm:$0xff]  }
 0x63d   :  { %v9449_v3 = vpop.f32.mrb[183].mxu1  ;;  %v18428_v39 = vld [vmem:[%s22635_s8 + $0x860] ss:$16 sps:$4 sm:$0xff]  }
 0x63e   :  { %v18433_v3 = vld [vmem:[%s22634_s9 + $0x104] ss:$16 sps:$4 sm:$0xff]  }
 0x645   :  { %v8916_v1 = vpop.f32.mrb[212].mxu0 }
 0x646   :  { %v8925_v40 = vadd.f32 %v8916_v1, %v8734_v34  ;;  %v8918_v18 = vpop.f32.mrb[213].mxu0  ;;  %v18431_v1 = vld [vmem:[%s22634_s9 + $0x100] ss:$16 sps:$4 sm:$0xff]  }
 0x647   :  { %v8926_v2 = vadd.f32 %v8918_v18, %v8735_v36  ;;  %v8920_v27 = vpop.f32.mrb[214].mxu0  ;;  %v18422_v36 = vld [vmem:[%s22635_s8 + $0x820] ss:$16 sps:$4 sm:$0xff]   ;;  %v21528_v18 = vpop.permute.xlu0 %10497 }
 0x648   :  { %v8921_v61 = vpop.f32.mrb[215].mxu0 }
 0x64a   :  { %v9635_v7 = vpop.f32.mrb[184].mxu1 }
 0x64b   :  { %v9683_v55 = vadd.f32 %v9635_v7, %v9492_v42  ;;  %v9637_v6 = vpop.f32.mrb[185].mxu1  ;;  %v18434_v7 = vld [vmem:[%s22634_s9 + $0x120] ss:$16 sps:$4 sm:$0xff]  }
 0x64c   :  { %v9684_v32 = vadd.f32 %v9637_v6, %v9493_v30  ;;  %v9639_v5 = vpop.f32.mrb[186].mxu1  ;;  %v18430_v30 = vld [vmem:[%s22635_s8 + $0x864] ss:$16 sps:$4 sm:$0xff]  }
 0x64d   :  { %v9640_v49 = vpop.f32.mrb[187].mxu1 }
 0x64e   :  { %v18437_v49 = vld [vmem:[%s22634_s9 + $0x140] ss:$16 sps:$4 sm:$0xff]  }
 0x655   :  { %v9103_v38 = vpop.f32.mrb[216].mxu0 }
 0x656   :  { %v9112_v25 = vadd.f32 %v9103_v38, %v8925_v40  ;;  %v9105_v15 = vpop.f32.mrb[217].mxu0  ;;  %v18436_v40 = vld [vmem:[%s22634_s9 + $0x124] ss:$16 sps:$4 sm:$0xff]  }
 0x657   :  { %v9113_v37 = vadd.f32 %v9105_v15, %v8926_v2  ;;  %v9107_v59 = vpop.f32.mrb[218].mxu0  ;;  %v18443_v38 = vld [vmem:[%s22634_s9 + $0x164] ss:$16 sps:$4 sm:$0xff]  }
 0x658   :  { %v9108_v11 = vpop.f32.mrb[219].mxu0  ;;  %v18448_v15 = vld [vmem:[%s22634_s9 + $0x184] ss:$16 sps:$4 sm:$0xff]  }
 0x659   :  { %v18453_v59 = vld [vmem:[%s22634_s9 + $0x1a4] ss:$16 sps:$4 sm:$0xff]  }
 0x65a   :  { %v9826_v51 = vpop.f32.mrb[188].mxu1 }
 0x65b   :  { %v9874_v35 = vadd.f32 %v9826_v51, %v9683_v55  ;;  %v9828_v16 = vpop.f32.mrb[189].mxu1 }
 0x65c   :  { %v9875_v26 = vadd.f32 %v9828_v16, %v9684_v32  ;;  %v9830_v13 = vpop.f32.mrb[190].mxu1  ;;  %v18439_v32 = vld [vmem:[%s22634_s9 + $0x144] ss:$16 sps:$4 sm:$0xff]   ;;  %v18451_v16 = vld [vmem:[%s22634_s9 + $0x1a0] ss:$16 sps:$4 sm:$0xff]  }
 0x65d   :  { %v9831_v21 = vpop.f32.mrb[191].mxu1 }
 0x65e   :  { %v18458_v21 = vld [vmem:[%s22634_s9 + $0x1c4] ss:$16 sps:$4 sm:$0xff]  }
 0x665   :  { %v9294_v12 = vpop.f32.mrb[220].mxu0 }
 0x666   :  { %v9303_v57 = vadd.f32 %v9294_v12, %v9112_v25  ;;  %v9296_v23 = vpop.f32.mrb[221].mxu0  ;;  %v18441_v25 = vld [vmem:[%s22634_s9 + $0x160] ss:$16 sps:$4 sm:$0xff]  }
 0x667   :  { %v9304_v4 = vadd.f32 %v9296_v23, %v9113_v37  ;;  %v9298_v46 = vpop.f32.mrb[222].mxu0  ;;  %v18446_v37 = vld [vmem:[%s22634_s9 + $0x180] ss:$16 sps:$4 sm:$0xff]  }
 0x668   :  { %v9299_v48 = vpop.f32.mrb[223].mxu0  ;;  %v18456_v12 = vld [vmem:[%s22634_s9 + $0x1c0] ss:$16 sps:$4 sm:$0xff]   ;;  %v10077_v46 = vsub.s32 2, %v21482_v22 }
 0x669   :  { %v18461_v23 = vld [vmem:[%s22634_s9 + $0x1e0] ss:$16 sps:$4 sm:$0xff]   ;;  %v10081_v48 = vsub.s32 3, %v21482_v22 }
 0x66a   :  { %v10013_v58 = vpop.f32.mrb[192].mxu1  ;;  %v16227_v22 = vld [vmem:[%s22640_s12 + $0x1] ss:$0 sm:$0xff] }
 0x66b   :  { %v10061_v17 = vadd.f32 %v10013_v58, %v9874_v35  ;;  %v10015_v10 = vpop.f32.mrb[193].mxu1  ;;  %v18473_v58 = vld [vmem:[%s22635_s8 + $0x8a4] ss:$16 sps:$4 sm:$0xff]  }
 0x66c   :  { %v10062_v63 = vadd.f32 %v10015_v10, %v9875_v26  ;;  %v10017_v45 = vpop.f32.mrb[194].mxu1 }
 0x66d   :  { %v10087_v44 = vadd.f32 %v10070_v50, %v10061_v17  ;;  %v10018_v33 = vpop.f32.mrb[195].mxu1  ;;  %v18466_v50 = vld [vmem:[%s22635_s8 + $0x880] ss:$16 sps:$4 sm:$0xff]  }
 0x66e   :  { %v10088_v60 = vadd.f32 %v10074_v43, %v10062_v63  ;;  %v10078_v43 = vrot.slane %v21488_v9, %v10077_v46  ;;  %v21589_v17 = vld [vmem:[%s22636_s1] sm:$0x1]  ;;  %v10082_v63 = vrot.slane %v21488_v9, %v10081_v48 }
 0x66f   :  { %v10091_v29 = vmax.f32 %v10087_v44, 0.0  ;;  %v18471_v33 = vld [vmem:[%s22635_s8 + $0x8a0] ss:$16 sps:$4 sm:$0xff]  }
 0x670   :  { %v10092_v53 = vmax.f32 %v10088_v60, 0.0 }
 0x671   :  { %v10095_v52 = vpack.c.bf16 %v10091_v29, %v10091_v29 }
 0x672   :  { %v10096_v19 = vpack.c.bf16 %v10092_v53, %v10092_v53  ;;  %v18478_v53 = vld [vmem:[%s22635_s8 + $0x8c4] ss:$16 sps:$4 sm:$0xff]  }
 0x674   :  { %10394 = vmatprep.mubr.bf16.mxu1 %v10096_v19 }
 0x675   :  { %10395 = vmatmul.mubr.bf16.vlgmr.msra.gmra.mrb[196].mxu1 %v10095_v52  ;;  %v9485_v24 = vpop.f32.mrb[224].mxu0 }
 0x676   :  { %10583 = vmatpush1.bf16.msra.mxu1 %v18419_v62  ;;  %v9494_v34 = vadd.f32 %v9485_v24, %v9303_v57  ;;  %v9487_v8 = vpop.f32.mrb[225].mxu0  ;;  %10614 = vmatprep.mubr.bf16.mxu1 %v22648_v56  ;;  %v18463_v57 = vld [vmem:[%s22634_s9 + $0x1e4] ss:$16 sps:$4 sm:$0xff]  }
 0x677   :  { %v9495_v0 = vadd.f32 %v9487_v8, %v9304_v4  ;;  %v9489_v28 = vpop.f32.mrb[226].mxu0  ;;  %10584 = vmatprep.subr.bf16.mxu1 %v18424_v20  ;;  %v18468_v4 = vld [vmem:[%s22635_s8 + $0x884] ss:$16 sps:$4 sm:$0xff]   ;;  %v18476_v20 = vld [vmem:[%s22635_s8 + $0x8c0] ss:$16 sps:$4 sm:$0xff]  }
 0x678   :  { %v9490_v42 = vpop.f32.mrb[227].mxu0  ;;  %v18483_v28 = vld [vmem:[%s22635_s8 + $0x8e0] ss:$16 sps:$4 sm:$0xff]  }
 0x679   :  { %v18491_v42 = vld [vmem:[%s22635_s8 + $0x904] ss:$16 sps:$4 sm:$0xff]  }
 0x67a   :  { %10585 = vmatpush1.bf16.msra.mxu1 %v18422_v36  ;;  %v18480_v36 = vld [vmem:[%s22635_s8 + $0x808] ss:$16 sps:$4 sm:$0xff]  }
 0x67b   :  { %10586 = vmatprep.subr.bf16.mxu1 %v18427_v14  ;;  %v18488_v14 = vld [vmem:[%s22635_s8 + $0x82c] ss:$16 sps:$4 sm:$0xff]  }
 0x67e   :  { %10587 = vmatpush1.bf16.msra.mxu1 %v18425_v41  ;;  %v18486_v41 = vld [vmem:[%s22635_s8 + $0x828] ss:$16 sps:$4 sm:$0xff]  }
 0x67f   :  { %10588 = vmatprep.subr.bf16.mxu1 %v18430_v30  ;;  %v18489_v30 = vld [vmem:[%s22635_s8 + $0x900] ss:$16 sps:$4 sm:$0xff]  }
 0x682   :  { %10589 = vmatpush1.bf16.msra.mxu1 %v18428_v39  ;;  %v18494_v39 = vld [vmem:[%s22635_s8 + $0x84c] ss:$16 sps:$4 sm:$0xff]  }
 0x683   :  { %10824 = vmatprep.subr.bf16.mxu1 %v18433_v3  ;;  %v18497_v3 = vld [vmem:[%s22635_s8 + $0x924] ss:$16 sps:$4 sm:$0xff]  }
 0x685   :  { %15602 = vmatmul.mubr.msk.bf16.vlgmr.msra.gmra.mrb[200].mxu1 %vm1086_vm1, %v21528_v18  ;;  %v9676_v2 = vpop.f32.mrb[228].mxu0 }
 0x686   :  { %10825 = vmatpush1.bf16.msra.mxu1 %v18431_v1  ;;  %v9685_v27 = vadd.f32 %v9676_v2, %v9494_v34  ;;  %v9678_v61 = vpop.f32.mrb[229].mxu0  ;;  %10856 = vmatprep.mubr.bf16.mxu1 %v22648_v56  ;;  %v18485_v34 = vld [vmem:[%s22635_s8 + $0x8e4] ss:$16 sps:$4 sm:$0xff]   ;;  %v21633_v1 = vpop.permute.xlu0 %10928  ;;  %v18495_v2 = vld [vmem:[%s22635_s8 + $0x920] ss:$16 sps:$4 sm:$0xff]  }
 0x687   :  { %v9686_v55 = vadd.f32 %v9678_v61, %v9495_v0  ;;  %v9680_v6 = vpop.f32.mrb[230].mxu0  ;;  %10826 = vmatprep.subr.bf16.mxu1 %v18436_v40  ;;  %v18492_v40 = vld [vmem:[%s22635_s8 + $0x848] ss:$16 sps:$4 sm:$0xff]   ;;  %v18503_v61 = vld [vmem:[%s22635_s8 + $0x944] ss:$16 sps:$4 sm:$0xff]  }
 0x688   :  { %v9681_v5 = vpop.f32.mrb[231].mxu0  ;;  %v18506_v6 = vld [vmem:[%s22634_s9 + $0x10c] ss:$16 sps:$4 sm:$0xff]  }
 0x689   :  { %v18504_v5 = vld [vmem:[%s22634_s9 + $0x108] ss:$16 sps:$4 sm:$0xff]  }
 0x68a   :  { %10827 = vmatpush1.bf16.msra.mxu1 %v18434_v7  ;;  %v18498_v7 = vld [vmem:[%s22635_s8 + $0x868] ss:$16 sps:$4 sm:$0xff]  }
 0x68b   :  { %10828 = vmatprep.subr.bf16.mxu1 %v18439_v32  ;;  %v18509_v32 = vld [vmem:[%s22635_s8 + $0x964] ss:$16 sps:$4 sm:$0xff]  }
 0x68e   :  { %10829 = vmatpush1.bf16.msra.mxu1 %v18437_v49  ;;  %v18507_v49 = vld [vmem:[%s22635_s8 + $0x960] ss:$16 sps:$4 sm:$0xff]  }
 0x68f   :  { %10830 = vmatprep.subr.bf16.mxu1 %v18443_v38  ;;  %v18512_v38 = vld [vmem:[%s22634_s9 + $0x12c] ss:$16 sps:$4 sm:$0xff]  }
 0x692   :  { %10831 = vmatpush1.bf16.msra.mxu1 %v18441_v25  ;;  %v18515_v25 = vld [vmem:[%s22635_s8 + $0x984] ss:$16 sps:$4 sm:$0xff]  }
 0x693   :  { %10832 = vmatprep.subr.bf16.mxu1 %v18448_v15  ;;  %v18510_v15 = vld [vmem:[%s22634_s9 + $0x128] ss:$16 sps:$4 sm:$0xff]  }
 0x695   :  { %v9867_v11 = vpop.f32.mrb[232].mxu0 }
 0x696   :  { %10833 = vmatpush1.bf16.msra.mxu1 %v18446_v37  ;;  %v9876_v51 = vadd.f32 %v9867_v11, %v9685_v27  ;;  %v9869_v35 = vpop.f32.mrb[233].mxu0  ;;  %v18500_v27 = vld [vmem:[%s22635_s8 + $0x86c] ss:$16 sps:$4 sm:$0xff]   ;;  %v18513_v37 = vld [vmem:[%s22635_s8 + $0x980] ss:$16 sps:$4 sm:$0xff]   ;;  %v21689_v11 = vpop.permute.xlu1 %11121 }
 0x697   :  { %v9877_v26 = vadd.f32 %v9869_v35, %v9686_v55  ;;  %v9871_v13 = vpop.f32.mrb[234].mxu0  ;;  %10834 = vmatprep.subr.bf16.mxu1 %v18453_v59  ;;  %v18501_v55 = vld [vmem:[%s22635_s8 + $0x940] ss:$16 sps:$4 sm:$0xff]   ;;  %v18518_v59 = vld [vmem:[%s22634_s9 + $0x14c] ss:$16 sps:$4 sm:$0xff]  }
 0x698   :  { %v9872_v31 = vpop.f32.mrb[235].mxu0  ;;  %v18519_v35 = vld [vmem:[%s22635_s8 + $0x9a0] ss:$16 sps:$4 sm:$0xff]   ;;  %v18522_v13 = vld [vmem:[%s22634_s9 + $0x168] ss:$16 sps:$4 sm:$0xff]  }
 0x699   :  { %v18530_v31 = vld [vmem:[%s22634_s9 + $0x18c] ss:$16 sps:$4 sm:$0xff]  }
 0x69a   :  { %10835 = vmatpush1.bf16.msra.mxu1 %v18451_v16  ;;  %v18524_v16 = vld [vmem:[%s22634_s9 + $0x16c] ss:$16 sps:$4 sm:$0xff]  }
 0x69b   :  { %10836 = vmatprep.subr.bf16.mxu1 %v18458_v21  ;;  %v18525_v21 = vld [vmem:[%s22635_s8 + $0x9c0] ss:$16 sps:$4 sm:$0xff]  }
 0x69e   :  { %10837 = vmatpush1.bf16.msra.mxu1 %v18456_v12  ;;  %v18533_v12 = vld [vmem:[%s22635_s8 + $0x9e4] ss:$16 sps:$4 sm:$0xff]  }
 0x69f   :  { %10838 = vmatprep.subr.bf16.mxu1 %v18463_v57  ;;  %v18528_v57 = vld [vmem:[%s22634_s9 + $0x188] ss:$16 sps:$4 sm:$0xff]  }
 0x6a2   :  { %10839 = vmatpush1.bf16.msra.mxu1 %v18461_v23  ;;  %v18531_v23 = vld [vmem:[%s22635_s8 + $0x9e0] ss:$16 sps:$4 sm:$0xff]  }
 0x6a3   :  { %11013 = vmatprep.subr.bf16.mxu1 %v18468_v4  ;;  %v18536_v4 = vld [vmem:[%s22634_s9 + $0x1ac] ss:$16 sps:$4 sm:$0xff]  }
 0x6a5   :  { %10857 = vmatmul.mubr.bf16.vlgmr.msra.gmra.mrb[204].mxu1 %v21589_v17  ;;  %v10054_v10 = vpop.f32.mrb[236].mxu0 }
 0x6a6   :  { %11014 = vmatpush1.bf16.msra.mxu1 %v18466_v50  ;;  %v10063_v45 = vadd.f32 %v10054_v10, %v9876_v51  ;;  %v10056_v44 = vpop.f32.mrb[237].mxu0  ;;  %11045 = vmatprep.mubr.bf16.mxu1 %v22648_v56  ;;  %v18516_v51 = vld [vmem:[%s22634_s9 + $0x148] ss:$16 sps:$4 sm:$0xff]   ;;  %v18539_v50 = vld [vmem:[%s22635_s8 + $0xa04] ss:$16 sps:$4 sm:$0xff]  }
 0x6a7   :  { %v10064_v60 = vadd.f32 %v10056_v44, %v9877_v26  ;;  %v10058_v29 = vpop.f32.mrb[238].mxu0  ;;  %11015 = vmatprep.subr.bf16.mxu1 %v18473_v58  ;;  %v18527_v26 = vld [vmem:[%s22635_s8 + $0x9c4] ss:$16 sps:$4 sm:$0xff]   ;;  %v18534_v58 = vld [vmem:[%s22634_s9 + $0x1a8] ss:$16 sps:$4 sm:$0xff]  }
 0x6a8   :  { %v10089_v19 = vadd.f32 %v10078_v43, %v10063_v45  ;;  %v10059_v62 = vpop.f32.mrb[239].mxu0  ;;  %v18537_v43 = vld [vmem:[%s22635_s8 + $0xa00] ss:$16 sps:$4 sm:$0xff]   ;;  %v18542_v10 = vld [vmem:[%s22634_s9 + $0x1cc] ss:$16 sps:$4 sm:$0xff]   ;;  %v21742_v45 = vpop.permute.xlu1 %11314 }
 0x6a9   :  { %v10090_v52 = vadd.f32 %v10082_v63, %v10064_v60  ;;  %v18545_v63 = vld [vmem:[%s22635_s8 + $0xa24] ss:$16 sps:$4 sm:$0xff]   ;;  %v18540_v44 = vld [vmem:[%s22634_s9 + $0x1c8] ss:$16 sps:$4 sm:$0xff]   ;;  %v18548_v60 = vld [vmem:[%s22634_s9 + $0x1ec] ss:$16 sps:$4 sm:$0xff]  }
 0x6aa   :  { %v10093_v9 = vmax.f32 %v10089_v19, 0.0  ;;  %11016 = vmatpush1.bf16.msra.mxu1 %v18471_v33  ;;  %v18543_v33 = vld [vmem:[%s22635_s8 + $0xa20] ss:$16 sps:$4 sm:$0xff]   ;;  %v18551_v29 = vld [vmem:[%s22635_s8 + $0xa44] ss:$16 sps:$4 sm:$0xff]  }
 0x6ab   :  { %v10094_v24 = vmax.f32 %v10090_v52, 0.0  ;;  %11017 = vmatprep.subr.bf16.mxu1 %v18478_v53  ;;  %v18546_v53 = vld [vmem:[%s22634_s9 + $0x1e8] ss:$16 sps:$4 sm:$0xff]   ;;  %v18549_v19 = vld [vmem:[%s22635_s8 + $0xa40] ss:$16 sps:$4 sm:$0xff]  }
 0x6ac   :  { %v10097_v0 = vpack.c.bf16 %v10093_v9, %v10093_v9  ;;  %v18554_v62 = vld [vmem:[%s22635_s8 + $0x88c] ss:$16 sps:$4 sm:$0xff]   ;;  %v18557_v52 = vld [vmem:[%s22635_s8 + $0xa64] ss:$16 sps:$4 sm:$0xff]   ;;  %v18552_v9 = vld [vmem:[%s22635_s8 + $0x888] ss:$16 sps:$4 sm:$0xff]  }
 0x6ad   :  { %v10098_v8 = vpack.c.bf16 %v10094_v24, %v10094_v24  ;;  %v18560_v24 = vld [vmem:[%s22635_s8 + $0x8ac] ss:$16 sps:$4 sm:$0xff]  }
 0x6ae   :  { %11018 = vmatpush1.bf16.msra.mxu1 %v18476_v20  ;;  %v18555_v20 = vld [vmem:[%s22635_s8 + $0xa60] ss:$16 sps:$4 sm:$0xff]  }
 0x6af   :  { %10434 = vmatprep.mubr.bf16.mxu0 %v10098_v8  ;;  %11019 = vmatprep.subr.bf16.mxu1 %v18485_v34  ;;  %v18563_v34 = vld [vmem:[%s22635_s8 + $0xa84] ss:$16 sps:$4 sm:$0xff]   ;;  %v18558_v8 = vld [vmem:[%s22635_s8 + $0x8a8] ss:$16 sps:$4 sm:$0xff]  }
 0x6b0   :  { %10435 = vmatmul.mubr.bf16.vlgmr.msra.gmra.mrb[240].mxu0 %v10097_v0  ;;  %v18566_v0 = vld [vmem:[%s22635_s8 + $0x8cc] ss:$16 sps:$4 sm:$0xff]  }
 0x6b1   :  { %10624 = vmatpush1.bf16.msra.mxu0 %v18480_v36  ;;  %10655 = vmatprep.mubr.bf16.mxu0 %v22648_v56  ;;  %v18561_v36 = vld [vmem:[%s22635_s8 + $0xa80] ss:$16 sps:$4 sm:$0xff]  }
 0x6b2   :  { %11020 = vmatpush1.bf16.msra.mxu1 %v18483_v28  ;;  %10625 = vmatprep.subr.bf16.mxu0 %v18488_v14  ;;  %v21797_v28 = vpop.permute.xlu0 %11507  ;;  %v18564_v14 = vld [vmem:[%s22635_s8 + $0x8c8] ss:$16 sps:$4 sm:$0xff]  }
 0x6b3   :  { %11206 = vmatprep.subr.bf16.mxu1 %v18491_v42  ;;  %v18567_v42 = vld [vmem:[%s22635_s8 + $0xaa0] ss:$16 sps:$4 sm:$0xff]  }
 0x6b5   :  { %15669 = vmatmul.mubr.msk.bf16.vlgmr.msra.gmra.mrb[208].mxu1 %vm1086_vm1, %v21633_v1  ;;  %10626 = vmatpush1.bf16.msra.mxu0 %v18486_v41  ;;  %v18572_v41 = vld [vmem:[%s22635_s8 + $0x8ec] ss:$16 sps:$4 sm:$0xff]  }
 0x6b6   :  { %11207 = vmatpush1.bf16.msra.mxu1 %v18489_v30  ;;  %10627 = vmatprep.subr.bf16.mxu0 %v18494_v39  ;;  %v18575_v30 = vld [vmem:[%s22635_s8 + $0xac4] ss:$16 sps:$4 sm:$0xff]   ;;  %v18570_v39 = vld [vmem:[%s22635_s8 + $0x8e8] ss:$16 sps:$4 sm:$0xff]  }
 0x6b7   :  { %11208 = vmatprep.subr.bf16.mxu1 %v18497_v3  ;;  %11238 = vmatprep.mubr.bf16.mxu1 %v22648_v56  ;;  %v18573_v3 = vld [vmem:[%s22635_s8 + $0xac0] ss:$16 sps:$4 sm:$0xff]  }
 0x6b9   :  { %10628 = vmatpush1.bf16.msra.mxu0 %v18492_v40  ;;  %v18578_v40 = vld [vmem:[%s22635_s8 + $0x90c] ss:$16 sps:$4 sm:$0xff]  }
 0x6ba   :  { %11209 = vmatpush1.bf16.msra.mxu1 %v18495_v2  ;;  %10629 = vmatprep.subr.bf16.mxu0 %v18500_v27  ;;  %v18581_v2 = vld [vmem:[%s22635_s8 + $0xae4] ss:$16 sps:$4 sm:$0xff]   ;;  %v18576_v27 = vld [vmem:[%s22635_s8 + $0x908] ss:$16 sps:$4 sm:$0xff]  }
 0x6bb   :  { %11210 = vmatprep.subr.bf16.mxu1 %v18503_v61  ;;  %v18579_v61 = vld [vmem:[%s22635_s8 + $0xae0] ss:$16 sps:$4 sm:$0xff]  }
 0x6bd   :  { %10630 = vmatpush1.bf16.msra.mxu0 %v18498_v7  ;;  %v18584_v7 = vld [vmem:[%s22635_s8 + $0x92c] ss:$16 sps:$4 sm:$0xff]  }
 0x6be   :  { %11211 = vmatpush1.bf16.msra.mxu1 %v18501_v55  ;;  %10865 = vmatprep.subr.bf16.mxu0 %v18506_v6  ;;  %v18587_v55 = vld [vmem:[%s22635_s8 + $0xb04] ss:$16 sps:$4 sm:$0xff]   ;;  %v18582_v6 = vld [vmem:[%s22635_s8 + $0x928] ss:$16 sps:$4 sm:$0xff]  }
 0x6bf   :  { %11212 = vmatprep.subr.bf16.mxu1 %v18509_v32  ;;  %v18585_v32 = vld [vmem:[%s22635_s8 + $0xb00] ss:$16 sps:$4 sm:$0xff]  }
 0x6c0   :  { %15603 = vmatmul.mubr.msk.bf16.vlgmr.msra.gmra.mrb[244].mxu0 %vm1086_vm1, %v21528_v18  ;;  %v18521_v18 = vld [vmem:[%s22635_s8 + $0x9a4] ss:$16 sps:$4 sm:$0xff]  }
 0x6c1   :  { %10866 = vmatpush1.bf16.msra.mxu0 %v18504_v5  ;;  %10897 = vmatprep.mubr.bf16.mxu0 %v22648_v56  ;;  %v18590_v5 = vld [vmem:[%s22635_s8 + $0x94c] ss:$16 sps:$4 sm:$0xff]  }
 0x6c2   :  { %11213 = vmatpush1.bf16.msra.mxu1 %v18507_v49  ;;  %10867 = vmatprep.subr.bf16.mxu0 %v18512_v38  ;;  %v21853_v49 = vpop.permute.xlu1 %11699  ;;  %v18588_v38 = vld [vmem:[%s22635_s8 + $0x948] ss:$16 sps:$4 sm:$0xff]  }
 0x6c3   :  { %11399 = vmatprep.subr.bf16.mxu1 %v18515_v25  ;;  %v18591_v25 = vld [vmem:[%s22635_s8 + $0xb20] ss:$16 sps:$4 sm:$0xff]  }
 0x6c5   :  { %15704 = vmatmul.mubr.msk.bf16.vlgmr.msra.gmra.mrb[212].mxu1 %vm1086_vm1, %v21689_v11  ;;  %10868 = vmatpush1.bf16.msra.mxu0 %v18510_v15  ;;  %v18596_v15 = vld [vmem:[%s22635_s8 + $0x96c] ss:$16 sps:$4 sm:$0xff]  }
 0x6c6   :  { %11400 = vmatpush1.bf16.msra.mxu1 %v18513_v37  ;;  %10869 = vmatprep.subr.bf16.mxu0 %v18518_v59  ;;  %v18599_v37 = vld [vmem:[%s22635_s8 + $0xb44] ss:$16 sps:$4 sm:$0xff]   ;;  %v18594_v59 = vld [vmem:[%s22635_s8 + $0x968] ss:$16 sps:$4 sm:$0xff]  }
 0x6c7   :  { %11401 = vmatprep.subr.bf16.mxu1 %v18521_v18  ;;  %11431 = vmatprep.mubr.bf16.mxu1 %v22648_v56  ;;  %v18597_v18 = vld [vmem:[%s22635_s8 + $0xb40] ss:$16 sps:$4 sm:$0xff]  }
 0x6c9   :  { %10870 = vmatpush1.bf16.msra.mxu0 %v18516_v51  ;;  %v18602_v51 = vld [vmem:[%s22635_s8 + $0x98c] ss:$16 sps:$4 sm:$0xff]  }
 0x6ca   :  { %11402 = vmatpush1.bf16.msra.mxu1 %v18519_v35  ;;  %10871 = vmatprep.subr.bf16.mxu0 %v18524_v16  ;;  %v18605_v35 = vld [vmem:[%s22635_s8 + $0xb64] ss:$16 sps:$4 sm:$0xff]   ;;  %v18600_v16 = vld [vmem:[%s22635_s8 + $0x988] ss:$16 sps:$4 sm:$0xff]  }
 0x6cb   :  { %11403 = vmatprep.subr.bf16.mxu1 %v18527_v26  ;;  %v18603_v26 = vld [vmem:[%s22635_s8 + $0xb60] ss:$16 sps:$4 sm:$0xff]  }
 0x6cd   :  { %10872 = vmatpush1.bf16.msra.mxu0 %v18522_v13  ;;  %v18608_v13 = vld [vmem:[%s22635_s8 + $0x9ac] ss:$16 sps:$4 sm:$0xff]  }
 0x6ce   :  { %11404 = vmatpush1.bf16.msra.mxu1 %v18525_v21  ;;  %10873 = vmatprep.subr.bf16.mxu0 %v18530_v31  ;;  %v18611_v21 = vld [vmem:[%s22635_s8 + $0xb84] ss:$16 sps:$4 sm:$0xff]   ;;  %v18606_v31 = vld [vmem:[%s22635_s8 + $0x9a8] ss:$16 sps:$4 sm:$0xff]  }
 0x6cf   :  { %11405 = vmatprep.subr.bf16.mxu1 %v18533_v12  ;;  %v18609_v12 = vld [vmem:[%s22635_s8 + $0xb80] ss:$16 sps:$4 sm:$0xff]  }
 0x6d1   :  { %10874 = vmatpush1.bf16.msra.mxu0 %v18528_v57  ;;  %v18614_v57 = vld [vmem:[%s22635_s8 + $0x9cc] ss:$16 sps:$4 sm:$0xff]  }
 0x6d2   :  { %11406 = vmatpush1.bf16.msra.mxu1 %v18531_v23  ;;  %10875 = vmatprep.subr.bf16.mxu0 %v18536_v4  ;;  %v21909_v23 = vpop.permute.xlu0 %11892  ;;  %v18612_v4 = vld [vmem:[%s22635_s8 + $0x9c8] ss:$16 sps:$4 sm:$0xff]  }
 0x6d3   :  { %11592 = vmatprep.subr.bf16.mxu1 %v18539_v50  ;;  %v18615_v50 = vld [vmem:[%s22635_s8 + $0xba0] ss:$16 sps:$4 sm:$0xff]  }
 0x6d5   :  { %15739 = vmatmul.mubr.msk.bf16.vlgmr.msra.gmra.mrb[216].mxu1 %vm1086_vm1, %v21742_v45  ;;  %10876 = vmatpush1.bf16.msra.mxu0 %v18534_v58  ;;  %v18620_v58 = vld [vmem:[%s22635_s8 + $0x9ec] ss:$16 sps:$4 sm:$0xff]  }
 0x6d6   :  { %11593 = vmatpush1.bf16.msra.mxu1 %v18537_v43  ;;  %10877 = vmatprep.subr.bf16.mxu0 %v18542_v10  ;;  %v18623_v43 = vld [vmem:[%s22635_s8 + $0xbc4] ss:$16 sps:$4 sm:$0xff]   ;;  %v18618_v10 = vld [vmem:[%s22635_s8 + $0x9e8] ss:$16 sps:$4 sm:$0xff]  }
 0x6d7   :  { %11594 = vmatprep.subr.bf16.mxu1 %v18545_v63  ;;  %11624 = vmatprep.mubr.bf16.mxu1 %v22648_v56  ;;  %v18621_v63 = vld [vmem:[%s22635_s8 + $0xbc0] ss:$16 sps:$4 sm:$0xff]  }
 0x6d9   :  { %10878 = vmatpush1.bf16.msra.mxu0 %v18540_v44  ;;  %v18626_v44 = vld [vmem:[%s22635_s8 + $0xa0c] ss:$16 sps:$4 sm:$0xff]  }
 0x6da   :  { %11595 = vmatpush1.bf16.msra.mxu1 %v18543_v33  ;;  %10879 = vmatprep.subr.bf16.mxu0 %v18548_v60  ;;  %v18629_v33 = vld [vmem:[%s22635_s8 + $0xbe4] ss:$16 sps:$4 sm:$0xff]   ;;  %v18624_v60 = vld [vmem:[%s22635_s8 + $0xa08] ss:$16 sps:$4 sm:$0xff]  }
 0x6db   :  { %11596 = vmatprep.subr.bf16.mxu1 %v18551_v29  ;;  %v18627_v29 = vld [vmem:[%s22635_s8 + $0xbe0] ss:$16 sps:$4 sm:$0xff]  }
 0x6dd   :  { %10880 = vmatpush1.bf16.msra.mxu0 %v18546_v53  ;;  %v18632_v53 = vld [vmem:[%s22635_s8 + $0xa2c] ss:$16 sps:$4 sm:$0xff]  }
 0x6de   :  { %11597 = vmatpush1.bf16.msra.mxu1 %v18549_v19  ;;  %11054 = vmatprep.subr.bf16.mxu0 %v18554_v62  ;;  %v18635_v19 = vld [vmem:[%s22635_s8 + $0xc04] ss:$16 sps:$4 sm:$0xff]   ;;  %v18630_v62 = vld [vmem:[%s22635_s8 + $0xa28] ss:$16 sps:$4 sm:$0xff]  }
 0x6df   :  { %11598 = vmatprep.subr.bf16.mxu1 %v18557_v52  ;;  %v18633_v52 = vld [vmem:[%s22635_s8 + $0xc00] ss:$16 sps:$4 sm:$0xff]  }
 0x6e0   :  { %10898 = vmatmul.mubr.bf16.vlgmr.msra.gmra.mrb[248].mxu0 %v21589_v17  ;;  %v18569_v17 = vld [vmem:[%s22635_s8 + $0xaa4] ss:$16 sps:$4 sm:$0xff]  }
 0x6e1   :  { %11055 = vmatpush1.bf16.msra.mxu0 %v18552_v9  ;;  %11086 = vmatprep.mubr.bf16.mxu0 %v22648_v56  ;;  %v18638_v9 = vld [vmem:[%s22635_s8 + $0xa4c] ss:$16 sps:$4 sm:$0xff]  }
 0x6e2   :  { %11599 = vmatpush1.bf16.msra.mxu1 %v18555_v20  ;;  %11056 = vmatprep.subr.bf16.mxu0 %v18560_v24  ;;  %v21965_v20 = vpop.permute.xlu1 %12085  ;;  %v18636_v24 = vld [vmem:[%s22635_s8 + $0xa48] ss:$16 sps:$4 sm:$0xff]  }
 0x6e3   :  { %11784 = vmatprep.subr.bf16.mxu1 %v18563_v34  ;;  %v18639_v34 = vld [vmem:[%s22635_s8 + $0xc20] ss:$16 sps:$4 sm:$0xff]  }
 0x6e5   :  { %15774 = vmatmul.mubr.msk.bf16.vlgmr.msra.gmra.mrb[220].mxu1 %vm1086_vm1, %v21797_v28  ;;  %11057 = vmatpush1.bf16.msra.mxu0 %v18558_v8  ;;  %v18644_v8 = vld [vmem:[%s22635_s8 + $0xa6c] ss:$16 sps:$4 sm:$0xff]  }
 0x6e6   :  { %11785 = vmatpush1.bf16.msra.mxu1 %v18561_v36  ;;  %11058 = vmatprep.subr.bf16.mxu0 %v18566_v0  ;;  %v18647_v36 = vld [vmem:[%s22635_s8 + $0xc44] ss:$16 sps:$4 sm:$0xff]   ;;  %v18642_v0 = vld [vmem:[%s22635_s8 + $0xa68] ss:$16 sps:$4 sm:$0xff]  }
 0x6e7   :  { %11786 = vmatprep.subr.bf16.mxu1 %v18569_v17  ;;  %11816 = vmatprep.mubr.bf16.mxu1 %v22648_v56  ;;  %v18645_v17 = vld [vmem:[%s22635_s8 + $0xc40] ss:$16 sps:$4 sm:$0xff]  }
 0x6e9   :  { %11059 = vmatpush1.bf16.msra.mxu0 %v18564_v14  ;;  %v18650_v14 = vld [vmem:[%s22635_s8 + $0xa8c] ss:$16 sps:$4 sm:$0xff]  }
 0x6ea   :  { %11787 = vmatpush1.bf16.msra.mxu1 %v18567_v42  ;;  %11060 = vmatprep.subr.bf16.mxu0 %v18572_v41  ;;  %v18653_v42 = vld [vmem:[%s22635_s8 + $0xc64] ss:$16 sps:$4 sm:$0xff]   ;;  %v18648_v41 = vld [vmem:[%s22635_s8 + $0xa88] ss:$16 sps:$4 sm:$0xff]  }
 0x6eb   :  { %11788 = vmatprep.subr.bf16.mxu1 %v18575_v30  ;;  %v18651_v30 = vld [vmem:[%s22635_s8 + $0xc60] ss:$16 sps:$4 sm:$0xff]  }
 0x6ed   :  { %11061 = vmatpush1.bf16.msra.mxu0 %v18570_v39  ;;  %v18656_v39 = vld [vmem:[%s22635_s8 + $0xaac] ss:$16 sps:$4 sm:$0xff]  }
 0x6ee   :  { %11789 = vmatpush1.bf16.msra.mxu1 %v18573_v3  ;;  %11247 = vmatprep.subr.bf16.mxu0 %v18578_v40  ;;  %v18659_v3 = vld [vmem:[%s22635_s8 + $0xc84] ss:$16 sps:$4 sm:$0xff]   ;;  %v18654_v40 = vld [vmem:[%s22635_s8 + $0xaa8] ss:$16 sps:$4 sm:$0xff]  }
 0x6ef   :  { %11790 = vmatprep.subr.bf16.mxu1 %v18581_v2  ;;  %v18657_v2 = vld [vmem:[%s22635_s8 + $0xc80] ss:$16 sps:$4 sm:$0xff]  }
 0x6f0   :  { %15670 = vmatmul.mubr.msk.bf16.vlgmr.msra.gmra.mrb[252].mxu0 %vm1086_vm1, %v21633_v1  ;;  %v18593_v1 = vld [vmem:[%s22635_s8 + $0xb24] ss:$16 sps:$4 sm:$0xff]  }
 0x6f1   :  { %11248 = vmatpush1.bf16.msra.mxu0 %v18576_v27  ;;  %11279 = vmatprep.mubr.bf16.mxu0 %v22648_v56  ;;  %v18662_v27 = vld [vmem:[%s22635_s8 + $0xacc] ss:$16 sps:$4 sm:$0xff]  }
 0x6f2   :  { %11791 = vmatpush1.bf16.msra.mxu1 %v18579_v61  ;;  %11249 = vmatprep.subr.bf16.mxu0 %v18584_v7  ;;  %v22021_v61 = vpop.permute.xlu0 %12278  ;;  %v18660_v7 = vld [vmem:[%s22635_s8 + $0xac8] ss:$16 sps:$4 sm:$0xff]  }
 0x6f3   :  { %11977 = vmatprep.subr.bf16.mxu1 %v18587_v55  ;;  %v18663_v55 = vld [vmem:[%s22635_s8 + $0xca0] ss:$16 sps:$4 sm:$0xff]  }
 0x6f5   :  { %15809 = vmatmul.mubr.msk.bf16.vlgmr.msra.gmra.mrb[224].mxu1 %vm1086_vm1, %v21853_v49  ;;  %11250 = vmatpush1.bf16.msra.mxu0 %v18582_v6  ;;  %v18668_v6 = vld [vmem:[%s22635_s8 + $0xaec] ss:$16 sps:$4 sm:$0xff]  }
 0x6f6   :  { %11978 = vmatpush1.bf16.msra.mxu1 %v18585_v32  ;;  %11251 = vmatprep.subr.bf16.mxu0 %v18590_v5  ;;  %v18671_v32 = vld [vmem:[%s22635_s8 + $0xcc4] ss:$16 sps:$4 sm:$0xff]   ;;  %v18666_v5 = vld [vmem:[%s22635_s8 + $0xae8] ss:$16 sps:$4 sm:$0xff]  }
 0x6f7   :  { %11979 = vmatprep.subr.bf16.mxu1 %v18593_v1  ;;  %12009 = vmatprep.mubr.bf16.mxu1 %v22648_v56  ;;  %v18669_v1 = vld [vmem:[%s22635_s8 + $0xcc0] ss:$16 sps:$4 sm:$0xff]  }
 0x6f9   :  { %11252 = vmatpush1.bf16.msra.mxu0 %v18588_v38  ;;  %v18674_v38 = vld [vmem:[%s22635_s8 + $0xb0c] ss:$16 sps:$4 sm:$0xff]  }
 0x6fa   :  { %11980 = vmatpush1.bf16.msra.mxu1 %v18591_v25  ;;  %11253 = vmatprep.subr.bf16.mxu0 %v18596_v15  ;;  %v18677_v25 = vld [vmem:[%s22635_s8 + $0xce4] ss:$16 sps:$4 sm:$0xff]   ;;  %v18672_v15 = vld [vmem:[%s22635_s8 + $0xb08] ss:$16 sps:$4 sm:$0xff]  }
 0x6fb   :  { %11981 = vmatprep.subr.bf16.mxu1 %v18599_v37  ;;  %v18675_v37 = vld [vmem:[%s22635_s8 + $0xce0] ss:$16 sps:$4 sm:$0xff]  }
 0x6fd   :  { %11254 = vmatpush1.bf16.msra.mxu0 %v18594_v59  ;;  %v18680_v59 = vld [vmem:[%s22635_s8 + $0xb2c] ss:$16 sps:$4 sm:$0xff]  }
 0x6fe   :  { %11982 = vmatpush1.bf16.msra.mxu1 %v18597_v18  ;;  %11440 = vmatprep.subr.bf16.mxu0 %v18602_v51  ;;  %v18683_v18 = vld [vmem:[%s22635_s8 + $0xd04] ss:$16 sps:$4 sm:$0xff]   ;;  %v18678_v51 = vld [vmem:[%s22635_s8 + $0xb28] ss:$16 sps:$4 sm:$0xff]  }
 0x6ff   :  { %11983 = vmatprep.subr.bf16.mxu1 %v18605_v35  ;;  %v18681_v35 = vld [vmem:[%s22635_s8 + $0xd00] ss:$16 sps:$4 sm:$0xff]  }
 0x700   :  { %15705 = vmatmul.mubr.msk.bf16.vlgmr.msra.gmra.mrb[0].mxu0 %vm1086_vm1, %v21689_v11  ;;  %v18617_v11 = vld [vmem:[%s22635_s8 + $0xba4] ss:$16 sps:$4 sm:$0xff]  }
 0x701   :  { %11441 = vmatpush1.bf16.msra.mxu0 %v18600_v16  ;;  %11472 = vmatprep.mubr.bf16.mxu0 %v22648_v56  ;;  %v18686_v16 = vld [vmem:[%s22635_s8 + $0xb4c] ss:$16 sps:$4 sm:$0xff]  }
 0x702   :  { %11984 = vmatpush1.bf16.msra.mxu1 %v18603_v26  ;;  %11442 = vmatprep.subr.bf16.mxu0 %v18608_v13  ;;  %v22077_v26 = vpop.permute.xlu1 %12471  ;;  %v18684_v13 = vld [vmem:[%s22635_s8 + $0xb48] ss:$16 sps:$4 sm:$0xff]  }
 0x703   :  { %12170 = vmatprep.subr.bf16.mxu1 %v18611_v21  ;;  %v18687_v21 = vld [vmem:[%s22635_s8 + $0xd20] ss:$16 sps:$4 sm:$0xff]  }
 0x705   :  { %15844 = vmatmul.mubr.msk.bf16.vlgmr.msra.gmra.mrb[228].mxu1 %vm1086_vm1, %v21909_v23  ;;  %11443 = vmatpush1.bf16.msra.mxu0 %v18606_v31  ;;  %v18692_v31 = vld [vmem:[%s22635_s8 + $0xb6c] ss:$16 sps:$4 sm:$0xff]  }
 0x706   :  { %12171 = vmatpush1.bf16.msra.mxu1 %v18609_v12  ;;  %11444 = vmatprep.subr.bf16.mxu0 %v18614_v57  ;;  %v18695_v12 = vld [vmem:[%s22635_s8 + $0xd44] ss:$16 sps:$4 sm:$0xff]   ;;  %v18690_v57 = vld [vmem:[%s22635_s8 + $0xb68] ss:$16 sps:$4 sm:$0xff]  }
 0x707   :  { %12172 = vmatprep.subr.bf16.mxu1 %v18617_v11  ;;  %12202 = vmatprep.mubr.bf16.mxu1 %v22648_v56  ;;  %v18693_v11 = vld [vmem:[%s22635_s8 + $0xd40] ss:$16 sps:$4 sm:$0xff]  }
 0x709   :  { %11445 = vmatpush1.bf16.msra.mxu0 %v18612_v4  ;;  %v18698_v4 = vld [vmem:[%s22635_s8 + $0xb8c] ss:$16 sps:$4 sm:$0xff]  }
 0x70a   :  { %12173 = vmatpush1.bf16.msra.mxu1 %v18615_v50  ;;  %11446 = vmatprep.subr.bf16.mxu0 %v18620_v58  ;;  %v18701_v50 = vld [vmem:[%s22635_s8 + $0xd64] ss:$16 sps:$4 sm:$0xff]   ;;  %v18696_v58 = vld [vmem:[%s22635_s8 + $0xb88] ss:$16 sps:$4 sm:$0xff]  }
 0x70b   :  { %12174 = vmatprep.subr.bf16.mxu1 %v18623_v43  ;;  %v18699_v43 = vld [vmem:[%s22635_s8 + $0xd60] ss:$16 sps:$4 sm:$0xff]  }
 0x70d   :  { %11447 = vmatpush1.bf16.msra.mxu0 %v18618_v10  ;;  %v18704_v10 = vld [vmem:[%s22635_s8 + $0xbac] ss:$16 sps:$4 sm:$0xff]  }
 0x70e   :  { %12175 = vmatpush1.bf16.msra.mxu1 %v18621_v63  ;;  %11633 = vmatprep.subr.bf16.mxu0 %v18626_v44  ;;  %v18707_v63 = vld [vmem:[%s22635_s8 + $0xd84] ss:$16 sps:$4 sm:$0xff]   ;;  %v18702_v44 = vld [vmem:[%s22635_s8 + $0xba8] ss:$16 sps:$4 sm:$0xff]  }
 0x70f   :  { %12176 = vmatprep.subr.bf16.mxu1 %v18629_v33  ;;  %v18705_v33 = vld [vmem:[%s22635_s8 + $0xd80] ss:$16 sps:$4 sm:$0xff]  }
 0x710   :  { %15740 = vmatmul.mubr.msk.bf16.vlgmr.msra.gmra.mrb[4].mxu0 %vm1086_vm1, %v21742_v45  ;;  %v18641_v45 = vld [vmem:[%s22635_s8 + $0xc24] ss:$16 sps:$4 sm:$0xff]  }
 0x711   :  { %11634 = vmatpush1.bf16.msra.mxu0 %v18624_v60  ;;  %11665 = vmatprep.mubr.bf16.mxu0 %v22648_v56  ;;  %v18710_v60 = vld [vmem:[%s22635_s8 + $0xbcc] ss:$16 sps:$4 sm:$0xff]  }
 0x712   :  { %12177 = vmatpush1.bf16.msra.mxu1 %v18627_v29  ;;  %11635 = vmatprep.subr.bf16.mxu0 %v18632_v53  ;;  %v22133_v29 = vpop.permute.xlu0 %12663  ;;  %v18708_v53 = vld [vmem:[%s22635_s8 + $0xbc8] ss:$16 sps:$4 sm:$0xff]  }
 0x713   :  { %12363 = vmatprep.subr.bf16.mxu1 %v18635_v19  ;;  %v18711_v19 = vld [vmem:[%s22635_s8 + $0xda0] ss:$16 sps:$4 sm:$0xff]  }
 0x715   :  { %15879 = vmatmul.mubr.msk.bf16.vlgmr.msra.gmra.mrb[232].mxu1 %vm1086_vm1, %v21965_v20  ;;  %11636 = vmatpush1.bf16.msra.mxu0 %v18630_v62  ;;  %v18716_v62 = vld [vmem:[%s22635_s8 + $0xbec] ss:$16 sps:$4 sm:$0xff]  }
 0x716   :  { %12364 = vmatpush1.bf16.msra.mxu1 %v18633_v52  ;;  %11637 = vmatprep.subr.bf16.mxu0 %v18638_v9  ;;  %v18719_v52 = vld [vmem:[%s22635_s8 + $0xdc4] ss:$16 sps:$4 sm:$0xff]  }
 0x717   :  { %12365 = vmatprep.subr.bf16.mxu1 %v18641_v45  ;;  %12395 = vmatprep.mubr.bf16.mxu1 %v22648_v56 }
 0x719   :  { %11638 = vmatpush1.bf16.msra.mxu0 %v18636_v24  ;;  %v18714_v24 = vld [vmem:[%s22635_s8 + $0xbe8] ss:$16 sps:$4 sm:$0xff]  }
 0x71a   :  { %12366 = vmatpush1.bf16.msra.mxu1 %v18639_v34  ;;  %11639 = vmatprep.subr.bf16.mxu0 %v18644_v8 }
 0x71b   :  { %12367 = vmatprep.subr.bf16.mxu1 %v18647_v36  ;;  %v18717_v36 = vld [vmem:[%s22635_s8 + $0xdc0] ss:$16 sps:$4 sm:$0xff]  }
 0x71d   :  { %11640 = vmatpush1.bf16.msra.mxu0 %v18642_v0  ;;  %v18722_v0 = vld [vmem:[%s22635_s8 + $0xc0c] ss:$16 sps:$4 sm:$0xff]  }
 0x71e   :  { %12368 = vmatpush1.bf16.msra.mxu1 %v18645_v17  ;;  %11825 = vmatprep.subr.bf16.mxu0 %v18650_v14  ;;  %v18725_v14 = vld [vmem:[%s22635_s8 + $0xde4] ss:$16 sps:$4 sm:$0xff]  }
 0x71f   :  { %12369 = vmatprep.subr.bf16.mxu1 %v18653_v42  ;;  %v18720_v42 = vld [vmem:[%s22635_s8 + $0xc08] ss:$16 sps:$4 sm:$0xff]  }
 0x720   :  { %15775 = vmatmul.mubr.msk.bf16.vlgmr.msra.gmra.mrb[8].mxu0 %vm1086_vm1, %v21797_v28  ;;  %v18665_v28 = vld [vmem:[%s22635_s8 + $0xca4] ss:$16 sps:$4 sm:$0xff]  }
 0x721   :  { %11826 = vmatpush1.bf16.msra.mxu0 %v18648_v41  ;;  %11857 = vmatprep.mubr.bf16.mxu0 %v22648_v56  ;;  %v18723_v41 = vld [vmem:[%s22635_s8 + $0xde0] ss:$16 sps:$4 sm:$0xff]  }
 0x722   :  { %12370 = vmatpush1.bf16.msra.mxu1 %v18651_v30  ;;  %11827 = vmatprep.subr.bf16.mxu0 %v18656_v39  ;;  %v18728_v30 = vld [vmem:[%s22635_s8 + $0xc2c] ss:$16 sps:$4 sm:$0xff]   ;;  %v18731_v39 = vld [vmem:[%s22635_s8 + $0xe04] ss:$16 sps:$4 sm:$0xff]  }
 0x723   :  { %12556 = vmatprep.subr.bf16.mxu1 %v18659_v3  ;;  %v18726_v3 = vld [vmem:[%s22635_s8 + $0xc28] ss:$16 sps:$4 sm:$0xff]  }
 0x725   :  { %15914 = vmatmul.mubr.msk.bf16.vlgmr.msra.gmra.mrb[236].mxu1 %vm1086_vm1, %v22021_v61  ;;  %11828 = vmatpush1.bf16.msra.mxu0 %v18654_v40  ;;  %v18729_v40 = vld [vmem:[%s22635_s8 + $0xe00] ss:$16 sps:$4 sm:$0xff]  }
 0x726   :  { %12557 = vmatpush1.bf16.msra.mxu1 %v18657_v2  ;;  %11829 = vmatprep.subr.bf16.mxu0 %v18662_v27  ;;  %v18734_v2 = vld [vmem:[%s22635_s8 + $0xc4c] ss:$16 sps:$4 sm:$0xff]   ;;  %v22191_v27 = vpop.permute.xlu1 %12856 }
 0x727   :  { %12558 = vmatprep.subr.bf16.mxu1 %v18665_v28  ;;  %12588 = vmatprep.mubr.bf16.mxu1 %v22648_v56  ;;  %v18732_v28 = vld [vmem:[%s22635_s8 + $0xc48] ss:$16 sps:$4 sm:$0xff]  }
 0x729   :  { %11830 = vmatpush1.bf16.msra.mxu0 %v18660_v7  ;;  %v18735_v7 = vld [vmem:[%s22635_s8 + $0xe20] ss:$16 sps:$4 sm:$0xff]  }
 0x72a   :  { %12559 = vmatpush1.bf16.msra.mxu1 %v18663_v55  ;;  %11831 = vmatprep.subr.bf16.mxu0 %v18668_v6  ;;  %v18740_v55 = vld [vmem:[%s22635_s8 + $0xc6c] ss:$16 sps:$4 sm:$0xff]   ;;  %v18743_v6 = vld [vmem:[%s22635_s8 + $0xe44] ss:$16 sps:$4 sm:$0xff]  }
 0x72b   :  { %12560 = vmatprep.subr.bf16.mxu1 %v18671_v32 }
 0x72d   :  { %11832 = vmatpush1.bf16.msra.mxu0 %v18666_v5 }
 0x72e   :  { %12561 = vmatpush1.bf16.msra.mxu1 %v18669_v1  ;;  %12018 = vmatprep.subr.bf16.mxu0 %v18674_v38  ;;  %v18738_v1 = vld [vmem:[%s22635_s8 + $0xc68] ss:$16 sps:$4 sm:$0xff]  }
 0x72f   :  { %12562 = vmatprep.subr.bf16.mxu1 %v18677_v25  ;;  %v18741_v25 = vld [vmem:[%s22635_s8 + $0xe40] ss:$16 sps:$4 sm:$0xff]  }
 0x730   :  { %15810 = vmatmul.mubr.msk.bf16.vlgmr.msra.gmra.mrb[12].mxu0 %vm1086_vm1, %v21853_v49  ;;  %v18689_v49 = vld [vmem:[%s22635_s8 + $0xd24] ss:$16 sps:$4 sm:$0xff]  }
 0x731   :  { %12019 = vmatpush1.bf16.msra.mxu0 %v18672_v15  ;;  %12050 = vmatprep.mubr.bf16.mxu0 %v22648_v56  ;;  %v18746_v15 = vld [vmem:[%s22635_s8 + $0xc8c] ss:$16 sps:$4 sm:$0xff]  }
 0x732   :  { %12563 = vmatpush1.bf16.msra.mxu1 %v18675_v37  ;;  %12020 = vmatprep.subr.bf16.mxu0 %v18680_v59  ;;  %v18749_v59 = vld [vmem:[%s22635_s8 + $0xe64] ss:$16 sps:$4 sm:$0xff]  }
 0x733   :  { %12748 = vmatprep.subr.bf16.mxu1 %v18683_v18  ;;  %v18744_v18 = vld [vmem:[%s22635_s8 + $0xc88] ss:$16 sps:$4 sm:$0xff]  }
 0x735   :  { %15949 = vmatmul.mubr.msk.bf16.vlgmr.msra.gmra.mrb[240].mxu1 %vm1086_vm1, %v22077_v26  ;;  %12021 = vmatpush1.bf16.msra.mxu0 %v18678_v51  ;;  %v18747_v51 = vld [vmem:[%s22635_s8 + $0xe60] ss:$16 sps:$4 sm:$0xff]  }
 0x736   :  { %12749 = vmatpush1.bf16.msra.mxu1 %v18681_v35  ;;  %12022 = vmatprep.subr.bf16.mxu0 %v18686_v16  ;;  %v18752_v35 = vld [vmem:[%s22635_s8 + $0xcac] ss:$16 sps:$4 sm:$0xff]   ;;  %v18755_v16 = vld [vmem:[%s22635_s8 + $0xe84] ss:$16 sps:$4 sm:$0xff]  }
 0x737   :  { %12750 = vmatprep.subr.bf16.mxu1 %v18689_v49  ;;  %12780 = vmatprep.mubr.bf16.mxu1 %v22648_v56  ;;  %v18750_v49 = vld [vmem:[%s22635_s8 + $0xca8] ss:$16 sps:$4 sm:$0xff]  }
 0x739   :  { %12023 = vmatpush1.bf16.msra.mxu0 %v18684_v13  ;;  %v18753_v13 = vld [vmem:[%s22635_s8 + $0xe80] ss:$16 sps:$4 sm:$0xff]  }
 0x73a   :  { %12751 = vmatpush1.bf16.msra.mxu1 %v18687_v21  ;;  %12024 = vmatprep.subr.bf16.mxu0 %v18692_v31  ;;  %v18758_v21 = vld [vmem:[%s22635_s8 + $0xccc] ss:$16 sps:$4 sm:$0xff]   ;;  %v22251_v31 = vpop.permute.xlu0 %13049 }
 0x73b   :  { %12752 = vmatprep.subr.bf16.mxu1 %v18695_v12  ;;  %v18756_v12 = vld [vmem:[%s22635_s8 + $0xcc8] ss:$16 sps:$4 sm:$0xff]  }
 0x73d   :  { %12025 = vmatpush1.bf16.msra.mxu0 %v18690_v57  ;;  %v18759_v57 = vld [vmem:[%s22635_s8 + $0xea0] ss:$16 sps:$4 sm:$0xff]  }
 0x73e   :  { %12753 = vmatpush1.bf16.msra.mxu1 %v18693_v11  ;;  %12211 = vmatprep.subr.bf16.mxu0 %v18698_v4  ;;  %v18764_v11 = vld [vmem:[%s22635_s8 + $0xcec] ss:$16 sps:$4 sm:$0xff]   ;;  %v18767_v4 = vld [vmem:[%s22635_s8 + $0xec4] ss:$16 sps:$4 sm:$0xff]  }
 0x73f   :  { %12754 = vmatprep.subr.bf16.mxu1 %v18701_v50  ;;  %v18762_v50 = vld [vmem:[%s22635_s8 + $0xce8] ss:$16 sps:$4 sm:$0xff]  }
 0x740   :  { %15845 = vmatmul.mubr.msk.bf16.vlgmr.msra.gmra.mrb[16].mxu0 %vm1086_vm1, %v21909_v23  ;;  %v18713_v23 = vld [vmem:[%s22635_s8 + $0xda4] ss:$16 sps:$4 sm:$0xff]  }
 0x741   :  { %12212 = vmatpush1.bf16.msra.mxu0 %v18696_v58  ;;  %12243 = vmatprep.mubr.bf16.mxu0 %v22648_v56  ;;  %v18765_v58 = vld [vmem:[%s22635_s8 + $0xec0] ss:$16 sps:$4 sm:$0xff]  }
 0x742   :  { %12755 = vmatpush1.bf16.msra.mxu1 %v18699_v43  ;;  %12213 = vmatprep.subr.bf16.mxu0 %v18704_v10  ;;  %v18770_v43 = vld [vmem:[%s22635_s8 + $0xd0c] ss:$16 sps:$4 sm:$0xff]   ;;  %v18773_v10 = vld [vmem:[%s22635_s8 + $0xee4] ss:$16 sps:$4 sm:$0xff]  }
 0x743   :  { %12941 = vmatprep.subr.bf16.mxu1 %v18707_v63  ;;  %v18768_v63 = vld [vmem:[%s22635_s8 + $0xd08] ss:$16 sps:$4 sm:$0xff]  }
 0x745   :  { %15984 = vmatmul.mubr.msk.bf16.vlgmr.msra.gmra.mrb[244].mxu1 %vm1086_vm1, %v22133_v29  ;;  %12214 = vmatpush1.bf16.msra.mxu0 %v18702_v44  ;;  %v18771_v44 = vld [vmem:[%s22635_s8 + $0xee0] ss:$16 sps:$4 sm:$0xff]  }
 0x746   :  { %12942 = vmatpush1.bf16.msra.mxu1 %v18705_v33  ;;  %12215 = vmatprep.subr.bf16.mxu0 %v18710_v60  ;;  %v18776_v33 = vld [vmem:[%s22635_s8 + $0xd2c] ss:$16 sps:$4 sm:$0xff]   ;;  %v18779_v60 = vld [vmem:[%s22635_s8 + $0xf04] ss:$16 sps:$4 sm:$0xff]  }
 0x747   :  { %12943 = vmatprep.subr.bf16.mxu1 %v18713_v23  ;;  %12973 = vmatprep.mubr.bf16.mxu1 %v22648_v56  ;;  %v18774_v23 = vld [vmem:[%s22635_s8 + $0xd28] ss:$16 sps:$4 sm:$0xff]  }
 0x748   :  { %v16658_v9 = vpop.f32.mrb[196].mxu1 }
 0x749   :  { %v16659_v45 = vpop.f32.mrb[197].mxu1  ;;  %12216 = vmatpush1.bf16.msra.mxu0 %v18708_v53  ;;  %v18777_v53 = vld [vmem:[%s22635_s8 + $0xf00] ss:$16 sps:$4 sm:$0xff]  }
 0x74a   :  { %v22153_v34 = vadd.f32 %v16659_v45, %v16658_v9  ;;  %12944 = vmatpush1.bf16.msra.mxu1 %v18711_v19  ;;  %v16661_v8 = vpop.f32.mrb[198].mxu1  ;;  %12217 = vmatprep.subr.bf16.mxu0 %v18716_v62  ;;  %v18782_v19 = vld [vmem:[%s22635_s8 + $0xd4c] ss:$16 sps:$4 sm:$0xff]   ;;  %v22307_v62 = vpop.permute.xlu1 %13242  ;;  %v18783_v9 = vld [vmem:[%s22635_s8 + $0xf20] ss:$16 sps:$4 sm:$0xff]  }
 0x74b   :  { %v16662_v17 = vpop.f32.mrb[199].mxu1  ;;  %12945 = vmatprep.subr.bf16.mxu1 %v18719_v52  ;;  %v18780_v52 = vld [vmem:[%s22635_s8 + $0xd48] ss:$16 sps:$4 sm:$0xff]   ;;  %v18788_v45 = vld [vmem:[%s22635_s8 + $0xd6c] ss:$16 sps:$4 sm:$0xff]  }
 0x74c   :  { %v18786_v17 = vld [vmem:[%s22635_s8 + $0xd68] ss:$16 sps:$4 sm:$0xff]  }
 0x74d   :  { %12218 = vmatpush1.bf16.msra.mxu0 %v18714_v24  ;;  %v18791_v24 = vld [vmem:[%s22635_s8 + $0xf44] ss:$16 sps:$4 sm:$0xff]  }
 0x74e   :  { %12946 = vmatpush1.bf16.msra.mxu1 %v18717_v36  ;;  %12404 = vmatprep.subr.bf16.mxu0 %v18722_v0 }
 0x74f   :  { %12947 = vmatprep.subr.bf16.mxu1 %v18725_v14 }
 0x750   :  { %15880 = vmatmul.mubr.msk.bf16.vlgmr.msra.gmra.mrb[20].mxu0 %vm1086_vm1, %v21965_v20  ;;  %v18737_v20 = vld [vmem:[%s22635_s8 + $0xe24] ss:$16 sps:$4 sm:$0xff]  }
 0x751   :  { %12405 = vmatpush1.bf16.msra.mxu0 %v18720_v42  ;;  %12436 = vmatprep.mubr.bf16.mxu0 %v22648_v56  ;;  %v18789_v42 = vld [vmem:[%s22635_s8 + $0xf40] ss:$16 sps:$4 sm:$0xff]  }
 0x752   :  { %12948 = vmatpush1.bf16.msra.mxu1 %v18723_v41  ;;  %12406 = vmatprep.subr.bf16.mxu0 %v18728_v30  ;;  %v18794_v41 = vld [vmem:[%s22635_s8 + $0xd8c] ss:$16 sps:$4 sm:$0xff]  }
 0x753   :  { %13134 = vmatprep.subr.bf16.mxu1 %v18731_v39  ;;  %v18797_v39 = vld [vmem:[%s22635_s8 + $0xf64] ss:$16 sps:$4 sm:$0xff]  }
 0x755   :  { %16019 = vmatmul.mubr.msk.bf16.vlgmr.msra.gmra.mrb[248].mxu1 %vm1086_vm1, %v22191_v27  ;;  %12407 = vmatpush1.bf16.msra.mxu0 %v18726_v3 }
 0x756   :  { %13135 = vmatpush1.bf16.msra.mxu1 %v18729_v40  ;;  %12408 = vmatprep.subr.bf16.mxu0 %v18734_v2  ;;  %v18792_v40 = vld [vmem:[%s22635_s8 + $0xd88] ss:$16 sps:$4 sm:$0xff]   ;;  %v18795_v2 = vld [vmem:[%s22635_s8 + $0xf60] ss:$16 sps:$4 sm:$0xff]  }
 0x757   :  { %13136 = vmatprep.subr.bf16.mxu1 %v18737_v20  ;;  %13166 = vmatprep.mubr.bf16.mxu1 %v22648_v56  ;;  %v18800_v20 = vld [vmem:[%s22635_s8 + $0xdac] ss:$16 sps:$4 sm:$0xff]  }
 0x758   :  { %v22208_v32 = vpop.f32.mrb[200].mxu1 }
 0x759   :  { %v22210_v5 = vpop.f32.mrb[201].mxu1  ;;  %12409 = vmatpush1.bf16.msra.mxu0 %v18732_v28  ;;  %v18803_v28 = vld [vmem:[%s22635_s8 + $0xf84] ss:$16 sps:$4 sm:$0xff]  }
 0x75a   :  { %v10620_v38 = vpop.f32.mrb[202].mxu1  ;;  %13137 = vmatpush1.bf16.msra.mxu1 %v18735_v7  ;;  %12410 = vmatprep.subr.bf16.mxu0 %v18740_v55  ;;  %v18798_v7 = vld [vmem:[%s22635_s8 + $0xda8] ss:$16 sps:$4 sm:$0xff]   ;;  %v15504_v55 = vld [vmem:[%s22640_s12] ss:$0 sm:$0xff] }
 0x75b   :  { %v10621_v37 = vpop.f32.mrb[203].mxu1  ;;  %13138 = vmatprep.subr.bf16.mxu1 %v18743_v6  ;;  %v18801_v6 = vld [vmem:[%s22635_s8 + $0xf80] ss:$16 sps:$4 sm:$0xff]  }
 0x75d   :  { %12411 = vmatpush1.bf16.msra.mxu0 %v18738_v1  ;;  %v22368_v1 = vpop.permute.xlu0 %13435 }
 0x75e   :  { %13139 = vmatpush1.bf16.msra.mxu1 %v18741_v25  ;;  %12597 = vmatprep.subr.bf16.mxu0 %v18746_v15  ;;  %v10397_v25 = vadd.f32 %v22153_v34, %v15504_v55  ;;  %v18812_v34 = vld [vmem:[%s22635_s8 + $0xdec] ss:$16 sps:$4 sm:$0xff]  }
 0x75f   :  { %13140 = vmatprep.subr.bf16.mxu1 %v18749_v59  ;;  %v18804_v59 = vld [vmem:[%s22635_s8 + $0xdc8] ss:$16 sps:$4 sm:$0xff]  }
 0x760   :  { %15915 = vmatmul.mubr.msk.bf16.vlgmr.msra.gmra.mrb[24].mxu0 %vm1086_vm1, %v22021_v61  ;;  %v18761_v61 = vld [vmem:[%s22635_s8 + $0xea4] ss:$16 sps:$4 sm:$0xff]  }
 0x761   :  { %12598 = vmatpush1.bf16.msra.mxu0 %v18744_v18  ;;  %12629 = vmatprep.mubr.bf16.mxu0 %v22648_v56 }
 0x762   :  { %13141 = vmatpush1.bf16.msra.mxu1 %v18747_v51  ;;  %12599 = vmatprep.subr.bf16.mxu0 %v18752_v35  ;;  %v18807_v51 = vld [vmem:[%s22635_s8 + $0xfa0] ss:$16 sps:$4 sm:$0xff]  }
 0x763   :  { %13327 = vmatprep.subr.bf16.mxu1 %v18755_v16  ;;  %v18815_v16 = vld [vmem:[%s22635_s8 + $0xfc4] ss:$16 sps:$4 sm:$0xff]  }
 0x765   :  { %16054 = vmatmul.mubr.msk.bf16.vlgmr.msra.gmra.mrb[252].mxu1 %vm1086_vm1, %v22251_v31  ;;  %12600 = vmatpush1.bf16.msra.mxu0 %v18750_v49 }
 0x766   :  { %13328 = vmatpush1.bf16.msra.mxu1 %v18753_v13  ;;  %12601 = vmatprep.subr.bf16.mxu0 %v18758_v21 }
 0x767   :  { %13329 = vmatprep.subr.bf16.mxu1 %v18761_v61  ;;  %13359 = vmatprep.mubr.bf16.mxu1 %v22648_v56  ;;  %v18810_v61 = vld [vmem:[%s22635_s8 + $0xde8] ss:$16 sps:$4 sm:$0xff]  }
 0x769   :  { %12602 = vmatpush1.bf16.msra.mxu0 %v18756_v12 }
 0x76a   :  { %13330 = vmatpush1.bf16.msra.mxu1 %v18759_v57  ;;  %12603 = vmatprep.subr.bf16.mxu0 %v18764_v11  ;;  %v18813_v11 = vld [vmem:[%s22635_s8 + $0xfc0] ss:$16 sps:$4 sm:$0xff]  }
 0x76b   :  { %13331 = vmatprep.subr.bf16.mxu1 %v18767_v4  ;;  %v18818_v4 = vld [vmem:[%s22635_s8 + $0xe0c] ss:$16 sps:$4 sm:$0xff]  }
 0x76d   :  { %12604 = vmatpush1.bf16.msra.mxu0 %v18762_v50 }
 0x76e   :  { %13332 = vmatpush1.bf16.msra.mxu1 %v18765_v58  ;;  %12789 = vmatprep.subr.bf16.mxu0 %v18770_v43  ;;  %v18821_v58 = vld [vmem:[%s22635_s8 + $0xfe4] ss:$16 sps:$4 sm:$0xff]   ;;  %v18816_v43 = vld [vmem:[%s22635_s8 + $0xe08] ss:$16 sps:$4 sm:$0xff]  }
 0x76f   :  { %13333 = vmatprep.subr.bf16.mxu1 %v18773_v10  ;;  %v18819_v10 = vld [vmem:[%s22635_s8 + $0xfe0] ss:$16 sps:$4 sm:$0xff]  }
 0x770   :  { %15950 = vmatmul.mubr.msk.bf16.vlgmr.msra.gmra.mrb[28].mxu0 %vm1086_vm1, %v22077_v26  ;;  %v18785_v26 = vld [vmem:[%s22635_s8 + $0xf24] ss:$16 sps:$4 sm:$0xff]  }
 0x771   :  { %12790 = vmatpush1.bf16.msra.mxu0 %v18768_v63  ;;  %12821 = vmatprep.mubr.bf16.mxu0 %v22648_v56  ;;  %v18824_v63 = vld [vmem:[%s22635_s8 + $0xe2c] ss:$16 sps:$4 sm:$0xff]  }
 0x772   :  { %13334 = vmatpush1.bf16.msra.mxu1 %v18771_v44  ;;  %12791 = vmatprep.subr.bf16.mxu0 %v18776_v33  ;;  %v18822_v44 = vld [vmem:[%s22635_s8 + $0xe28] ss:$16 sps:$4 sm:$0xff]   ;;  %v18827_v33 = vld [vmem:[%s22635_s8 + $0xe4c] ss:$16 sps:$4 sm:$0xff]  }
 0x773   :  { %13520 = vmatprep.subr.bf16.mxu1 %v18779_v60 }
 0x775   :  { %16089 = vmatmul.mubr.msk.bf16.vlgmr.msra.gmra.mrb[8].mxu1 %vm1086_vm1, %v22307_v62  ;;  %12792 = vmatpush1.bf16.msra.mxu0 %v18774_v23  ;;  %v22419_v23 = vpop.permute.xlu1 %13627 }
 0x776   :  { %13521 = vmatpush1.bf16.msra.mxu1 %v18777_v53  ;;  %12793 = vmatprep.subr.bf16.mxu0 %v18782_v19  ;;  %v18825_v19 = vld [vmem:[%s22635_s8 + $0xe48] ss:$16 sps:$4 sm:$0xff]  }
 0x777   :  { %13522 = vmatprep.subr.bf16.mxu1 %v18785_v26  ;;  %13552 = vmatprep.mubr.bf16.mxu1 %v22648_v56 }
 0x778   :  { %v10858_v8 = vpop.f32.mrb[204].mxu1 }
 0x779   :  { %v10859_v36 = vadd.f32 %v10858_v8, %v22208_v32  ;;  %v10860_v0 = vpop.f32.mrb[205].mxu1  ;;  %12794 = vmatpush1.bf16.msra.mxu0 %v18780_v52  ;;  %v18830_v52 = vld [vmem:[%s22635_s8 + $0xe6c] ss:$16 sps:$4 sm:$0xff]   ;;  %v18828_v8 = vld [vmem:[%s22635_s8 + $0xe68] ss:$16 sps:$4 sm:$0xff]  }
 0x77a   :  { %v10861_v14 = vadd.f32 %v10860_v0, %v22210_v5  ;;  %13523 = vmatpush1.bf16.msra.mxu1 %v18783_v9  ;;  %12795 = vmatprep.subr.bf16.mxu0 %v18788_v45  ;;  %v10862_v30 = vpop.f32.mrb[206].mxu1  ;;  %v18809_v5 = vld [vmem:[%s22635_s8 + $0xfa4] ss:$16 sps:$4 sm:$0xff]  }
 0x77b   :  { %13524 = vmatprep.subr.bf16.mxu1 %v18791_v24  ;;  %v10863_v3 = vpop.f32.mrb[207].mxu1  ;;  %v18834_v30 = vld [vmem:[%s22635_s8 + $0xea8] ss:$16 sps:$4 sm:$0xff]  }
 0x77c   :  { %v18837_v3 = vld [vmem:[%s22635_s8 + $0xec8] ss:$16 sps:$4 sm:$0xff]  }
 0x77d   :  { %12796 = vmatpush1.bf16.msra.mxu0 %v18786_v17  ;;  %v18833_v17 = vld [vmem:[%s22635_s8 + $0xe8c] ss:$16 sps:$4 sm:$0xff]  }
 0x77e   :  { %13525 = vmatpush1.bf16.msra.mxu1 %v18789_v42  ;;  %12982 = vmatprep.subr.bf16.mxu0 %v18794_v41  ;;  %v18831_v42 = vld [vmem:[%s22635_s8 + $0xe88] ss:$16 sps:$4 sm:$0xff]   ;;  %v18836_v41 = vld [vmem:[%s22635_s8 + $0xeac] ss:$16 sps:$4 sm:$0xff]  }
 0x77f   :  { %13526 = vmatprep.subr.bf16.mxu1 %v18797_v39  ;;  %v18839_v39 = vld [vmem:[%s22635_s8 + $0xecc] ss:$16 sps:$4 sm:$0xff]  }
 0x780   :  { %15985 = vmatmul.mubr.msk.bf16.vlgmr.msra.gmra.mrb[32].mxu0 %vm1086_vm1, %v22133_v29  ;;  %v18806_v29 = vld [vmem:[%s22635_s8 + $0xdcc] ss:$16 sps:$4 sm:$0xff]  }
 0x781   :  { %12983 = vmatpush1.bf16.msra.mxu0 %v18792_v40  ;;  %13014 = vmatprep.mubr.bf16.mxu0 %v22648_v56 }
 0x782   :  { %13527 = vmatpush1.bf16.msra.mxu1 %v18795_v2  ;;  %12984 = vmatprep.subr.bf16.mxu0 %v18800_v20 }
 0x783   :  { %v16680_v32 = vpop.f32.mrb[240].mxu0  ;;  %13712 = vmatprep.subr.bf16.mxu1 %v18803_v28  ;;  %v18840_v28 = vld [vmem:[%s22635_s8 + $0xee8] ss:$16 sps:$4 sm:$0xff]  }
 0x784   :  { %v16681_v38 = vpop.f32.mrb[241].mxu0 }
 0x785   :  { %16124 = vmatmul.mubr.msk.bf16.vlgmr.msra.gmra.mrb[12].mxu1 %vm1086_vm1, %v22368_v1  ;;  %v16682_v15 = vadd.f32 %v16681_v38, %v16680_v32  ;;  %12985 = vmatpush1.bf16.msra.mxu0 %v18798_v7  ;;  %v16683_v37 = vpop.f32.mrb[242].mxu0  ;;  %v18843_v32 = vld [vmem:[%s22635_s8 + $0xf08] ss:$16 sps:$4 sm:$0xff]  }
 0x786   :  { %13713 = vmatpush1.bf16.msra.mxu1 %v18801_v6  ;;  %v16684_v18 = vpop.f32.mrb[243].mxu0  ;;  %12986 = vmatprep.subr.bf16.mxu0 %v18806_v29  ;;  %v18845_v6 = vld [vmem:[%s22635_s8 + $0xf0c] ss:$16 sps:$4 sm:$0xff]   ;;  %v18846_v38 = vld [vmem:[%s22635_s8 + $0xf28] ss:$16 sps:$4 sm:$0xff]  }
 0x787   :  { %v10437_v35 = vadd.f32 %v16682_v15, %v10397_v25  ;;  %13714 = vmatprep.subr.bf16.mxu1 %v18809_v5  ;;  %13744 = vmatprep.mubr.bf16.mxu1 %v22648_v56  ;;  %v18848_v5 = vld [vmem:[%s22635_s8 + $0xf2c] ss:$16 sps:$4 sm:$0xff]  }
 0x788   :  { %v11047_v49 = vpop.f32.mrb[208].mxu1  ;;  %v18851_v25 = vld [vmem:[%s22635_s8 + $0xf4c] ss:$16 sps:$4 sm:$0xff]  }
 0x789   :  { %10442 = vst [vmem:[%s22641_s13] sm:$0x3] %v10437_v35  ;;  %v11095_v13 = vadd.f32 %v11047_v49, %v10859_v36  ;;  %v11049_v21 = vpop.f32.mrb[209].mxu1  ;;  %12987 = vmatpush1.bf16.msra.mxu0 %v18804_v59  ;;  %v18854_v35 = vld [vmem:[%s22635_s8 + $0xf6c] ss:$16 sps:$4 sm:$0xff]  }
 0x78a   :  { %v11096_v12 = vadd.f32 %v11049_v21, %v10861_v14  ;;  %v11051_v57 = vpop.f32.mrb[210].mxu1  ;;  %13715 = vmatpush1.bf16.msra.mxu1 %v18807_v51  ;;  %12988 = vmatprep.subr.bf16.mxu0 %v18812_v34  ;;  %v18852_v21 = vld [vmem:[%s22635_s8 + $0xf68] ss:$16 sps:$4 sm:$0xff]  }
 0x78b   :  { %v11052_v50 = vpop.f32.mrb[211].mxu1  ;;  %13716 = vmatprep.subr.bf16.mxu1 %v18815_v16  ;;  %v18857_v57 = vld [vmem:[%s22635_s8 + $0xf8c] ss:$16 sps:$4 sm:$0xff]  }
 0x78c   :  { %v18860_v50 = vld [vmem:[%s22635_s8 + $0xfac] ss:$16 sps:$4 sm:$0xff]  }
 0x78d   :  { %12989 = vmatpush1.bf16.msra.mxu0 %v18810_v61 }
 0x78e   :  { %13717 = vmatpush1.bf16.msra.mxu1 %v18813_v11  ;;  %13175 = vmatprep.subr.bf16.mxu0 %v18818_v4  ;;  %v18855_v4 = vld [vmem:[%s22635_s8 + $0xf88] ss:$16 sps:$4 sm:$0xff]  }
 0x78f   :  { %13718 = vmatprep.subr.bf16.mxu1 %v18821_v58  ;;  %v18858_v58 = vld [vmem:[%s22635_s8 + $0xfa8] ss:$16 sps:$4 sm:$0xff]  }
 0x790   :  { %16020 = vmatmul.mubr.msk.bf16.vlgmr.msra.gmra.mrb[36].mxu0 %vm1086_vm1, %v22191_v27 }
 0x791   :  { %13176 = vmatpush1.bf16.msra.mxu0 %v18816_v43  ;;  %13207 = vmatprep.mubr.bf16.mxu0 %v22648_v56  ;;  %v18863_v43 = vld [vmem:[%s22635_s8 + $0xfcc] ss:$16 sps:$4 sm:$0xff]  }
 0x792   :  { %13719 = vmatpush1.bf16.msra.mxu1 %v18819_v10  ;;  %13177 = vmatprep.subr.bf16.mxu0 %v18824_v63 }
 0x793   :  { %v10657_v60 = vpop.f32.mrb[244].mxu0 }
 0x794   :  { %v10659_v53 = vpop.f32.mrb[245].mxu0 }
 0x795   :  { %16159 = vmatmul.mubr.msk.bf16.vlgmr.msra.gmra.mrb[16].mxu1 %vm1086_vm1, %v22419_v23  ;;  %v10661_v27 = vpop.f32.mrb[246].mxu0  ;;  %13178 = vmatpush1.bf16.msra.mxu0 %v18822_v44 }
 0x796   :  { %v10662_v26 = vpop.f32.mrb[247].mxu0  ;;  %13179 = vmatprep.subr.bf16.mxu0 %v18827_v33 }
 0x798   :  { %v11240_v9 = vpop.f32.mrb[212].mxu1 }
 0x799   :  { %v11288_v45 = vadd.f32 %v11240_v9, %v11095_v13  ;;  %v11242_v24 = vpop.f32.mrb[213].mxu1  ;;  %13180 = vmatpush1.bf16.msra.mxu0 %v18825_v19 }
 0x79a   :  { %v11289_v36 = vadd.f32 %v11242_v24, %v11096_v12  ;;  %v11244_v0 = vpop.f32.mrb[214].mxu1  ;;  %13181 = vmatprep.subr.bf16.mxu0 %v18830_v52  ;;  %v18864_v52 = vld [vmem:[%s22635_s8 + $0xfe8] ss:$16 sps:$4 sm:$0xff]  }
 0x79b   :  { %v11245_v14 = vpop.f32.mrb[215].mxu1 }
 0x79c   :  { %v18868_v14 = vld [vmem:[%s22638_s11 + $0x100] sm:$0xff]  }
 0x79d   :  { %13182 = vmatpush1.bf16.msra.mxu0 %v18828_v8  ;;  %v18867_v8 = vld [vmem:[%s22638_s11 + $0x140] sm:$0xff]  }
 0x79e   :  { %13368 = vmatprep.subr.bf16.mxu0 %v18833_v17  ;;  %16686 = vmatprep.subr.bf16.mxu1 %v18867_v8  ;;  %v18884_v8 = vld [vmem:[%s22638_s11 + $0x180] sm:$0xff]  }
 0x79f   :  { %16687 = vmatpush3.bf16.msra.mxu1 %v18868_v14 }
 0x7a0   :  { %16055 = vmatmul.mubr.msk.bf16.vlgmr.msra.gmra.mrb[40].mxu0 %vm1086_vm1, %v22251_v31  ;;  %v18842_v31 = vld [vmem:[%s22635_s8 + $0xeec] ss:$16 sps:$4 sm:$0xff]  }
 0x7a1   :  { %13369 = vmatpush1.bf16.msra.mxu0 %v18831_v42  ;;  %13400 = vmatprep.mubr.bf16.mxu0 %v22648_v56 }
 0x7a2   :  { %13370 = vmatprep.subr.bf16.mxu0 %v18836_v41 }
 0x7a5   :  { %13371 = vmatpush1.bf16.msra.mxu0 %v18834_v30 }
 0x7a6   :  { %13372 = vmatprep.subr.bf16.mxu0 %v18839_v39  ;;  %v18869_v39 = vld [vmem:[%s22638_s11 + $0x148] sm:$0xff]  }
 0x7a7   :  { %16688 = vmatprep.subr.bf16.mxu1 %v18869_v39 }
 0x7a8   :  { %v11433_v40 = vpop.f32.mrb[216].mxu1 }
 0x7a9   :  { %v11481_v2 = vadd.f32 %v11433_v40, %v11288_v45  ;;  %v11435_v20 = vpop.f32.mrb[217].mxu1  ;;  %13373 = vmatpush1.bf16.msra.mxu0 %v18837_v3 }
 0x7aa   :  { %v11482_v7 = vadd.f32 %v11435_v20, %v11289_v36  ;;  %v11437_v55 = vpop.f32.mrb[218].mxu1  ;;  %13374 = vmatprep.subr.bf16.mxu0 %v18842_v31 }
 0x7ab   :  { %v11438_v29 = vpop.f32.mrb[219].mxu1  ;;  %v18872_v55 = vld [vmem:[%s22638_s11 + $0x110] sm:$0xff]  }
 0x7ac   :  { %v18874_v29 = vld [vmem:[%s22638_s11 + $0x118] sm:$0xff]  }
 0x7ad   :  { %13375 = vmatpush1.bf16.msra.mxu0 %v18840_v28 }
 0x7ae   :  { %13561 = vmatprep.subr.bf16.mxu0 %v18845_v6  ;;  %v18873_v6 = vld [vmem:[%s22638_s11 + $0x158] sm:$0xff]  }
 0x7b0   :  { %16090 = vmatmul.mubr.msk.bf16.vlgmr.msra.gmra.mrb[44].mxu0 %vm1086_vm1, %v22307_v62  ;;  %v18849_v62 = vld [vmem:[%s22635_s8 + $0xf48] ss:$16 sps:$4 sm:$0xff]  }
 0x7b1   :  { %13562 = vmatpush1.bf16.msra.mxu0 %v18843_v32  ;;  %13593 = vmatprep.mubr.bf16.mxu0 %v22648_v56  ;;  %v18875_v32 = vld [vmem:[%s22638_s11 + $0x160] sm:$0xff]  }
 0x7b2   :  { %13563 = vmatprep.subr.bf16.mxu0 %v18848_v5 }
 0x7b3   :  { %v10899_v15 = vpop.f32.mrb[248].mxu0 }
 0x7b4   :  { %v10900_v37 = vadd.f32 %v10899_v15, %v10657_v60  ;;  %v10901_v59 = vpop.f32.mrb[249].mxu0  ;;  %v18876_v15 = vld [vmem:[%s22638_s11 + $0x120] sm:$0xff]  }
 0x7b5   :  { %v10902_v18 = vadd.f32 %v10901_v59, %v10659_v53  ;;  %v10903_v51 = vpop.f32.mrb[250].mxu0  ;;  %13564 = vmatpush1.bf16.msra.mxu0 %v18846_v38 }
 0x7b6   :  { %v10904_v34 = vpop.f32.mrb[251].mxu0  ;;  %13565 = vmatprep.subr.bf16.mxu0 %v18851_v25  ;;  %v18877_v51 = vld [vmem:[%s22638_s11 + $0x168] sm:$0xff]  }
 0x7b8   :  { %v11626_v16 = vpop.f32.mrb[220].mxu1 }
 0x7b9   :  { %v11674_v49 = vadd.f32 %v11626_v16, %v11481_v2  ;;  %v11628_v13 = vpop.f32.mrb[221].mxu1  ;;  %13566 = vmatpush1.bf16.msra.mxu0 %v18849_v62 }
 0x7ba   :  { %v11675_v61 = vadd.f32 %v11628_v13, %v11482_v7  ;;  %v11630_v12 = vpop.f32.mrb[222].mxu1  ;;  %13567 = vmatprep.subr.bf16.mxu0 %v18854_v35  ;;  %v18871_v7 = vld [vmem:[%s22638_s11 + $0x150] sm:$0xff]  }
 0x7bb   :  { %v11631_v11 = vpop.f32.mrb[223].mxu1  ;;  %v18880_v12 = vld [vmem:[%s22638_s11 + $0x130] sm:$0xff]  }
 0x7bd   :  { %13568 = vmatpush1.bf16.msra.mxu0 %v18852_v21  ;;  %v18878_v21 = vld [vmem:[%s22638_s11 + $0x128] sm:$0xff]  }
 0x7be   :  { %13753 = vmatprep.subr.bf16.mxu0 %v18857_v57  ;;  %v18881_v57 = vld [vmem:[%s22638_s11 + $0x178] sm:$0xff]  }
 0x7c0   :  { %16125 = vmatmul.mubr.msk.bf16.vlgmr.msra.gmra.mrb[48].mxu0 %vm1086_vm1, %v22368_v1  ;;  %v18861_v1 = vld [vmem:[%s22635_s8 + $0xfc8] ss:$16 sps:$4 sm:$0xff]  }
 0x7c1   :  { %13754 = vmatpush1.bf16.msra.mxu0 %v18855_v4  ;;  %13785 = vmatprep.mubr.bf16.mxu0 %v22648_v56  ;;  %v18866_v56 = vld [vmem:[%s22635_s8 + $0xfec] ss:$16 sps:$4 sm:$0xff]  }
 0x7c2   :  { %13755 = vmatprep.subr.bf16.mxu0 %v18860_v50 }
 0x7c3   :  { %v11088_v10 = vpop.f32.mrb[252].mxu0 }
 0x7c4   :  { %v11097_v63 = vadd.f32 %v11088_v10, %v10900_v37  ;;  %v11090_v44 = vpop.f32.mrb[253].mxu0  ;;  %v18882_v10 = vld [vmem:[%s22638_s11 + $0x138] sm:$0xff]  }
 0x7c5   :  { %v11098_v33 = vadd.f32 %v11090_v44, %v10902_v18  ;;  %v11092_v60 = vpop.f32.mrb[254].mxu0  ;;  %13756 = vmatpush1.bf16.msra.mxu0 %v18858_v58 }
 0x7c6   :  { %v11093_v53 = vpop.f32.mrb[255].mxu0  ;;  %13757 = vmatprep.subr.bf16.mxu0 %v18863_v43 }
 0x7c8   :  { %v11818_v27 = vpop.f32.mrb[224].mxu1 }
 0x7c9   :  { %v11866_v19 = vadd.f32 %v11818_v27, %v11674_v49  ;;  %v11820_v26 = vpop.f32.mrb[225].mxu1  ;;  %13758 = vmatpush1.bf16.msra.mxu0 %v18861_v1 }
 0x7ca   :  { %v11867_v9 = vadd.f32 %v11820_v26, %v11675_v61  ;;  %v11822_v45 = vpop.f32.mrb[226].mxu1  ;;  %13759 = vmatprep.subr.bf16.mxu0 %v18866_v56  ;;  %v18879_v61 = vld [vmem:[%s22638_s11 + $0x170] sm:$0xff]  }
 0x7cb   :  { %v11823_v24 = vpop.f32.mrb[227].mxu1 }
 0x7cc   :  { %v18883_v24 = vld [vmem:[%s22638_s11 + $0x1c0] sm:$0xff]  }
 0x7cd   :  { %13760 = vmatpush1.bf16.msra.mxu0 %v18864_v52 }
 0x7ce   :  { %16708 = vmatprep.subr.bf16.mxu0 %v18883_v24 }
 0x7d0   :  { %16160 = vmatmul.mubr.msk.bf16.vlgmr.msra.gmra.mrb[52].mxu0 %vm1086_vm1, %v22419_v23  ;;  %v18870_v23 = vld [vmem:[%s22638_s11 + $0x108] sm:$0xff]  }
 0x7d1   :  { %16689 = vmatpush3.bf16.msra.mxu1 %v18870_v23  ;;  %16709 = vmatpush3.bf16.msra.mxu0 %v18884_v8 }
 0x7d2   :  { %16690 = vmatprep.subr.bf16.mxu1 %v18871_v7  ;;  %v18888_v7 = vld [vmem:[%s22638_s11 + $0x190] sm:$0xff]  }
 0x7d3   :  { %v11281_v36 = vpop.f32.mrb[0].mxu0 }
 0x7d4   :  { %v11290_v0 = vadd.f32 %v11281_v36, %v11097_v63  ;;  %v11283_v17 = vpop.f32.mrb[1].mxu0  ;;  %v18885_v36 = vld [vmem:[%s22638_s11 + $0x1c8] sm:$0xff]  }
 0x7d5   :  { %v11291_v42 = vadd.f32 %v11283_v17, %v11098_v33  ;;  %v11285_v41 = vpop.f32.mrb[2].mxu0  ;;  %16691 = vmatpush3.bf16.msra.mxu1 %v18872_v55  ;;  %16710 = vmatprep.subr.bf16.mxu0 %v18885_v36  ;;  %v18889_v55 = vld [vmem:[%s22638_s11 + $0x1d8] sm:$0xff]  }
 0x7d6   :  { %v11286_v30 = vpop.f32.mrb[3].mxu0  ;;  %16692 = vmatprep.subr.bf16.mxu1 %v18873_v6 }
 0x7d8   :  { %v12011_v3 = vpop.f32.mrb[228].mxu1 }
 0x7d9   :  { %v12059_v31 = vadd.f32 %v12011_v3, %v11866_v19  ;;  %v12013_v40 = vpop.f32.mrb[229].mxu1  ;;  %16693 = vmatpush3.bf16.msra.mxu1 %v18874_v29 }
 0x7da   :  { %v12060_v2 = vadd.f32 %v12013_v40, %v11867_v9  ;;  %v12015_v20 = vpop.f32.mrb[230].mxu1  ;;  %16694 = vmatprep.subr.bf16.mxu1 %v18875_v32  ;;  %v18886_v40 = vld [vmem:[%s22638_s11 + $0x188] sm:$0xff]  }
 0x7db   :  { %v12016_v28 = vpop.f32.mrb[231].mxu1  ;;  %16711 = vmatpush3.bf16.msra.mxu0 %v18886_v40 }
 0x7dc   :  { %v18887_v28 = vld [vmem:[%s22638_s11 + $0x1d0] sm:$0xff]  }
 0x7dd   :  { %16695 = vmatpush3.bf16.msra.mxu1 %v18876_v15  ;;  %16712 = vmatprep.subr.bf16.mxu0 %v18887_v28 }
 0x7de   :  { %16696 = vmatprep.subr.bf16.mxu1 %v18877_v51 }
 0x7df   :  { %16713 = vmatpush3.bf16.msra.mxu0 %v18888_v7 }
 0x7e0   :  { %16714 = vmatprep.subr.bf16.mxu0 %v18889_v55 }
 0x7e1   :  { %16697 = vmatpush3.bf16.msra.mxu1 %v18878_v21 }
 0x7e2   :  { %16698 = vmatprep.subr.bf16.mxu1 %v18879_v61 }
 0x7e3   :  { %v11474_v5 = vpop.f32.mrb[4].mxu0 }
 0x7e4   :  { %v11483_v38 = vadd.f32 %v11474_v5, %v11290_v0  ;;  %v11476_v25 = vpop.f32.mrb[5].mxu0 }
 0x7e5   :  { %v11484_v37 = vadd.f32 %v11476_v25, %v11291_v42  ;;  %v11478_v59 = vpop.f32.mrb[6].mxu0  ;;  %16699 = vmatpush3.bf16.msra.mxu1 %v18880_v12  ;;  %v18890_v25 = vld [vmem:[%s22638_s11 + $0x198] sm:$0xff]  }
 0x7e6   :  { %v11479_v18 = vpop.f32.mrb[7].mxu0  ;;  %16700 = vmatprep.subr.bf16.mxu1 %v18881_v57  ;;  %16715 = vmatpush3.bf16.msra.mxu0 %v18890_v25  ;;  %v18892_v59 = vld [vmem:[%s22638_s11 + $0x1a0] sm:$0xff]  }
 0x7e7   :  { %v18893_v18 = vld [vmem:[%s22638_s11 + $0x1e8] sm:$0xff]  }
 0x7e8   :  { %v12204_v62 = vpop.f32.mrb[232].mxu1 }
 0x7e9   :  { %v12252_v34 = vadd.f32 %v12204_v62, %v12059_v31  ;;  %v12206_v35 = vpop.f32.mrb[233].mxu1  ;;  %16701 = vmatpush3.bf16.msra.mxu1 %v18882_v10  ;;  %v18898_v10 = vld [vmem:[%s22638_s11 + $0x1b8] sm:$0xff]  }
 0x7ea   :  { %v12253_v16 = vadd.f32 %v12206_v35, %v12060_v2  ;;  %v12208_v49 = vpop.f32.mrb[234].mxu1 }
 0x7eb   :  { %v12209_v13 = vpop.f32.mrb[235].mxu1 }
 0x7f3   :  { %v11667_v11 = vpop.f32.mrb[8].mxu0 }
 0x7f4   :  { %v11676_v4 = vadd.f32 %v11667_v11, %v11483_v38  ;;  %v11669_v50 = vpop.f32.mrb[9].mxu0  ;;  %v18894_v11 = vld [vmem:[%s22638_s11 + $0x1a8] sm:$0xff]  }
 0x7f5   :  { %v11677_v58 = vadd.f32 %v11669_v50, %v11484_v37  ;;  %v11671_v43 = vpop.f32.mrb[10].mxu0  ;;  %v18891_v37 = vld [vmem:[%s22638_s11 + $0x1e0] sm:$0xff]   ;;  %v18895_v50 = vld [vmem:[%s22638_s11 + $0x1f0] sm:$0xff]  }
 0x7f6   :  { %v11672_v63 = vpop.f32.mrb[11].mxu0  ;;  %16716 = vmatprep.subr.bf16.mxu0 %v18891_v37  ;;  %v18897_v43 = vld [vmem:[%s22638_s11 + $0x1f8] sm:$0xff]   ;;  %v16161_v37 = vld [vmem:[%s22639_s10 + $0x4] sm:$0xf] }
 0x7f7   :  { %16717 = vmatpush3.bf16.msra.mxu0 %v18892_v59 }
 0x7f8   :  { %v12397_v44 = vpop.f32.mrb[236].mxu1  ;;  %16718 = vmatprep.subr.bf16.mxu0 %v18893_v18 }
 0x7f9   :  { %v12445_v33 = vadd.f32 %v12397_v44, %v12252_v34  ;;  %v12399_v60 = vpop.f32.mrb[237].mxu1 }
 0x7fa   :  { %v12446_v1 = vadd.f32 %v12399_v60, %v12253_v16  ;;  %v12401_v53 = vpop.f32.mrb[238].mxu1 }
 0x7fb   :  { %v12402_v56 = vpop.f32.mrb[239].mxu1  ;;  %16719 = vmatpush3.bf16.msra.mxu0 %v18894_v11 }
 0x7fc   :  { %16720 = vmatprep.subr.bf16.mxu0 %v18895_v50 }
 0x803   :  { %v11859_v27 = vpop.f32.mrb[12].mxu0 }
 0x804   :  { %v11868_v19 = vadd.f32 %v11859_v27, %v11676_v4  ;;  %v11861_v26 = vpop.f32.mrb[13].mxu0 }
 0x805   :  { %v11869_v52 = vadd.f32 %v11861_v26, %v11677_v58  ;;  %v11863_v9 = vpop.f32.mrb[14].mxu0  ;;  %v18896_v58 = vld [vmem:[%s22638_s11 + $0x1b0] sm:$0xff]  }
 0x806   :  { %v11864_v45 = vpop.f32.mrb[15].mxu0  ;;  %16721 = vmatpush3.bf16.msra.mxu0 %v18896_v58 }
 0x807   :  { %16722 = vmatprep.subr.bf16.mxu0 %v18897_v43 }
 0x808   :  { %v12590_v0 = vpop.f32.mrb[240].mxu1 }
 0x809   :  { %v12638_v17 = vadd.f32 %v12590_v0, %v12445_v33  ;;  %v12592_v14 = vpop.f32.mrb[241].mxu1 }
 0x80a   :  { %v12639_v42 = vadd.f32 %v12592_v14, %v12446_v1  ;;  %v12594_v41 = vpop.f32.mrb[242].mxu1  ;;  %16723 = vmatpush3.bf16.msra.mxu0 %v18898_v10 }
 0x80b   :  { %v12595_v30 = vpop.f32.mrb[243].mxu1 }
 0x813   :  { %v12052_v39 = vpop.f32.mrb[16].mxu0 }
 0x814   :  { %v12061_v3 = vadd.f32 %v12052_v39, %v11868_v19  ;;  %v12054_v31 = vpop.f32.mrb[17].mxu0 }
 0x815   :  { %v12062_v23 = vadd.f32 %v12054_v31, %v11869_v52  ;;  %v12056_v2 = vpop.f32.mrb[18].mxu0 }
 0x816   :  { %v12057_v20 = vpop.f32.mrb[19].mxu0 }
 0x818   :  { %v12782_v6 = vpop.f32.mrb[244].mxu1 }
 0x819   :  { %v12830_v29 = vadd.f32 %v12782_v6, %v12638_v17  ;;  %v12784_v32 = vpop.f32.mrb[245].mxu1 }
 0x81a   :  { %v12831_v5 = vadd.f32 %v12784_v32, %v12639_v42  ;;  %v12786_v38 = vpop.f32.mrb[246].mxu1 }
 0x81b   :  { %v12787_v15 = vpop.f32.mrb[247].mxu1 }
 0x823   :  { %v12245_v51 = vpop.f32.mrb[20].mxu0 }
 0x824   :  { %v12254_v62 = vadd.f32 %v12245_v51, %v12061_v3  ;;  %v12247_v34 = vpop.f32.mrb[21].mxu0 }
 0x825   :  { %v12255_v35 = vadd.f32 %v12247_v34, %v12062_v23  ;;  %v12249_v16 = vpop.f32.mrb[22].mxu0 }
 0x826   :  { %v12250_v49 = vpop.f32.mrb[23].mxu0 }
 0x828   :  { %v12975_v13 = vpop.f32.mrb[248].mxu1 }
 0x829   :  { %v13023_v21 = vadd.f32 %v12975_v13, %v12830_v29  ;;  %v12977_v61 = vpop.f32.mrb[249].mxu1 }
 0x82a   :  { %v13024_v12 = vadd.f32 %v12977_v61, %v12831_v5  ;;  %v12979_v57 = vpop.f32.mrb[250].mxu1 }
 0x82b   :  { %v12980_v4 = vpop.f32.mrb[251].mxu1 }
 0x833   :  { %v12438_v63 = vpop.f32.mrb[24].mxu0 }
 0x834   :  { %v12447_v44 = vadd.f32 %v12438_v63, %v12254_v62  ;;  %v12440_v33 = vpop.f32.mrb[25].mxu0  ;;  %v13804_v62 = vrot.slane %v16161_v37, %v10069_v47 }
 0x835   :  { %v12448_v60 = vadd.f32 %v12440_v33, %v12255_v35  ;;  %v12442_v1 = vpop.f32.mrb[26].mxu0  ;;  %v13808_v35 = vrot.slane %v16161_v37, %v10073_v54 }
 0x836   :  { %v12443_v53 = vpop.f32.mrb[27].mxu0 }
 0x838   :  { %v13168_v56 = vpop.f32.mrb[252].mxu1 }
 0x839   :  { %v13216_v27 = vadd.f32 %v13168_v56, %v13023_v21  ;;  %v13170_v19 = vpop.f32.mrb[253].mxu1 }
 0x83a   :  { %v13217_v26 = vadd.f32 %v13170_v19, %v13024_v12  ;;  %v13172_v52 = vpop.f32.mrb[254].mxu1 }
 0x83b   :  { %v13173_v9 = vpop.f32.mrb[255].mxu1 }
 0x843   :  { %v12631_v45 = vpop.f32.mrb[28].mxu0 }
 0x844   :  { %v12640_v24 = vadd.f32 %v12631_v45, %v12447_v44  ;;  %v12633_v8 = vpop.f32.mrb[29].mxu0 }
 0x845   :  { %v12641_v36 = vadd.f32 %v12633_v8, %v12448_v60  ;;  %v12635_v0 = vpop.f32.mrb[30].mxu0  ;;  %v13812_v8 = vrot.slane %v16161_v37, %v10077_v46 }
 0x846   :  { %v12636_v17 = vpop.f32.mrb[31].mxu0  ;;  %v13816_v0 = vrot.slane %v16161_v37, %v10081_v48 }
 0x848   :  { %v13361_v14 = vpop.f32.mrb[8].mxu1 }
 0x849   :  { %v13409_v42 = vadd.f32 %v13361_v14, %v13216_v27  ;;  %v13363_v41 = vpop.f32.mrb[9].mxu1 }
 0x84a   :  { %v13410_v30 = vadd.f32 %v13363_v41, %v13217_v26  ;;  %v13365_v39 = vpop.f32.mrb[10].mxu1 }
 0x84b   :  { %v13366_v3 = vpop.f32.mrb[11].mxu1 }
 0x853   :  { %v12823_v31 = vpop.f32.mrb[32].mxu0 }
 0x854   :  { %v12832_v40 = vadd.f32 %v12823_v31, %v12640_v24  ;;  %v12825_v23 = vpop.f32.mrb[33].mxu0 }
 0x855   :  { %v12833_v2 = vadd.f32 %v12825_v23, %v12641_v36  ;;  %v12827_v20 = vpop.f32.mrb[34].mxu0 }
 0x856   :  { %v12828_v28 = vpop.f32.mrb[35].mxu0 }
 0x858   :  { %v13554_v7 = vpop.f32.mrb[12].mxu1 }
 0x859   :  { %v13602_v55 = vadd.f32 %v13554_v7, %v13409_v42  ;;  %v13556_v6 = vpop.f32.mrb[13].mxu1 }
 0x85a   :  { %v13603_v29 = vadd.f32 %v13556_v6, %v13410_v30  ;;  %v13558_v32 = vpop.f32.mrb[14].mxu1 }
 0x85b   :  { %v13559_v5 = vpop.f32.mrb[15].mxu1 }
 0x863   :  { %v13016_v38 = vpop.f32.mrb[36].mxu0 }
 0x864   :  { %v13025_v25 = vadd.f32 %v13016_v38, %v12832_v40  ;;  %v13018_v15 = vpop.f32.mrb[37].mxu0 }
 0x865   :  { %v13026_v59 = vadd.f32 %v13018_v15, %v12833_v2  ;;  %v13020_v18 = vpop.f32.mrb[38].mxu0 }
 0x866   :  { %v13021_v51 = vpop.f32.mrb[39].mxu0 }
 0x868   :  { %v13746_v34 = vpop.f32.mrb[16].mxu1 }
 0x869   :  { %v13794_v16 = vadd.f32 %v13746_v34, %v13602_v55  ;;  %v13748_v49 = vpop.f32.mrb[17].mxu1 }
 0x86a   :  { %v13795_v13 = vadd.f32 %v13748_v49, %v13603_v29  ;;  %v13750_v21 = vpop.f32.mrb[18].mxu1 }
 0x86b   :  { %v13821_v61 = vadd.f32 %v13804_v62, %v13794_v16  ;;  %v13751_v12 = vpop.f32.mrb[19].mxu1 }
 0x86c   :  { %v13822_v57 = vadd.f32 %v13808_v35, %v13795_v13 }
 0x86d   :  { %v13825_v11 = vmax.f32 %v13821_v61, 0.0 }
 0x86e   :  { %v13826_v4 = vmax.f32 %v13822_v57, 0.0 }
 0x86f   :  { %v13829_v58 = vpack.c.bf16 %v13825_v11, %v13825_v11 }
 0x870   :  { %v13830_v50 = vpack.c.bf16 %v13826_v4, %v13826_v4 }
 0x872   :  { %14130 = vmatprep.mubr.bf16.mxu1 %v13830_v50 }
 0x873   :  { %14131 = vmatmul.mubr.bf16.vlgmr.msra.gmra.mrb[20].mxu1 %v13829_v58  ;;  %v13209_v43 = vpop.f32.mrb[40].mxu0 }
 0x874   :  { %v13218_v10 = vadd.f32 %v13209_v43, %v13025_v25  ;;  %v13211_v47 = vpop.f32.mrb[41].mxu0 }
 0x875   :  { %v13219_v63 = vadd.f32 %v13211_v47, %v13026_v59  ;;  %v13213_v44 = vpop.f32.mrb[42].mxu0 }
 0x876   :  { %v13214_v33 = vpop.f32.mrb[43].mxu0 }
 0x883   :  { %v13402_v54 = vpop.f32.mrb[44].mxu0 }
 0x884   :  { %v13411_v60 = vadd.f32 %v13402_v54, %v13218_v10  ;;  %v13404_v1 = vpop.f32.mrb[45].mxu0 }
 0x885   :  { %v13412_v53 = vadd.f32 %v13404_v1, %v13219_v63  ;;  %v13406_v56 = vpop.f32.mrb[46].mxu0 }
 0x886   :  { %v13407_v27 = vpop.f32.mrb[47].mxu0 }
 0x893   :  { %v13595_v19 = vpop.f32.mrb[48].mxu0 }
 0x894   :  { %v13604_v26 = vadd.f32 %v13595_v19, %v13411_v60  ;;  %v13597_v52 = vpop.f32.mrb[49].mxu0 }
 0x895   :  { %v13605_v9 = vadd.f32 %v13597_v52, %v13412_v53  ;;  %v13599_v45 = vpop.f32.mrb[50].mxu0 }
 0x896   :  { %v13600_v24 = vpop.f32.mrb[51].mxu0 }
 0x8a3   :  { %v13787_v36 = vpop.f32.mrb[52].mxu0 }
 0x8a4   :  { %v13796_v17 = vadd.f32 %v13787_v36, %v13604_v26  ;;  %v13789_v14 = vpop.f32.mrb[53].mxu0 }
 0x8a5   :  { %v13797_v42 = vadd.f32 %v13789_v14, %v13605_v9  ;;  %v13791_v41 = vpop.f32.mrb[54].mxu0 }
 0x8a6   :  { %v13823_v30 = vadd.f32 %v13812_v8, %v13796_v17  ;;  %v13792_v39 = vpop.f32.mrb[55].mxu0 }
 0x8a7   :  { %v13824_v3 = vadd.f32 %v13816_v0, %v13797_v42 }
 0x8a8   :  { %v13827_v31 = vmax.f32 %v13823_v30, 0.0 }
 0x8a9   :  { %v13828_v40 = vmax.f32 %v13824_v3, 0.0 }
 0x8aa   :  { %v13831_v2 = vpack.c.bf16 %v13827_v31, %v13827_v31 }
 0x8ab   :  { %v13832_v23 = vpack.c.bf16 %v13828_v40, %v13828_v40 }
 0x8ad   :  { %14170 = vmatprep.mubr.bf16.mxu0 %v13832_v23 }
 0x8ae   :  { %14171 = vmatmul.mubr.bf16.vlgmr.msra.gmra.mrb[56].mxu0 %v13831_v2 }
 0x946   :  { %v16702_v20 = vpop.f32.mrb[20].mxu1 }
 0x947   :  { %v16703_v28 = vpop.f32.mrb[21].mxu1 }
 0x948   :  { %v16704_v46 = vadd.f32 %v16703_v28, %v16702_v20  ;;  %v16705_v7 = vpop.f32.mrb[22].mxu1 }
 0x949   :  { %v16706_v55 = vpop.f32.mrb[23].mxu1 }
 0x94a   :  { %v14133_v29 = vadd.f32 %v16704_v46, %v16227_v22 }
 0x981   :  { %v16724_v48 = vpop.f32.mrb[56].mxu0 }
 0x982   :  { %v16725_v6 = vpop.f32.mrb[57].mxu0 }
 0x983   :  { %v16726_v32 = vadd.f32 %v16725_v6, %v16724_v48  ;;  %v16727_v5 = vpop.f32.mrb[58].mxu0 }
 0x984   :  { %v16728_v38 = vpop.f32.mrb[59].mxu0 }
 0x985   :  { %v14173_v25 = vadd.f32 %v16726_v32, %v14133_v29 }
 0x987   :  { %16260 = vst [vmem:[%s22641_s13 + $0x2] sm:$0x3] %v14173_v25 }

</bundles_post_ra>
